<compile_context>
chip_gen: v6e
topology: v6e:2x2x1
jax: 0.10.0
libtpu: 0.0.40
codegen_flags: <defaults>
</compile_context>

<pallas_src>
import jax
import jax.numpy as jnp
import numpy as np
from jax.experimental import pallas as pl
from jax.experimental.pallas import tpu as pltpu

BN_EPS = 1e-5


def _round_up(x, m):
    return (x + m - 1) // m * m


# ----------------------------------------------------------------------------
# Parameter construction (eval-mode BatchNorm folded into the conv weights)
# ----------------------------------------------------------------------------
def _conv_bn_init(key, cin, cout, k):
    k1, k2, k3, k4, k5, k6 = jax.random.split(key, 6)
    return dict(
        w=0.1 * jax.random.normal(k1, (cout, cin, k), jnp.float32),  # torch (O,I,K)
        b=0.1 * jax.random.normal(k2, (cout,), jnp.float32),
        gamma=1.0 + 0.1 * jax.random.normal(k3, (cout,), jnp.float32),
        beta=0.1 * jax.random.normal(k4, (cout,), jnp.float32),
        mean=0.1 * jax.random.normal(k5, (cout,), jnp.float32),
        var=0.5 + jnp.abs(jax.random.normal(k6, (cout,), jnp.float32)),
    )


def _fold_bn(layer):
    """BN-folded, tap-major weight (Cout, K, Cin) and shift (Cout,)."""
    scale = layer["gamma"] / jnp.sqrt(layer["var"] + BN_EPS)
    wkc = jnp.transpose(layer["w"] * scale[:, None, None], (0, 2, 1))
    shift = layer["beta"] - layer["mean"] * scale + layer["b"] * scale
    return wkc, shift


def _pack_weight(wkc, cin_groups):
    """Pad Cout and each Cin group to multiples of 8; return (Cout_p, K*Cin_p)."""
    cout, k, _ = wkc.shape
    cout_p = _round_up(cout, 8)
    parts, off = [], 0
    for g in cin_groups:
        gp = _round_up(g, 8)
        parts.append(jnp.pad(wkc[:, :, off:off + g],
                             ((0, cout_p - cout), (0, 0), (0, gp - g))))
        off += g
    w = jnp.concatenate(parts, axis=2)
    return w.reshape(cout_p, k * w.shape[2])


def _fuse_pair(wkc_a, sh_a, wkc_b, sh_b):
    """Block-diagonal fusion of two same-K convs (sig_i || seq_i)."""
    k = wkc_a.shape[1]
    assert k == wkc_b.shape[1]
    ao, _, ai = wkc_a.shape
    bo, _, bi = wkc_b.shape
    aop, aip = _round_up(ao, 8), _round_up(ai, 8)
    bop, bip = _round_up(bo, 8), _round_up(bi, 8)
    w = jnp.zeros((aop + bop, k, aip + bip), jnp.float32)
    w = w.at[:ao, :, :ai].set(wkc_a)
    w = w.at[aop:aop + bo, :, aip:aip + bi].set(wkc_b)
    sh = jnp.zeros((aop + bop,), jnp.float32)
    sh = sh.at[:ao].set(sh_a).at[aop:aop + bo].set(sh_b)
    return w.reshape(aop + bop, k * (aip + bip)), sh


def init_params(key, size, kmer_len, num_out):
    keys = jax.random.split(key, 12)
    raw = {
        "sig1": _conv_bn_init(keys[0], 1, 4, 11),
        "sig2": _conv_bn_init(keys[1], 4, 16, 11),
        "sig3": _conv_bn_init(keys[2], 16, size, 9),
        "seq1": _conv_bn_init(keys[3], kmer_len * 4, 16, 11),
        "seq2": _conv_bn_init(keys[4], 16, 32, 11),
        "seq3": _conv_bn_init(keys[5], 32, size, 9),
        "m1": _conv_bn_init(keys[6], size * 2, size, 5),
        "m2": _conv_bn_init(keys[7], size, size, 5),
        "m3": _conv_bn_init(keys[8], size, size, 3),
        "m4": _conv_bn_init(keys[9], size, size, 3),
        "fc_w": 0.1 * jax.random.normal(keys[10], (num_out, size * 3), jnp.float32),
        "fc_b": 0.1 * jax.random.normal(keys[11], (num_out,), jnp.float32),
    }

    entries = []  # (w2, shift, K, stride, apply_swish)
    # sig/seq branch levels fused block-diagonally (same K, stride, Lout).
    for a, b, k, s in (("sig1", "seq1", 11, 1),
                       ("sig2", "seq2", 11, 1),
                       ("sig3", "seq3", 9, 3)):
        wa, sa = _fold_bn(raw[a])
        wb, sb = _fold_bn(raw[b])
        w2, sh = _fuse_pair(wa, sa, wb, sb)
        entries.append((w2, sh, k, s, True))
    # merge trunk (m1 input groups match the fused layer-3 output layout).
    for name, k, s, groups in (("m1", 5, 1, (size, size)),
                               ("m2", 5, 1, (size,)),
                               ("m3", 3, 2, (size,)),
                               ("m4", 3, 2, (size,))):
        wkc, sh = _fold_bn(raw[name])
        w2 = _pack_weight(wkc, groups)
        entries.append((w2, jnp.pad(sh, (0, w2.shape[0] - sh.shape[0])), k, s, True))
    # torch.flatten + nn.Linear expressed as a K=3 conv (one output column);
    # output rows padded to 8 for a clean (8,128)-layout final matmul.
    wkc_fc = raw["fc_w"].reshape(num_out, size, 3).transpose(0, 2, 1)  # (O, K, C)
    w2 = _pack_weight(wkc_fc, (size,))
    entries.append((w2, jnp.pad(raw["fc_b"], (0, w2.shape[0] - num_out)), 3, 1, False))

    rows = max(int(e[0].shape[0]) for e in entries)
    cols = _round_up(max(int(e[0].shape[1]) for e in entries), 128)
    w_slab = jnp.stack(
        [jnp.pad(w2, ((0, rows - w2.shape[0]), (0, cols - w2.shape[1])))
         for w2, *_ in entries]).astype(jnp.bfloat16)           # (n_layers, 64, 512)
    shift_slab = jnp.stack(
        [jnp.pad(sh, (0, rows - sh.shape[0])) for _, sh, *_ in entries],
        axis=1)                                                  # (64, n_layers) f32

    plan = dict(
        layers=tuple((int(k), int(s), int(w2.shape[1]) // int(k),
                      int(w2.shape[0]), bool(sw))
                     for w2, _, k, s, sw in entries),
        sig_cin_p=_round_up(1, 8),
        seq_cin_p=_round_up(kmer_len * 4, 8),
        num_out=num_out,
        num_out_p=int(entries[-1][0].shape[0]),
    )
    packed = dict(w_slab=w_slab, shift_slab=shift_slab)
    return raw, packed, plan


# ----------------------------------------------------------------------------
# Constant stride-subsample matrices (built once in the wrapper, not per step)
# ----------------------------------------------------------------------------
def _build_sels(layers, lin0, nb):
    sels, lin = [], lin0
    for k, s, _, _, _ in layers:
        lfull = lin - k + 1
        lout = (lin - k) // s + 1
        if s > 1:
            m = np.zeros((nb * lfull, nb * lout), np.float32)
            for b in range(nb):
                for j in range(lout):
                    m[b * lfull + j * s, b * lout + j] = 1.0
            sels.append(jnp.asarray(m))
        lin = lout
    return sels


# ----------------------------------------------------------------------------
# Fused kernel
# ----------------------------------------------------------------------------
def _make_kernel(plan, nb, lin0):
    layers = plan["layers"]
    n_sel = sum(1 for l in layers if l[1] > 1)

    def kernel(x_ref, w_ref, sh_ref, *rest):
        sel_refs, out_ref = rest[:n_sel], rest[n_sel]
        shifts = sh_ref[...]                      # (ROWS, n_layers) f32, loaded once
        x = x_ref[0]                              # (cin0_p, nb*lin0) f32
        lin, si = lin0, 0
        for li, (k, s, cin_p, cout_p, do_swish) in enumerate(layers):
            lfull = lin - k + 1
            # im2col: tap-major rows (t*cin_p + c), sample-major lanes
            # (b*lfull + l).  Slices never cross a sample's lane slab.
            x2 = jnp.concatenate(
                [jnp.concatenate(
                    [x[:, b * lin + t: b * lin + t + lfull] for b in range(nb)],
                    axis=1) if nb > 1 else x[:, t:t + lfull]
                 for t in range(k)], axis=0)      # (k*cin_p, nb*lfull)
            w = w_ref[li][:cout_p, :k * cin_p]    # bf16, BN scale folded in
            y = jnp.dot(w, x2.astype(jnp.bfloat16),
                        preferred_element_type=jnp.float32)     # (cout_p, nb*lfull)
            if s > 1:
                # strided conv: constant block-diagonal 0/1 selection matmul.
                y = jnp.dot(y, sel_refs[si][...],
                            preferred_element_type=jnp.float32)
                si += 1
            lout = (lin - k) // s + 1
            y = y + shifts[:cout_p, li:li + 1]    # folded BN shift (+ conv bias)
            if do_swish:
                y = y * jax.nn.sigmoid(y)         # f32 epilogue (safe on v5e too)
            x, lin = y, lout
        out_ref[0] = x.astype(out_ref.dtype)      # (num_out_p, nb), batch on lanes
    return kernel


# ----------------------------------------------------------------------------
# Wrapper
# ----------------------------------------------------------------------------
def build_forward(plan, *, nb=4):
    layers = plan["layers"]
    sig_cin_p, seq_cin_p = plan["sig_cin_p"], plan["seq_cin_p"]
    cin0_p = sig_cin_p + seq_cin_p
    num_out, num_out_p = plan["num_out"], plan["num_out_p"]

    def forward(packed, sigs, seqs):
        w_slab, shift_slab = packed["w_slab"], packed["shift_slab"]
        B, _, L = sigs.shape
        nblk = (B + nb - 1) // nb
        bpad = nblk * nb - B

        def prep(a, cp):
            return jnp.pad(a, ((0, bpad), (0, cp - a.shape[1]), (0, 0)))

        # (B_p, cin0_p, L) -> (nblk, cin0_p, nb*L): NB samples per grid step,
        # stacked along the lane axis (layout plumbing done once in XLA).
        x0 = jnp.concatenate([prep(sigs, sig_cin_p), prep(seqs, seq_cin_p)], axis=1)
        x0 = x0.reshape(nblk, nb, cin0_p, L).transpose(0, 2, 1, 3)
        x0 = x0.reshape(nblk, cin0_p, nb * L)

        sels = _build_sels(layers, L, nb)
        kernel = _make_kernel(plan, nb, L)

        in_specs = [pl.BlockSpec((1, cin0_p, nb * L), lambda g: (g, 0, 0)),
                    # Constant operands (constant index_map -> fetched once).
                    pl.BlockSpec(w_slab.shape, lambda g: (0, 0, 0)),
                    pl.BlockSpec(shift_slab.shape, lambda g: (0, 0))]
        in_specs += [pl.BlockSpec(m.shape, lambda g: (0, 0)) for m in sels]

        out = pl.pallas_call(
            kernel,
            out_shape=jax.ShapeDtypeStruct((nblk, num_out_p, nb), jnp.float32),
            grid=(nblk,),
            in_specs=in_specs,
            out_specs=pl.BlockSpec((1, num_out_p, nb), lambda g: (g, 0, 0)),
            compiler_params=pltpu.CompilerParams(
                dimension_semantics=("parallel",),
                vmem_limit_bytes=32 * 1024 * 1024),
        )(x0, w_slab, shift_slab, *sels)

        out = out.transpose(0, 2, 1).reshape(nblk * nb, num_out_p)
        return out[:B, :num_out]

    return forward


# ----------------------------------------------------------------------------
# Pure-JAX reference (raw, unfolded f32 parameters)
# ----------------------------------------------------------------------------
def _conv_bn_swish_ref(x, layer, stride):
    out = jax.lax.conv_general_dilated(
        x, layer["w"], (stride,), "VALID",
        dimension_numbers=("NCH", "OIH", "NCH"))
    out = out + layer["b"][None, :, None]
    out = (out - layer["mean"][None, :, None]) / jnp.sqrt(
        layer["var"][None, :, None] + BN_EPS)
    out = out * layer["gamma"][None, :, None] + layer["beta"][None, :, None]
    return out * jax.nn.sigmoid(out)


def forward_ref(raw, sigs, seqs):
    c = lambda x, n, s: _conv_bn_swish_ref(x, raw[n], s)
    x = c(sigs, "sig1", 1)
    x = c(x, "sig2", 1)
    x = c(x, "sig3", 3)
    y = c(seqs, "seq1", 1)
    y = c(y, "seq2", 1)
    y = c(y, "seq3", 3)
    z = jnp.concatenate([x, y], axis=1)
    z = c(z, "m1", 1)
    z = c(z, "m2", 1)
    z = c(z, "m3", 2)
    z = c(z, "m4", 2)
    zf = z.reshape(z.shape[0], -1)
    return zf @ raw["fc_w"].T + raw["fc_b"][None, :]


# ----------------------------------------------------------------------------
if __name__ == "__main__":
    B, SIZE, KMER_LEN, NUM_OUT, L = 8, 32, 4, 2, 100   # L=100 -> final len 3
    NB = 4                                              # samples per grid step (grid has 2 steps)

    key = jax.random.PRNGKey(0)
    kp, ksig, kseq = jax.random.split(key, 3)
    raw, packed, plan = init_params(kp, SIZE, KMER_LEN, NUM_OUT)
    sigs = jax.random.normal(ksig, (B, 1, L), jnp.float32)
    seqs = jax.random.normal(kseq, (B, KMER_LEN * 4, L), jnp.float32)

    fwd = jax.jit(build_forward(plan, nb=NB))
    out = jax.block_until_ready(fwd(packed, sigs, seqs))

    ref = forward_ref(raw, sigs, seqs)
    assert out.shape == (B, NUM_OUT), out.shape
    # bf16 MXU inputs through 8 fused conv layers give a few 1e-3 of drift vs
    # the f32 reference; 3e-2 leaves ample margin while still catching any
    # layout / fusion / stride-selection bug.
    err = float(jnp.max(jnp.abs(out - ref)))
    assert jnp.allclose(out, ref, rtol=3e-2, atol=3e-2), ("max abs diff", err)

    print("KERNEL_OK")
</pallas_src>

<mosaic_0001>
module attributes {stable_mosaic.version = 11 : i64} {
  func.func @kernel(%arg0: i32, %arg1: memref<1x24x400xf32, #tpu.memory_space<vmem>>, %arg2: memref<8x64x512xbf16, #tpu.memory_space<vmem>>, %arg3: memref<64x8xf32, #tpu.memory_space<vmem>>, %arg4: memref<288x96xf32, #tpu.memory_space<vmem>>, %arg5: memref<56x28xf32, #tpu.memory_space<vmem>>, %arg6: memref<20x12xf32, #tpu.memory_space<vmem>>, %arg7: memref<1x8x4xf32, #tpu.memory_space<vmem>>) attributes {dimension_semantics = [#tpu.dimension_semantics<parallel>], iteration_bounds = array<i64: 2>, scalar_prefetch = 0 : i64, scratch_operands = 0 : i64, tpu.core_type = #tpu.core_type<tc>, window_params = [{transform_indices = @transform_0, window_bounds = array<i64: 1, 24, 400>}, {pipeline_mode = #tpu.pipeline_mode<synchronous>, transform_indices = @transform_1, window_bounds = array<i64: 8, 64, 512>}, {pipeline_mode = #tpu.pipeline_mode<synchronous>, transform_indices = @transform_2, window_bounds = array<i64: 64, 8>}, {pipeline_mode = #tpu.pipeline_mode<synchronous>, transform_indices = @transform_3, window_bounds = array<i64: 288, 96>}, {pipeline_mode = #tpu.pipeline_mode<synchronous>, transform_indices = @transform_4, window_bounds = array<i64: 56, 28>}, {pipeline_mode = #tpu.pipeline_mode<synchronous>, transform_indices = @transform_5, window_bounds = array<i64: 20, 12>}, {transform_indices = @transform_6, window_bounds = array<i64: 1, 8, 4>}]} {
    %c0 = arith.constant 0 : index
    %c0_0 = arith.constant 0 : index
    %0 = vector.load %arg3[%c0, %c0_0] : memref<64x8xf32, #tpu.memory_space<vmem>>, vector<64x8xf32>
    %c0_1 = arith.constant 0 : index
    %c0_2 = arith.constant 0 : index
    %c0_3 = arith.constant 0 : index
    %1 = vector.load %arg1[%c0_1, %c0_2, %c0_3] : memref<1x24x400xf32, #tpu.memory_space<vmem>>, vector<1x24x400xf32>
    %2 = vector.shape_cast %1 : vector<1x24x400xf32> to vector<24x400xf32>
    %3 = vector.extract_strided_slice %2 {offsets = [0, 0], sizes = [24, 90], strides = [1, 1]} : vector<24x400xf32> to vector<24x90xf32>
    %4 = vector.extract_strided_slice %2 {offsets = [0, 100], sizes = [24, 90], strides = [1, 1]} : vector<24x400xf32> to vector<24x90xf32>
    %5 = vector.extract_strided_slice %2 {offsets = [0, 200], sizes = [24, 90], strides = [1, 1]} : vector<24x400xf32> to vector<24x90xf32>
    %6 = vector.extract_strided_slice %2 {offsets = [0, 300], sizes = [24, 90], strides = [1, 1]} : vector<24x400xf32> to vector<24x90xf32>
    %7 = tpu.concatenate %3, %4, %5, %6 in 1 : vector<24x90xf32>, vector<24x90xf32>, vector<24x90xf32>, vector<24x90xf32> -> vector<24x360xf32>
    %8 = vector.extract_strided_slice %2 {offsets = [0, 1], sizes = [24, 90], strides = [1, 1]} : vector<24x400xf32> to vector<24x90xf32>
    %9 = vector.extract_strided_slice %2 {offsets = [0, 101], sizes = [24, 90], strides = [1, 1]} : vector<24x400xf32> to vector<24x90xf32>
    %10 = vector.extract_strided_slice %2 {offsets = [0, 201], sizes = [24, 90], strides = [1, 1]} : vector<24x400xf32> to vector<24x90xf32>
    %11 = vector.extract_strided_slice %2 {offsets = [0, 301], sizes = [24, 90], strides = [1, 1]} : vector<24x400xf32> to vector<24x90xf32>
    %12 = tpu.concatenate %8, %9, %10, %11 in 1 : vector<24x90xf32>, vector<24x90xf32>, vector<24x90xf32>, vector<24x90xf32> -> vector<24x360xf32>
    %13 = vector.extract_strided_slice %2 {offsets = [0, 2], sizes = [24, 90], strides = [1, 1]} : vector<24x400xf32> to vector<24x90xf32>
    %14 = vector.extract_strided_slice %2 {offsets = [0, 102], sizes = [24, 90], strides = [1, 1]} : vector<24x400xf32> to vector<24x90xf32>
    %15 = vector.extract_strided_slice %2 {offsets = [0, 202], sizes = [24, 90], strides = [1, 1]} : vector<24x400xf32> to vector<24x90xf32>
    %16 = vector.extract_strided_slice %2 {offsets = [0, 302], sizes = [24, 90], strides = [1, 1]} : vector<24x400xf32> to vector<24x90xf32>
    %17 = tpu.concatenate %13, %14, %15, %16 in 1 : vector<24x90xf32>, vector<24x90xf32>, vector<24x90xf32>, vector<24x90xf32> -> vector<24x360xf32>
    %18 = vector.extract_strided_slice %2 {offsets = [0, 3], sizes = [24, 90], strides = [1, 1]} : vector<24x400xf32> to vector<24x90xf32>
    %19 = vector.extract_strided_slice %2 {offsets = [0, 103], sizes = [24, 90], strides = [1, 1]} : vector<24x400xf32> to vector<24x90xf32>
    %20 = vector.extract_strided_slice %2 {offsets = [0, 203], sizes = [24, 90], strides = [1, 1]} : vector<24x400xf32> to vector<24x90xf32>
    %21 = vector.extract_strided_slice %2 {offsets = [0, 303], sizes = [24, 90], strides = [1, 1]} : vector<24x400xf32> to vector<24x90xf32>
    %22 = tpu.concatenate %18, %19, %20, %21 in 1 : vector<24x90xf32>, vector<24x90xf32>, vector<24x90xf32>, vector<24x90xf32> -> vector<24x360xf32>
    %23 = vector.extract_strided_slice %2 {offsets = [0, 4], sizes = [24, 90], strides = [1, 1]} : vector<24x400xf32> to vector<24x90xf32>
    %24 = vector.extract_strided_slice %2 {offsets = [0, 104], sizes = [24, 90], strides = [1, 1]} : vector<24x400xf32> to vector<24x90xf32>
    %25 = vector.extract_strided_slice %2 {offsets = [0, 204], sizes = [24, 90], strides = [1, 1]} : vector<24x400xf32> to vector<24x90xf32>
    %26 = vector.extract_strided_slice %2 {offsets = [0, 304], sizes = [24, 90], strides = [1, 1]} : vector<24x400xf32> to vector<24x90xf32>
    %27 = tpu.concatenate %23, %24, %25, %26 in 1 : vector<24x90xf32>, vector<24x90xf32>, vector<24x90xf32>, vector<24x90xf32> -> vector<24x360xf32>
    %28 = vector.extract_strided_slice %2 {offsets = [0, 5], sizes = [24, 90], strides = [1, 1]} : vector<24x400xf32> to vector<24x90xf32>
    %29 = vector.extract_strided_slice %2 {offsets = [0, 105], sizes = [24, 90], strides = [1, 1]} : vector<24x400xf32> to vector<24x90xf32>
    %30 = vector.extract_strided_slice %2 {offsets = [0, 205], sizes = [24, 90], strides = [1, 1]} : vector<24x400xf32> to vector<24x90xf32>
    %31 = vector.extract_strided_slice %2 {offsets = [0, 305], sizes = [24, 90], strides = [1, 1]} : vector<24x400xf32> to vector<24x90xf32>
    %32 = tpu.concatenate %28, %29, %30, %31 in 1 : vector<24x90xf32>, vector<24x90xf32>, vector<24x90xf32>, vector<24x90xf32> -> vector<24x360xf32>
    %33 = vector.extract_strided_slice %2 {offsets = [0, 6], sizes = [24, 90], strides = [1, 1]} : vector<24x400xf32> to vector<24x90xf32>
    %34 = vector.extract_strided_slice %2 {offsets = [0, 106], sizes = [24, 90], strides = [1, 1]} : vector<24x400xf32> to vector<24x90xf32>
    %35 = vector.extract_strided_slice %2 {offsets = [0, 206], sizes = [24, 90], strides = [1, 1]} : vector<24x400xf32> to vector<24x90xf32>
    %36 = vector.extract_strided_slice %2 {offsets = [0, 306], sizes = [24, 90], strides = [1, 1]} : vector<24x400xf32> to vector<24x90xf32>
    %37 = tpu.concatenate %33, %34, %35, %36 in 1 : vector<24x90xf32>, vector<24x90xf32>, vector<24x90xf32>, vector<24x90xf32> -> vector<24x360xf32>
    %38 = vector.extract_strided_slice %2 {offsets = [0, 7], sizes = [24, 90], strides = [1, 1]} : vector<24x400xf32> to vector<24x90xf32>
    %39 = vector.extract_strided_slice %2 {offsets = [0, 107], sizes = [24, 90], strides = [1, 1]} : vector<24x400xf32> to vector<24x90xf32>
    %40 = vector.extract_strided_slice %2 {offsets = [0, 207], sizes = [24, 90], strides = [1, 1]} : vector<24x400xf32> to vector<24x90xf32>
    %41 = vector.extract_strided_slice %2 {offsets = [0, 307], sizes = [24, 90], strides = [1, 1]} : vector<24x400xf32> to vector<24x90xf32>
    %42 = tpu.concatenate %38, %39, %40, %41 in 1 : vector<24x90xf32>, vector<24x90xf32>, vector<24x90xf32>, vector<24x90xf32> -> vector<24x360xf32>
    %43 = vector.extract_strided_slice %2 {offsets = [0, 8], sizes = [24, 90], strides = [1, 1]} : vector<24x400xf32> to vector<24x90xf32>
    %44 = vector.extract_strided_slice %2 {offsets = [0, 108], sizes = [24, 90], strides = [1, 1]} : vector<24x400xf32> to vector<24x90xf32>
    %45 = vector.extract_strided_slice %2 {offsets = [0, 208], sizes = [24, 90], strides = [1, 1]} : vector<24x400xf32> to vector<24x90xf32>
    %46 = vector.extract_strided_slice %2 {offsets = [0, 308], sizes = [24, 90], strides = [1, 1]} : vector<24x400xf32> to vector<24x90xf32>
    %47 = tpu.concatenate %43, %44, %45, %46 in 1 : vector<24x90xf32>, vector<24x90xf32>, vector<24x90xf32>, vector<24x90xf32> -> vector<24x360xf32>
    %48 = vector.extract_strided_slice %2 {offsets = [0, 9], sizes = [24, 90], strides = [1, 1]} : vector<24x400xf32> to vector<24x90xf32>
    %49 = vector.extract_strided_slice %2 {offsets = [0, 109], sizes = [24, 90], strides = [1, 1]} : vector<24x400xf32> to vector<24x90xf32>
    %50 = vector.extract_strided_slice %2 {offsets = [0, 209], sizes = [24, 90], strides = [1, 1]} : vector<24x400xf32> to vector<24x90xf32>
    %51 = vector.extract_strided_slice %2 {offsets = [0, 309], sizes = [24, 90], strides = [1, 1]} : vector<24x400xf32> to vector<24x90xf32>
    %52 = tpu.concatenate %48, %49, %50, %51 in 1 : vector<24x90xf32>, vector<24x90xf32>, vector<24x90xf32>, vector<24x90xf32> -> vector<24x360xf32>
    %53 = vector.extract_strided_slice %2 {offsets = [0, 10], sizes = [24, 90], strides = [1, 1]} : vector<24x400xf32> to vector<24x90xf32>
    %54 = vector.extract_strided_slice %2 {offsets = [0, 110], sizes = [24, 90], strides = [1, 1]} : vector<24x400xf32> to vector<24x90xf32>
    %55 = vector.extract_strided_slice %2 {offsets = [0, 210], sizes = [24, 90], strides = [1, 1]} : vector<24x400xf32> to vector<24x90xf32>
    %56 = vector.extract_strided_slice %2 {offsets = [0, 310], sizes = [24, 90], strides = [1, 1]} : vector<24x400xf32> to vector<24x90xf32>
    %57 = tpu.concatenate %53, %54, %55, %56 in 1 : vector<24x90xf32>, vector<24x90xf32>, vector<24x90xf32>, vector<24x90xf32> -> vector<24x360xf32>
    %58 = tpu.concatenate %7, %12, %17, %22, %27, %32, %37, %42, %47, %52, %57 in 0 : vector<24x360xf32>, vector<24x360xf32>, vector<24x360xf32>, vector<24x360xf32>, vector<24x360xf32>, vector<24x360xf32>, vector<24x360xf32>, vector<24x360xf32>, vector<24x360xf32>, vector<24x360xf32>, vector<24x360xf32> -> vector<264x360xf32>
    %c0_4 = arith.constant 0 : index
    %c0_5 = arith.constant 0 : index
    %c0_6 = arith.constant 0 : index
    %59 = vector.load %arg2[%c0_4, %c0_5, %c0_6] : memref<8x64x512xbf16, #tpu.memory_space<vmem>>, vector<1x64x512xbf16>
    %60 = vector.shape_cast %59 : vector<1x64x512xbf16> to vector<64x512xbf16>
    %61 = vector.extract_strided_slice %60 {offsets = [0, 0], sizes = [24, 264], strides = [1, 1]} : vector<64x512xbf16> to vector<24x264xbf16>
    %62 = arith.truncf %58 : vector<264x360xf32> to vector<264x360xbf16>
    %cst = arith.constant dense<0.000000e+00> : vector<24x360xf32>
    %63 = tpu.matmul %61, %62, %cst {dimension_numbers = #tpu.dot_dimension_numbers<[1], [0], [0], [1], [0, 0, 1, 1], [], []>} : vector<24x264xbf16>, vector<264x360xbf16>, vector<24x360xf32> -> vector<24x360xf32>
    %64 = vector.extract_strided_slice %0 {offsets = [0, 0], sizes = [24, 1], strides = [1, 1]} : vector<64x8xf32> to vector<24x1xf32>
    %65 = vector.broadcast %64 : vector<24x1xf32> to vector<24x360xf32>
    %66 = arith.addf %63, %65 : vector<24x360xf32>
    %67 = arith.negf %66 : vector<24x360xf32>
    %68 = math.exp %67 : vector<24x360xf32>
    %cst_7 = arith.constant 1.000000e+00 : f32
    %69 = vector.broadcast %cst_7 : f32 to vector<24x360xf32>
    %70 = arith.addf %69, %68 : vector<24x360xf32>
    %71 = arith.divf %69, %70 : vector<24x360xf32>
    %72 = arith.mulf %66, %71 : vector<24x360xf32>
    %73 = vector.extract_strided_slice %72 {offsets = [0, 0], sizes = [24, 80], strides = [1, 1]} : vector<24x360xf32> to vector<24x80xf32>
    %74 = vector.extract_strided_slice %72 {offsets = [0, 90], sizes = [24, 80], strides = [1, 1]} : vector<24x360xf32> to vector<24x80xf32>
    %75 = vector.extract_strided_slice %72 {offsets = [0, 180], sizes = [24, 80], strides = [1, 1]} : vector<24x360xf32> to vector<24x80xf32>
    %76 = vector.extract_strided_slice %72 {offsets = [0, 270], sizes = [24, 80], strides = [1, 1]} : vector<24x360xf32> to vector<24x80xf32>
    %77 = tpu.concatenate %73, %74, %75, %76 in 1 : vector<24x80xf32>, vector<24x80xf32>, vector<24x80xf32>, vector<24x80xf32> -> vector<24x320xf32>
    %78 = vector.extract_strided_slice %72 {offsets = [0, 1], sizes = [24, 80], strides = [1, 1]} : vector<24x360xf32> to vector<24x80xf32>
    %79 = vector.extract_strided_slice %72 {offsets = [0, 91], sizes = [24, 80], strides = [1, 1]} : vector<24x360xf32> to vector<24x80xf32>
    %80 = vector.extract_strided_slice %72 {offsets = [0, 181], sizes = [24, 80], strides = [1, 1]} : vector<24x360xf32> to vector<24x80xf32>
    %81 = vector.extract_strided_slice %72 {offsets = [0, 271], sizes = [24, 80], strides = [1, 1]} : vector<24x360xf32> to vector<24x80xf32>
    %82 = tpu.concatenate %78, %79, %80, %81 in 1 : vector<24x80xf32>, vector<24x80xf32>, vector<24x80xf32>, vector<24x80xf32> -> vector<24x320xf32>
    %83 = vector.extract_strided_slice %72 {offsets = [0, 2], sizes = [24, 80], strides = [1, 1]} : vector<24x360xf32> to vector<24x80xf32>
    %84 = vector.extract_strided_slice %72 {offsets = [0, 92], sizes = [24, 80], strides = [1, 1]} : vector<24x360xf32> to vector<24x80xf32>
    %85 = vector.extract_strided_slice %72 {offsets = [0, 182], sizes = [24, 80], strides = [1, 1]} : vector<24x360xf32> to vector<24x80xf32>
    %86 = vector.extract_strided_slice %72 {offsets = [0, 272], sizes = [24, 80], strides = [1, 1]} : vector<24x360xf32> to vector<24x80xf32>
    %87 = tpu.concatenate %83, %84, %85, %86 in 1 : vector<24x80xf32>, vector<24x80xf32>, vector<24x80xf32>, vector<24x80xf32> -> vector<24x320xf32>
    %88 = vector.extract_strided_slice %72 {offsets = [0, 3], sizes = [24, 80], strides = [1, 1]} : vector<24x360xf32> to vector<24x80xf32>
    %89 = vector.extract_strided_slice %72 {offsets = [0, 93], sizes = [24, 80], strides = [1, 1]} : vector<24x360xf32> to vector<24x80xf32>
    %90 = vector.extract_strided_slice %72 {offsets = [0, 183], sizes = [24, 80], strides = [1, 1]} : vector<24x360xf32> to vector<24x80xf32>
    %91 = vector.extract_strided_slice %72 {offsets = [0, 273], sizes = [24, 80], strides = [1, 1]} : vector<24x360xf32> to vector<24x80xf32>
    %92 = tpu.concatenate %88, %89, %90, %91 in 1 : vector<24x80xf32>, vector<24x80xf32>, vector<24x80xf32>, vector<24x80xf32> -> vector<24x320xf32>
    %93 = vector.extract_strided_slice %72 {offsets = [0, 4], sizes = [24, 80], strides = [1, 1]} : vector<24x360xf32> to vector<24x80xf32>
    %94 = vector.extract_strided_slice %72 {offsets = [0, 94], sizes = [24, 80], strides = [1, 1]} : vector<24x360xf32> to vector<24x80xf32>
    %95 = vector.extract_strided_slice %72 {offsets = [0, 184], sizes = [24, 80], strides = [1, 1]} : vector<24x360xf32> to vector<24x80xf32>
    %96 = vector.extract_strided_slice %72 {offsets = [0, 274], sizes = [24, 80], strides = [1, 1]} : vector<24x360xf32> to vector<24x80xf32>
    %97 = tpu.concatenate %93, %94, %95, %96 in 1 : vector<24x80xf32>, vector<24x80xf32>, vector<24x80xf32>, vector<24x80xf32> -> vector<24x320xf32>
    %98 = vector.extract_strided_slice %72 {offsets = [0, 5], sizes = [24, 80], strides = [1, 1]} : vector<24x360xf32> to vector<24x80xf32>
    %99 = vector.extract_strided_slice %72 {offsets = [0, 95], sizes = [24, 80], strides = [1, 1]} : vector<24x360xf32> to vector<24x80xf32>
    %100 = vector.extract_strided_slice %72 {offsets = [0, 185], sizes = [24, 80], strides = [1, 1]} : vector<24x360xf32> to vector<24x80xf32>
    %101 = vector.extract_strided_slice %72 {offsets = [0, 275], sizes = [24, 80], strides = [1, 1]} : vector<24x360xf32> to vector<24x80xf32>
    %102 = tpu.concatenate %98, %99, %100, %101 in 1 : vector<24x80xf32>, vector<24x80xf32>, vector<24x80xf32>, vector<24x80xf32> -> vector<24x320xf32>
    %103 = vector.extract_strided_slice %72 {offsets = [0, 6], sizes = [24, 80], strides = [1, 1]} : vector<24x360xf32> to vector<24x80xf32>
    %104 = vector.extract_strided_slice %72 {offsets = [0, 96], sizes = [24, 80], strides = [1, 1]} : vector<24x360xf32> to vector<24x80xf32>
    %105 = vector.extract_strided_slice %72 {offsets = [0, 186], sizes = [24, 80], strides = [1, 1]} : vector<24x360xf32> to vector<24x80xf32>
    %106 = vector.extract_strided_slice %72 {offsets = [0, 276], sizes = [24, 80], strides = [1, 1]} : vector<24x360xf32> to vector<24x80xf32>
    %107 = tpu.concatenate %103, %104, %105, %106 in 1 : vector<24x80xf32>, vector<24x80xf32>, vector<24x80xf32>, vector<24x80xf32> -> vector<24x320xf32>
    %108 = vector.extract_strided_slice %72 {offsets = [0, 7], sizes = [24, 80], strides = [1, 1]} : vector<24x360xf32> to vector<24x80xf32>
    %109 = vector.extract_strided_slice %72 {offsets = [0, 97], sizes = [24, 80], strides = [1, 1]} : vector<24x360xf32> to vector<24x80xf32>
    %110 = vector.extract_strided_slice %72 {offsets = [0, 187], sizes = [24, 80], strides = [1, 1]} : vector<24x360xf32> to vector<24x80xf32>
    %111 = vector.extract_strided_slice %72 {offsets = [0, 277], sizes = [24, 80], strides = [1, 1]} : vector<24x360xf32> to vector<24x80xf32>
    %112 = tpu.concatenate %108, %109, %110, %111 in 1 : vector<24x80xf32>, vector<24x80xf32>, vector<24x80xf32>, vector<24x80xf32> -> vector<24x320xf32>
    %113 = vector.extract_strided_slice %72 {offsets = [0, 8], sizes = [24, 80], strides = [1, 1]} : vector<24x360xf32> to vector<24x80xf32>
    %114 = vector.extract_strided_slice %72 {offsets = [0, 98], sizes = [24, 80], strides = [1, 1]} : vector<24x360xf32> to vector<24x80xf32>
    %115 = vector.extract_strided_slice %72 {offsets = [0, 188], sizes = [24, 80], strides = [1, 1]} : vector<24x360xf32> to vector<24x80xf32>
    %116 = vector.extract_strided_slice %72 {offsets = [0, 278], sizes = [24, 80], strides = [1, 1]} : vector<24x360xf32> to vector<24x80xf32>
    %117 = tpu.concatenate %113, %114, %115, %116 in 1 : vector<24x80xf32>, vector<24x80xf32>, vector<24x80xf32>, vector<24x80xf32> -> vector<24x320xf32>
    %118 = vector.extract_strided_slice %72 {offsets = [0, 9], sizes = [24, 80], strides = [1, 1]} : vector<24x360xf32> to vector<24x80xf32>
    %119 = vector.extract_strided_slice %72 {offsets = [0, 99], sizes = [24, 80], strides = [1, 1]} : vector<24x360xf32> to vector<24x80xf32>
    %120 = vector.extract_strided_slice %72 {offsets = [0, 189], sizes = [24, 80], strides = [1, 1]} : vector<24x360xf32> to vector<24x80xf32>
    %121 = vector.extract_strided_slice %72 {offsets = [0, 279], sizes = [24, 80], strides = [1, 1]} : vector<24x360xf32> to vector<24x80xf32>
    %122 = tpu.concatenate %118, %119, %120, %121 in 1 : vector<24x80xf32>, vector<24x80xf32>, vector<24x80xf32>, vector<24x80xf32> -> vector<24x320xf32>
    %123 = vector.extract_strided_slice %72 {offsets = [0, 10], sizes = [24, 80], strides = [1, 1]} : vector<24x360xf32> to vector<24x80xf32>
    %124 = vector.extract_strided_slice %72 {offsets = [0, 100], sizes = [24, 80], strides = [1, 1]} : vector<24x360xf32> to vector<24x80xf32>
    %125 = vector.extract_strided_slice %72 {offsets = [0, 190], sizes = [24, 80], strides = [1, 1]} : vector<24x360xf32> to vector<24x80xf32>
    %126 = vector.extract_strided_slice %72 {offsets = [0, 280], sizes = [24, 80], strides = [1, 1]} : vector<24x360xf32> to vector<24x80xf32>
    %127 = tpu.concatenate %123, %124, %125, %126 in 1 : vector<24x80xf32>, vector<24x80xf32>, vector<24x80xf32>, vector<24x80xf32> -> vector<24x320xf32>
    %128 = tpu.concatenate %77, %82, %87, %92, %97, %102, %107, %112, %117, %122, %127 in 0 : vector<24x320xf32>, vector<24x320xf32>, vector<24x320xf32>, vector<24x320xf32>, vector<24x320xf32>, vector<24x320xf32>, vector<24x320xf32>, vector<24x320xf32>, vector<24x320xf32>, vector<24x320xf32>, vector<24x320xf32> -> vector<264x320xf32>
    %c1 = arith.constant 1 : index
    %c0_8 = arith.constant 0 : index
    %c0_9 = arith.constant 0 : index
    %129 = vector.load %arg2[%c1, %c0_8, %c0_9] : memref<8x64x512xbf16, #tpu.memory_space<vmem>>, vector<1x64x512xbf16>
    %130 = vector.shape_cast %129 : vector<1x64x512xbf16> to vector<64x512xbf16>
    %131 = vector.extract_strided_slice %130 {offsets = [0, 0], sizes = [48, 264], strides = [1, 1]} : vector<64x512xbf16> to vector<48x264xbf16>
    %132 = arith.truncf %128 : vector<264x320xf32> to vector<264x320xbf16>
    %cst_10 = arith.constant dense<0.000000e+00> : vector<48x320xf32>
    %133 = tpu.matmul %131, %132, %cst_10 {dimension_numbers = #tpu.dot_dimension_numbers<[1], [0], [0], [1], [0, 0, 1, 1], [], []>} : vector<48x264xbf16>, vector<264x320xbf16>, vector<48x320xf32> -> vector<48x320xf32>
    %134 = vector.extract_strided_slice %0 {offsets = [0, 1], sizes = [48, 1], strides = [1, 1]} : vector<64x8xf32> to vector<48x1xf32>
    %135 = vector.broadcast %134 : vector<48x1xf32> to vector<48x320xf32>
    %136 = arith.addf %133, %135 : vector<48x320xf32>
    %137 = arith.negf %136 : vector<48x320xf32>
    %138 = math.exp %137 : vector<48x320xf32>
    %cst_11 = arith.constant 1.000000e+00 : f32
    %139 = vector.broadcast %cst_11 : f32 to vector<48x320xf32>
    %140 = arith.addf %139, %138 : vector<48x320xf32>
    %141 = arith.divf %139, %140 : vector<48x320xf32>
    %142 = arith.mulf %136, %141 : vector<48x320xf32>
    %143 = vector.extract_strided_slice %142 {offsets = [0, 0], sizes = [48, 72], strides = [1, 1]} : vector<48x320xf32> to vector<48x72xf32>
    %144 = vector.extract_strided_slice %142 {offsets = [0, 80], sizes = [48, 72], strides = [1, 1]} : vector<48x320xf32> to vector<48x72xf32>
    %145 = vector.extract_strided_slice %142 {offsets = [0, 160], sizes = [48, 72], strides = [1, 1]} : vector<48x320xf32> to vector<48x72xf32>
    %146 = vector.extract_strided_slice %142 {offsets = [0, 240], sizes = [48, 72], strides = [1, 1]} : vector<48x320xf32> to vector<48x72xf32>
    %147 = tpu.concatenate %143, %144, %145, %146 in 1 : vector<48x72xf32>, vector<48x72xf32>, vector<48x72xf32>, vector<48x72xf32> -> vector<48x288xf32>
    %148 = vector.extract_strided_slice %142 {offsets = [0, 1], sizes = [48, 72], strides = [1, 1]} : vector<48x320xf32> to vector<48x72xf32>
    %149 = vector.extract_strided_slice %142 {offsets = [0, 81], sizes = [48, 72], strides = [1, 1]} : vector<48x320xf32> to vector<48x72xf32>
    %150 = vector.extract_strided_slice %142 {offsets = [0, 161], sizes = [48, 72], strides = [1, 1]} : vector<48x320xf32> to vector<48x72xf32>
    %151 = vector.extract_strided_slice %142 {offsets = [0, 241], sizes = [48, 72], strides = [1, 1]} : vector<48x320xf32> to vector<48x72xf32>
    %152 = tpu.concatenate %148, %149, %150, %151 in 1 : vector<48x72xf32>, vector<48x72xf32>, vector<48x72xf32>, vector<48x72xf32> -> vector<48x288xf32>
    %153 = vector.extract_strided_slice %142 {offsets = [0, 2], sizes = [48, 72], strides = [1, 1]} : vector<48x320xf32> to vector<48x72xf32>
    %154 = vector.extract_strided_slice %142 {offsets = [0, 82], sizes = [48, 72], strides = [1, 1]} : vector<48x320xf32> to vector<48x72xf32>
    %155 = vector.extract_strided_slice %142 {offsets = [0, 162], sizes = [48, 72], strides = [1, 1]} : vector<48x320xf32> to vector<48x72xf32>
    %156 = vector.extract_strided_slice %142 {offsets = [0, 242], sizes = [48, 72], strides = [1, 1]} : vector<48x320xf32> to vector<48x72xf32>
    %157 = tpu.concatenate %153, %154, %155, %156 in 1 : vector<48x72xf32>, vector<48x72xf32>, vector<48x72xf32>, vector<48x72xf32> -> vector<48x288xf32>
    %158 = vector.extract_strided_slice %142 {offsets = [0, 3], sizes = [48, 72], strides = [1, 1]} : vector<48x320xf32> to vector<48x72xf32>
    %159 = vector.extract_strided_slice %142 {offsets = [0, 83], sizes = [48, 72], strides = [1, 1]} : vector<48x320xf32> to vector<48x72xf32>
    %160 = vector.extract_strided_slice %142 {offsets = [0, 163], sizes = [48, 72], strides = [1, 1]} : vector<48x320xf32> to vector<48x72xf32>
    %161 = vector.extract_strided_slice %142 {offsets = [0, 243], sizes = [48, 72], strides = [1, 1]} : vector<48x320xf32> to vector<48x72xf32>
    %162 = tpu.concatenate %158, %159, %160, %161 in 1 : vector<48x72xf32>, vector<48x72xf32>, vector<48x72xf32>, vector<48x72xf32> -> vector<48x288xf32>
    %163 = vector.extract_strided_slice %142 {offsets = [0, 4], sizes = [48, 72], strides = [1, 1]} : vector<48x320xf32> to vector<48x72xf32>
    %164 = vector.extract_strided_slice %142 {offsets = [0, 84], sizes = [48, 72], strides = [1, 1]} : vector<48x320xf32> to vector<48x72xf32>
    %165 = vector.extract_strided_slice %142 {offsets = [0, 164], sizes = [48, 72], strides = [1, 1]} : vector<48x320xf32> to vector<48x72xf32>
    %166 = vector.extract_strided_slice %142 {offsets = [0, 244], sizes = [48, 72], strides = [1, 1]} : vector<48x320xf32> to vector<48x72xf32>
    %167 = tpu.concatenate %163, %164, %165, %166 in 1 : vector<48x72xf32>, vector<48x72xf32>, vector<48x72xf32>, vector<48x72xf32> -> vector<48x288xf32>
    %168 = vector.extract_strided_slice %142 {offsets = [0, 5], sizes = [48, 72], strides = [1, 1]} : vector<48x320xf32> to vector<48x72xf32>
    %169 = vector.extract_strided_slice %142 {offsets = [0, 85], sizes = [48, 72], strides = [1, 1]} : vector<48x320xf32> to vector<48x72xf32>
    %170 = vector.extract_strided_slice %142 {offsets = [0, 165], sizes = [48, 72], strides = [1, 1]} : vector<48x320xf32> to vector<48x72xf32>
    %171 = vector.extract_strided_slice %142 {offsets = [0, 245], sizes = [48, 72], strides = [1, 1]} : vector<48x320xf32> to vector<48x72xf32>
    %172 = tpu.concatenate %168, %169, %170, %171 in 1 : vector<48x72xf32>, vector<48x72xf32>, vector<48x72xf32>, vector<48x72xf32> -> vector<48x288xf32>
    %173 = vector.extract_strided_slice %142 {offsets = [0, 6], sizes = [48, 72], strides = [1, 1]} : vector<48x320xf32> to vector<48x72xf32>
    %174 = vector.extract_strided_slice %142 {offsets = [0, 86], sizes = [48, 72], strides = [1, 1]} : vector<48x320xf32> to vector<48x72xf32>
    %175 = vector.extract_strided_slice %142 {offsets = [0, 166], sizes = [48, 72], strides = [1, 1]} : vector<48x320xf32> to vector<48x72xf32>
    %176 = vector.extract_strided_slice %142 {offsets = [0, 246], sizes = [48, 72], strides = [1, 1]} : vector<48x320xf32> to vector<48x72xf32>
    %177 = tpu.concatenate %173, %174, %175, %176 in 1 : vector<48x72xf32>, vector<48x72xf32>, vector<48x72xf32>, vector<48x72xf32> -> vector<48x288xf32>
    %178 = vector.extract_strided_slice %142 {offsets = [0, 7], sizes = [48, 72], strides = [1, 1]} : vector<48x320xf32> to vector<48x72xf32>
    %179 = vector.extract_strided_slice %142 {offsets = [0, 87], sizes = [48, 72], strides = [1, 1]} : vector<48x320xf32> to vector<48x72xf32>
    %180 = vector.extract_strided_slice %142 {offsets = [0, 167], sizes = [48, 72], strides = [1, 1]} : vector<48x320xf32> to vector<48x72xf32>
    %181 = vector.extract_strided_slice %142 {offsets = [0, 247], sizes = [48, 72], strides = [1, 1]} : vector<48x320xf32> to vector<48x72xf32>
    %182 = tpu.concatenate %178, %179, %180, %181 in 1 : vector<48x72xf32>, vector<48x72xf32>, vector<48x72xf32>, vector<48x72xf32> -> vector<48x288xf32>
    %183 = vector.extract_strided_slice %142 {offsets = [0, 8], sizes = [48, 72], strides = [1, 1]} : vector<48x320xf32> to vector<48x72xf32>
    %184 = vector.extract_strided_slice %142 {offsets = [0, 88], sizes = [48, 72], strides = [1, 1]} : vector<48x320xf32> to vector<48x72xf32>
    %185 = vector.extract_strided_slice %142 {offsets = [0, 168], sizes = [48, 72], strides = [1, 1]} : vector<48x320xf32> to vector<48x72xf32>
    %186 = vector.extract_strided_slice %142 {offsets = [0, 248], sizes = [48, 72], strides = [1, 1]} : vector<48x320xf32> to vector<48x72xf32>
    %187 = tpu.concatenate %183, %184, %185, %186 in 1 : vector<48x72xf32>, vector<48x72xf32>, vector<48x72xf32>, vector<48x72xf32> -> vector<48x288xf32>
    %188 = tpu.concatenate %147, %152, %157, %162, %167, %172, %177, %182, %187 in 0 : vector<48x288xf32>, vector<48x288xf32>, vector<48x288xf32>, vector<48x288xf32>, vector<48x288xf32>, vector<48x288xf32>, vector<48x288xf32>, vector<48x288xf32>, vector<48x288xf32> -> vector<432x288xf32>
    %c2 = arith.constant 2 : index
    %c0_12 = arith.constant 0 : index
    %c0_13 = arith.constant 0 : index
    %189 = vector.load %arg2[%c2, %c0_12, %c0_13] : memref<8x64x512xbf16, #tpu.memory_space<vmem>>, vector<1x64x512xbf16>
    %190 = vector.shape_cast %189 : vector<1x64x512xbf16> to vector<64x512xbf16>
    %191 = vector.extract_strided_slice %190 {offsets = [0, 0], sizes = [64, 432], strides = [1, 1]} : vector<64x512xbf16> to vector<64x432xbf16>
    %192 = arith.truncf %188 : vector<432x288xf32> to vector<432x288xbf16>
    %cst_14 = arith.constant dense<0.000000e+00> : vector<64x288xf32>
    %193 = tpu.matmul %191, %192, %cst_14 {dimension_numbers = #tpu.dot_dimension_numbers<[1], [0], [0], [1], [0, 0, 1, 1], [], []>} : vector<64x432xbf16>, vector<432x288xbf16>, vector<64x288xf32> -> vector<64x288xf32>
    %c0_15 = arith.constant 0 : index
    %c0_16 = arith.constant 0 : index
    %194 = vector.load %arg4[%c0_15, %c0_16] : memref<288x96xf32, #tpu.memory_space<vmem>>, vector<288x96xf32>
    %cst_17 = arith.constant dense<0.000000e+00> : vector<64x96xf32>
    %195 = tpu.matmul %193, %194, %cst_17 {dimension_numbers = #tpu.dot_dimension_numbers<[1], [0], [0], [1], [0, 0, 1, 1], [], []>} : vector<64x288xf32>, vector<288x96xf32>, vector<64x96xf32> -> vector<64x96xf32>
    %196 = vector.extract_strided_slice %0 {offsets = [0, 2], sizes = [64, 1], strides = [1, 1]} : vector<64x8xf32> to vector<64x1xf32>
    %197 = vector.broadcast %196 : vector<64x1xf32> to vector<64x96xf32>
    %198 = arith.addf %195, %197 : vector<64x96xf32>
    %199 = arith.negf %198 : vector<64x96xf32>
    %200 = math.exp %199 : vector<64x96xf32>
    %cst_18 = arith.constant 1.000000e+00 : f32
    %201 = vector.broadcast %cst_18 : f32 to vector<64x96xf32>
    %202 = arith.addf %201, %200 : vector<64x96xf32>
    %203 = arith.divf %201, %202 : vector<64x96xf32>
    %204 = arith.mulf %198, %203 : vector<64x96xf32>
    %205 = vector.extract_strided_slice %204 {offsets = [0, 0], sizes = [64, 20], strides = [1, 1]} : vector<64x96xf32> to vector<64x20xf32>
    %206 = vector.extract_strided_slice %204 {offsets = [0, 24], sizes = [64, 20], strides = [1, 1]} : vector<64x96xf32> to vector<64x20xf32>
    %207 = vector.extract_strided_slice %204 {offsets = [0, 48], sizes = [64, 20], strides = [1, 1]} : vector<64x96xf32> to vector<64x20xf32>
    %208 = vector.extract_strided_slice %204 {offsets = [0, 72], sizes = [64, 20], strides = [1, 1]} : vector<64x96xf32> to vector<64x20xf32>
    %209 = tpu.concatenate %205, %206, %207, %208 in 1 : vector<64x20xf32>, vector<64x20xf32>, vector<64x20xf32>, vector<64x20xf32> -> vector<64x80xf32>
    %210 = vector.extract_strided_slice %204 {offsets = [0, 1], sizes = [64, 20], strides = [1, 1]} : vector<64x96xf32> to vector<64x20xf32>
    %211 = vector.extract_strided_slice %204 {offsets = [0, 25], sizes = [64, 20], strides = [1, 1]} : vector<64x96xf32> to vector<64x20xf32>
    %212 = vector.extract_strided_slice %204 {offsets = [0, 49], sizes = [64, 20], strides = [1, 1]} : vector<64x96xf32> to vector<64x20xf32>
    %213 = vector.extract_strided_slice %204 {offsets = [0, 73], sizes = [64, 20], strides = [1, 1]} : vector<64x96xf32> to vector<64x20xf32>
    %214 = tpu.concatenate %210, %211, %212, %213 in 1 : vector<64x20xf32>, vector<64x20xf32>, vector<64x20xf32>, vector<64x20xf32> -> vector<64x80xf32>
    %215 = vector.extract_strided_slice %204 {offsets = [0, 2], sizes = [64, 20], strides = [1, 1]} : vector<64x96xf32> to vector<64x20xf32>
    %216 = vector.extract_strided_slice %204 {offsets = [0, 26], sizes = [64, 20], strides = [1, 1]} : vector<64x96xf32> to vector<64x20xf32>
    %217 = vector.extract_strided_slice %204 {offsets = [0, 50], sizes = [64, 20], strides = [1, 1]} : vector<64x96xf32> to vector<64x20xf32>
    %218 = vector.extract_strided_slice %204 {offsets = [0, 74], sizes = [64, 20], strides = [1, 1]} : vector<64x96xf32> to vector<64x20xf32>
    %219 = tpu.concatenate %215, %216, %217, %218 in 1 : vector<64x20xf32>, vector<64x20xf32>, vector<64x20xf32>, vector<64x20xf32> -> vector<64x80xf32>
    %220 = vector.extract_strided_slice %204 {offsets = [0, 3], sizes = [64, 20], strides = [1, 1]} : vector<64x96xf32> to vector<64x20xf32>
    %221 = vector.extract_strided_slice %204 {offsets = [0, 27], sizes = [64, 20], strides = [1, 1]} : vector<64x96xf32> to vector<64x20xf32>
    %222 = vector.extract_strided_slice %204 {offsets = [0, 51], sizes = [64, 20], strides = [1, 1]} : vector<64x96xf32> to vector<64x20xf32>
    %223 = vector.extract_strided_slice %204 {offsets = [0, 75], sizes = [64, 20], strides = [1, 1]} : vector<64x96xf32> to vector<64x20xf32>
    %224 = tpu.concatenate %220, %221, %222, %223 in 1 : vector<64x20xf32>, vector<64x20xf32>, vector<64x20xf32>, vector<64x20xf32> -> vector<64x80xf32>
    %225 = vector.extract_strided_slice %204 {offsets = [0, 4], sizes = [64, 20], strides = [1, 1]} : vector<64x96xf32> to vector<64x20xf32>
    %226 = vector.extract_strided_slice %204 {offsets = [0, 28], sizes = [64, 20], strides = [1, 1]} : vector<64x96xf32> to vector<64x20xf32>
    %227 = vector.extract_strided_slice %204 {offsets = [0, 52], sizes = [64, 20], strides = [1, 1]} : vector<64x96xf32> to vector<64x20xf32>
    %228 = vector.extract_strided_slice %204 {offsets = [0, 76], sizes = [64, 20], strides = [1, 1]} : vector<64x96xf32> to vector<64x20xf32>
    %229 = tpu.concatenate %225, %226, %227, %228 in 1 : vector<64x20xf32>, vector<64x20xf32>, vector<64x20xf32>, vector<64x20xf32> -> vector<64x80xf32>
    %230 = tpu.concatenate %209, %214, %219, %224, %229 in 0 : vector<64x80xf32>, vector<64x80xf32>, vector<64x80xf32>, vector<64x80xf32>, vector<64x80xf32> -> vector<320x80xf32>
    %c3 = arith.constant 3 : index
    %c0_19 = arith.constant 0 : index
    %c0_20 = arith.constant 0 : index
    %231 = vector.load %arg2[%c3, %c0_19, %c0_20] : memref<8x64x512xbf16, #tpu.memory_space<vmem>>, vector<1x64x512xbf16>
    %232 = vector.shape_cast %231 : vector<1x64x512xbf16> to vector<64x512xbf16>
    %233 = vector.extract_strided_slice %232 {offsets = [0, 0], sizes = [32, 320], strides = [1, 1]} : vector<64x512xbf16> to vector<32x320xbf16>
    %234 = arith.truncf %230 : vector<320x80xf32> to vector<320x80xbf16>
    %cst_21 = arith.constant dense<0.000000e+00> : vector<32x80xf32>
    %235 = tpu.matmul %233, %234, %cst_21 {dimension_numbers = #tpu.dot_dimension_numbers<[1], [0], [0], [1], [0, 0, 1, 1], [], []>} : vector<32x320xbf16>, vector<320x80xbf16>, vector<32x80xf32> -> vector<32x80xf32>
    %236 = vector.extract_strided_slice %0 {offsets = [0, 3], sizes = [32, 1], strides = [1, 1]} : vector<64x8xf32> to vector<32x1xf32>
    %237 = vector.broadcast %236 : vector<32x1xf32> to vector<32x80xf32>
    %238 = arith.addf %235, %237 : vector<32x80xf32>
    %239 = arith.negf %238 : vector<32x80xf32>
    %240 = math.exp %239 : vector<32x80xf32>
    %cst_22 = arith.constant 1.000000e+00 : f32
    %241 = vector.broadcast %cst_22 : f32 to vector<32x80xf32>
    %242 = arith.addf %241, %240 : vector<32x80xf32>
    %243 = arith.divf %241, %242 : vector<32x80xf32>
    %244 = arith.mulf %238, %243 : vector<32x80xf32>
    %245 = vector.extract_strided_slice %244 {offsets = [0, 0], sizes = [32, 16], strides = [1, 1]} : vector<32x80xf32> to vector<32x16xf32>
    %246 = vector.extract_strided_slice %244 {offsets = [0, 20], sizes = [32, 16], strides = [1, 1]} : vector<32x80xf32> to vector<32x16xf32>
    %247 = vector.extract_strided_slice %244 {offsets = [0, 40], sizes = [32, 16], strides = [1, 1]} : vector<32x80xf32> to vector<32x16xf32>
    %248 = vector.extract_strided_slice %244 {offsets = [0, 60], sizes = [32, 16], strides = [1, 1]} : vector<32x80xf32> to vector<32x16xf32>
    %249 = tpu.concatenate %245, %246, %247, %248 in 1 : vector<32x16xf32>, vector<32x16xf32>, vector<32x16xf32>, vector<32x16xf32> -> vector<32x64xf32>
    %250 = vector.extract_strided_slice %244 {offsets = [0, 1], sizes = [32, 16], strides = [1, 1]} : vector<32x80xf32> to vector<32x16xf32>
    %251 = vector.extract_strided_slice %244 {offsets = [0, 21], sizes = [32, 16], strides = [1, 1]} : vector<32x80xf32> to vector<32x16xf32>
    %252 = vector.extract_strided_slice %244 {offsets = [0, 41], sizes = [32, 16], strides = [1, 1]} : vector<32x80xf32> to vector<32x16xf32>
    %253 = vector.extract_strided_slice %244 {offsets = [0, 61], sizes = [32, 16], strides = [1, 1]} : vector<32x80xf32> to vector<32x16xf32>
    %254 = tpu.concatenate %250, %251, %252, %253 in 1 : vector<32x16xf32>, vector<32x16xf32>, vector<32x16xf32>, vector<32x16xf32> -> vector<32x64xf32>
    %255 = vector.extract_strided_slice %244 {offsets = [0, 2], sizes = [32, 16], strides = [1, 1]} : vector<32x80xf32> to vector<32x16xf32>
    %256 = vector.extract_strided_slice %244 {offsets = [0, 22], sizes = [32, 16], strides = [1, 1]} : vector<32x80xf32> to vector<32x16xf32>
    %257 = vector.extract_strided_slice %244 {offsets = [0, 42], sizes = [32, 16], strides = [1, 1]} : vector<32x80xf32> to vector<32x16xf32>
    %258 = vector.extract_strided_slice %244 {offsets = [0, 62], sizes = [32, 16], strides = [1, 1]} : vector<32x80xf32> to vector<32x16xf32>
    %259 = tpu.concatenate %255, %256, %257, %258 in 1 : vector<32x16xf32>, vector<32x16xf32>, vector<32x16xf32>, vector<32x16xf32> -> vector<32x64xf32>
    %260 = vector.extract_strided_slice %244 {offsets = [0, 3], sizes = [32, 16], strides = [1, 1]} : vector<32x80xf32> to vector<32x16xf32>
    %261 = vector.extract_strided_slice %244 {offsets = [0, 23], sizes = [32, 16], strides = [1, 1]} : vector<32x80xf32> to vector<32x16xf32>
    %262 = vector.extract_strided_slice %244 {offsets = [0, 43], sizes = [32, 16], strides = [1, 1]} : vector<32x80xf32> to vector<32x16xf32>
    %263 = vector.extract_strided_slice %244 {offsets = [0, 63], sizes = [32, 16], strides = [1, 1]} : vector<32x80xf32> to vector<32x16xf32>
    %264 = tpu.concatenate %260, %261, %262, %263 in 1 : vector<32x16xf32>, vector<32x16xf32>, vector<32x16xf32>, vector<32x16xf32> -> vector<32x64xf32>
    %265 = vector.extract_strided_slice %244 {offsets = [0, 4], sizes = [32, 16], strides = [1, 1]} : vector<32x80xf32> to vector<32x16xf32>
    %266 = vector.extract_strided_slice %244 {offsets = [0, 24], sizes = [32, 16], strides = [1, 1]} : vector<32x80xf32> to vector<32x16xf32>
    %267 = vector.extract_strided_slice %244 {offsets = [0, 44], sizes = [32, 16], strides = [1, 1]} : vector<32x80xf32> to vector<32x16xf32>
    %268 = vector.extract_strided_slice %244 {offsets = [0, 64], sizes = [32, 16], strides = [1, 1]} : vector<32x80xf32> to vector<32x16xf32>
    %269 = tpu.concatenate %265, %266, %267, %268 in 1 : vector<32x16xf32>, vector<32x16xf32>, vector<32x16xf32>, vector<32x16xf32> -> vector<32x64xf32>
    %270 = tpu.concatenate %249, %254, %259, %264, %269 in 0 : vector<32x64xf32>, vector<32x64xf32>, vector<32x64xf32>, vector<32x64xf32>, vector<32x64xf32> -> vector<160x64xf32>
    %c4 = arith.constant 4 : index
    %c0_23 = arith.constant 0 : index
    %c0_24 = arith.constant 0 : index
    %271 = vector.load %arg2[%c4, %c0_23, %c0_24] : memref<8x64x512xbf16, #tpu.memory_space<vmem>>, vector<1x64x512xbf16>
    %272 = vector.shape_cast %271 : vector<1x64x512xbf16> to vector<64x512xbf16>
    %273 = vector.extract_strided_slice %272 {offsets = [0, 0], sizes = [32, 160], strides = [1, 1]} : vector<64x512xbf16> to vector<32x160xbf16>
    %274 = arith.truncf %270 : vector<160x64xf32> to vector<160x64xbf16>
    %cst_25 = arith.constant dense<0.000000e+00> : vector<32x64xf32>
    %275 = tpu.matmul %273, %274, %cst_25 {dimension_numbers = #tpu.dot_dimension_numbers<[1], [0], [0], [1], [0, 0, 1, 1], [], []>} : vector<32x160xbf16>, vector<160x64xbf16>, vector<32x64xf32> -> vector<32x64xf32>
    %276 = vector.extract_strided_slice %0 {offsets = [0, 4], sizes = [32, 1], strides = [1, 1]} : vector<64x8xf32> to vector<32x1xf32>
    %277 = vector.broadcast %276 : vector<32x1xf32> to vector<32x64xf32>
    %278 = arith.addf %275, %277 : vector<32x64xf32>
    %279 = arith.negf %278 : vector<32x64xf32>
    %280 = math.exp %279 : vector<32x64xf32>
    %cst_26 = arith.constant 1.000000e+00 : f32
    %281 = vector.broadcast %cst_26 : f32 to vector<32x64xf32>
    %282 = arith.addf %281, %280 : vector<32x64xf32>
    %283 = arith.divf %281, %282 : vector<32x64xf32>
    %284 = arith.mulf %278, %283 : vector<32x64xf32>
    %285 = vector.extract_strided_slice %284 {offsets = [0, 0], sizes = [32, 14], strides = [1, 1]} : vector<32x64xf32> to vector<32x14xf32>
    %286 = vector.extract_strided_slice %284 {offsets = [0, 16], sizes = [32, 14], strides = [1, 1]} : vector<32x64xf32> to vector<32x14xf32>
    %287 = vector.extract_strided_slice %284 {offsets = [0, 32], sizes = [32, 14], strides = [1, 1]} : vector<32x64xf32> to vector<32x14xf32>
    %288 = vector.extract_strided_slice %284 {offsets = [0, 48], sizes = [32, 14], strides = [1, 1]} : vector<32x64xf32> to vector<32x14xf32>
    %289 = tpu.concatenate %285, %286, %287, %288 in 1 : vector<32x14xf32>, vector<32x14xf32>, vector<32x14xf32>, vector<32x14xf32> -> vector<32x56xf32>
    %290 = vector.extract_strided_slice %284 {offsets = [0, 1], sizes = [32, 14], strides = [1, 1]} : vector<32x64xf32> to vector<32x14xf32>
    %291 = vector.extract_strided_slice %284 {offsets = [0, 17], sizes = [32, 14], strides = [1, 1]} : vector<32x64xf32> to vector<32x14xf32>
    %292 = vector.extract_strided_slice %284 {offsets = [0, 33], sizes = [32, 14], strides = [1, 1]} : vector<32x64xf32> to vector<32x14xf32>
    %293 = vector.extract_strided_slice %284 {offsets = [0, 49], sizes = [32, 14], strides = [1, 1]} : vector<32x64xf32> to vector<32x14xf32>
    %294 = tpu.concatenate %290, %291, %292, %293 in 1 : vector<32x14xf32>, vector<32x14xf32>, vector<32x14xf32>, vector<32x14xf32> -> vector<32x56xf32>
    %295 = vector.extract_strided_slice %284 {offsets = [0, 2], sizes = [32, 14], strides = [1, 1]} : vector<32x64xf32> to vector<32x14xf32>
    %296 = vector.extract_strided_slice %284 {offsets = [0, 18], sizes = [32, 14], strides = [1, 1]} : vector<32x64xf32> to vector<32x14xf32>
    %297 = vector.extract_strided_slice %284 {offsets = [0, 34], sizes = [32, 14], strides = [1, 1]} : vector<32x64xf32> to vector<32x14xf32>
    %298 = vector.extract_strided_slice %284 {offsets = [0, 50], sizes = [32, 14], strides = [1, 1]} : vector<32x64xf32> to vector<32x14xf32>
    %299 = tpu.concatenate %295, %296, %297, %298 in 1 : vector<32x14xf32>, vector<32x14xf32>, vector<32x14xf32>, vector<32x14xf32> -> vector<32x56xf32>
    %300 = tpu.concatenate %289, %294, %299 in 0 : vector<32x56xf32>, vector<32x56xf32>, vector<32x56xf32> -> vector<96x56xf32>
    %c5 = arith.constant 5 : index
    %c0_27 = arith.constant 0 : index
    %c0_28 = arith.constant 0 : index
    %301 = vector.load %arg2[%c5, %c0_27, %c0_28] : memref<8x64x512xbf16, #tpu.memory_space<vmem>>, vector<1x64x512xbf16>
    %302 = vector.shape_cast %301 : vector<1x64x512xbf16> to vector<64x512xbf16>
    %303 = vector.extract_strided_slice %302 {offsets = [0, 0], sizes = [32, 96], strides = [1, 1]} : vector<64x512xbf16> to vector<32x96xbf16>
    %304 = arith.truncf %300 : vector<96x56xf32> to vector<96x56xbf16>
    %cst_29 = arith.constant dense<0.000000e+00> : vector<32x56xf32>
    %305 = tpu.matmul %303, %304, %cst_29 {dimension_numbers = #tpu.dot_dimension_numbers<[1], [0], [0], [1], [0, 0, 1, 1], [], []>} : vector<32x96xbf16>, vector<96x56xbf16>, vector<32x56xf32> -> vector<32x56xf32>
    %c0_30 = arith.constant 0 : index
    %c0_31 = arith.constant 0 : index
    %306 = vector.load %arg5[%c0_30, %c0_31] : memref<56x28xf32, #tpu.memory_space<vmem>>, vector<56x28xf32>
    %cst_32 = arith.constant dense<0.000000e+00> : vector<32x28xf32>
    %307 = tpu.matmul %305, %306, %cst_32 {dimension_numbers = #tpu.dot_dimension_numbers<[1], [0], [0], [1], [0, 0, 1, 1], [], []>} : vector<32x56xf32>, vector<56x28xf32>, vector<32x28xf32> -> vector<32x28xf32>
    %308 = vector.extract_strided_slice %0 {offsets = [0, 5], sizes = [32, 1], strides = [1, 1]} : vector<64x8xf32> to vector<32x1xf32>
    %309 = vector.broadcast %308 : vector<32x1xf32> to vector<32x28xf32>
    %310 = arith.addf %307, %309 : vector<32x28xf32>
    %311 = arith.negf %310 : vector<32x28xf32>
    %312 = math.exp %311 : vector<32x28xf32>
    %cst_33 = arith.constant 1.000000e+00 : f32
    %313 = vector.broadcast %cst_33 : f32 to vector<32x28xf32>
    %314 = arith.addf %313, %312 : vector<32x28xf32>
    %315 = arith.divf %313, %314 : vector<32x28xf32>
    %316 = arith.mulf %310, %315 : vector<32x28xf32>
    %317 = vector.extract_strided_slice %316 {offsets = [0, 0], sizes = [32, 5], strides = [1, 1]} : vector<32x28xf32> to vector<32x5xf32>
    %318 = vector.extract_strided_slice %316 {offsets = [0, 7], sizes = [32, 5], strides = [1, 1]} : vector<32x28xf32> to vector<32x5xf32>
    %319 = vector.extract_strided_slice %316 {offsets = [0, 14], sizes = [32, 5], strides = [1, 1]} : vector<32x28xf32> to vector<32x5xf32>
    %320 = vector.extract_strided_slice %316 {offsets = [0, 21], sizes = [32, 5], strides = [1, 1]} : vector<32x28xf32> to vector<32x5xf32>
    %321 = tpu.concatenate %317, %318, %319, %320 in 1 : vector<32x5xf32>, vector<32x5xf32>, vector<32x5xf32>, vector<32x5xf32> -> vector<32x20xf32>
    %322 = vector.extract_strided_slice %316 {offsets = [0, 1], sizes = [32, 5], strides = [1, 1]} : vector<32x28xf32> to vector<32x5xf32>
    %323 = vector.extract_strided_slice %316 {offsets = [0, 8], sizes = [32, 5], strides = [1, 1]} : vector<32x28xf32> to vector<32x5xf32>
    %324 = vector.extract_strided_slice %316 {offsets = [0, 15], sizes = [32, 5], strides = [1, 1]} : vector<32x28xf32> to vector<32x5xf32>
    %325 = vector.extract_strided_slice %316 {offsets = [0, 22], sizes = [32, 5], strides = [1, 1]} : vector<32x28xf32> to vector<32x5xf32>
    %326 = tpu.concatenate %322, %323, %324, %325 in 1 : vector<32x5xf32>, vector<32x5xf32>, vector<32x5xf32>, vector<32x5xf32> -> vector<32x20xf32>
    %327 = vector.extract_strided_slice %316 {offsets = [0, 2], sizes = [32, 5], strides = [1, 1]} : vector<32x28xf32> to vector<32x5xf32>
    %328 = vector.extract_strided_slice %316 {offsets = [0, 9], sizes = [32, 5], strides = [1, 1]} : vector<32x28xf32> to vector<32x5xf32>
    %329 = vector.extract_strided_slice %316 {offsets = [0, 16], sizes = [32, 5], strides = [1, 1]} : vector<32x28xf32> to vector<32x5xf32>
    %330 = vector.extract_strided_slice %316 {offsets = [0, 23], sizes = [32, 5], strides = [1, 1]} : vector<32x28xf32> to vector<32x5xf32>
    %331 = tpu.concatenate %327, %328, %329, %330 in 1 : vector<32x5xf32>, vector<32x5xf32>, vector<32x5xf32>, vector<32x5xf32> -> vector<32x20xf32>
    %332 = tpu.concatenate %321, %326, %331 in 0 : vector<32x20xf32>, vector<32x20xf32>, vector<32x20xf32> -> vector<96x20xf32>
    %c6 = arith.constant 6 : index
    %c0_34 = arith.constant 0 : index
    %c0_35 = arith.constant 0 : index
    %333 = vector.load %arg2[%c6, %c0_34, %c0_35] : memref<8x64x512xbf16, #tpu.memory_space<vmem>>, vector<1x64x512xbf16>
    %334 = vector.shape_cast %333 : vector<1x64x512xbf16> to vector<64x512xbf16>
    %335 = vector.extract_strided_slice %334 {offsets = [0, 0], sizes = [32, 96], strides = [1, 1]} : vector<64x512xbf16> to vector<32x96xbf16>
    %336 = arith.truncf %332 : vector<96x20xf32> to vector<96x20xbf16>
    %cst_36 = arith.constant dense<0.000000e+00> : vector<32x20xf32>
    %337 = tpu.matmul %335, %336, %cst_36 {dimension_numbers = #tpu.dot_dimension_numbers<[1], [0], [0], [1], [0, 0, 1, 1], [], []>} : vector<32x96xbf16>, vector<96x20xbf16>, vector<32x20xf32> -> vector<32x20xf32>
    %c0_37 = arith.constant 0 : index
    %c0_38 = arith.constant 0 : index
    %338 = vector.load %arg6[%c0_37, %c0_38] : memref<20x12xf32, #tpu.memory_space<vmem>>, vector<20x12xf32>
    %cst_39 = arith.constant dense<0.000000e+00> : vector<32x12xf32>
    %339 = tpu.matmul %337, %338, %cst_39 {dimension_numbers = #tpu.dot_dimension_numbers<[1], [0], [0], [1], [0, 0, 1, 1], [], []>} : vector<32x20xf32>, vector<20x12xf32>, vector<32x12xf32> -> vector<32x12xf32>
    %340 = vector.extract_strided_slice %0 {offsets = [0, 6], sizes = [32, 1], strides = [1, 1]} : vector<64x8xf32> to vector<32x1xf32>
    %341 = vector.broadcast %340 : vector<32x1xf32> to vector<32x12xf32>
    %342 = arith.addf %339, %341 : vector<32x12xf32>
    %343 = arith.negf %342 : vector<32x12xf32>
    %344 = math.exp %343 : vector<32x12xf32>
    %cst_40 = arith.constant 1.000000e+00 : f32
    %345 = vector.broadcast %cst_40 : f32 to vector<32x12xf32>
    %346 = arith.addf %345, %344 : vector<32x12xf32>
    %347 = arith.divf %345, %346 : vector<32x12xf32>
    %348 = arith.mulf %342, %347 : vector<32x12xf32>
    %349 = vector.extract_strided_slice %348 {offsets = [0, 0], sizes = [32, 1], strides = [1, 1]} : vector<32x12xf32> to vector<32x1xf32>
    %350 = vector.extract_strided_slice %348 {offsets = [0, 3], sizes = [32, 1], strides = [1, 1]} : vector<32x12xf32> to vector<32x1xf32>
    %351 = vector.extract_strided_slice %348 {offsets = [0, 6], sizes = [32, 1], strides = [1, 1]} : vector<32x12xf32> to vector<32x1xf32>
    %352 = vector.extract_strided_slice %348 {offsets = [0, 9], sizes = [32, 1], strides = [1, 1]} : vector<32x12xf32> to vector<32x1xf32>
    %353 = tpu.concatenate %349, %350, %351, %352 in 1 : vector<32x1xf32>, vector<32x1xf32>, vector<32x1xf32>, vector<32x1xf32> -> vector<32x4xf32>
    %354 = vector.extract_strided_slice %348 {offsets = [0, 1], sizes = [32, 1], strides = [1, 1]} : vector<32x12xf32> to vector<32x1xf32>
    %355 = vector.extract_strided_slice %348 {offsets = [0, 4], sizes = [32, 1], strides = [1, 1]} : vector<32x12xf32> to vector<32x1xf32>
    %356 = vector.extract_strided_slice %348 {offsets = [0, 7], sizes = [32, 1], strides = [1, 1]} : vector<32x12xf32> to vector<32x1xf32>
    %357 = vector.extract_strided_slice %348 {offsets = [0, 10], sizes = [32, 1], strides = [1, 1]} : vector<32x12xf32> to vector<32x1xf32>
    %358 = tpu.concatenate %354, %355, %356, %357 in 1 : vector<32x1xf32>, vector<32x1xf32>, vector<32x1xf32>, vector<32x1xf32> -> vector<32x4xf32>
    %359 = vector.extract_strided_slice %348 {offsets = [0, 2], sizes = [32, 1], strides = [1, 1]} : vector<32x12xf32> to vector<32x1xf32>
    %360 = vector.extract_strided_slice %348 {offsets = [0, 5], sizes = [32, 1], strides = [1, 1]} : vector<32x12xf32> to vector<32x1xf32>
    %361 = vector.extract_strided_slice %348 {offsets = [0, 8], sizes = [32, 1], strides = [1, 1]} : vector<32x12xf32> to vector<32x1xf32>
    %362 = vector.extract_strided_slice %348 {offsets = [0, 11], sizes = [32, 1], strides = [1, 1]} : vector<32x12xf32> to vector<32x1xf32>
    %363 = tpu.concatenate %359, %360, %361, %362 in 1 : vector<32x1xf32>, vector<32x1xf32>, vector<32x1xf32>, vector<32x1xf32> -> vector<32x4xf32>
    %364 = tpu.concatenate %353, %358, %363 in 0 : vector<32x4xf32>, vector<32x4xf32>, vector<32x4xf32> -> vector<96x4xf32>
    %c7 = arith.constant 7 : index
    %c0_41 = arith.constant 0 : index
    %c0_42 = arith.constant 0 : index
    %365 = vector.load %arg2[%c7, %c0_41, %c0_42] : memref<8x64x512xbf16, #tpu.memory_space<vmem>>, vector<1x64x512xbf16>
    %366 = vector.shape_cast %365 : vector<1x64x512xbf16> to vector<64x512xbf16>
    %367 = vector.extract_strided_slice %366 {offsets = [0, 0], sizes = [8, 96], strides = [1, 1]} : vector<64x512xbf16> to vector<8x96xbf16>
    %368 = arith.truncf %364 : vector<96x4xf32> to vector<96x4xbf16>
    %cst_43 = arith.constant dense<0.000000e+00> : vector<8x4xf32>
    %369 = tpu.matmul %367, %368, %cst_43 {dimension_numbers = #tpu.dot_dimension_numbers<[1], [0], [0], [1], [0, 0, 1, 1], [], []>} : vector<8x96xbf16>, vector<96x4xbf16>, vector<8x4xf32> -> vector<8x4xf32>
    %370 = vector.extract_strided_slice %0 {offsets = [0, 7], sizes = [8, 1], strides = [1, 1]} : vector<64x8xf32> to vector<8x1xf32>
    %371 = vector.broadcast %370 : vector<8x1xf32> to vector<8x4xf32>
    %372 = arith.addf %369, %371 : vector<8x4xf32>
    %c0_44 = arith.constant 0 : index
    %c0_45 = arith.constant 0 : index
    %c0_46 = arith.constant 0 : index
    %373 = vector.load %arg7[%c0_44, %c0_45, %c0_46] : memref<1x8x4xf32, #tpu.memory_space<vmem>>, vector<1x8x4xf32>
    %374 = vector.shape_cast %373 : vector<1x8x4xf32> to vector<8x4xf32>
    %375 = vector.shape_cast %372 : vector<8x4xf32> to vector<1x8x4xf32>
    tpu.vector_store %arg7[%c0_44, %c0_45, %c0_46], %375 {strides = array<i32>} : memref<1x8x4xf32, #tpu.memory_space<vmem>>, vector<1x8x4xf32>,
    return
  }
  func.func @transform_0(%arg0: i32) -> (i32, i32, i32) {
    %c0_i32 = arith.constant 0 : i32
    %c0_i32_0 = arith.constant 0 : i32
    %c0_i32_1 = arith.constant 0 : i32
    return %arg0, %c0_i32, %c0_i32_0 : i32, i32, i32
  }
  func.func @transform_1(%arg0: i32) -> (i32, i32, i32) {
    %c0_i32 = arith.constant 0 : i32
    %c0_i32_0 = arith.constant 0 : i32
    %c0_i32_1 = arith.constant 0 : i32
    %c0_i32_2 = arith.constant 0 : i32
    return %c0_i32, %c0_i32_0, %c0_i32_1 : i32, i32, i32
  }
  func.func @transform_2(%arg0: i32) -> (i32, i32) {
    %c0_i32 = arith.constant 0 : i32
    %c0_i32_0 = arith.constant 0 : i32
    %c0_i32_1 = arith.constant 0 : i32
    return %c0_i32, %c0_i32_0 : i32, i32
  }
  func.func @transform_3(%arg0: i32) -> (i32, i32) {
    %c0_i32 = arith.constant 0 : i32
    %c0_i32_0 = arith.constant 0 : i32
    %c0_i32_1 = arith.constant 0 : i32
    return %c0_i32, %c0_i32_0 : i32, i32
  }
  func.func @transform_4(%arg0: i32) -> (i32, i32) {
    %c0_i32 = arith.constant 0 : i32
    %c0_i32_0 = arith.constant 0 : i32
    %c0_i32_1 = arith.constant 0 : i32
    return %c0_i32, %c0_i32_0 : i32, i32
  }
  func.func @transform_5(%arg0: i32) -> (i32, i32) {
    %c0_i32 = arith.constant 0 : i32
    %c0_i32_0 = arith.constant 0 : i32
    %c0_i32_1 = arith.constant 0 : i32
    return %c0_i32, %c0_i32_0 : i32, i32
  }
  func.func @transform_6(%arg0: i32) -> (i32, i32, i32) {
    %c0_i32 = arith.constant 0 : i32
    %c0_i32_0 = arith.constant 0 : i32
    %c0_i32_1 = arith.constant 0 : i32
    return %arg0, %c0_i32, %c0_i32_0 : i32, i32, i32
  }
}

</mosaic_0001>

<bundles_post_ra>
// kernel: forward.1
= control target key start
LH: loop header
LB: loop body
LE: loop exit
PB: predicated region body
PF: predicated region fallthrough
CT: control target
= control target key end

     0   :  { %s15776_s0 = inlined_call_operand.vmem [shape: f32[2,24,400], index: 0, kind: input, shape index: {}]   ;;  %s15777_s1 = inlined_call_operand.vmem [shape: bf16[8,64,512], index: 1, kind: input, shape index: {}]   ;;  %s15778_s2 = inlined_call_operand.vmem [shape: f32[64,8], index: 2, kind: input, shape index: {}]   ;;  %s15779_s3 = inlined_call_operand.hbm [shape: f32[288,96], index: 3, kind: input, shape index: {}]   ;;  %s15780_s4 = inlined_call_operand.vmem [shape: f32[56,28], index: 4, kind: input, shape index: {}]   ;;  %s15781_s5 = inlined_call_operand.vmem [shape: f32[20,12], index: 5, kind: input, shape index: {}]   ;;  %s15782_s6 = inlined_call_operand.vmem [shape: f32[2,8,4], index: 6, kind: output, shape index: {}]  }
   0x1   :  { %16067 = sst [smem:[#allocation91_spill]] %s15776_s0 }
   0x2   :  { %16068 = sst [smem:[#allocation92_spill]] %s15777_s1 }
   0x3   :  { %16069 = sst [smem:[#allocation93_spill]] %s15778_s2 }
   0x4   :  { %16070 = sst [smem:[#allocation94_spill]] %s15779_s3 }
   0x5   :  { %16071 = sst [smem:[#allocation95_spill]] %s15780_s4 }
   0x6   :  { %16072 = sst [smem:[#allocation96_spill]] %s15781_s5 }
   0x7   :  { %16073 = sst [smem:[#allocation97_spill]] %s15782_s6 }
   0x8   :  { %11 = vsyncpa [#allocation3], 0  ;;  %s10388_s21 = smov 0  }
   0x9 LB: > { %16074 = sst [smem:[#allocation5_spill]] %s10298_s21  ;;  %s6891_s22 = sadd.s32 4294967295, %s10298_s21   ;;  %s10298_s21 = sphi %s10388_s21, %s17_s21  }
   0xa   : > { %p6893_p0 = scmp.ge.s32.totalorder %s10298_s21, 1  ;;  %p179_p1 = scmp.lt.s32.totalorder %s10298_s21, 3 }
   0xb   : > { %s10300_s23 = smov [#allocation2]   ;;  %p7487_p3 = scmp.eq.s32.totalorder %s6891_s22, 0 }
   0xc   : > { %s197_s24 = sshll.u32 %s10300_s23, 4  ;;  %p10396_p2 = pnand %p6893_p0, %p179_p1  ;;  %s198_s24 = int_to_ptr.vmem [resolvable:$true] %s197_s24 }
   0xd   : > { %s10273_s26 = scalar_lea.vmem %s198_s24, 4608  ;;  %p10281_p10 = scmp.lt.s32.totalorder %s198_s24, %s198_s24 }
   0xe   : > { %p7483_p4 = pneg %p10396_p2  ;;  %p10274_p7 = scmp.ne.s32.totalorder %s198_s24, %s10273_s26 }
   0xf   : > { %p10282_p11 = scmp.lt.s32.totalorder %s10273_s26, %s10273_s26 }
  0x10   : > { %p7484_p5 = pnand %p7487_p3, %p7483_p4 }
  0x11   : > { %p10283_p12 = por %p10282_p11, %p10281_p10 }
  0x12   : > { %p10264_p6 = pneg %p7484_p5 }
  0x14   : > { %p10276_p8 = pnand %p10274_p7, %p10264_p6 }
  0x16   : > { %p10277_p9 = pneg %p10276_p8 }
  0x18   : > { %p10284_p13 = pnand %p10283_p12, %p10277_p9 }
  0x1a   : > { %10287 = shalt.err (!%p10284_p13)
}
  0x1b   : > { %s10301_s27 = smov 128   ;;  %s10302_s28 = smov 8  }
  0x1c   : > { %s16076_s3 = sld [smem:[#allocation94_spill]] }
  0x1e   : > { %227 = sbr.rel (%p10396_p2) target bundleno = 4569 (0x11d9), region = 44 }
  0x22   : > { %7486 = dma.hbm_to_vmem [thread:$0]  (!%p7484_p5), %s16076_s3, 4608, %s198_s24, [#allocation3], %s10301_s27, %s10301_s27, %s10302_s28  }
  0x23   : > { %10293 = dma.done.wait (%p7487_p3), [#allocation3], 4608  }
  0x24   : > { %10295 = vsyncadd (%p7487_p3), [#allocation3], 4294962688  ;;  %p256_p0 = scmp.lt.s32.totalorder %s6891_s22, 1  ;;  %s16078_s0 = sld [smem:[#allocation91_spill]]  ;;  %v15830_v27 = vmov 0   ;;  %vm15904_vm0 = vcmask 850944  }
  0x25   : > { %s15815_s11 = smov 104   ;;  %s15787_s12 = smov 114   ;;  %1359 = vmatprep.mubr.bf16.mxu1 %v15830_v27  ;;  %8070 = vset.pattern.permute.xlu1 %v15830_v27  ;;  %vm365_vm1 = vcmask 424960   ;;  %vm740_vm2 = vcmask 842752   ;;  %vm718_vm3 = vcmask 924672   ;;  %vm15843_vm4 = vcmask 932864  }
  0x26   : > { %s16830_s22 = smov (!%p256_p0, %s6891_s22), 1  ;;  %s15855_s13 = smov 103   ;;  %8071 = vset.pattern.permute.xlu0 %v15830_v27  ;;  %vm361_vm5 = vcmask 736256   ;;  %vm15827_vm6 = vcmask 859136   ;;  %vm15826_vm7 = vcmask 941056   ;;  %vm15822_vm8 = vcmask 867328  }
  0x27   : > { %16077 = sst [smem:[#allocation6_spill]] %s16830_s22  ;;  %s7478_s7 = smul.u32 96, %s16830_s22  ;;  %vm15817_vm9 = vcmask 949248   ;;  %vm15823_vm10 = vcmask 875520   ;;  %vm15842_vm11 = vcmask 957440   ;;  %vm354_vm12 = vcmask 801792  }
  0x28   : > { %s15853_s14 = smov 113   ;;  %s15783_s15 = smov 124   ;;  %vm15841_vm13 = vcmask 883712   ;;  %vm15969_vm14 = vcmask 1043456   ;;  %vm15832_vm15 = vcmask 965632  }
  0x29   : > { %s15861_s16 = smov 123   ;;  %s15805_s17 = smov 105  }
  0x2a   : > { %s10416_s10 = scalar_lea.vmem %s16078_s0, %s7478_s7  ;;  %s15799_s18 = smov 115  }
  0x2b   : > { %v10419_v0 = vld [vmem:[%s10416_s10 + $0x48] sm:$0xff]  ;;  %v10422_v1 = vld [vmem:[%s10416_s10 + $0x50] sm:$0xff]  ;;  %v10425_v2 = vld [vmem:[%s10416_s10 + $0x40] sm:$0xff]  ;;  %s15857_s19 = smov 125   ;;  %s15795_s20 = smov 106  }
  0x2c   : > { %v7550_v3 = vpack.i.bf16 %v10422_v1, %v10419_v0  ;;  %v10431_v4 = vpack.i.bf16 %v10419_v0, %v10425_v2  ;;  %v10434_v5 = vld [vmem:[%s10416_s10 + $0x8] sm:$0xff]  ;;  %v10437_v6 = vld [vmem:[%s10416_s10 + $0x10] sm:$0xff]  ;;  %v10440_v7 = vld [vmem:[%s10416_s10] sm:$0xff]  ;;  %s15797_s23 = smov 116   ;;  %s15791_s24 = smov 126   ;;  %v7690_v20 = vpack.i.bf16 %v10425_v2, %v10419_v0  ;;  %v7695_v21 = vpack.i.bf16 %v10419_v0, %v10422_v1 }
  0x2d   : > { %v10447_v8 = vpack.i.bf16 %v10437_v6, %v10434_v5  ;;  %v10451_v9 = vpack.i.bf16 %v10434_v5, %v10440_v7  ;;  %v10454_v10 = vld [vmem:[%s10416_s10 + $0x20] sm:$0xff]  ;;  %v10457_v11 = vld [vmem:[%s10416_s10 + $0x18] sm:$0xff]  ;;  %v10460_v12 = vld [vmem:[%s10416_s10 + $0x28] sm:$0xff]  ;;  %v10471_v14 = vpack.i.bf16 %v10440_v7, %v10425_v2  ;;  %s15789_s25 = smov 107   ;;  %s15801_s26 = smov 117   ;;  %v7710_v22 = vpack.i.bf16 %v10434_v5, %v10422_v1 }
  0x2e   : > { %7551 = vrot.lane.b32.xlu0 %v7550_v3, %s15815_s11  ;;  %7561 = vrot.lane.b32.xlu1 %v10431_v4, %s15787_s12  ;;  %v10463_v13 = vld [vmem:[%s10416_s10 + $0x30] sm:$0xff]  ;;  %v7575_v15 = vpack.i.bf16 %v10454_v10, %v10440_v7  ;;  %v10477_v16 = vpack.i.bf16 %v10457_v11, %v10437_v6  ;;  %v10489_v18 = vpack.i.bf16 %v10460_v12, %v10454_v10  ;;  %s15820_s27 = smov 108   ;;  %s15859_s28 = smov 98   ;;  %v10553_v23 = vld [vmem:[%s10416_s10 + $0x38] sm:$0xff] }
  0x2f   : > { %v7585_v17 = vpack.i.bf16 %v10463_v13, %v10460_v12  ;;  %v10503_v19 = vpack.i.bf16 %v10425_v2, %v10454_v10  ;;  %s15824_s29 = smov 127   ;;  %s15785_s30 = smov 118   ;;  %v10561_v24 = vpack.i.bf16 %v10553_v23, %v10463_v13  ;;  %v7735_v25 = vpack.i.bf16 %v10463_v13, %v10437_v6  ;;  %v10566_v26 = vld [vmem:[%s10416_s10 + $0x58] sm:$0xff] }
  0x30   : > { %s10321_s7 = smov 88   ;;  %v10576_v28 = vpack.i.bf16 %v10566_v26, %v10422_v1  ;;  %s10323_s8 = smov 94   ;;  %v10584_v29 = vpack.i.bf16 %v10460_v12, %v10437_v6  ;;  %v7755_v30 = vpack.i.bf16 %v10440_v7, %v10463_v13  ;;  %v10605_v31 = vpack.i.bf16 %v10422_v1, %v10463_v13 }
  0x31   : > { %s10324_s9 = smov 93   ;;  %v10609_v32 = vpack.i.bf16 %v10460_v12, %v10434_v5  ;;  %v10625_v33 = vpack.i.bf16 %v10437_v6, %v10422_v1  ;;  %v10637_v38 = vpack.i.bf16 %v10434_v5, %v10419_v0  ;;  %s16079_s1 = sld [smem:[#allocation92_spill]] }
  0x32   : > { %7556 = vrot.lane.b32.xlu0 %v10447_v8, %s15855_s13  ;;  %7566 = vrot.lane.b32.xlu1 %v10451_v9, %s15853_s14  ;;  %s16080_s2 = sld [smem:[#allocation93_spill]]  ;;  %s16121_s0 = smov 121  }
  0x33   : > { %s16122_s3 = smov 102   ;;  %s16124_s21 = smov 112  }
  0x34   : > { %s16128_s6 = smov 103   ;;  %s16130_s22 = smov 113  }
  0x35   : > { %s16131_s5 = smov 123   ;;  %s16277_s4 = smov 97  }
  0x36   : > { %7571 = vrot.lane.b32.xlu0 %v10471_v14, %s15783_s15  ;;  %7576 = vrot.lane.b32.xlu1 %v7575_v15, %s15861_s16 }
  0x3a   : > { %7581 = vrot.lane.b32.xlu0 %v10447_v8, %s15815_s11  ;;  %7586 = vrot.lane.b32.xlu1 %v7585_v17, %s15815_s11  ;;  %s15863_s11 = smov 121  }
  0x3e   : > { %7591 = vrot.lane.b32.xlu0 %v10451_v9, %s15787_s12  ;;  %7596 = vrot.lane.b32.xlu1 %v10489_v18, %s15787_s12  ;;  %s10327_s12 = smov 90  }
  0x42   : > { %618 = vrot.lane.b32.xlu0 %v10454_v10, %s15783_s15  ;;  %7601 = vrot.lane.b32.xlu1 %v7585_v17, %s15805_s17  ;;  %s10325_s15 = smov 89  }
  0x46   : > { %7606 = vrot.lane.b32.xlu0 %v7550_v3, %s15805_s17  ;;  %7611 = vrot.lane.b32.xlu1 %v10489_v18, %s15799_s18 }
  0x4a   : > { %7616 = vrot.lane.b32.xlu0 %v10431_v4, %s15799_s18  ;;  %7621 = vrot.lane.b32.xlu1 %v10503_v19, %s15857_s19 }
  0x4e   : > { %7626 = vrot.lane.b32.xlu0 %v7550_v3, %s15795_s20  ;;  %7631 = vrot.lane.b32.xlu1 %v10447_v8, %s15805_s17  ;;  %s15813_s17 = smov 101  }
  0x52   : > { %7636 = vrot.lane.b32.xlu0 %v10431_v4, %s15797_s23  ;;  %7641 = vrot.lane.b32.xlu1 %v10451_v9, %s15799_s18  ;;  %s15809_s18 = smov 110  }
  0x56   : > { %7646 = vrot.lane.b32.xlu0 %v10471_v14, %s15791_s24  ;;  %535 = vrot.lane.b32.xlu1 %v10440_v7, %s15857_s19 }
  0x5a   : > { %7651 = vrot.lane.b32.xlu0 %v10447_v8, %s15795_s20  ;;  %7656 = vrot.lane.b32.xlu1 %v7585_v17, %s15795_s20  ;;  %s15818_s20 = smov 119  }
  0x5e   : > { %7661 = vrot.lane.b32.xlu0 %v10451_v9, %s15797_s23  ;;  %7666 = vrot.lane.b32.xlu1 %v10489_v18, %s15797_s23  ;;  %s15849_s23 = smov 96  }
  0x62   : > { %456 = vrot.lane.b32.xlu0 %v10454_v10, %s15791_s24  ;;  %7671 = vrot.lane.b32.xlu1 %v7585_v17, %s15789_s25  ;;  %s15807_s24 = smov 100  }
  0x66   : > { %7676 = vrot.lane.b32.xlu0 %v7550_v3, %s15789_s25  ;;  %7681 = vrot.lane.b32.xlu1 %v10489_v18, %s15801_s26 }
  0x6a   : > { %7686 = vrot.lane.b32.xlu0 %v10431_v4, %s15801_s26  ;;  %7691 = vrot.lane.b32.xlu1 %v7690_v20, %s15820_s27 }
  0x6e   : > { %7696 = vrot.lane.b32.xlu0 %v7695_v21, %s15859_s28  ;;  %7701 = vrot.lane.b32.xlu1 %v10503_v19, %s15824_s29 }
  0x72   : > { %7706 = vrot.lane.b32.xlu0 %v10431_v4, %s15785_s30  ;;  %7711 = vrot.lane.b32.xlu1 %v7710_v22, %s15820_s27 }
  0x76   : > { %7716 = vrot.lane.b32.xlu0 %v10447_v8, %s15789_s25  ;;  %7721 = vrot.lane.b32.xlu1 %v10451_v9, %s15801_s26  ;;  %s10328_s25 = smov 95   ;;  %s10334_s26 = smov 91  }
  0x7a   : > { %373 = vrot.lane.b32.xlu0 %v10440_v7, %s15824_s29  ;;  %7726 = vrot.lane.b32.xlu1 %v10477_v16, %s10321_s7  ;;  %s16094_s29 = smov 106  }
  0x7e   : > { %7731 = vrot.lane.b32.xlu0 %v10561_v24, %s10321_s7  ;;  %7736 = vrot.lane.b32.xlu1 %v7735_v25, %s15859_s28  ;;  %v10687_v25 = vpack.i.bf16 %v10419_v0, %v10463_v13 }
  0x82   : > { %7741 = vrot.lane.b32.xlu0 %v10576_v28, %s10323_s8  ;;  %7746 = vrot.lane.b32.xlu1 %v10477_v16, %s10324_s9 }
  0x86   : > { %7751 = vrot.lane.b32.xlu0 %v10584_v29, %s15820_s27  ;;  %7756 = vrot.lane.b32.xlu1 %v7755_v30, %s15820_s27 }
  0x8a   : > { %7761 = vrot.lane.b32.xlu0 %v10451_v9, %s15785_s30  ;;  %7766 = vrot.lane.b32.xlu1 %v10489_v18, %s15785_s30  ;;  %s15793_s30 = smov 99  }
  0x8e   : > { %7771 = vrot.lane.b32.xlu0 %v10561_v24, %s10325_s15  ;;  %7776 = vrot.lane.b32.xlu1 %v10576_v28, %s10325_s15 }
  0x92   : > { %7781 = vrot.lane.b32.xlu0 %v10477_v16, %s10323_s8  ;;  %7786 = vrot.lane.b32.xlu1 %v10561_v24, %s10323_s8 }
  0x96   : > { %7791 = vrot.lane.b32.xlu0 %v10605_v31, %s15793_s30  ;;  %7796 = vrot.lane.b32.xlu1 %v10609_v32, %s15859_s28 }
  0x9a   : > { %1106 = vrot.lane.b32.xlu0 %v10454_v10, %s15820_s27  ;;  %7801 = vrot.lane.b32.xlu1 %v10576_v28, %s10327_s12  ;;  %s16095_s27 = smov 126  }
  0x9e   : > { %7806 = vrot.lane.b32.xlu0 %v10477_v16, %s10325_s15  ;;  %7811 = vrot.lane.b32.xlu1 %v10561_v24, %s10328_s25 }
  0xa0   : > { %v10627_v34 = vpop.permute.xlu0 %7551  ;;  %v7562_v35 = vpop.permute.xlu1 %7561 }
  0xa1   : > { %v7554_v36 = vunpack.i.h.bf16 %v10627_v34  ;;  %v7553_v37 = vunpack.i.l.bf16 %v10627_v34  ;;  %v7564_v39 = vunpack.i.h.bf16 %v7562_v35  ;;  %v7563_v46 = vunpack.i.l.bf16 %v7562_v35 }
  0xa2   : > { %7816 = vrot.lane.b32.xlu0 %v10576_v28, %s10328_s25  ;;  %7821 = vrot.lane.b32.xlu1 %v10625_v33, %s15807_s24 }
  0xa3   : > { %v662_v47 = vsel %vm15904_vm0, %v7553_v37, %v7554_v36  ;;  %v640_v57 = vsel %vm15843_vm4, %v7563_v46, %v7564_v39 }
  0xa4   : > { %v10639_v40 = vpop.permute.xlu0 %7556  ;;  %v7567_v41 = vpop.permute.xlu1 %7566  ;;  %v693_v55 = vsel %vm365_vm1, %v7564_v39, %v662_v47 }
  0xa5   : > { %v7559_v42 = vunpack.i.h.bf16 %v10639_v40  ;;  %v7558_v43 = vunpack.i.l.bf16 %v10639_v40  ;;  %v7569_v44 = vunpack.i.h.bf16 %v7567_v41  ;;  %v7568_v45 = vunpack.i.l.bf16 %v7567_v41 }
  0xa6   : > { %7826 = vrot.lane.b32.xlu0 %v10584_v29, %s15793_s30  ;;  %7831 = vrot.lane.b32.xlu1 %v10637_v38, %s15793_s30  ;;  %s15803_s30 = smov 109  }
  0xa7   : > { %v741_v48 = vsel %vm740_vm2, %v7558_v43, %v7559_v42  ;;  %v719_v52 = vsel %vm718_vm3, %v7568_v45, %v7569_v44 }
  0xa8   : > { %v7572_v49 = vpop.permute.xlu0 %7571  ;;  %v10653_v50 = vpop.permute.xlu1 %7576  ;;  %v772_v51 = vsel %vm365_vm1, %v7569_v44, %v741_v48 }
  0xa9   : > { %v7573_v53 = vunpack.i.l.bf16 %v7572_v49  ;;  %v7578_v54 = vunpack.i.l.bf16 %v10653_v50  ;;  %v1190_v56 = vpack.c.bf16 %v772_v51, %v693_v55  ;;  %v7574_v22 = vunpack.i.h.bf16 %v7572_v49 }
  0xaa   : > { %7836 = vrot.lane.b32.xlu0 %v10489_v18, %s15803_s30  ;;  %7841 = vrot.lane.b32.xlu1 %v10431_v4, %s15803_s30 }
  0xab   : > { %v690_v58 = vsel %vm361_vm5, %v7573_v53, %v640_v57  ;;  %v769_v59 = vsel %vm361_vm5, %v7578_v54, %v719_v52  ;;  %1276 = vmatprep.subr.bf16.mxu0 %v1190_v56 }
  0xac   : > { %v10666_v60 = vpop.permute.xlu0 %7581  ;;  %v10668_v61 = vpop.permute.xlu1 %7586  ;;  %v1189_v62 = vpack.c.bf16 %v769_v59, %v690_v58 }
  0xad   : > { %v7589_v63 = vunpack.i.h.bf16 %v10668_v61  ;;  %v7588_v1 = vunpack.i.l.bf16 %v10668_v61  ;;  %v7584_v3 = vunpack.i.h.bf16 %v10666_v60  ;;  %v7583_v5 = vunpack.i.l.bf16 %v10666_v60 }
  0xae   : > { %7846 = vrot.lane.b32.xlu0 %v10477_v16, %s10327_s12  ;;  %7851 = vrot.lane.b32.xlu1 %v10561_v24, %s10327_s12 }
  0xaf   : > { %1277 = vmatpush1.bf16.msra.mxu0 %v1189_v62  ;;  %v661_v12 = vsel %vm15904_vm0, %v7588_v1, %v7589_v63  ;;  %v660_v30 = vsel %vm15904_vm0, %v7583_v5, %v7584_v3 }
  0xb0   : > { %v7592_v6 = vpop.permute.xlu0 %7591  ;;  %v7597_v8 = vpop.permute.xlu1 %7596 }
  0xb1   : > { %v7594_v15 = vunpack.i.h.bf16 %v7592_v6  ;;  %v7593_v17 = vunpack.i.l.bf16 %v7592_v6  ;;  %v7599_v20 = vunpack.i.h.bf16 %v7597_v8  ;;  %v7598_v21 = vunpack.i.l.bf16 %v7597_v8 }
  0xb2   : > { %7856 = vrot.lane.b32.xlu0 %v10503_v19, %s15818_s20  ;;  %7861 = vrot.lane.b32.xlu1 %v10576_v28, %s15849_s23 }
  0xb3   : > { %v638_v35 = vsel %vm15843_vm4, %v7593_v17, %v7594_v15  ;;  %v639_v37 = vsel %vm15843_vm4, %v7598_v21, %v7599_v20  ;;  %v691_v39 = vsel %vm365_vm1, %v7594_v15, %v660_v30  ;;  %v692_v41 = vsel %vm365_vm1, %v7599_v20, %v661_v12 }
  0xb4   : > { %v619_v43 = vpop.permute.xlu0 %618  ;;  %v688_v44 = vsel %vm361_vm5, %v7574_v22, %v638_v35  ;;  %v10697_v45 = vpop.permute.xlu1 %7601  ;;  %v1187_v46 = vpack.c.bf16 %v692_v41, %v691_v39  ;;  %vm15847_vm4 = vcmask 818176  }
  0xb5   : > { %v689_v0 = vsel %vm361_vm5, %v619_v43, %v639_v37  ;;  %v7604_v47 = vunpack.i.h.bf16 %v10697_v45  ;;  %v7603_v48 = vunpack.i.l.bf16 %v10697_v45 }
  0xb6   : > { %v1186_v13 = vpack.c.bf16 %v689_v0, %v688_v44  ;;  %7866 = vrot.lane.b32.xlu0 %v10477_v16, %s10328_s25  ;;  %7871 = vrot.lane.b32.xlu1 %v10687_v25, %s15807_s24 }
  0xb7   : > { %1278 = vmatprep.subr.bf16.mxu0 %v1187_v46  ;;  %v580_v58 = vsel %vm15827_vm6, %v7603_v48, %v7604_v47 }
  0xb8   : > { %v10706_v49 = vpop.permute.xlu0 %7606  ;;  %v7612_v51 = vpop.permute.xlu1 %7611  ;;  %1279 = vmatpush1.bf16.msra.mxu0 %v1186_v13 }
  0xb9   : > { %v7613_v52 = vunpack.i.l.bf16 %v7612_v51  ;;  %v7609_v53 = vunpack.i.h.bf16 %v10706_v49  ;;  %v7608_v54 = vunpack.i.l.bf16 %v10706_v49  ;;  %v7614_v55 = vunpack.i.h.bf16 %v7612_v51 }
  0xba   : > { %7876 = vrot.lane.b32.xlu0 %v10431_v4, %s15809_s18  ;;  %7881 = vrot.lane.b32.xlu1 %v10451_v9, %s15803_s30  ;;  %s15811_s30 = smov 120  }
  0xbb   : > { %v558_v59 = vsel %vm15826_vm7, %v7613_v52, %v7614_v55  ;;  %v581_v8 = vsel %vm15827_vm6, %v7608_v54, %v7609_v53  ;;  %v611_v12 = vsel %vm365_vm1, %v7614_v55, %v580_v58 }
  0xbc   : > { %v7617_v56 = vpop.permute.xlu0 %7616  ;;  %v7622_v57 = vpop.permute.xlu1 %7621 }
  0xbd   : > { %v7619_v62 = vunpack.i.h.bf16 %v7617_v56  ;;  %v7618_v1 = vunpack.i.l.bf16 %v7617_v56  ;;  %v7624_v5 = vunpack.i.h.bf16 %v7622_v57  ;;  %v7623_v6 = vunpack.i.l.bf16 %v7622_v57 }
  0xbe   : > { %7886 = vrot.lane.b32.xlu0 %v10561_v24, %s10334_s26  ;;  %7891 = vrot.lane.b32.xlu1 %v10576_v28, %s10334_s26 }
  0xbf   : > { %v612_v15 = vsel %vm365_vm1, %v7619_v62, %v581_v8  ;;  %v559_v17 = vsel %vm15826_vm7, %v7618_v1, %v7619_v62  ;;  %v608_v20 = vsel %vm361_vm5, %v7623_v6, %v558_v59 }
  0xc0   : > { %v10729_v21 = vpop.permute.xlu0 %7626  ;;  %v10731_v22 = vpop.permute.xlu1 %7631  ;;  %v1184_v30 = vpack.c.bf16 %v612_v15, %v611_v12  ;;  %v609_v35 = vsel %vm361_vm5, %v7624_v5, %v559_v17 }
  0xc1   : > { %v7634_v37 = vunpack.i.h.bf16 %v10731_v22  ;;  %v7633_v39 = vunpack.i.l.bf16 %v10731_v22  ;;  %v7629_v41 = vunpack.i.h.bf16 %v10729_v21  ;;  %v7628_v43 = vunpack.i.l.bf16 %v10729_v21 }
  0xc2   : > { %7896 = vrot.lane.b32.xlu0 %v10471_v14, %s15811_s30  ;;  %1020 = vrot.lane.b32.xlu1 %v10440_v7, %s15818_s20  ;;  %v1183_v44 = vpack.c.bf16 %v609_v35, %v608_v20  ;;  %s15835_s20 = smov 112  }
  0xc3   : > { %1280 = vmatprep.subr.bf16.mxu0 %v1184_v30  ;;  %v579_v13 = vsel %vm15827_vm6, %v7633_v39, %v7634_v37  ;;  %v500_v7 = vsel %vm15822_vm8, %v7628_v43, %v7629_v41  ;;  %vm762_vm6 = vcmask 760832  }
  0xc4   : > { %1281 = vmatpush1.bf16.msra.mxu0 %v1183_v44  ;;  %v7637_v46 = vpop.permute.xlu0 %7636  ;;  %v7642_v0 = vpop.permute.xlu1 %7641 }
  0xc5   : > { %v7639_v48 = vunpack.i.h.bf16 %v7637_v46  ;;  %v7644_v51 = vunpack.i.h.bf16 %v7642_v0  ;;  %v7643_v52 = vunpack.i.l.bf16 %v7642_v0  ;;  %v7638_v54 = vunpack.i.l.bf16 %v7637_v46 }
  0xc6   : > { %7901 = vrot.lane.b32.xlu0 %v10477_v16, %s15849_s23  ;;  %7906 = vrot.lane.b32.xlu1 %v10561_v24, %s15849_s23 }
  0xc7   : > { %v557_v14 = vsel %vm15826_vm7, %v7643_v52, %v7644_v51  ;;  %v531_v55 = vsel %vm365_vm1, %v7639_v48, %v500_v7  ;;  %v610_v56 = vsel %vm365_vm1, %v7644_v51, %v579_v13  ;;  %v478_v5 = vsel %vm15817_vm9, %v7638_v54, %v7639_v48 }
  0xc8   : > { %v7647_v57 = vpop.permute.xlu0 %7646  ;;  %v536_v58 = vpop.permute.xlu1 %535  ;;  %v1181_v59 = vpack.c.bf16 %v610_v56, %v531_v55  ;;  %vm681_vm7 = vcmask 769024  }
  0xc9   : > { %v7648_v62 = vunpack.i.l.bf16 %v7647_v57  ;;  %v607_v1 = vsel %vm361_vm5, %v536_v58, %v557_v14  ;;  %v7649_v13 = vunpack.i.h.bf16 %v7647_v57 }
  0xca   : > { %7911 = vrot.lane.b32.xlu0 %v10605_v31, %s15813_s17  ;;  %7916 = vrot.lane.b32.xlu1 %v10609_v32, %s15807_s24  ;;  %s10337_s24 = smov 92  }
  0xcb   : > { %v528_v6 = vsel %vm361_vm5, %v7648_v62, %v478_v5  ;;  %1282 = vmatprep.subr.bf16.mxu0 %v1181_v59 }
  0xcc   : > { %v1180_v8 = vpack.c.bf16 %v607_v1, %v528_v6  ;;  %v10762_v12 = vpop.permute.xlu0 %7651  ;;  %v10764_v15 = vpop.permute.xlu1 %7656 }
  0xcd   : > { %v7659_v17 = vunpack.i.h.bf16 %v10764_v15  ;;  %v7658_v20 = vunpack.i.l.bf16 %v10764_v15  ;;  %v7654_v30 = vunpack.i.h.bf16 %v10762_v12  ;;  %v7653_v35 = vunpack.i.l.bf16 %v10762_v12 }
  0xce   : > { %7921 = vrot.lane.b32.xlu0 %v10451_v9, %s15809_s18  ;;  %7926 = vrot.lane.b32.xlu1 %v10489_v18, %s15809_s18  ;;  %s15851_s18 = smov 97  }
  0xcf   : > { %1283 = vmatpush1.bf16.msra.mxu0 %v1180_v8  ;;  %v499_v39 = vsel %vm15822_vm8, %v7658_v20, %v7659_v17  ;;  %v498_v48 = vsel %vm15822_vm8, %v7653_v35, %v7654_v30  ;;  %vm1259_vm8 = vcmask 64512  }
  0xd0   : > { %v7662_v31 = vpop.permute.xlu0 %7661  ;;  %v7667_v32 = vpop.permute.xlu1 %7666 }
  0xd1   : > { %v7664_v43 = vunpack.i.h.bf16 %v7662_v31  ;;  %v7663_v44 = vunpack.i.l.bf16 %v7662_v31  ;;  %v7669_v46 = vunpack.i.h.bf16 %v7667_v32  ;;  %v7668_v0 = vunpack.i.l.bf16 %v7667_v32 }
  0xd2   : > { %7931 = vrot.lane.b32.xlu0 %v10576_v28, %s10337_s24  ;;  %7936 = vrot.lane.b32.xlu1 %v10477_v16, %s10334_s26 }
  0xd3   : > { %v476_v51 = vsel %vm15817_vm9, %v7663_v44, %v7664_v43  ;;  %v477_v52 = vsel %vm15817_vm9, %v7668_v0, %v7669_v46  ;;  %v529_v54 = vsel %vm365_vm1, %v7664_v43, %v498_v48  ;;  %v530_v7 = vsel %vm365_vm1, %v7669_v46, %v499_v39 }
  0xd4   : > { %v457_v14 = vpop.permute.xlu0 %456  ;;  %v526_v55 = vsel %vm361_vm5, %v7649_v13, %v476_v51  ;;  %v10789_v56 = vpop.permute.xlu1 %7671  ;;  %v1178_v57 = vpack.c.bf16 %v530_v7, %v529_v54  ;;  %vm15907_vm9 = vcmask 719872  }
  0xd5   : > { %v527_v58 = vsel %vm361_vm5, %v457_v14, %v477_v52  ;;  %v7674_v62 = vunpack.i.h.bf16 %v10789_v56  ;;  %v7673_v1 = vunpack.i.l.bf16 %v10789_v56 }
  0xd6   : > { %v1177_v59 = vpack.c.bf16 %v527_v58, %v526_v55  ;;  %942 = vrot.lane.b32.xlu0 %v10454_v10, %s15811_s30  ;;  %7941 = vrot.lane.b32.xlu1 %v10561_v24, %s15851_s18  ;;  %s15837_s30 = smov 102  }
  0xd7   : > { %1284 = vmatprep.subr.bf16.mxu0 %v1178_v57  ;;  %v418_v32 = vsel %vm15823_vm10, %v7673_v1, %v7674_v62 }
  0xd8   : > { %v10798_v5 = vpop.permute.xlu0 %7676  ;;  %v7682_v6 = vpop.permute.xlu1 %7681  ;;  %1285 = vmatpush1.bf16.msra.mxu0 %v1177_v59 }
  0xd9   : > { %v7679_v8 = vunpack.i.h.bf16 %v10798_v5  ;;  %v7678_v20 = vunpack.i.l.bf16 %v10798_v5  ;;  %v7684_v10 = vunpack.i.h.bf16 %v7682_v6  ;;  %v7683_v43 = vunpack.i.l.bf16 %v7682_v6 }
  0xda   : > { %7946 = vrot.lane.b32.xlu0 %v10576_v28, %s15851_s18  ;;  %7951 = vrot.lane.b32.xlu1 %v10625_v33, %s15837_s30 }
  0xdb   : > { %v419_v28 = vsel %vm15823_vm10, %v7678_v20, %v7679_v8  ;;  %v449_v33 = vsel %vm365_vm1, %v7684_v10, %v418_v32  ;;  %v396_v14 = vsel %vm15842_vm11, %v7683_v43, %v7684_v10  ;;  %v7990_v32 = vpack.i.bf16 %v10457_v11, %v10566_v26 }
  0xdc   : > { %v7687_v35 = vpop.permute.xlu0 %7686  ;;  %v7692_v31 = vpop.permute.xlu1 %7691 }
  0xdd   : > { %v7689_v39 = vunpack.i.h.bf16 %v7687_v35  ;;  %v7688_v44 = vunpack.i.l.bf16 %v7687_v35  ;;  %v7693_v0 = vunpack.i.l.bf16 %v7692_v31 }
  0xde   : > { %7956 = vrot.lane.b32.xlu0 %v10584_v29, %s15813_s17  ;;  %7961 = vrot.lane.b32.xlu1 %v10637_v38, %s15813_s17  ;;  %v7694_v38 = vunpack.i.h.bf16 %v7692_v31  ;;  %s15828_s17 = smov 111  }
  0xdf   : > { %v450_v46 = vsel %vm365_vm1, %v7689_v39, %v419_v28  ;;  %v397_v55 = vsel %vm15842_vm11, %v7688_v44, %v7689_v39 }
  0xe0   : > { %v7697_v13 = vpop.permute.xlu0 %7696  ;;  %v7702_v48 = vpop.permute.xlu1 %7701  ;;  %v1175_v51 = vpack.c.bf16 %v450_v46, %v449_v33  ;;  %v1112_v39 = vsel %vm15841_vm13, %v7694_v38, %v7693_v0  ;;  %v10862_v38 = vld [vmem:[%s16079_s1 + $0x8] ss:$16 sps:$4 sm:$0xff]  }
  0xe1   : > { %v7699_v52 = vunpack.i.h.bf16 %v7697_v13  ;;  %v10818_v54 = vunpack.i.l.bf16 %v7697_v13  ;;  %v7704_v29 = vunpack.i.h.bf16 %v7702_v48  ;;  %v7703_v7 = vunpack.i.l.bf16 %v7702_v48 }
  0xe2   : > { %7966 = vrot.lane.b32.xlu0 %v10489_v18, %s15828_s17  ;;  %7971 = vrot.lane.b32.xlu1 %v10431_v4, %s15828_s17 }
  0xe3   : > { %1286 = vmatprep.subr.bf16.mxu0 %v1175_v51  ;;  %v446_v57 = vsel %vm361_vm5, %v7703_v7, %v396_v14  ;;  %v447_v58 = vsel %vm361_vm5, %v7704_v29, %v397_v55  ;;  %v1127_v59 = vsel %vm354_vm12, %v7699_v52, %v10818_v54 }
  0xe4   : > { %v7707_v1 = vpop.permute.xlu0 %7706  ;;  %v10830_v6 = vpop.permute.xlu1 %7711  ;;  %v1174_v18 = vpack.c.bf16 %v447_v58, %v446_v57  ;;  %v1158_v20 = vsel %vm365_vm1, %v7693_v0, %v1127_v59 }
  0xe5   : > { %v7709_v4 = vunpack.i.h.bf16 %v7707_v1  ;;  %v7708_v10 = vunpack.i.l.bf16 %v7707_v1  ;;  %v7713_v35 = vunpack.i.l.bf16 %v10830_v6  ;;  %v1217_v31 = vpack.c.bf16 %v1158_v20, %v1158_v20 }
  0xe6   : > { %7976 = vrot.lane.b32.xlu0 %v10477_v16, %s10337_s24  ;;  %7981 = vrot.lane.b32.xlu1 %v10561_v24, %s10337_s24  ;;  %v10941_v40 = vunpack.i.h.bf16 %v10830_v6 }
  0xe7   : > { %1287 = vmatpush1.bf16.msra.mxu0 %v1174_v18  ;;  %v1155_v43 = vsel %vm361_vm5, %v7708_v10, %v1112_v39  ;;  %6906 = vmatprep.subr.msk.bf16.mxu1 %vm15969_vm14, %v1217_v31  ;;  %v307_v46 = vsel %vm15832_vm15, %v7708_v10, %v7709_v4  ;;  %v332_v13 = vsel %vm15841_vm13, %v7693_v0, %v7713_v35  ;;  %v10874_v31 = vld [vmem:[%s10416_s10 + $0x48] sm:$0xff] }
  0xe8   : > { %v10843_v44 = vpop.permute.xlu0 %7716  ;;  %v7722_v28 = vpop.permute.xlu1 %7721  ;;  %v1216_v33 = vpack.c.bf16 %v1155_v43, %v1155_v43  ;;  %v364_v14 = vsel %vm361_vm5, %v10425_v2, %v307_v46  ;;  %v368_v57 = vsel %vm365_vm1, %v7709_v4, %v332_v13  ;;  %v10877_v2 = vld [vmem:[%s10416_s10 + $0x40] sm:$0xff]  ;;  %v10237_v46 = vld [vmem:[%s10416_s10 + $0x50] sm:$0xff] }
  0xe9   : > { %v7719_v48 = vunpack.i.h.bf16 %v10843_v44  ;;  %v7718_v11 = vunpack.i.l.bf16 %v10843_v44  ;;  %v7724_v51 = vunpack.i.h.bf16 %v7722_v28  ;;  %v7723_v52 = vunpack.i.l.bf16 %v7722_v28 }
  0xea   : > { %7986 = vrot.lane.b32.xlu0 %v10503_v19, %s15863_s11  ;;  %7991 = vrot.lane.b32.xlu1 %v7990_v32, %s15859_s28  ;;  %v1268_v29 = vsel %vm15969_vm14, %v1216_v33, 0  ;;  %v10881_v4 = vpack.i.bf16 %v10874_v31, %v10877_v2  ;;  %v10897_v13 = vpack.i.bf16 %v10566_v26, %v10237_v46 }
  0xeb   : > { %1342 = vmatpush1.bf16.msra.mxu1 %v1268_v29  ;;  %v395_v7 = vsel %vm15842_vm11, %v7723_v52, %v7724_v51  ;;  %v417_v0 = vsel %vm15823_vm10, %v7718_v11, %v7719_v48  ;;  %vm15903_vm10 = vcmask 113664   ;;  %v10905_v52 = vld [vmem:[%s16079_s1 + $0x28] ss:$0 sps:$4 sm:$0xff]   ;;  %vm15845_vm11 = vcmask 785408  }
  0xec   : > { %v374_v19 = vpop.permute.xlu0 %373  ;;  %v7727_v55 = vpop.permute.xlu1 %7726  ;;  %v448_v58 = vsel %vm365_vm1, %v7724_v51, %v417_v0 }
  0xed   : > { %v445_v59 = vsel %vm361_vm5, %v374_v19, %v395_v7  ;;  %v7729_v1 = vunpack.i.h.bf16 %v7727_v55  ;;  %v7728_v18 = vunpack.i.l.bf16 %v7727_v55  ;;  %v1172_v20 = vpack.c.bf16 %v448_v58, %v368_v57  ;;  %v10238_v57 = vld [vmem:[%s10416_s10] sm:$0xff] }
  0xee   : > { %v1171_v10 = vpack.c.bf16 %v445_v59, %v364_v14  ;;  %7996 = vrot.lane.b32.xlu0 %v10477_v16, %s15851_s18  ;;  %8001 = vrot.lane.b32.xlu1 %v10687_v25, %s15837_s30  ;;  %v8025_v58 = vpack.i.bf16 %v10238_v57, %v10877_v2 }
  0xef   : > { %1288 = vmatprep.subr.bf16.mxu0 %v1172_v20  ;;  %6907 = vmatmul.mubr.msk.bf16.vlgmr.msra.gmra.mxu1 %vm1259_vm8, %v10862_v38  ;;  %v1147_v16 = vsel %vm15907_vm9, %v7728_v18, %v7729_v1 }
  0xf0   : > { %v7732_v32 = vpop.permute.xlu0 %7731  ;;  %v7737_v39 = vpop.permute.xlu1 %7736  ;;  %1289 = vmatpush1.bf16.msra.mxu0 %v1171_v10  ;;  %1369 = vmatprep.mubr.bf16.mxu1 %v15830_v27 }
  0xf1   : > { %v7734_v25 = vunpack.i.h.bf16 %v7732_v32  ;;  %v7733_v43 = vunpack.i.l.bf16 %v7732_v32  ;;  %v10887_v28 = vunpack.i.h.bf16 %v7737_v39  ;;  %v10889_v33 = vunpack.i.l.bf16 %v7737_v39  ;;  %v9974_v32 = vld [vmem:[%s16079_s1 + $0x4] ss:$16 sps:$4 sm:$0xff]  }
  0xf2   : > { %8006 = vrot.lane.b32.xlu0 %v10881_v4, %s15835_s20  ;;  %8011 = vrot.lane.b32.xlu1 %v10451_v9, %s15828_s17  ;;  %v10239_v39 = vld [vmem:[%s10416_s10 + $0x30] sm:$0xff]  ;;  %s15839_s17 = smov 122  }
  0xf3   : > { %v1148_v11 = vsel %vm15907_vm9, %v7733_v43, %v7734_v25  ;;  %v1159_v51 = vsel %vm15903_vm10, %v10889_v33, %v1147_v16  ;;  %v8030_v16 = vpack.i.bf16 %v10237_v46, %v10239_v39  ;;  %1308 = vmatprep.mubr.bf16.mxu0 %v9974_v32 }
  0xf4   : > { %v7742_v29 = vpop.permute.xlu0 %7741  ;;  %v7747_v7 = vpop.permute.xlu1 %7746  ;;  %v1160_v9 = vsel %vm15903_vm10, %v10887_v28, %v1148_v11  ;;  %v10240_v11 = vld [vmem:[%s10416_s10 + $0x8] sm:$0xff] }
  0xf5   : > { %v7744_v26 = vunpack.i.h.bf16 %v7742_v29  ;;  %v7743_v0 = vunpack.i.l.bf16 %v7742_v29  ;;  %v7749_v19 = vunpack.i.h.bf16 %v7747_v7  ;;  %v7748_v14 = vunpack.i.l.bf16 %v7747_v7 }
  0xf6   : > { %8016 = vrot.lane.b32.xlu0 %v10561_v24, %s10324_s9  ;;  %8021 = vrot.lane.b32.xlu1 %v10897_v13, %s10324_s9  ;;  %v1215_v55 = vpack.c.bf16 %v1160_v9, %v1159_v51  ;;  %v10241_v51 = vld [vmem:[%s10416_s10 + $0x28] sm:$0xff] }
  0xf7   : > { %v684_v59 = vsel %vm681_vm7, %v7743_v0, %v7744_v26  ;;  %v763_v1 = vsel %vm762_vm6, %v7748_v14, %v7749_v19  ;;  %6908 = vmatmul.mubr.msk.bf16.gmra.mxu1 %vm1259_vm8, %v10905_v52  ;;  %v8035_v29 = vpack.i.bf16 %v10241_v51, %v10240_v11  ;;  %v8040_v19 = vpack.i.bf16 %v10240_v11, %v10238_v57 }
  0xf8   : > { %7093 = vmatprep.subr.bf16.mxu1 %v1215_v55  ;;  %v10919_v18 = vpop.permute.xlu0 %7751  ;;  %v10921_v20 = vpop.permute.xlu1 %7756  ;;  %v696_v24 = vsel %vm15903_vm10, %v7554_v36, %v684_v59  ;;  %v775_v10 = vsel %vm15903_vm10, %v7559_v42, %v763_v1  ;;  %1410 = vmatprep.mubr.bf16.mxu1 %v9974_v32 }
  0xf9   : > { %v10934_v25 = vunpack.i.h.bf16 %v10919_v18  ;;  %v15833_v43 = vunpack.i.l.bf16 %v10919_v18  ;;  %v15834_v34 = vunpack.i.l.bf16 %v10921_v20  ;;  %v1191_v36 = vpack.c.bf16 %v775_v10, %v696_v24 }
  0xfa   : > { %8026 = vrot.lane.b32.xlu0 %v8025_v58, %s15839_s17  ;;  %859 = vrot.lane.b32.xlu1 %v10238_v57, %s15863_s11 }
  0xfb   : > { %7094 = vmatpush3.bf16.msra.mxu1 %v1191_v36  ;;  %v330_v14 = vsel %vm15841_vm13, %v10941_v40, %v15833_v43  ;;  %v331_v55 = vsel %vm15841_vm13, %v10934_v25, %v15834_v34 }
  0xfc   : > { %v10943_v42 = vpop.permute.xlu0 %7761  ;;  %v10945_v46 = vpop.permute.xlu1 %7766 }
  0xfd   : > { %v7764_v7 = vunpack.i.h.bf16 %v10943_v42  ;;  %v7763_v9 = vunpack.i.l.bf16 %v10943_v42  ;;  %v7769_v26 = vunpack.i.h.bf16 %v10945_v46  ;;  %v7768_v0 = vunpack.i.l.bf16 %v10945_v46 }
  0xfe   : > { %348 = vrot.lane.b32.xlu0 %v10553_v23, %s15859_s28  ;;  %8031 = vrot.lane.b32.xlu1 %v8030_v16, %s15855_s13  ;;  %v10242_v16 = vld [vmem:[%s10416_s10 + $0x20] sm:$0xff]  ;;  %s16099_s10 = smov 114  }
  0xff   : > { %v366_v58 = vsel %vm365_vm1, %v7764_v7, %v330_v14  ;;  %v367_v59 = vsel %vm365_vm1, %v7769_v26, %v331_v55  ;;  %v305_v23 = vsel %vm15832_vm15, %v7763_v9, %v7764_v7  ;;  %v306_v1 = vsel %vm15832_vm15, %v7768_v0, %v7769_v26 }
 0x100   : > { %v7772_v24 = vpop.permute.xlu0 %7771  ;;  %v7777_v10 = vpop.permute.xlu1 %7776  ;;  %v1169_v32 = vpack.c.bf16 %v367_v59, %v366_v58  ;;  %v362_v39 = vsel %vm361_vm5, %v10238_v57, %v305_v23  ;;  %v363_v36 = vsel %vm361_vm5, %v10242_v16, %v306_v1  ;;  %v8045_v14 = vpack.i.bf16 %v10241_v51, %v10242_v16 }
 0x101   : > { %v1168_v11 = vpack.c.bf16 %v363_v36, %v362_v39  ;;  %v7774_v7 = vunpack.i.h.bf16 %v7772_v24  ;;  %v7773_v55 = vunpack.i.l.bf16 %v7772_v24  ;;  %vm1085_vm15 = vcmask 728064  }
 0x102   : > { %8036 = vrot.lane.b32.xlu0 %v8035_v29, %s15837_s30  ;;  %8041 = vrot.lane.b32.xlu1 %v8040_v19, %s15835_s20  ;;  %v7779_v23 = vunpack.i.h.bf16 %v7777_v10  ;;  %v7778_v34 = vunpack.i.l.bf16 %v7777_v10  ;;  %v8050_v29 = vpack.i.bf16 %v10874_v31, %v10241_v51  ;;  %v7759_v24 = vunpack.i.h.bf16 %v10921_v20  ;;  %s16097_s30 = smov 110  }
 0x103   : > { %1290 = vmatprep.subr.bf16.mxu0 %v1169_v32 }
 0x104   : > { %1291 = vmatpush1.bf16.msra.mxu0 %v1168_v11  ;;  %v7782_v27 = vpop.permute.xlu0 %7781  ;;  %v7787_v26 = vpop.permute.xlu1 %7786  ;;  %v1088_v31 = vsel %vm1085_vm15, %v7778_v34, %v7779_v23  ;;  %v1110_v23 = vsel %vm15841_vm13, %v7759_v24, %v10941_v40 }
 0x105   : > { %v7784_v43 = vunpack.i.h.bf16 %v7782_v27  ;;  %v7783_v58 = vunpack.i.l.bf16 %v7782_v27  ;;  %v7789_v59 = vunpack.i.h.bf16 %v7787_v26  ;;  %v7788_v57 = vunpack.i.l.bf16 %v7787_v26 }
 0x106   : > { %8046 = vrot.lane.b32.xlu0 %v8045_v14, %s15835_s20  ;;  %780 = vrot.lane.b32.xlu1 %v10242_v16, %s15839_s17  ;;  %v1087_v27 = vsel %vm1085_vm15, %v7773_v55, %v7774_v7  ;;  %s16096_s17 = smov 107   ;;  %s16098_s20 = smov 99  }
 0x107   : > { %v682_v19 = vsel %vm681_vm7, %v7783_v58, %v7784_v43  ;;  %v683_v1 = vsel %vm681_vm7, %v7788_v57, %v7789_v59  ;;  %vm600_vm7 = vcmask 777216  }
 0x108   : > { %v10983_v32 = vpop.permute.xlu0 %7791  ;;  %v7797_v39 = vpop.permute.xlu1 %7796  ;;  %v694_v43 = vsel %vm15903_vm10, %v7584_v3, %v682_v19  ;;  %v695_v51 = vsel %vm15903_vm10, %v7589_v63, %v683_v1  ;;  %v1153_v19 = vsel %vm361_vm5, %v7763_v9, %v1110_v23 }
 0x109   : > { %v7794_v36 = vunpack.i.h.bf16 %v10983_v32  ;;  %v7793_v10 = vunpack.i.l.bf16 %v10983_v32  ;;  %v7799_v11 = vunpack.i.h.bf16 %v7797_v39  ;;  %v7798_v26 = vunpack.i.l.bf16 %v7797_v39 }
 0x10a   : > { %8051 = vrot.lane.b32.xlu0 %v8050_v29, %s15855_s13  ;;  %8056 = vrot.lane.b32.xlu1 %v8045_v14, %s15853_s14  ;;  %v1188_v57 = vpack.c.bf16 %v695_v51, %v694_v43 }
 0x10b   : > { %v1099_v16 = vsel %vm15903_vm10, %v7793_v10, %v1087_v27  ;;  %v1100_v7 = vsel %vm15903_vm10, %v7794_v36, %v1088_v31  ;;  %v1125_v14 = vsel %vm354_vm12, %v7798_v26, %v10889_v33  ;;  %v1126_v60 = vsel %vm354_vm12, %v7799_v11, %v10887_v28 }
 0x10c   : > { %v1107_v34 = vpop.permute.xlu0 %1106  ;;  %v7802_v3 = vpop.permute.xlu1 %7801  ;;  %v1212_v55 = vpack.c.bf16 %v1100_v7, %v1099_v16  ;;  %v1156_v61 = vsel %vm365_vm1, %v10941_v40, %v1125_v14  ;;  %v1157_v63 = vsel %vm365_vm1, %v10934_v25, %v1126_v60  ;;  %v268_v40 = vld [vmem:[%s16080_s2 + $0x10] sm:$0xff] }
 0x10d   : > { %v1111_v58 = vsel %vm15841_vm13, %v1107_v34, %v10934_v25  ;;  %v1214_v59 = vpack.c.bf16 %v1157_v63, %v1156_v61  ;;  %v7804_v42 = vunpack.i.h.bf16 %v7802_v3  ;;  %v7803_v46 = vunpack.i.l.bf16 %v7802_v3 }
 0x10e   : > { %v1154_v29 = vsel %vm361_vm5, %v7768_v0, %v1111_v58  ;;  %8061 = vrot.lane.b32.xlu0 %v10881_v4, %s15853_s14  ;;  %7095 = vmatprep.subr.bf16.mxu1 %v1212_v55  ;;  %v266_v4 = vld [vmem:[%s16080_s2] sm:$0xff]  ;;  %vm15848_vm13 = vcmask 809984  }
 0x10f   : > { %1292 = vmatprep.subr.bf16.mxu0 %v1214_v59  ;;  %7096 = vmatpush3.bf16.msra.mxu1 %v1188_v57  ;;  %v1213_v25 = vpack.c.bf16 %v1154_v29, %v1153_v19  ;;  %v1007_v34 = vsel %vm361_vm5, %v7803_v46, %v7804_v42 }
 0x110   : > { %v7807_v1 = vpop.permute.xlu0 %7806  ;;  %v7812_v39 = vpop.permute.xlu1 %7811  ;;  %701 = vrot.lane.b32.xlu1 %v10877_v2, %s15861_s16 }
 0x111   : > { %1293 = vmatpush2.bf16.msra.mxu0 %v1213_v25  ;;  %v7814_v24 = vunpack.i.h.bf16 %v7812_v39  ;;  %v7813_v2 = vunpack.i.l.bf16 %v7812_v39  ;;  %v7809_v26 = vunpack.i.h.bf16 %v7807_v1  ;;  %v7808_v31 = vunpack.i.l.bf16 %v7807_v1 }
 0x112   : > { %8066 = vrot.lane.b32.xlu0 %v10897_v13, %s10321_s7  ;;  %v267_v13 = vld [vmem:[%s16080_s2 + $0x8] sm:$0xff] }
 0x113   : > { %v602_v14 = vsel %vm600_vm7, %v7813_v2, %v7814_v24  ;;  %v1086_v61 = vsel %vm1085_vm15, %v7808_v31, %v7809_v26  ;;  %vm15844_vm15 = vcmask 891904  }
 0x114   : > { %v7817_v9 = vpop.permute.xlu0 %7816  ;;  %v11033_v0 = vpop.permute.xlu1 %7821  ;;  %1221 = vperm.xlu1 %8070, %v266_v4   ;;  %v614_v19 = vsel %vm15903_vm10, %v7604_v47, %v602_v14 }
 0x115   : > { %v7819_v27 = vunpack.i.h.bf16 %v7817_v9  ;;  %v7818_v11 = vunpack.i.l.bf16 %v7817_v9  ;;  %v7823_v51 = vunpack.i.l.bf16 %v11033_v0 }
 0x116   : > { %1231 = vperm.xlu0 %8071, %v268_v40  }
 0x117   : > { %v603_v43 = vsel %vm600_vm7, %v7818_v11, %v7819_v27  ;;  %v1019_v58 = vsel %vm15903_vm10, %v7823_v51, %v1007_v34 }
 0x118   : > { %v11040_v16 = vpop.permute.xlu0 %7826  ;;  %v11042_v7 = vpop.permute.xlu1 %7831  ;;  %1226 = vperm.xlu1 %8070, %v267_v13   ;;  %v615_v63 = vsel %vm15903_vm10, %v7609_v53, %v603_v43 }
 0x119   : > { %v7828_v60 = vunpack.i.l.bf16 %v11040_v16  ;;  %v7829_v3 = vunpack.i.h.bf16 %v11040_v16  ;;  %v7833_v55 = vunpack.i.l.bf16 %v11042_v7  ;;  %v1185_v1 = vpack.c.bf16 %v615_v63, %v614_v19 }
 0x11a   : > { %v7834_v19 = vunpack.i.h.bf16 %v11042_v7 }
 0x11b   : > { %v1098_v59 = vsel %vm15903_vm10, %v7828_v60, %v1086_v61  ;;  %v1065_v53 = vsel %vm15848_vm13, %v7829_v3, %v7793_v10  ;;  %v1066_v39 = vsel %vm15848_vm13, %v7833_v55, %v7794_v36 }
 0x11c   : > { %v7837_v57 = vpop.permute.xlu0 %7836  ;;  %v7842_v23 = vpop.permute.xlu1 %7841  ;;  %v1209_v29 = vpack.c.bf16 %v1098_v59, %v1019_v58  ;;  %v7824_v59 = vunpack.i.h.bf16 %v11033_v0 }
 0x11d   : > { %v7839_v25 = vunpack.i.h.bf16 %v7837_v57  ;;  %v7844_v49 = vunpack.i.h.bf16 %v7842_v23  ;;  %v7838_v46 = vunpack.i.l.bf16 %v7837_v57  ;;  %v7843_v9 = vunpack.i.l.bf16 %v7842_v23 }
 0x11e   : > { %7097 = vmatprep.subr.bf16.mxu1 %v1209_v29 }
 0x11f   : > { %7098 = vmatpush3.bf16.msra.mxu1 %v1185_v1  ;;  %v1096_v4 = vsel %vm365_vm1, %v7839_v25, %v1065_v53  ;;  %v1097_v40 = vsel %vm365_vm1, %v7844_v49, %v1066_v39  ;;  %v1043_v36 = vsel %vm15844_vm15, %v7838_v46, %v7839_v25  ;;  %v1044_v13 = vsel %vm15844_vm15, %v7843_v9, %v7844_v49 }
 0x120   : > { %v7847_v45 = vpop.permute.xlu0 %7846  ;;  %v7852_v42 = vpop.permute.xlu1 %7851  ;;  %v1211_v47 = vpack.c.bf16 %v1097_v40, %v1096_v4 }
 0x121   : > { %v7849_v24 = vunpack.i.h.bf16 %v7847_v45  ;;  %v7848_v2 = vunpack.i.l.bf16 %v7847_v45  ;;  %v7854_v26 = vunpack.i.h.bf16 %v7852_v42  ;;  %v7853_v31 = vunpack.i.l.bf16 %v7852_v42 }
 0x122   : > { %1294 = vmatprep.subr.bf16.mxu0 %v1211_v47 }
 0x123   : > { %v1005_v58 = vsel %vm361_vm5, %v7848_v2, %v7849_v24  ;;  %v1006_v1 = vsel %vm361_vm5, %v7853_v31, %v7854_v26 }
 0x124   : > { %v7857_v27 = vpop.permute.xlu0 %7856  ;;  %v7862_v10 = vpop.permute.xlu1 %7861  ;;  %v1017_v39 = vsel %vm15903_vm10, %v7824_v59, %v1005_v58 }
 0x125   : > { %v7859_v11 = vunpack.i.h.bf16 %v7857_v27  ;;  %v7858_v32 = vunpack.i.l.bf16 %v7857_v27  ;;  %v7864_v43 = vunpack.i.h.bf16 %v7862_v10  ;;  %v7863_v14 = vunpack.i.l.bf16 %v7862_v10 }
 0x126   : > { %v1064_v27 = vsel %vm15848_vm13, %v7834_v19, %v7828_v60  ;;  %vm821_vm13 = vcmask 834560  }
 0x127   : > { %v1093_v34 = vsel %vm361_vm5, %v7858_v32, %v1043_v36  ;;  %v1094_v3 = vsel %vm361_vm5, %v7859_v11, %v1044_v13  ;;  %v522_v25 = vsel %vm15845_vm11, %v7863_v14, %v7864_v43 }
 0x128   : > { %v7867_v55 = vpop.permute.xlu0 %7866  ;;  %v11074_v61 = vpop.permute.xlu1 %7871  ;;  %v1210_v63 = vpack.c.bf16 %v1094_v3, %v1093_v34  ;;  %v534_v9 = vsel %vm15903_vm10, %v7629_v41, %v522_v25 }
 0x129   : > { %v7869_v57 = vunpack.i.h.bf16 %v7867_v55  ;;  %v7868_v23 = vunpack.i.l.bf16 %v7867_v55  ;;  %v7873_v29 = vunpack.i.l.bf16 %v11074_v61  ;;  %v7874_v49 = vunpack.i.h.bf16 %v11074_v61 }
 0x12a   : > { %1295 = vmatpush2.bf16.msra.mxu0 %v1210_v63 }
 0x12b   : > { %v601_v53 = vsel %vm600_vm7, %v7868_v23, %v7869_v57  ;;  %v1018_v4 = vsel %vm15903_vm10, %v7873_v29, %v1006_v1  ;;  %v986_v2 = vsel %vm15847_vm4, %v7874_v49, %v7823_v51  ;;  %vm15846_vm7 = vcmask 900096  }
 0x12c   : > { %v7877_v40 = vpop.permute.xlu0 %7876  ;;  %v7882_v7 = vpop.permute.xlu1 %7881  ;;  %v1206_v45 = vpack.c.bf16 %v1018_v4, %v1017_v39  ;;  %v613_v42 = vsel %vm15903_vm10, %v7634_v37, %v601_v53 }
 0x12d   : > { %v7879_v47 = vunpack.i.h.bf16 %v7877_v40  ;;  %v7884_v46 = vunpack.i.h.bf16 %v7882_v7  ;;  %v1182_v24 = vpack.c.bf16 %v613_v42, %v534_v9  ;;  %v7883_v10 = vunpack.i.l.bf16 %v7882_v7 }
 0x12e   : > { %7099 = vmatprep.subr.bf16.mxu1 %v1206_v45  ;;  %v7878_v41 = vunpack.i.l.bf16 %v7877_v40 }
 0x12f   : > { %v1016_v22 = vsel %vm365_vm1, %v7879_v47, %v986_v2  ;;  %v1095_v37 = vsel %vm365_vm1, %v7884_v46, %v1064_v27  ;;  %7100 = vmatpush3.bf16.msra.mxu1 %v1182_v24  ;;  %v1042_v51 = vsel %vm15844_vm15, %v7883_v10, %v7884_v46  ;;  %vm924_vm15 = vcmask 744448  }
 0x130   : > { %v7887_v11 = vpop.permute.xlu0 %7886  ;;  %v7892_v21 = vpop.permute.xlu1 %7891  ;;  %v1208_v32 = vpack.c.bf16 %v1095_v37, %v1016_v22  ;;  %v964_v16 = vsel %vm15846_vm7, %v7878_v41, %v7879_v47 }
 0x131   : > { %v7889_v60 = vunpack.i.h.bf16 %v7887_v11  ;;  %v7888_v14 = vunpack.i.l.bf16 %v7887_v11  ;;  %v7894_v34 = vunpack.i.h.bf16 %v7892_v21  ;;  %v7893_v3 = vunpack.i.l.bf16 %v7892_v21 }
 0x132   : > { %1296 = vmatprep.subr.bf16.mxu0 %v1208_v32 }
 0x133   : > { %v926_v7 = vsel %vm924_vm15, %v7888_v14, %v7889_v60  ;;  %v927_v45 = vsel %vm924_vm15, %v7893_v3, %v7894_v34 }
 0x134   : > { %v7897_v36 = vpop.permute.xlu0 %7896  ;;  %v1021_v13 = vpop.permute.xlu1 %1020 }
 0x135   : > { %v7898_v26 = vunpack.i.l.bf16 %v7897_v36  ;;  %v1092_v43 = vsel %vm361_vm5, %v1021_v13, %v1042_v51  ;;  %v7899_v0 = vunpack.i.h.bf16 %v7897_v36 }
 0x137   : > { %v1013_v31 = vsel %vm361_vm5, %v7898_v26, %v964_v16 }
 0x138   : > { %v1207_v55 = vpack.c.bf16 %v1092_v43, %v1013_v31  ;;  %v7902_v63 = vpop.permute.xlu0 %7901  ;;  %v7907_v58 = vpop.permute.xlu1 %7906 }
 0x139   : > { %v7904_v57 = vunpack.i.h.bf16 %v7902_v63  ;;  %v7903_v23 = vunpack.i.l.bf16 %v7902_v63  ;;  %v7909_v19 = vunpack.i.h.bf16 %v7907_v58  ;;  %v7908_v25 = vunpack.i.l.bf16 %v7907_v58 }
 0x13a   : > { %1297 = vmatpush2.bf16.msra.mxu0 %v1207_v55 }
 0x13b   : > { %v520_v49 = vsel %vm15845_vm11, %v7903_v23, %v7904_v57  ;;  %v521_v1 = vsel %vm15845_vm11, %v7908_v25, %v7909_v19  ;;  %vm15906_vm11 = vcmask 793600  }
 0x13c   : > { %v11110_v53 = vpop.permute.xlu0 %7911  ;;  %v7917_v39 = vpop.permute.xlu1 %7916  ;;  %v532_v46 = vsel %vm15903_vm10, %v7654_v30, %v520_v49  ;;  %v533_v9 = vsel %vm15903_vm10, %v7659_v17, %v521_v1 }
 0x13d   : > { %v7914_v4 = vunpack.i.h.bf16 %v11110_v53  ;;  %v7913_v40 = vunpack.i.l.bf16 %v11110_v53  ;;  %v7919_v42 = vunpack.i.h.bf16 %v7917_v39  ;;  %v7918_v47 = vunpack.i.l.bf16 %v7917_v39 }
 0x13e   : > { %v1179_v12 = vpack.c.bf16 %v533_v9, %v532_v46 }
 0x13f   : > { %v938_v24 = vsel %vm15903_vm10, %v7913_v40, %v926_v7  ;;  %v939_v2 = vsel %vm15903_vm10, %v7914_v4, %v927_v45  ;;  %v984_v15 = vsel %vm15847_vm4, %v7918_v47, %v7824_v59  ;;  %v985_v17 = vsel %vm15847_vm4, %v7919_v42, %v7873_v29 }
 0x140   : > { %v7922_v27 = vpop.permute.xlu0 %7921  ;;  %v7927_v22 = vpop.permute.xlu1 %7926  ;;  %v1203_v37 = vpack.c.bf16 %v939_v2, %v938_v24  ;;  %vm902_vm4 = vcmask 826368  }
 0x141   : > { %v7924_v10 = vunpack.i.h.bf16 %v7922_v27  ;;  %v7929_v11 = vunpack.i.h.bf16 %v7927_v22  ;;  %v7923_v21 = vunpack.i.l.bf16 %v7922_v27  ;;  %v7928_v30 = vunpack.i.l.bf16 %v7927_v22 }
 0x142   : > { %7101 = vmatprep.subr.bf16.mxu1 %v1203_v37 }
 0x143   : > { %7102 = vmatpush3.bf16.msra.mxu1 %v1179_v12  ;;  %v1014_v32 = vsel %vm365_vm1, %v7924_v10, %v984_v15  ;;  %v1015_v41 = vsel %vm365_vm1, %v7929_v11, %v985_v17  ;;  %v962_v16 = vsel %vm15846_vm7, %v7923_v21, %v7924_v10  ;;  %v963_v60 = vsel %vm15846_vm7, %v7928_v30, %v7929_v11 }
 0x144   : > { %v7932_v13 = vpop.permute.xlu0 %7931  ;;  %v7937_v51 = vpop.permute.xlu1 %7936  ;;  %v1205_v26 = vpack.c.bf16 %v1015_v41, %v1014_v32  ;;  %v1011_v61 = vsel %vm361_vm5, %v7899_v0, %v962_v16  ;;  %vm843_vm7 = vcmask 752640  }
 0x145   : > { %v7934_v14 = vunpack.i.h.bf16 %v7932_v13  ;;  %v7933_v34 = vunpack.i.l.bf16 %v7932_v13  ;;  %v7939_v19 = vunpack.i.h.bf16 %v7937_v51  ;;  %v7938_v25 = vunpack.i.l.bf16 %v7937_v51 }
 0x146   : > { %1298 = vmatprep.subr.bf16.mxu0 %v1205_v26 }
 0x147   : > { %v846_v42 = vsel %vm843_vm7, %v7933_v34, %v7934_v14  ;;  %v925_v9 = vsel %vm924_vm15, %v7938_v25, %v7939_v19  ;;  %vm880_vm15 = vcmask 908288  }
 0x148   : > { %v943_v31 = vpop.permute.xlu0 %942  ;;  %v7942_v59 = vpop.permute.xlu1 %7941 }
 0x149   : > { %v1012_v29 = vsel %vm361_vm5, %v943_v31, %v963_v60  ;;  %v7944_v63 = vunpack.i.h.bf16 %v7942_v59  ;;  %v7943_v58 = vunpack.i.l.bf16 %v7942_v59 }
 0x14a   : > { %v1204_v43 = vpack.c.bf16 %v1012_v29, %v1011_v61 }
 0x14b   : > { %v440_v7 = vsel %vm15906_vm11, %v7943_v58, %v7944_v63 }
 0x14c   : > { %v7947_v3 = vpop.permute.xlu0 %7946  ;;  %v11140_v55 = vpop.permute.xlu1 %7951  ;;  %1299 = vmatpush2.bf16.msra.mxu0 %v1204_v43  ;;  %v452_v11 = vsel %vm15903_vm10, %v7674_v62, %v440_v7 }
 0x14d   : > { %v7949_v57 = vunpack.i.h.bf16 %v7947_v3  ;;  %v7948_v23 = vunpack.i.l.bf16 %v7947_v3  ;;  %v7953_v49 = vunpack.i.l.bf16 %v11140_v55  ;;  %v7954_v58 = vunpack.i.h.bf16 %v11140_v55 }
 0x14f   : > { %v441_v36 = vsel %vm15906_vm11, %v7948_v23, %v7949_v57  ;;  %v858_v2 = vsel %vm15903_vm10, %v7953_v49, %v846_v42 }
 0x150   : > { %v11144_v1 = vpop.permute.xlu0 %7956  ;;  %v11146_v39 = vpop.permute.xlu1 %7961  ;;  %v453_v24 = vsel %vm15903_vm10, %v7679_v8, %v441_v36 }
 0x151   : > { %v7958_v45 = vunpack.i.l.bf16 %v11144_v1  ;;  %v7959_v47 = vunpack.i.h.bf16 %v11144_v1  ;;  %v7963_v46 = vunpack.i.l.bf16 %v11146_v39  ;;  %v1176_v21 = vpack.c.bf16 %v453_v24, %v452_v11 }
 0x152   : > { %v7964_v25 = vunpack.i.h.bf16 %v11146_v39 }
 0x153   : > { %v937_v27 = vsel %vm15903_vm10, %v7958_v45, %v925_v9  ;;  %v904_v8 = vsel %vm902_vm4, %v7959_v47, %v7913_v40  ;;  %v905_v30 = vsel %vm902_vm4, %v7963_v46, %v7914_v4 }
 0x154   : > { %v7967_v22 = vpop.permute.xlu0 %7966  ;;  %v7972_v37 = vpop.permute.xlu1 %7971  ;;  %v1200_v10 = vpack.c.bf16 %v937_v27, %v858_v2 }
 0x155   : > { %v7969_v12 = vunpack.i.h.bf16 %v7967_v22  ;;  %v7974_v5 = vunpack.i.h.bf16 %v7972_v37  ;;  %v7968_v41 = vunpack.i.l.bf16 %v7967_v22  ;;  %v7973_v13 = vunpack.i.l.bf16 %v7972_v37 }
 0x156   : > { %7103 = vmatprep.subr.bf16.mxu1 %v1200_v10 }
 0x157   : > { %7104 = vmatpush3.bf16.msra.mxu1 %v1176_v21  ;;  %v935_v15 = vsel %vm365_vm1, %v7969_v12, %v904_v8  ;;  %v936_v17 = vsel %vm365_vm1, %v7974_v5, %v905_v30  ;;  %v882_v4 = vsel %vm880_vm15, %v7968_v41, %v7969_v12  ;;  %v883_v61 = vsel %vm880_vm15, %v7973_v13, %v7974_v5 }
 0x158   : > { %v7977_v56 = vpop.permute.xlu0 %7976  ;;  %v7982_v32 = vpop.permute.xlu1 %7981  ;;  %v1202_v62 = vpack.c.bf16 %v936_v17, %v935_v15  ;;  %v903_v5 = vsel %vm902_vm4, %v7964_v25, %v7958_v45 }
 0x159   : > { %v7979_v51 = vunpack.i.h.bf16 %v7977_v56  ;;  %v7978_v26 = vunpack.i.l.bf16 %v7977_v56  ;;  %v7984_v0 = vunpack.i.h.bf16 %v7982_v32  ;;  %v7983_v31 = vunpack.i.l.bf16 %v7982_v32 }
 0x15a   : > { %1300 = vmatprep.subr.bf16.mxu0 %v1202_v62 }
 0x15b   : > { %v844_v63 = vsel %vm843_vm7, %v7978_v26, %v7979_v51  ;;  %v845_v42 = vsel %vm843_vm7, %v7983_v31, %v7984_v0  ;;  %vm799_vm7 = vcmask 916480  }
 0x15c   : > { %v7987_v16 = vpop.permute.xlu0 %7986  ;;  %v11174_v40 = vpop.permute.xlu1 %7991  ;;  %v856_v46 = vsel %vm15903_vm10, %v7954_v58, %v844_v63 }
 0x15d   : > { %v7989_v53 = vunpack.i.h.bf16 %v7987_v16  ;;  %v7988_v60 = vunpack.i.l.bf16 %v7987_v16  ;;  %v7993_v59 = vunpack.i.l.bf16 %v11174_v40  ;;  %v7994_v1 = vunpack.i.h.bf16 %v11174_v40 }
 0x15f   : > { %v932_v29 = vsel %vm361_vm5, %v7988_v60, %v882_v4  ;;  %v933_v43 = vsel %vm361_vm5, %v7989_v53, %v883_v61  ;;  %v357_v36 = vsel %vm354_vm12, %v10818_v54, %v7993_v59  ;;  %v355_v4 = vsel %vm354_vm12, %v10889_v33, %v7994_v1 }
 0x160   : > { %v7997_v14 = vpop.permute.xlu0 %7996  ;;  %v11181_v34 = vpop.permute.xlu1 %8001  ;;  %v1201_v3 = vpack.c.bf16 %v933_v43, %v932_v29  ;;  %v372_v10 = vsel %vm15903_vm10, %v7713_v35, %v357_v36  ;;  %v16081_v59 = vunpack.i.l.bf16 %v10921_v20  ;;  %v16082_v33 = vunpack.i.l.bf16 %v10919_v18  ;;  %v1166_v20 = vld [vmem:[%s16079_s1 + $0x20] sm:$0xff] }
 0x161   : > { %v7999_v57 = vunpack.i.h.bf16 %v7997_v14  ;;  %v7998_v23 = vunpack.i.l.bf16 %v7997_v14  ;;  %v8003_v19 = vunpack.i.l.bf16 %v11181_v34  ;;  %v8004_v7 = vunpack.i.h.bf16 %v11181_v34 }
 0x162   : > { %1301 = vmatpush2.bf16.msra.mxu0 %v1201_v3  ;;  %v370_v63 = vsel %vm15903_vm10, %v16082_v33, %v355_v4  ;;  %v6904_v18 = vcombine.high %v1166_v20, %v1166_v20 }
 0x163   : > { %v439_v47 = vsel %vm15906_vm11, %v7998_v23, %v7999_v57  ;;  %v857_v9 = vsel %vm15903_vm10, %v8003_v19, %v845_v42  ;;  %v824_v12 = vsel %vm821_vm13, %v8004_v7, %v7953_v49  ;;  %vm16178_vm11 = vcmask 883712  }
 0x164   : > { %v8007_v39 = vpop.permute.xlu0 %8006  ;;  %v8012_v24 = vpop.permute.xlu1 %8011  ;;  %v1197_v2 = vpack.c.bf16 %v857_v9, %v856_v46  ;;  %v451_v27 = vsel %vm15903_vm10, %v7719_v48, %v439_v47  ;;  %v9972_v46 = vld [vmem:[%s16079_s1] ss:$16 sps:$4 sm:$0xff]  }
 0x165   : > { %v8009_v22 = vunpack.i.h.bf16 %v8007_v39  ;;  %v8014_v37 = vunpack.i.h.bf16 %v8012_v24  ;;  %v1173_v11 = vpack.c.bf16 %v451_v27, %v372_v10  ;;  %v8013_v21 = vunpack.i.l.bf16 %v8012_v24 }
 0x166   : > { %7105 = vmatprep.subr.bf16.mxu1 %v1197_v2  ;;  %v8008_v35 = vunpack.i.l.bf16 %v8007_v39 }
 0x167   : > { %v855_v44 = vsel %vm365_vm1, %v8009_v22, %v824_v12  ;;  %v934_v48 = vsel %vm365_vm1, %v8014_v37, %v903_v5  ;;  %7106 = vmatpush3.bf16.msra.mxu1 %v1173_v11  ;;  %v881_v49 = vsel %vm880_vm15, %v8013_v21, %v8014_v37 }
 0x168   : > { %v8017_v8 = vpop.permute.xlu0 %8016  ;;  %v8022_v6 = vpop.permute.xlu1 %8021  ;;  %v1199_v30 = vpack.c.bf16 %v934_v48, %v855_v44  ;;  %v802_v45 = vsel %vm799_vm7, %v8008_v35, %v8009_v22 }
 0x169   : > { %v8019_v32 = vunpack.i.h.bf16 %v8017_v8  ;;  %v8018_v62 = vunpack.i.l.bf16 %v8017_v8  ;;  %v8024_v41 = vunpack.i.h.bf16 %v8022_v6  ;;  %v8023_v13 = vunpack.i.l.bf16 %v8022_v6 }
 0x16a   : > { %1302 = vmatprep.subr.bf16.mxu0 %v1199_v30 }
 0x16b   : > { %v764_v29 = vsel %vm762_vm6, %v8018_v62, %v8019_v32  ;;  %v765_v43 = vsel %vm762_vm6, %v8023_v13, %v8024_v41  ;;  %vm16172_vm6 = vcmask 932864  }
 0x16c   : > { %v8027_v15 = vpop.permute.xlu0 %8026  ;;  %v860_v17 = vpop.permute.xlu1 %859 }
 0x16d   : > { %v8028_v56 = vunpack.i.l.bf16 %v8027_v15  ;;  %v931_v26 = vsel %vm361_vm5, %v860_v17, %v881_v49  ;;  %v8029_v37 = vunpack.i.h.bf16 %v8027_v15 }
 0x16f   : > { %v852_v51 = vsel %vm361_vm5, %v8028_v56, %v802_v45  ;;  %v7579_v45 = vunpack.i.h.bf16 %v10653_v50 }
 0x170   : > { %v1198_v16 = vpack.c.bf16 %v931_v26, %v852_v51  ;;  %v349_v53 = vpop.permute.xlu0 %348  ;;  %v8032_v60 = vpop.permute.xlu1 %8031 }
 0x171   : > { %v356_v40 = vsel %vm354_vm12, %v10887_v28, %v349_v53  ;;  %v8034_v0 = vunpack.i.h.bf16 %v8032_v60  ;;  %v8033_v31 = vunpack.i.l.bf16 %v8032_v60 }
 0x172   : > { %v371_v61 = vsel %vm15903_vm10, %v16081_v59, %v356_v40  ;;  %1303 = vmatpush2.bf16.msra.mxu0 %v1198_v16 }
 0x173   : > { %v776_v14 = vsel %vm15903_vm10, %v8033_v31, %v764_v29  ;;  %v777_v3 = vsel %vm15903_vm10, %v8034_v0, %v765_v43  ;;  %v1170_v25 = vpack.c.bf16 %v371_v61, %v370_v63  ;;  %v16083_v61 = vmov 0  }
 0x174   : > { %v8037_v28 = vpop.permute.xlu0 %8036  ;;  %v8042_v57 = vpop.permute.xlu1 %8041  ;;  %v1194_v23 = vpack.c.bf16 %v777_v3, %v776_v14 }
 0x175   : > { %v8038_v36 = vunpack.i.l.bf16 %v8037_v28  ;;  %v8044_v7 = vunpack.i.h.bf16 %v8042_v57  ;;  %v8043_v42 = vunpack.i.l.bf16 %v8042_v57  ;;  %v8039_v47 = vunpack.i.h.bf16 %v8037_v28 }
 0x176   : > { %7107 = vmatprep.subr.bf16.mxu1 %v1194_v23 }
 0x177   : > { %7108 = vmatpush3.bf16.msra.mxu1 %v1170_v25  ;;  %v822_v24 = vsel %vm821_vm13, %v8038_v36, %v7954_v58  ;;  %v800_v22 = vsel %vm799_vm7, %v8043_v42, %v8044_v7  ;;  %v823_v10 = vsel %vm821_vm13, %v8039_v47, %v8003_v19  ;;  %v6903_v19 = vcombine.low %v1166_v20, %v1166_v20 }
 0x178   : > { %v8047_v9 = vpop.permute.xlu0 %8046  ;;  %v781_v39 = vpop.permute.xlu1 %780  ;;  %v853_v12 = vsel %vm365_vm1, %v8044_v7, %v822_v24  ;;  %v850_v55 = vsel %vm361_vm5, %v8029_v37, %v800_v22 }
 0x179   : > { %v8049_v2 = vunpack.i.h.bf16 %v8047_v9  ;;  %v8048_v27 = vunpack.i.l.bf16 %v8047_v9 }
 0x17a   : > { %1411 = vmatmul.mubr.bf16.vlgmr.msra.gmra.mxu1 %v9972_v46 }
 0x17b   : > { %v801_v11 = vsel %vm799_vm7, %v8048_v27, %v8049_v2  ;;  %v854_v5 = vsel %vm365_vm1, %v8049_v2, %v823_v10  ;;  %1418 = vmatprep.mubr.bf16.mxu1 %v6904_v18 }
 0x17c   : > { %v851_v58 = vsel %vm361_vm5, %v781_v39, %v801_v11  ;;  %v8052_v44 = vpop.permute.xlu0 %8051  ;;  %v8057_v48 = vpop.permute.xlu1 %8056  ;;  %v1196_v21 = vpack.c.bf16 %v854_v5, %v853_v12 }
 0x17d   : > { %v1195_v8 = vpack.c.bf16 %v851_v58, %v850_v55  ;;  %v8053_v6 = vunpack.i.l.bf16 %v8052_v44  ;;  %v8059_v30 = vunpack.i.h.bf16 %v8057_v48  ;;  %v8054_v34 = vunpack.i.h.bf16 %v8052_v44 }
 0x17e   : > { %v8058_v35 = vunpack.i.l.bf16 %v8057_v48  ;;  %1304 = vmatprep.subr.bf16.mxu0 %v1196_v21 }
 0x17f   : > { %1305 = vmatpush2.bf16.msra.mxu0 %v1195_v8  ;;  %v742_v17 = vsel %vm740_vm2, %v8053_v6, %v8033_v31  ;;  %v743_v62 = vsel %vm740_vm2, %v8054_v34, %v8034_v0 }
 0x180   : > { %v8062_v15 = vpop.permute.xlu0 %8061  ;;  %v720_v56 = vsel %vm718_vm3, %v8058_v35, %v8059_v30  ;;  %v773_v13 = vsel %vm365_vm1, %v8059_v30, %v742_v17 }
 0x181   : > { %v8064_v49 = vunpack.i.h.bf16 %v8062_v15  ;;  %v8063_v1 = vunpack.i.l.bf16 %v8062_v15  ;;  %v770_v26 = vsel %vm361_vm5, %v7579_v45, %v720_v56 }
 0x182   : > { %1419 = vmatmul.mubr.bf16.gmra.mxu1 %v6903_v19  ;;  %v702_v32 = vpop.permute.xlu1 %701 }
 0x183   : > { %v721_v41 = vsel %vm718_vm3, %v8063_v1, %v8064_v49  ;;  %v774_v51 = vsel %vm365_vm1, %v8064_v49, %v743_v62  ;;  %7347 = vmatprep.mubr.msk.bf16.mxu1 %vm1259_vm8, %v10862_v38  ;;  %vm1598_vm1 = vcmask 261120  }
 0x184   : > { %v771_v16 = vsel %vm361_vm5, %v702_v32, %v721_v41  ;;  %v8067_v53 = vpop.permute.xlu0 %8066  ;;  %v1193_v60 = vpack.c.bf16 %v774_v51, %v773_v13  ;;  %vm1594_vm5 = vcmask 654336  }
 0x185   : > { %v1192_v50 = vpack.c.bf16 %v771_v16, %v770_v26  ;;  %v8069_v4 = vunpack.i.h.bf16 %v8067_v53  ;;  %v8068_v40 = vunpack.i.l.bf16 %v8067_v53 }
 0x186   : > { %1306 = vmatprep.subr.bf16.mxu0 %v1193_v60 }
 0x187   : > { %v1149_v0 = vsel %vm15907_vm9, %v8068_v40, %v8069_v4  ;;  %1307 = vmatpush2.bf16.msra.mxu0 %v1192_v50  ;;  %vm16179_vm9 = vcmask 859136  }
 0x188   : > { %v1161_v31 = vsel %vm15903_vm10, %v10818_v54, %v1149_v0  ;;  %vm16175_vm10 = vcmask 932864  }
 0x189   : > { %v1218_v59 = vpack.c.bf16 %v1161_v31, %v1161_v31 }
 0x18a   : > { %1309 = vmatmul.mubr.bf16.vlgmr.msra.gmra.mxu0 %v9972_v46 }
 0x18b   : > { %7477 = vmatprep.subr.msk.bf16.mxu1 %vm15969_vm14, %v1218_v59  ;;  %v1274_v38 = vsel %vm15969_vm14, %v1218_v59, 0  ;;  %1318 = vmatprep.mubr.bf16.mxu0 %v6904_v18 }
 0x18c   : > { %7346 = vmatpush3.bf16.msra.mxu1 %v1274_v38 }
 0x18f   : > { %7348 = vmatmul.mubr.msk.bf16.vlgmr.msra.gmra.mxu1 %vm1259_vm8, %v10905_v52  ;;  %v1222_v47 = vpop.permute.xlu1 %1221 }
 0x191   : > { %v11274_v9 = vpop.permute.xlu0 %1231 }
 0x192   : > { %1319 = vmatmul.mubr.bf16.gmra.mxu0 %v6903_v19 }
 0x193   : > { %2496 = vmatprep.mubr.bf16.mxu0 %v16083_v61  ;;  %v11279_v11 = vpop.permute.xlu1 %1226 }
 0x1af   : > { %v11268_v29 = vpop.f32.mrf.mxu1 }
 0x1b1   : > { %v1363_v43 = vpop.f32.mrf.mxu1 }
 0x1b3   : > { %v11270_v14 = vpop.f32.mrf.mxu1 }
 0x1b5   : > { %v1367_v54 = vpop.f32.mrf.mxu1 }
 0x1b7   : > { %v11272_v3 = vpop.f32.mrf.mxu1 }
 0x1b9   : > { %v1373_v33 = vpop.f32.mrf.mxu1 }
 0x1bb   : > { %v1375_v63 = vpop.f32.mrf.mxu1 }
 0x1bd   : > { %v1376_v28 = vpop.f32.mrf.mxu1 }
 0x23a   : > { %v7109_v57 = vpop.f32.mrf.mxu1 }
 0x23c   : > { %v7110_v23 = vpop.f32.mrf.mxu1 }
 0x23d   : > { %v7111_v39 = vadd.f32 %v7110_v23, %v7109_v57 }
 0x23e   : > { %v7112_v20 = vpop.f32.mrf.mxu1 }
 0x23f   : > { %v1413_v55 = vadd.f32 %v7111_v39, %v1222_v47 }
 0x240   : > { %v7113_v25 = vpop.f32.mrf.mxu1 }
 0x241   : > { %v7114_v10 = vadd.f32 %v7113_v25, %v7112_v20 }
 0x242   : > { %v7115_v36 = vpop.f32.mrf.mxu1 }
 0x243   : > { %v1416_v15 = vadd.f32 %v7114_v10, %v11279_v11 }
 0x244   : > { %v7116_v52 = vpop.f32.mrf.mxu1 }
 0x245   : > { %v7117_v46 = vadd.f32 %v7116_v52, %v7115_v36 }
 0x246   : > { %v7118_v7 = vpop.f32.mrf.mxu1 }
 0x247   : > { %v1421_v22 = vadd.f32 %v7117_v46, %v11274_v9 }
 0x248   : > { %v7119_v42 = vpop.f32.mrf.mxu1 }
 0x24a   : > { %v1310_v18 = vpop.f32.mrf.mxu0 }
 0x24c   : > { %v1312_v24 = vpop.f32.mrf.mxu0 }
 0x24d   : > { %v1313_v2 = vadd.f32 %v1312_v24, %v1222_v47 }
 0x24e   : > { %v11276_v27 = vpop.f32.mrf.mxu0 }
 0x24f   : > { %v7349_v37 = vpop.f32.mrf.mxu1  ;;  %v11281_v58 = vadd.f32 %v1363_v43, %v1313_v2  ;;  %v1315_v2 = vadd.f32 %v11276_v27, %v11279_v11 }
 0x250   : > { %v1469_v12 = vadd.f32 %v7349_v37, %v1421_v22  ;;  %v1316_v5 = vpop.f32.mrf.mxu0 }
 0x251   : > { %v1317_v44 = vadd.f32 %v1316_v5, %v11279_v11  ;;  %v1460_v48 = vpop.f32.mrf.mxu1  ;;  %v6912_v17 = vmul.f32 -1.442695, %v11281_v58 }
 0x252   : > { %v6919_v21 = vmul.f32 -1.442695, %v1469_v12  ;;  %v1461_v8 = vadd.f32 %v1460_v48, %v1413_v55  ;;  %v11284_v6 = vpop.f32.mrf.mxu0 }
 0x253   : > { %v1368_v30 = vadd.f32 %v1367_v54, %v1317_v44  ;;  %v7350_v34 = vpop.f32.mrf.mxu1  ;;  %v1311_v54 = vadd.f32 %v1310_v18, %v1222_v47 }
 0x254   : > { %10031 = vpow2.f32 %v6919_v21  ;;  %v6913_v35 = vmul.f32 -1.442695, %v1461_v8  ;;  %v1322_v19 = vpop.f32.mrf.mxu0 }
 0x255   : > { %v6915_v49 = vmul.f32 -1.442695, %v1368_v30  ;;  %v1323_v1 = vadd.f32 %v1322_v19, %v11274_v9  ;;  %v1463_v56 = vpop.f32.mrf.mxu1  ;;  %v1321_v19 = vadd.f32 %v11284_v6, %v11274_v9 }
 0x256   : > { %10033 = vpow2.f32 %v6913_v35  ;;  %v1464_v45 = vadd.f32 %v1463_v56, %v1416_v15  ;;  %v1324_v32 = vpop.f32.mrf.mxu0 }
 0x257   : > { %10035 = vpow2.f32 %v6915_v49  ;;  %v1374_v62 = vadd.f32 %v1373_v33, %v1323_v1  ;;  %v1362_v33 = vadd.f32 %v11268_v29, %v1311_v54  ;;  %v1372_v1 = vadd.f32 %v11272_v3, %v1321_v19 }
 0x258   : > { %v6916_v41 = vmul.f32 -1.442695, %v1464_v45  ;;  %v1325_v13 = vpop.f32.mrf.mxu0  ;;  %10037 = vpow2.f32 %v6912_v17 }
 0x259   : > { %v6918_v51 = vmul.f32 -1.442695, %v1374_v62  ;;  %v6911_v23 = vmul.f32 -1.442695, %v1362_v33  ;;  %v6917_v56 = vmul.f32 -1.442695, %v1372_v1 }
 0x25a   : > { %10039 = vpow2.f32 %v6916_v41 }
 0x25b   : > { %10041 = vpow2.f32 %v6918_v51 }
 0x261   : > { %v10032_v26 = vpop.eup %10031 }
 0x262   : > { %v1509_v16 = vadd.f32 1.0, %v10032_v26 }
 0x263   : > { %v10034_v53 = vpop.eup %10033 }
 0x264   : > { %v10036_v60 = vpop.eup %10035  ;;  %10043 = vrcp.f32 %v1509_v16  ;;  %v1503_v50 = vadd.f32 1.0, %v10034_v53 }
 0x265   : > { %v1505_v4 = vadd.f32 1.0, %v10036_v60  ;;  %v10038_v40 = vpop.eup %10037 }
 0x266   : > { %10045 = vrcp.f32 %v1503_v50  ;;  %v1502_v38 = vadd.f32 1.0, %v10038_v40 }
 0x267   : > { %v10040_v0 = vpop.eup %10039  ;;  %10047 = vrcp.f32 %v1505_v4 }
 0x268   : > { %v10042_v31 = vpop.eup %10041  ;;  %v1506_v59 = vadd.f32 1.0, %v10040_v0 }
 0x269   : > { %v1508_v43 = vadd.f32 1.0, %v10042_v31 }
 0x26a   : > { %10049 = vrcp.f32 %v1506_v59 }
 0x26b   : > { %10051 = vrcp.f32 %v1508_v43 }
 0x26c   : > { %10053 = vrcp.f32 %v1502_v38 }
 0x26d   : > { %10055 = vpow2.f32 %v6911_v23 }
 0x271   : > { %v10044_v63 = vpop.eup %10043 }
 0x272   : > { %v11290_v28 = vmul.f32 %v10044_v63, %v1469_v12  ;;  %v1366_v12 = vadd.f32 %v11270_v14, %v1315_v2 }
 0x273   : > { %v10046_v57 = vpop.eup %10045 }
 0x274   : > { %v11292_v20 = vmul.f32 %v10046_v57, %v1461_v8  ;;  %1921 = vrot.lane.b32.xlu1 %v11290_v28, %s10324_s9  ;;  %v10048_v25 = vpop.eup %10047 }
 0x275   : > { %v11300_v7 = vmul.f32 %v10048_v25, %v1368_v30 }
 0x276   : > { %1785 = vrot.lane.b32.xlu0 %v11292_v20, %s10328_s25  ;;  %v8072_v36 = vpack.i.bf16 %v11292_v20, %v11290_v28 }
 0x277   : > { %v10050_v52 = vpop.eup %10049  ;;  %v8247_v39 = vpack.i.bf16 %v11300_v7, %v11292_v20 }
 0x278   : > { %v10052_v29 = vpop.eup %10051  ;;  %v1533_v42 = vmul.f32 %v10050_v52, %v1464_v45  ;;  %8073 = vrot.lane.b32.xlu1 %v8072_v36, %s10323_s8 }
 0x279   : > { %v10054_v47 = vpop.eup %10053  ;;  %v11305_v46 = vmul.f32 %v10052_v29, %v1374_v62 }
 0x27a   : > { %2181 = vrot.lane.b32.xlu0 %v11292_v20, %s10325_s15  ;;  %v11309_v18 = vpack.i.bf16 %v1533_v42, %v11300_v7  ;;  %v1529_v24 = vmul.f32 %v10054_v47, %v11281_v58  ;;  %v10056_v11 = vpop.eup %10055  ;;  %v8097_v5 = vpack.i.bf16 %v1533_v42, %v11292_v20  ;;  %v6914_v58 = vmul.f32 -1.442695, %v1366_v12 }
 0x27b   : > { %v11323_v37 = vpack.i.bf16 %v11290_v28, %v11305_v46  ;;  %v8332_v10 = vpack.i.bf16 %v11305_v46, %v11290_v28  ;;  %v11331_v27 = vpack.i.bf16 %v11305_v46, %v11300_v7  ;;  %v1501_v44 = vadd.f32 1.0, %v10056_v11 }
 0x27c   : > { %8078 = vrot.lane.b32.xlu1 %v8072_v36, %s10321_s7  ;;  %v11319_v22 = vpack.i.bf16 %v11300_v7, %v1529_v24  ;;  %v11338_v55 = vpack.i.bf16 %v11292_v20, %v1529_v24  ;;  %v8102_v14 = vpack.i.bf16 %v11290_v28, %v1533_v42  ;;  %10057 = vpow2.f32 %v6914_v58 }
 0x27d   : > { %10059 = vrcp.f32 %v1501_v44  ;;  %v8162_v15 = vpack.i.bf16 %v1529_v24, %v11290_v28 }
 0x27e   : > { %1653 = vrot.lane.b32.xlu0 %v11292_v20, %s15851_s18 }
 0x280   : > { %8083 = vrot.lane.b32.xlu1 %v8072_v36, %s15849_s23 }
 0x282   : > { %2049 = vrot.lane.b32.xlu0 %v11292_v20, %s10334_s26 }
 0x284   : > { %8088 = vrot.lane.b32.xlu1 %v8072_v36, %s10327_s12 }
 0x286   : > { %8098 = vrot.lane.b32.xlu0 %v8097_v5, %s10324_s9  ;;  %s16093_s9 = smov 116  }
 0x288   : > { %8093 = vrot.lane.b32.xlu1 %v8072_v36, %s10337_s24 }
 0x289   : > { %v10058_v48 = vpop.eup %10057 }
 0x28a   : > { %8103 = vrot.lane.b32.xlu0 %v8102_v14, %s10328_s25  ;;  %v10060_v21 = vpop.eup %10059  ;;  %v1504_v8 = vadd.f32 1.0, %v10058_v48  ;;  %s16087_s25 = smov 119  }
 0x28b   : > { %v11352_v30 = vmul.f32 %v10060_v21, %v1362_v33 }
 0x28c   : > { %1853 = vrot.lane.b32.xlu1 %v1533_v42, %s10323_s8  ;;  %10061 = vrcp.f32 %v1504_v8  ;;  %s16092_s8 = smov 115  }
 0x28d   : > { %16084 = vst [vmem:[#allocation7_spill] sm:$0xff] %v11352_v30  ;;  %v8127_v34 = vpack.i.bf16 %v11352_v30, %v1533_v42  ;;  %v11368_v35 = vpack.i.bf16 %v11352_v30, %v1529_v24  ;;  %10063 = vpow2.f32 %v6917_v56 }
 0x28e   : > { %1721 = vrot.lane.b32.xlu0 %v1533_v42, %s15849_s23  ;;  %s16100_s23 = smov 109  }
 0x290   : > { %2231 = vrot.lane.b32.xlu1 %v1533_v42, %s10321_s7  ;;  %s16091_s7 = smov 117  }
 0x292   : > { %8108 = vrot.lane.b32.xlu0 %v8102_v14, %s10325_s15  ;;  %s16085_s15 = smov 127  }
 0x294   : > { %8113 = vrot.lane.b32.xlu1 %v8102_v14, %s15851_s18  ;;  %s16101_s18 = smov 100  }
 0x296   : > { %2117 = vrot.lane.b32.xlu0 %v1533_v42, %s10327_s12  ;;  %s16086_s12 = smov 108  }
 0x298   : > { %8118 = vrot.lane.b32.xlu1 %v8097_v5, %s15859_s28  ;;  %v11587_v5 = vld [vmem:[%s16079_s1 + $0x84] ss:$16 sps:$4 sm:$0xff]  }
 0x299   : > { %v10062_v17 = vpop.eup %10061  ;;  %16125 = vst [vmem:[#allocation23_spill] sm:$0xff] %v11587_v5  ;;  %2433 = vmatprep.mubr.bf16.mxu1 %v11587_v5 }
 0x29a   : > { %8123 = vrot.lane.b32.xlu0 %v8102_v14, %s10334_s26  ;;  %s16088_s26 = smov 104   ;;  %v11376_v49 = vmul.f32 %v10062_v17, %v1366_v12  ;;  %v10064_v3 = vpop.eup %10063 }
 0x29b   : > { %v1507_v6 = vadd.f32 1.0, %v10064_v3 }
 0x29c   : > { %1985 = vrot.lane.b32.xlu1 %v1533_v42, %s10337_s24  ;;  %16089 = vst [vmem:[#allocation8_spill] sm:$0xff] %v11376_v49  ;;  %s16090_s24 = smov 105   ;;  %v11387_v9 = vpack.i.bf16 %v11376_v49, %v11352_v30 }
 0x29d   : > { %10065 = vrcp.f32 %v1507_v6  ;;  %v269_v6 = vld [vmem:[%s16080_s2 + $0x18] sm:$0xff] }
 0x29e   : > { %1737 = vrot.lane.b32.xlu0 %v11352_v30, %s15857_s19 }
 0x2a0   : > { %1605 = vrot.lane.b32.xlu1 %v11352_v30, %s16085_s15 }
 0x2a2   : > { %8128 = vrot.lane.b32.xlu0 %v8127_v34, %s16086_s12 }
 0x2a4   : > { %2133 = vrot.lane.b32.xlu1 %v11352_v30, %s16087_s25 }
 0x2a6   : > { %8133 = vrot.lane.b32.xlu0 %v11338_v55, %s15855_s13  ;;  %s16103_s13 = smov 124  }
 0x2a8   : > { %8143 = vrot.lane.b32.xlu1 %v11338_v55, %s16088_s26 }
 0x2aa   : > { %8138 = vrot.lane.b32.xlu0 %v11368_v35, %s15853_s14  ;;  %s16102_s14 = smov 118   ;;  %v10066_v45 = vpop.eup %10065 }
 0x2ab   : > { %v11429_v32 = vmul.f32 %v10066_v45, %v1372_v1 }
 0x2ac   : > { %8163 = vrot.lane.b32.xlu1 %v8162_v15, %s16086_s12 }
 0x2ad   : > { %16104 = vst [vmem:[#allocation9_spill] sm:$0xff] %v11429_v32  ;;  %v8277_v62 = vpack.i.bf16 %v11352_v30, %v11429_v32  ;;  %v11444_v41 = vpack.i.bf16 %v11429_v32, %v11376_v49  ;;  %v11469_v60 = vpack.i.bf16 %v11429_v32, %v11305_v46  ;;  %v8352_v23 = vpack.i.bf16 %v11305_v46, %v11429_v32 }
 0x2ae   : > { %8148 = vrot.lane.b32.xlu0 %v11338_v55, %s16090_s24 }
 0x2b0   : > { %8173 = vrot.lane.b32.xlu1 %v11368_v35, %s16091_s7 }
 0x2b2   : > { %8153 = vrot.lane.b32.xlu0 %v11368_v35, %s16092_s8 }
 0x2b4   : > { %8203 = vrot.lane.b32.xlu1 %v11387_v9, %s16093_s9 }
 0x2b6   : > { %8158 = vrot.lane.b32.xlu0 %v11338_v55, %s16094_s29 }
 0x2b8   : > { %1673 = vrot.lane.b32.xlu1 %v11376_v49, %s16095_s27 }
 0x2ba   : > { %8168 = vrot.lane.b32.xlu0 %v11338_v55, %s16096_s17 }
 0x2bc   : > { %8213 = vrot.lane.b32.xlu1 %v11387_v9, %s16097_s30 }
 0x2be   : > { %8178 = vrot.lane.b32.xlu0 %v11338_v55, %s16098_s20 }
 0x2c0   : > { %8223 = vrot.lane.b32.xlu1 %v11319_v22, %s16099_s10 }
 0x2c2   : > { %8183 = vrot.lane.b32.xlu0 %v11368_v35, %s16100_s23 }
 0x2c4   : > { %8233 = vrot.lane.b32.xlu1 %v11309_v18, %s16094_s29 }
 0x2c6   : > { %8188 = vrot.lane.b32.xlu0 %v11338_v55, %s16101_s18 }
 0x2c8   : > { %8243 = vrot.lane.b32.xlu1 %v11309_v18, %s16096_s17 }
 0x2ca   : > { %8193 = vrot.lane.b32.xlu0 %v11387_v9, %s15861_s16  ;;  %s16119_s16 = smov 111  }
 0x2cc   : > { %8248 = vrot.lane.b32.xlu1 %v8247_v39, %s16086_s12 }
 0x2ce   : > { %8198 = vrot.lane.b32.xlu0 %v11387_v9, %s16099_s10 }
 0x2d0   : > { %8253 = vrot.lane.b32.xlu1 %v11319_v22, %s16102_s14 }
 0x2d2   : > { %1805 = vrot.lane.b32.xlu0 %v11376_v49, %s16103_s13 }
 0x2d4   : > { %8258 = vrot.lane.b32.xlu1 %v11319_v22, %s15859_s28 }
 0x2d6   : > { %8208 = vrot.lane.b32.xlu0 %v11387_v9, %s16102_s14 }
 0x2d8   : > { %8263 = vrot.lane.b32.xlu1 %v11309_v18, %s16098_s20 }
 0x2da   : > { %2204 = vrot.lane.b32.xlu0 %v11376_v49, %s16086_s12 }
 0x2dc   : > { %8268 = vrot.lane.b32.xlu1 %v11309_v18, %s16101_s18 }
 0x2de   : > { %8218 = vrot.lane.b32.xlu0 %v11309_v18, %s16088_s26 }
 0x2e0   : > { %8278 = vrot.lane.b32.xlu1 %v8277_v62, %s16103_s13 }
 0x2e2   : > { %8228 = vrot.lane.b32.xlu0 %v11309_v18, %s16090_s24 }
 0x2e4   : > { %8283 = vrot.lane.b32.xlu1 %v11444_v41, %s16092_s8 }
 0x2e6   : > { %8238 = vrot.lane.b32.xlu0 %v11319_v22, %s16093_s9  ;;  %v11450_v13 = vpop.permute.xlu1 %1921 }
 0x2e7   : > { %16105 = vst [vmem:[#allocation10_spill] sm:$0xff] %v11450_v13 }
 0x2e8   : > { %v11452_v51 = vpop.permute.xlu0 %1785  ;;  %8293 = vrot.lane.b32.xlu1 %v8277_v62, %s16095_s27 }
 0x2ea   : > { %8273 = vrot.lane.b32.xlu0 %v11319_v22, %s16097_s30  ;;  %v11457_v26 = vpop.permute.xlu1 %8073 }
 0x2ec   : > { %v11459_v16 = vpop.permute.xlu0 %2181  ;;  %8323 = vrot.lane.b32.xlu1 %v11323_v37, %s16088_s26 }
 0x2ee   : > { %8288 = vrot.lane.b32.xlu0 %v11444_v41, %s15857_s19  ;;  %v11465_v53 = vpop.permute.xlu1 %8078  ;;  %s16111_s19 = smov 101  }
 0x2ef   : > { %16106 = vst [vmem:[#allocation11_spill] sm:$0xff] %v11465_v53 }
 0x2f0   : > { %v11471_v50 = vpop.permute.xlu0 %1653  ;;  %8328 = vrot.lane.b32.xlu1 %v11469_v60, %s16099_s10 }
 0x2f2   : > { %8298 = vrot.lane.b32.xlu0 %v11444_v41, %s16091_s7  ;;  %v11477_v4 = vpop.permute.xlu1 %8083 }
 0x2f4   : > { %v11479_v40 = vpop.permute.xlu0 %2049  ;;  %8333 = vrot.lane.b32.xlu1 %v8332_v10, %s15859_s28  ;;  %s16112_s28 = smov 120  }
 0x2f5   : > { %16107 = vst [vmem:[#allocation12_spill] sm:$0xff] %v11479_v40 }
 0x2f6   : > { %8303 = vrot.lane.b32.xlu0 %v11444_v41, %s16085_s15  ;;  %v11487_v0 = vpop.permute.xlu1 %8088 }
 0x2f7   : > { %16108 = vst [vmem:[#allocation13_spill] sm:$0xff] %v11487_v0 }
 0x2f8   : > { %v11489_v31 = vpop.permute.xlu0 %8098  ;;  %8338 = vrot.lane.b32.xlu1 %v11323_v37, %s16090_s24 }
 0x2f9   : > { %16109 = vst [vmem:[#allocation14_spill] sm:$0xff] %v11489_v31 }
 0x2fa   : > { %8308 = vrot.lane.b32.xlu0 %v11444_v41, %s16100_s23  ;;  %v11495_v59 = vpop.permute.xlu1 %8093 }
 0x2fb   : > { %16110 = vst [vmem:[#allocation15_spill] sm:$0xff] %v11495_v59 }
 0x2fc   : > { %v11497_v38 = vpop.permute.xlu0 %8103  ;;  %8348 = vrot.lane.b32.xlu1 %v11331_v27, %s16092_s8 }
 0x2fe   : > { %8313 = vrot.lane.b32.xlu0 %v11444_v41, %s16087_s25  ;;  %v11503_v43 = vpop.permute.xlu1 %1853 }
 0x300   : > { %v11505_v54 = vpop.permute.xlu0 %1721  ;;  %8358 = vrot.lane.b32.xlu1 %v11309_v18, %s16111_s19 }
 0x302   : > { %8318 = vrot.lane.b32.xlu0 %v8277_v62, %s16112_s28  ;;  %v11510_v33 = vpop.permute.xlu1 %2231 }
 0x303   : > { %16113 = vst [vmem:[#allocation16_spill] sm:$0xff] %v11510_v33 }
 0x304   : > { %v11512_v63 = vpop.permute.xlu0 %8108  ;;  %8363 = vrot.lane.b32.xlu1 %v11323_v37, %s16094_s29  ;;  %s16283_s29 = smov 108  }
 0x305   : > { %16114 = vst [vmem:[#allocation17_spill] sm:$0xff] %v11512_v63 }
 0x306   : > { %8343 = vrot.lane.b32.xlu0 %v11469_v60, %s16086_s12  ;;  %v11518_v28 = vpop.permute.xlu1 %8113  ;;  %s16282_s12 = smov 125  }
 0x307   : > { %16115 = vst [vmem:[#allocation18_spill] sm:$0xff] %v11518_v28 }
 0x308   : > { %v11520_v57 = vpop.permute.xlu0 %2117  ;;  %8368 = vrot.lane.b32.xlu1 %v11469_v60, %s16093_s9 }
 0x309   : > { %16116 = vst [vmem:[#allocation19_spill] sm:$0xff] %v11520_v57 }
 0x30a   : > { %8353 = vrot.lane.b32.xlu0 %v8352_v23, %s16102_s14  ;;  %v11527_v20 = vpop.permute.xlu1 %8118  ;;  %v10243_v23 = vld [vmem:[%s16080_s2 + $0x10] sm:$0xff] }
 0x30c   : > { %v11529_v25 = vpop.permute.xlu0 %8123  ;;  %8383 = vrot.lane.b32.xlu1 %v11444_v41, %s15863_s11  ;;  %s16120_s11 = smov 122  }
 0x30d   : > { %16117 = vst [vmem:[#allocation20_spill] sm:$0xff] %v11529_v25 }
 0x30e   : > { %2069 = vrot.lane.b32.xlu0 %v11376_v49, %s16112_s28  ;;  %v11535_v36 = vpop.permute.xlu1 %1985 }
 0x30f   : > { %16118 = vst [vmem:[#allocation21_spill] sm:$0xff] %v11535_v36 }
 0x310   : > { %v11537_v52 = vpop.permute.xlu0 %1737  ;;  %8388 = vrot.lane.b32.xlu1 %v11338_v55, %s16111_s19 }
 0x312   : > { %8373 = vrot.lane.b32.xlu0 %v11323_v37, %s16096_s17  ;;  %v11543_v29 = vpop.permute.xlu1 %1605 }
 0x314   : > { %v11545_v7 = vpop.permute.xlu0 %8128  ;;  %8393 = vrot.lane.b32.xlu1 %v11331_v27, %s16091_s7 }
 0x316   : > { %8378 = vrot.lane.b32.xlu0 %v11444_v41, %s16119_s16  ;;  %v11551_v42 = vpop.permute.xlu1 %2133 }
 0x318   : > { %v11553_v47 = vpop.permute.xlu0 %8133  ;;  %8398 = vrot.lane.b32.xlu1 %v11368_v35, %s16119_s16 }
 0x31a   : > { %8403 = vrot.lane.b32.xlu0 %v8277_v62, %s16120_s11  ;;  %v11558_v46 = vpop.permute.xlu1 %8143  ;;  %v10344_v62 = vmov 1  }
 0x31b   : > { %8487 = vset.pattern.permute.xlu0 %v10344_v62  ;;  %8488 = vset.pattern.permute.xlu1 %v10344_v62 }
 0x31c   : > { %v11560_v39 = vpop.permute.xlu0 %8138  ;;  %2001 = vrot.lane.b32.xlu1 %v11352_v30, %s16121_s0 }
 0x31e   : > { %8408 = vrot.lane.b32.xlu0 %v11338_v55, %s16122_s3  ;;  %v11566_v24 = vpop.permute.xlu1 %8163 }
 0x31f   : > { %16123 = vst [vmem:[#allocation22_spill] sm:$0xff] %v11566_v24 }
 0x320   : > { %v11568_v2 = vpop.permute.xlu0 %8148  ;;  %8418 = vrot.lane.b32.xlu1 %v11331_v27, %s16100_s23  ;;  %s16280_s23 = smov 98  }
 0x322   : > { %8413 = vrot.lane.b32.xlu0 %v11323_v37, %s16098_s20  ;;  %v11574_v10 = vpop.permute.xlu1 %8173 }
 0x324   : > { %v11576_v12 = vpop.permute.xlu0 %8153  ;;  %8423 = vrot.lane.b32.xlu1 %v11323_v37, %s16101_s18 }
 0x326   : > { %8438 = vrot.lane.b32.xlu0 %v11319_v22, %s16124_s21  ;;  %v11582_v11 = vpop.permute.xlu1 %8203 }
 0x328   : > { %v11589_v55 = vpop.permute.xlu0 %8158  ;;  %8428 = vrot.lane.b32.xlu1 %v11469_v60, %s16097_s30 }
 0x32a   : > { %8443 = vrot.lane.b32.xlu0 %v11323_v37, %s16111_s19  ;;  %v11596_v58 = vpop.permute.xlu1 %1673 }
 0x32b   : > { %16126 = vst [vmem:[#allocation24_spill] sm:$0xff] %v11596_v58  ;;  %v16150_v58 = vunpack.i.h.bf16 %v11457_v26 }
 0x32c   : > { %v11598_v22 = vpop.permute.xlu0 %8168  ;;  %8433 = vrot.lane.b32.xlu1 %v11309_v18, %s16122_s3 }
 0x32e   : > { %8458 = vrot.lane.b32.xlu0 %v11323_v37, %s16122_s3  ;;  %v11604_v44 = vpop.permute.xlu1 %8213 }
 0x32f   : > { %16127 = vst [vmem:[#allocation25_spill] sm:$0xff] %v11604_v44  ;;  %v16137_v44 = vunpack.i.l.bf16 %v11477_v4 }
 0x330   : > { %v11606_v14 = vpop.permute.xlu0 %8178  ;;  %8448 = vrot.lane.b32.xlu1 %v11331_v27, %s16119_s16 }
 0x331   : > { %v11685_v30 = vpack.c.bf16 %v11452_v51, %v16137_v44  ;;  %v16139_v44 = vunpack.i.l.bf16 %v11489_v31 }
 0x332   : > { %8463 = vrot.lane.b32.xlu0 %v11469_v60, %s16124_s21  ;;  %v11612_v48 = vpop.permute.xlu1 %8223 }
 0x333   : > { %16138 = vst [vmem:[#allocation32_spill] sm:$0xff] %v11685_v30  ;;  %v16141_v30 = vunpack.i.l.bf16 %v11487_v0 }
 0x334   : > { %v11614_v21 = vpop.permute.xlu0 %8183  ;;  %8453 = vrot.lane.b32.xlu1 %v11387_v9, %s16124_s21 }
 0x336   : > { %1937 = vrot.lane.b32.xlu0 %v11376_v49, %s16120_s11  ;;  %v11620_v8 = vpop.permute.xlu1 %8233 }
 0x338   : > { %v11622_v34 = vpop.permute.xlu0 %8188  ;;  %8468 = vrot.lane.b32.xlu1 %v11309_v18, %s16128_s6 }
 0x33a   : > { %8473 = vrot.lane.b32.xlu0 %v11323_v37, %s16128_s6  ;;  %v11628_v35 = vpop.permute.xlu1 %8243 }
 0x33c   : > { %v11630_v19 = vpop.permute.xlu0 %8193  ;;  %8478 = vrot.lane.b32.xlu1 %v11331_v27, %s16130_s22 }
 0x33d   : > { %16129 = vst [vmem:[#allocation26_spill] sm:$0xff] %v11630_v19 }
 0x33e   : > { %8483 = vrot.lane.b32.xlu0 %v11444_v41, %s16130_s22  ;;  %v11636_v15 = vpop.permute.xlu1 %8248  ;;  %v11662_v41 = vunpack.i.l.bf16 %v11465_v53 }
 0x340   : > { %v11638_v17 = vpop.permute.xlu0 %8198  ;;  %1873 = vrot.lane.b32.xlu1 %v11429_v32, %s16131_s5  ;;  %16136 = vst [vmem:[#allocation31_spill] sm:$0xff] %v11662_v41  ;;  %v10245_v32 = vld [vmem:[%s16080_s2] sm:$0xff]  ;;  %v8136_v41 = vunpack.i.h.bf16 %v11553_v47 }
 0x342   : > { %v11642_v18 = vpop.permute.xlu1 %8253  ;;  %2320 = vperm.xlu0 %8487, %v10243_v23  }
 0x344   : > { %v11644_v37 = vpop.permute.xlu0 %1805  ;;  %2325 = vperm.xlu1 %8488, %v269_v6   ;;  %v270_v6 = vld [vmem:[%s16080_s2 + $0x20] sm:$0xff] }
 0x346   : > { %v11646_v1 = vpop.permute.xlu1 %8258 }
 0x348   : > { %v11648_v56 = vpop.permute.xlu0 %8208  ;;  %2312 = vperm.xlu1 %8488, %v10245_v32   ;;  %v271_v32 = vld [vmem:[%s16080_s2 + $0x28] sm:$0xff] }
 0x349   : > { %16132 = vst [vmem:[#allocation27_spill] sm:$0xff] %v11648_v56  ;;  %v11750_v56 = vpack.c.bf16 %v11503_v43, %v16150_v58  ;;  %v8145_v58 = vunpack.i.l.bf16 %v11558_v46 }
 0x34a   : > { %v11650_v9 = vpop.permute.xlu1 %8263 }
 0x34b   : > { %16133 = vst [vmem:[#allocation28_spill] sm:$0xff] %v11650_v9  ;;  %v15878_v9 = vunpack.i.l.bf16 %v11457_v26  ;;  %16151 = vst [vmem:[#allocation38_spill] sm:$0xff] %v11750_v56  ;;  %v16157_v56 = vunpack.i.l.bf16 %v11512_v63 }
 0x34c   : > { %v11652_v27 = vpop.permute.xlu0 %2204  ;;  %2330 = vperm.xlu1 %8488, %v270_v6  }
 0x34d   : > { %16134 = vst [vmem:[#allocation29_spill] sm:$0xff] %v11652_v27  ;;  %v10244_v27 = vld [vmem:[%s16080_s2 + $0x8] sm:$0xff]  ;;  %v11700_v5 = vpack.c.bf16 %v16139_v44, %v15878_v9  ;;  %v16143_v44 = vunpack.i.l.bf16 %v11497_v38  ;;  %v16144_v9 = vunpack.i.h.bf16 %v11497_v38  ;;  %s16284_s2 = smov 106  }
 0x34e   : > { %v11654_v3 = vpop.permute.xlu1 %8268  ;;  %2316 = vperm.xlu0 %8487, %v10244_v27   ;;  %v11708_v27 = vpack.c.bf16 %v11459_v16, %v16141_v30 }
 0x34f   : > { %16135 = vst [vmem:[#allocation30_spill] sm:$0xff] %v11654_v3  ;;  %16140 = vst [vmem:[#allocation33_spill] sm:$0xff] %v11700_v5  ;;  %v11720_v62 = vpack.c.bf16 %v16144_v9, %v16143_v44  ;;  %v16146_v5 = vunpack.i.l.bf16 %v11495_v59  ;;  %v8135_v9 = vunpack.i.l.bf16 %v11553_v47  ;;  %v16152_v47 = vunpack.i.h.bf16 %v11477_v4 }
 0x350   : > { %v11659_v45 = vpop.permute.xlu0 %8218  ;;  %16142 = vst [vmem:[#allocation34_spill] sm:$0xff] %v11708_v27  ;;  %v16148_v27 = vunpack.i.h.bf16 %v11489_v31 }
 0x351   : > { %16145 = vst [vmem:[#allocation35_spill] sm:$0xff] %v11720_v62  ;;  %v11726_v30 = vpack.c.bf16 %v11479_v40, %v16146_v5  ;;  %v11741_v5 = vunpack.i.h.bf16 %v11527_v20  ;;  %v11744_v40 = vunpack.i.l.bf16 %v11527_v20  ;;  %v8141_v62 = vunpack.i.h.bf16 %v11560_v39 }
 0x352   : > { %v11670_v49 = vpop.permute.xlu1 %8278  ;;  %v11731_v3 = vpack.c.bf16 %v11450_v13, %v16148_v27  ;;  %v8140_v27 = vunpack.i.l.bf16 %v11560_v39  ;;  %2335 = vperm.xlu0 %8487, %v271_v32   ;;  %v11755_v13 = vpack.c.bf16 %v11505_v54, %v16152_v47  ;;  %v8146_v32 = vunpack.i.h.bf16 %v11558_v46 }
 0x353   : > { %16147 = vst [vmem:[#allocation36_spill] sm:$0xff] %v11726_v30  ;;  %v16154_v30 = vunpack.i.h.bf16 %v11465_v53  ;;  %v1911_v47 = vsel %vm740_vm2, %v8135_v9, %v8136_v41  ;;  %v8220_v61 = vunpack.i.l.bf16 %v11659_v45  ;;  %v16158_v53 = vunpack.i.h.bf16 %v11512_v63 }
 0x354   : > { %v11678_v23 = vpop.permute.xlu0 %8228  ;;  %16149 = vst [vmem:[#allocation37_spill] sm:$0xff] %v11731_v3  ;;  %16153 = vst [vmem:[#allocation39_spill] sm:$0xff] %v11755_v13  ;;  %v8221_v13 = vunpack.i.h.bf16 %v11659_v45  ;;  %v16161_v46 = vunpack.i.h.bf16 %v11518_v28  ;;  %v16163_v39 = vunpack.i.h.bf16 %v11487_v0  ;;  %v1929_v45 = vsel %vm1598_vm1, %v8140_v27, %v1911_v47 }
 0x355   : > { %v11764_v6 = vpack.c.bf16 %v11510_v33, %v16154_v30  ;;  %v11778_v30 = vpack.c.bf16 %v16158_v53, %v16157_v56  ;;  %v16160_v33 = vunpack.i.l.bf16 %v11518_v28  ;;  %v16165_v53 = vunpack.i.h.bf16 %v11495_v59 }
 0x356   : > { %v11703_v60 = vpop.permute.xlu1 %8283  ;;  %v11789_v41 = vpack.c.bf16 %v11520_v57, %v16163_v39  ;;  %v8131_v63 = vunpack.i.h.bf16 %v11545_v7  ;;  %v16168_v39 = vunpack.i.h.bf16 %v11529_v25  ;;  %v1845_v47 = vsel %vm15904_vm0, %v8145_v58, %v8146_v32 }
 0x357   : > { %16155 = vst [vmem:[#allocation40_spill] sm:$0xff] %v11764_v6  ;;  %16159 = vst [vmem:[#allocation42_spill] sm:$0xff] %v11778_v30  ;;  %v11784_v6 = vpack.c.bf16 %v16161_v46, %v16160_v33  ;;  %v11797_v56 = vpack.c.bf16 %v11535_v36, %v16165_v53  ;;  %v1890_v9 = vsel %vm718_vm3, %v8141_v62, %v8140_v27  ;;  %v11810_v59 = vunpack.i.h.bf16 %v11566_v24 }
 0x358   : > { %v11737_v44 = vpop.permute.xlu0 %8238  ;;  %16164 = vst [vmem:[#allocation44_spill] sm:$0xff] %v11789_v41  ;;  %v1846_v36 = vsel %vm15904_vm0, %v8220_v61, %v8221_v13  ;;  %v16170_v41 = vunpack.i.l.bf16 %v11489_v31  ;;  %v8150_v32 = vunpack.i.l.bf16 %v11568_v2  ;;  %v8226_v62 = vunpack.i.h.bf16 %v11612_v48 }
 0x359   : > { %16162 = vst [vmem:[#allocation43_spill] sm:$0xff] %v11784_v6  ;;  %16166 = vst [vmem:[#allocation45_spill] sm:$0xff] %v11797_v56  ;;  %v16167_v6 = vunpack.i.l.bf16 %v11529_v25  ;;  %v8225_v27 = vunpack.i.l.bf16 %v11612_v48  ;;  %v8176_v58 = vunpack.i.h.bf16 %v11574_v10  ;;  %v8175_v61 = vunpack.i.l.bf16 %v11574_v10 }
 0x35a   : > { %v11759_v20 = vpop.permute.xlu1 %8293  ;;  %v8156_v13 = vunpack.i.h.bf16 %v11576_v12  ;;  %v8155_v31 = vunpack.i.l.bf16 %v11576_v12  ;;  %v1864_v25 = vsel %vm1598_vm1, %v8226_v62, %v1846_v36  ;;  %v8280_v48 = vunpack.i.l.bf16 %v11670_v49 }
 0x35b   : > { %v11805_v57 = vpack.c.bf16 %v16168_v39, %v16167_v6  ;;  %v1932_v6 = vsel %vm799_vm7, %v1929_v45, %v16170_v41  ;;  %v8151_v39 = vunpack.i.h.bf16 %v11568_v2  ;;  %v8201_v2 = vunpack.i.h.bf16 %v11638_v17 }
 0x35c   : > { %v11772_v3 = vpop.permute.xlu0 %8273  ;;  %v8281_v30 = vunpack.i.h.bf16 %v11670_v49  ;;  %v8171_v49 = vunpack.i.h.bf16 %v11598_v22 }
 0x35d   : > { %16156 = vst [vmem:[#allocation41_spill] sm:$0xff] %v11772_v3  ;;  %16169 = vst [vmem:[#allocation46_spill] sm:$0xff] %v11805_v57  ;;  %v8200_v57 = vunpack.i.l.bf16 %v11638_v17  ;;  %v16173_v17 = vunpack.i.l.bf16 %v11457_v26 }
 0x35e   : > { %v8324_v46 = vpop.permute.xlu1 %8323 }
 0x35f   : > { %v8326_v56 = vunpack.i.h.bf16 %v8324_v46  ;;  %v8325_v33 = vunpack.i.l.bf16 %v8324_v46  ;;  %v8195_v46 = vunpack.i.l.bf16 %v11630_v19 }
 0x360   : > { %v11814_v0 = vpop.permute.xlu0 %8288 }
 0x361   : > { %v1847_v28 = vsel %vm15904_vm0, %v8325_v33, %v8326_v56  ;;  %v1926_v36 = vsel %vm1594_vm5, %v8195_v46, %v1890_v9  ;;  %v1867_v33 = vsel %vm799_vm7, %v1864_v25, %v11503_v43  ;;  %v1824_v9 = vsel %vm16175_vm10, %v8200_v57, %v8225_v27  ;;  %vm16176_vm0 = vmmov %vm16175_vm10 }
 0x362   : > { %v8329_v53 = vpop.permute.xlu1 %8328  ;;  %v1825_v46 = vsel %vm16176_vm0, %v8201_v2, %v8226_v62  ;;  %v11860_v43 = vsel %vm16178_vm11, %v8131_v63, %v11810_v59  ;;  %v1779_v25 = vsel %vm16179_vm9, %v8150_v32, %v8151_v39  ;;  %v8181_v57 = vunpack.i.h.bf16 %v11606_v14 }
 0x363   : > { %v8331_v41 = vunpack.i.h.bf16 %v8329_v53  ;;  %v8330_v45 = vunpack.i.l.bf16 %v8329_v53  ;;  %v1863_v53 = vsel %vm1598_vm1, %v8225_v27, %v1845_v47  ;;  %v8186_v62 = vunpack.i.h.bf16 %v11614_v21 }
 0x364   : > { %v11833_v10 = vpop.permute.xlu0 %8298  ;;  %vm16180_vm0 = vcmask 941056   ;;  %vm16181_vm10 = vcmask 875520   ;;  %v1861_v39 = vsel %vm1594_vm5, %v11644_v37, %v1825_v46  ;;  %v8160_v32 = vunpack.i.l.bf16 %v11589_v55 }
 0x365   : > { %16171 = vst [vmem:[#allocation47_spill] sm:$0xff] %v11833_v10  ;;  %v1826_v19 = vsel %vm16172_vm6, %v8331_v41, %v8330_v45  ;;  %v1865_v12 = vsel %vm1598_vm1, %v8330_v45, %v1847_v28  ;;  %v8170_v41 = vunpack.i.l.bf16 %v11598_v22  ;;  %vm16174_vm6 = vcmask 957440  }
 0x366   : > { %v11840_v3 = vpop.permute.xlu1 %8333  ;;  %v1868_v24 = vsel %vm799_vm7, %v1865_v12, %v16173_v17  ;;  %v1862_v56 = vsel %vm1594_vm5, %v8280_v48, %v1826_v19  ;;  %v1626_v47 = vsel %vm16174_vm6, %v8176_v58, %v8175_v61  ;;  %v16177_v12 = vunpack.i.h.bf16 %v11457_v26 }
 0x367   : > { %v2282_v28 = vpack.c.bf16 %v1932_v6, %v1868_v24  ;;  %v2281_v45 = vpack.c.bf16 %v1926_v36, %v1862_v56  ;;  %v1860_v24 = vsel %vm1594_vm5, %v8281_v30, %v1824_v9  ;;  %v8180_v6 = vunpack.i.l.bf16 %v11606_v14 }
 0x368   : > { %v11853_v10 = vpop.permute.xlu0 %8303  ;;  %v1866_v19 = vsel %vm799_vm7, %v1863_v53, %v16177_v12  ;;  %v8185_v26 = vunpack.i.l.bf16 %v11614_v21  ;;  %v1758_v58 = vsel %vm16180_vm0, %v8156_v13, %v8155_v31  ;;  %v1647_v63 = vsel %vm16181_vm10, %v8170_v41, %v8171_v49 }
 0x369   : > { %2401 = vmatprep.subr.bf16.mxu1 %v2282_v28  ;;  %v2279_v22 = vpack.c.bf16 %v1867_v33, %v1866_v19  ;;  %v11874_v30 = vsel %vm1594_vm5, %v11543_v29, %v1626_v47  ;;  %v8161_v14 = vunpack.i.h.bf16 %v11589_v55  ;;  %v2278_v21 = vpack.c.bf16 %v1861_v39, %v1860_v24 }
 0x36a   : > { %v8339_v27 = vpop.permute.xlu1 %8338  ;;  %2402 = vmatpush1.bf16.msra.mxu1 %v2281_v45  ;;  %v1797_v48 = vsel %vm1598_vm1, %v8155_v31, %v1779_v25  ;;  %v8231_v13 = vunpack.i.h.bf16 %v11678_v23  ;;  %v8230_v53 = vunpack.i.l.bf16 %v11678_v23  ;;  %vm16182_vm9 = vcmask 809984  }
 0x36b   : > { %2403 = vmatprep.subr.bf16.mxu1 %v2279_v22  ;;  %v8341_v36 = vunpack.i.h.bf16 %v8339_v27  ;;  %v8340_v37 = vunpack.i.l.bf16 %v8339_v27  ;;  %v2175_v17 = vsel %vm16182_vm9, %v8180_v6, %v8181_v57  ;;  %vm16183_vm11 = vcmask 891904  }
 0x36c   : > { %v11878_v2 = vpop.permute.xlu0 %8308  ;;  %v2154_v29 = vsel %vm16183_vm11, %v8186_v62, %v8185_v26  ;;  %v8236_v56 = vunpack.i.h.bf16 %v11620_v8  ;;  %v1665_v55 = vsel %vm1598_vm1, %v8175_v61, %v1647_v63  ;;  %v8286_v49 = vunpack.i.h.bf16 %v11703_v60 }
 0x36d   : > { %v8285_v31 = vunpack.i.l.bf16 %v11703_v60  ;;  %v8235_v23 = vunpack.i.l.bf16 %v11620_v8  ;;  %v8291_v45 = vunpack.i.h.bf16 %v11814_v0  ;;  %v8290_v47 = vunpack.i.l.bf16 %v11814_v0 }
 0x36e   : > { %v8349_v33 = vpop.permute.xlu1 %8348  ;;  %2404 = vmatpush1.bf16.msra.mxu1 %v2278_v21  ;;  %v2193_v46 = vsel %vm1598_vm1, %v8185_v26, %v2175_v17  ;;  %vm16184_vm6 = vcmask 859136   ;;  %vm16186_vm10 = vcmask 941056   ;;  %v8206_v57 = vunpack.i.h.bf16 %v11582_v11 }
 0x36f   : > { %v8351_v41 = vunpack.i.h.bf16 %v8349_v33  ;;  %v8350_v28 = vunpack.i.l.bf16 %v8349_v33  ;;  %v1780_v12 = vsel %vm16184_vm6, %v8230_v53, %v8231_v13  ;;  %vm16185_vm0 = vmmov %vm16184_vm6  ;;  %v8205_v6 = vunpack.i.l.bf16 %v11582_v11 }
 0x370   : > { %v11892_v9 = vpop.permute.xlu0 %8313  ;;  %v1781_v61 = vsel %vm16185_vm0, %v8340_v37, %v8341_v36  ;;  %vm16187_vm9 = vmmov %vm16186_vm10  ;;  %v16188_v62 = vunpack.i.l.bf16 %v11497_v38  ;;  %v16189_v27 = vunpack.i.h.bf16 %v11497_v38  ;;  %v11917_v53 = vsel %vm799_vm7, %v1797_v48, %v11452_v51 }
 0x371   : > { %v1759_v19 = vsel %vm16186_vm10, %v8285_v31, %v8350_v28  ;;  %v1760_v60 = vsel %vm16187_vm9, %v8286_v49, %v8351_v41  ;;  %v1798_v8 = vsel %vm1598_vm1, %v8350_v28, %v1780_v12  ;;  %v1799_v24 = vsel %vm1598_vm1, %v8351_v41, %v1781_v61 }
 0x372   : > { %v11899_v25 = vpop.permute.xlu1 %8358  ;;  %v1795_v0 = vsel %vm1594_vm5, %v8290_v47, %v1759_v19  ;;  %v1796_v22 = vsel %vm1594_vm5, %v8291_v45, %v1760_v60  ;;  %v1801_v26 = vsel %vm799_vm7, %v1798_v8, %v16188_v62  ;;  %v1802_v63 = vsel %vm799_vm7, %v1799_v24, %v16189_v27  ;;  %v16193_v8 = vld [vmem:[#allocation31_spill] sm:$0xff] }
 0x373   : > { %v2276_v21 = vpack.c.bf16 %v1802_v63, %v1801_v26  ;;  %v2275_v13 = vpack.c.bf16 %v1796_v22, %v1795_v0  ;;  %v11921_v36 = vsel %vm1594_vm5, %v11537_v52, %v1758_v58  ;;  %vm16190_vm11 = vcmask 867328  }
 0x374   : > { %v11913_v39 = vpop.permute.xlu0 %8318  ;;  %v1713_v11 = vsel %vm16190_vm11, %v8160_v32, %v8161_v14  ;;  %v11926_v37 = vsel %vm799_vm7, %v1665_v55, %v11471_v50  ;;  %v11930_v38 = vsel %vm799_vm7, %v2193_v46, %v11459_v16  ;;  %v11934_v17 = vsel %vm1594_vm5, %v11551_v42, %v2154_v29  ;;  %vm16191_vm6 = vmmov %vm16190_vm11 }
 0x375   : > { %v1714_v51 = vsel %vm16191_vm6, %v8235_v23, %v8236_v56  ;;  %v8240_v48 = vunpack.i.l.bf16 %v11737_v44  ;;  %v8336_v52 = vunpack.i.h.bf16 %v11840_v3  ;;  %v11940_v58 = vunpack.i.l.bf16 %v11840_v3  ;;  %2405 = vmatprep.subr.bf16.mxu1 %v2276_v21  ;;  %vm16194_vm10 = vmmov %vm16191_vm6 }
 0x376   : > { %v8364_v14 = vpop.permute.xlu1 %8363  ;;  %v8191_v32 = vunpack.i.h.bf16 %v11622_v34  ;;  %v8190_v16 = vunpack.i.l.bf16 %v11622_v34  ;;  %v8246_v33 = vunpack.i.h.bf16 %v11628_v35  ;;  %v8245_v42 = vunpack.i.l.bf16 %v11628_v35  ;;  %2406 = vmatpush1.bf16.msra.mxu1 %v2275_v13 }
 0x377   : > { %v11947_v29 = vunpack.i.h.bf16 %v11636_v15  ;;  %v8250_v56 = vunpack.i.l.bf16 %v11636_v15  ;;  %v8256_v55 = vunpack.i.h.bf16 %v11642_v18  ;;  %v8241_v3 = vunpack.i.h.bf16 %v11737_v44 }
 0x378   : > { %v8344_v49 = vpop.permute.xlu0 %8343  ;;  %v8255_v31 = vunpack.i.l.bf16 %v11642_v18  ;;  %v8366_v41 = vunpack.i.h.bf16 %v8364_v14  ;;  %v8365_v28 = vunpack.i.l.bf16 %v8364_v14  ;;  %v8261_v23 = vunpack.i.h.bf16 %v11646_v1 }
 0x379   : > { %v11953_v34 = vunpack.i.l.bf16 %v8344_v49  ;;  %v8260_v35 = vunpack.i.l.bf16 %v11646_v1  ;;  %vm16192_vm0 = vcmask 949248   ;;  %v2225_v15 = vsel %vm354_vm12, %v8336_v52, %v11940_v58 }
 0x37a   : > { %v1692_v45 = vsel %vm16192_vm0, %v8205_v6, %v8240_v48  ;;  %v8369_v47 = vpop.permute.xlu1 %8368  ;;  %v8346_v46 = vunpack.i.h.bf16 %v8344_v49  ;;  %v8295_v19 = vunpack.i.l.bf16 %v11759_v20  ;;  %v1731_v1 = vsel %vm1598_vm1, %v8240_v48, %v1713_v11  ;;  %vm16195_vm9 = vmmov %vm16192_vm0 }
 0x37b   : > { %v2243_v44 = vsel %vm1598_vm1, %v11953_v34, %v2225_v15  ;;  %v8371_v12 = vunpack.i.h.bf16 %v8369_v47  ;;  %v8370_v61 = vunpack.i.l.bf16 %v8369_v47  ;;  %v1732_v0 = vsel %vm1598_vm1, %v8241_v3, %v1714_v51  ;;  %vm16196_vm11 = vmmov %vm16192_vm0 }
 0x37c   : > { %v11963_v60 = vpop.permute.xlu0 %8353  ;;  %v2246_v24 = vsel %vm799_vm7, %v2243_v44, %v16193_v8  ;;  %v1715_v22 = vsel %vm16194_vm10, %v8365_v28, %v8366_v41  ;;  %v1693_v27 = vsel %vm16196_vm11, %v8206_v57, %v8241_v3  ;;  %v8296_v63 = vunpack.i.h.bf16 %v11759_v20 }
 0x37d   : > { %v1694_v6 = vsel %vm16195_vm9, %v8371_v12, %v8370_v61  ;;  %v8355_v62 = vunpack.i.l.bf16 %v11963_v60  ;;  %v2309_v26 = vpack.c.bf16 %v2246_v24, %v2246_v24  ;;  %v1733_v13 = vsel %vm1598_vm1, %v8370_v61, %v1715_v22  ;;  %v16206_v24 = vld [vmem:[#allocation27_spill] sm:$0xff] }
 0x37e   : > { %v11974_v21 = vpop.permute.xlu1 %8383  ;;  %v1730_v52 = vsel %vm1594_vm5, %v8295_v19, %v1694_v6  ;;  %v16197_v11 = vunpack.i.l.bf16 %v11477_v4  ;;  %v16198_v48 = vunpack.i.h.bf16 %v11477_v4  ;;  %v1735_v57 = vsel %vm799_vm7, %v1732_v0, %v11505_v54 }
 0x37f   : > { %6941 = vmatprep.subr.msk.bf16.mxu0 %vm15969_vm14, %v2309_v26  ;;  %vm16199_vm6 = vcmask 883712   ;;  %v2272_v28 = vpack.c.bf16 %v11921_v36, %v1730_v52  ;;  %vm16201_vm10 = vcmask 818176   ;;  %v16202_v54 = vunpack.i.l.bf16 %v11545_v7  ;;  %v16207_v26 = vld [vmem:[#allocation40_spill] sm:$0xff] }
 0x380   : > { %v1736_v51 = vsel %vm799_vm7, %v1733_v13, %v16197_v11  ;;  %v1734_v14 = vsel %vm799_vm7, %v1731_v1, %v16198_v48  ;;  %v2210_v20 = vsel %vm16199_vm6, %v8346_v46, %v11953_v34  ;;  %vm16200_vm0 = vmmov %vm16199_vm6  ;;  %v11991_v49 = vpop.permute.xlu0 %2069  ;;  %v11999_v15 = vsel %vm16201_vm10, %v8190_v16, %v8191_v32  ;;  %v16204_v16 = vld [vmem:[#allocation24_spill] sm:$0xff]  ;;  %v16208_v13 = vld [vmem:[#allocation30_spill] sm:$0xff] }
 0x381   : > { %v1579_v3 = vsel %vm16200_vm0, %v11810_v59, %v8250_v56  ;;  %v2273_v41 = vpack.c.bf16 %v11917_v53, %v1736_v51  ;;  %v2240_v4 = vsel %vm1594_vm5, %v8355_v62, %v2210_v20  ;;  %vm16203_vm9 = vmmov %vm16200_vm0  ;;  %v2223_v53 = vsel %vm354_vm12, %v8260_v35, %v11744_v40  ;;  %v12022_v35 = vld [vmem:[%s16079_s1 + $0x88] ss:$16 sps:$4 sm:$0xff]   ;;  %v16209_v11 = vld [vmem:[#allocation47_spill] sm:$0xff] }
 0x382   : > { %v1580_v47 = vsel %vm16203_vm9, %v11947_v29, %v16202_v54  ;;  %v2308_v46 = vpack.c.bf16 %v2240_v4, %v2240_v4  ;;  %v1599_v56 = vsel %vm1598_vm1, %v8255_v31, %v1579_v3  ;;  %v1728_v36 = vsel %vm1594_vm5, %v8296_v63, %v1692_v45  ;;  %v12011_v44 = vpop.permute.xlu1 %8388  ;;  %v16210_v20 = vld [vmem:[#allocation22_spill] sm:$0xff]  ;;  %vm16212_vm6 = vmmov %vm16200_vm0 }
 0x383   : > { %2407 = vmatprep.subr.bf16.mxu1 %v2273_v41  ;;  %v2270_v32 = vpack.c.bf16 %v1735_v57, %v1734_v14  ;;  %v1729_v7 = vsel %vm1594_vm5, %v16204_v16, %v1693_v27  ;;  %vm16205_vm11 = vcmask 875520   ;;  %v2224_v61 = vsel %vm354_vm12, %v8261_v23, %v11741_v5 }
 0x384   : > { %v1648_v12 = vsel %vm16205_vm11, %v8245_v42, %v8246_v33  ;;  %2408 = vmatpush1.bf16.msra.mxu1 %v2272_v28  ;;  %v2393_v19 = vsel %vm15969_vm14, %v2308_v46, 0  ;;  %v12027_v45 = vsel %vm1598_vm1, %v8256_v55, %v1580_v47  ;;  %v8211_v1 = vunpack.i.h.bf16 %v16206_v24  ;;  %v8374_v23 = vpop.permute.xlu0 %8373  ;;  %vm16213_vm0 = vmmov %vm16205_vm11 }
 0x385   : > { %v8210_v33 = vunpack.i.l.bf16 %v16206_v24  ;;  %v8356_v42 = vunpack.i.h.bf16 %v11963_v60  ;;  %2409 = vmatprep.subr.bf16.mxu1 %v2270_v32  ;;  %2479 = vmatpush1.bf16.msra.mxu0 %v2393_v19  ;;  %v12034_v0 = vsel %vm799_vm7, %v1599_v56, %v11744_v40  ;;  %v8376_v22 = vunpack.i.h.bf16 %v8374_v23  ;;  %v16214_v56 = vld [vmem:[#allocation33_spill] sm:$0xff]  ;;  %v16247_v24 = vld [vmem:[#allocation32_spill] sm:$0xff] }
 0x386   : > { %v8375_v6 = vunpack.i.l.bf16 %v8374_v23  ;;  %7124 = vmatprep.subr.bf16.mxu0 %v16207_v26  ;;  %v2269_v27 = vpack.c.bf16 %v1729_v7, %v1728_v36  ;;  %v2241_v63 = vsel %vm1598_vm1, %v11810_v59, %v2223_v53  ;;  %v8271_v52 = vunpack.i.h.bf16 %v16208_v13  ;;  %v8394_v14 = vpop.permute.xlu1 %8393  ;;  %v16216_v32 = vld [vmem:[#allocation41_spill] sm:$0xff]  ;;  %v16219_v23 = vld [vmem:[#allocation42_spill] sm:$0xff] }
 0x387   : > { %v8301_v51 = vunpack.i.h.bf16 %v16209_v11  ;;  %v8300_v48 = vunpack.i.l.bf16 %v16209_v11  ;;  %v2242_v57 = vsel %vm1598_vm1, %v11947_v29, %v2224_v61  ;;  %v16211_v3 = vunpack.i.l.bf16 %v16210_v20  ;;  %v16221_v11 = vld [vmem:[#allocation18_spill] sm:$0xff] }
 0x388   : > { %v1649_v28 = vsel %vm16213_vm0, %v8375_v6, %v8376_v22  ;;  %v8396_v4 = vunpack.i.h.bf16 %v8394_v14  ;;  %v8395_v54 = vunpack.i.l.bf16 %v8394_v14  ;;  %2410 = vmatpush1.bf16.msra.mxu1 %v2269_v27  ;;  %6942 = vmatmul.mubr.msk.bf16.vlgmr.msra.gmra.mxu0 %vm1259_vm8, %v12022_v35  ;;  %v8270_v59 = vunpack.i.l.bf16 %v16208_v13  ;;  %v12055_v53 = vpop.permute.xlu0 %8378 }
 0x389   : > { %v1581_v41 = vsel %vm16212_vm6, %v11953_v34, %v16211_v3  ;;  %v8306_v47 = vunpack.i.h.bf16 %v11853_v10  ;;  %v8305_v46 = vunpack.i.l.bf16 %v11853_v10  ;;  %7125 = vmatpush3.bf16.msra.mxu0 %v16214_v56  ;;  %v16215_v36 = vmov 0   ;;  %v12084_v3 = vld [vmem:[%s16079_s1 + $0xa8] ss:$16 sps:$4 sm:$0xff]   ;;  %v16228_v56 = vld [vmem:[#allocation29_spill] sm:$0xff] }
 0x38a   : > { %v1601_v34 = vsel %vm1598_vm1, %v8356_v42, %v1581_v41  ;;  %2506 = vmatprep.mubr.bf16.mxu0 %v16215_v36  ;;  %v8276_v16 = vunpack.i.h.bf16 %v16216_v32  ;;  %v8275_v7 = vunpack.i.l.bf16 %v16216_v32  ;;  %vm16217_vm10 = vcmask 957440   ;;  %7126 = vmatprep.subr.bf16.mxu0 %v16219_v23  ;;  %v12064_v22 = vpop.permute.xlu1 %8398 }
 0x38b   : > { %v1628_v61 = vsel %vm16217_vm10, %v8301_v51, %v8396_v4  ;;  %vm16218_vm9 = vmmov %vm16217_vm10  ;;  %v1666_v10 = vsel %vm1598_vm1, %v8395_v54, %v1648_v12  ;;  %v1667_v6 = vsel %vm1598_vm1, %v8396_v4, %v1649_v28  ;;  %vm16220_vm11 = vcmask 965632  }
 0x38c   : > { %v1627_v19 = vsel %vm16218_vm9, %v8300_v48, %v8395_v54  ;;  %v1664_v27 = vsel %vm1594_vm5, %v8306_v47, %v1628_v61  ;;  %v1557_v13 = vsel %vm16220_vm11, %v8355_v62, %v8356_v42  ;;  %v16222_v51 = vunpack.i.l.bf16 %v16221_v11  ;;  %vm16224_vm6 = vmmov %vm16220_vm11  ;;  %v16226_v42 = vld [vmem:[#allocation38_spill] sm:$0xff]  ;;  %v12097_v41 = vpop.permute.xlu0 %8403  ;;  %v16227_v54 = vld [vmem:[#allocation28_spill] sm:$0xff] }
 0x38d   : > { %v1663_v26 = vsel %vm1594_vm5, %v8305_v46, %v1627_v19  ;;  %v16223_v14 = vunpack.i.h.bf16 %v16221_v11  ;;  %v1604_v12 = vsel %vm799_vm7, %v1601_v34, %v11940_v58  ;;  %v1555_v60 = vsel %vm16224_vm6, %v8210_v33, %v8255_v31  ;;  %vm16225_vm0 = vmmov %vm16224_vm6  ;;  %7127 = vmatpush3.bf16.msra.mxu0 %v16226_v42  ;;  %v16231_v34 = vld [vmem:[#allocation34_spill] sm:$0xff]  ;;  %v16232_v19 = vld [vmem:[#allocation9_spill] sm:$0xff] }
 0x38e   : > { %v1669_v48 = vsel %vm799_vm7, %v1666_v10, %v16222_v51  ;;  %v1556_v62 = vsel %vm16225_vm0, %v8211_v1, %v8256_v55  ;;  %v2266_v4 = vpack.c.bf16 %v1664_v27, %v1663_v26  ;;  %v8266_v47 = vunpack.i.h.bf16 %v16227_v54  ;;  %7128 = vmatprep.subr.bf16.mxu0 %v16231_v34  ;;  %v12106_v55 = vpop.permute.xlu1 %2001  ;;  %v16234_v26 = vld [vmem:[#allocation8_spill] sm:$0xff]  ;;  %v16235_v27 = vld [vmem:[#allocation25_spill] sm:$0xff]  ;;  %v16236_v11 = vld [vmem:[#allocation35_spill] sm:$0xff] }
 0x38f   : > { %v1670_v20 = vsel %vm799_vm7, %v1667_v6, %v16223_v14  ;;  %v8265_v46 = vunpack.i.l.bf16 %v16227_v54  ;;  %vm16229_vm10 = vcmask 883712   ;;  %vm16230_vm9 = vcmask 818176   ;;  %v16237_v51 = vld [vmem:[#allocation11_spill] sm:$0xff] }
 0x390   : > { %v2267_v28 = vpack.c.bf16 %v1670_v20, %v1669_v48  ;;  %v2209_v31 = vsel %vm16229_vm10, %v16228_v56, %v11947_v29  ;;  %v2110_v18 = vsel %vm16230_vm9, %v8270_v59, %v8271_v52  ;;  %v2264_v61 = vpack.c.bf16 %v11926_v37, %v1604_v12  ;;  %v16233_v52 = vld [vmem:[#allocation7_spill] sm:$0xff]  ;;  %6943 = vmatmul.mubr.msk.bf16.gmra.mxu0 %vm1259_vm8, %v12084_v3  ;;  %v16239_v20 = vld [vmem:[#allocation16_spill] sm:$0xff] }
 0x391   : > { %v1597_v23 = vsel %vm1594_vm5, %v16232_v19, %v1557_v13  ;;  %v2127_v10 = vsel %vm1598_vm1, %v8275_v7, %v11999_v15  ;;  %v2128_v6 = vsel %vm1598_vm1, %v8276_v16, %v2110_v18  ;;  %v1603_v29 = vsel %vm799_vm7, %v12027_v45, %v11741_v5  ;;  %7129 = vmatpush3.bf16.msra.mxu0 %v16236_v11  ;;  %v12132_v45 = vpop.permute.xlu0 %8408  ;;  %v16243_v54 = vld [vmem:[#allocation19_spill] sm:$0xff] }
 0x392   : > { %2411 = vmatprep.subr.bf16.mxu1 %v2267_v28  ;;  %v1595_v59 = vsel %vm1594_vm5, %v16233_v52, %v1555_v60  ;;  %v1596_v37 = vsel %vm1594_vm5, %v16234_v26, %v1556_v62  ;;  %v8216_v15 = vunpack.i.h.bf16 %v16235_v27  ;;  %v12129_v13 = vsel %vm1594_vm5, %v8211_v1, %v2209_v31  ;;  %v16240_v62 = vld [vmem:[#allocation44_spill] sm:$0xff]  ;;  %2516 = vmatprep.mubr.bf16.mxu0 %v16215_v36  ;;  %v16241_v1 = vld [vmem:[#allocation13_spill] sm:$0xff]  ;;  %v8419_v31 = vpop.permute.xlu1 %8418 }
 0x393   : > { %2412 = vmatpush1.bf16.msra.mxu1 %v2266_v4  ;;  %v16238_v48 = vunpack.i.h.bf16 %v16237_v51  ;;  %v2245_v12 = vsel %vm799_vm7, %v2242_v57, %v16239_v20  ;;  %v8215_v60 = vunpack.i.l.bf16 %v16235_v27  ;;  %7130 = vmatprep.subr.bf16.mxu0 %v16240_v62  ;;  %v2263_v42 = vpack.c.bf16 %v11874_v30, %v1597_v23  ;;  %v16254_v62 = vld [vmem:[#allocation17_spill] sm:$0xff] }
 0x394   : > { %2413 = vmatprep.subr.bf16.mxu1 %v2264_v61  ;;  %v16242_v28 = vunpack.i.h.bf16 %v16241_v1  ;;  %v12150_v56 = vsel %vm799_vm7, %v2128_v6, %v16243_v54  ;;  %vm16244_vm11 = vcmask 809984   ;;  %v2238_v57 = vsel %vm1594_vm5, %v8210_v33, %v11860_v43 }
 0x395   : > { %v2244_v14 = vsel %vm799_vm7, %v2241_v63, %v16238_v48  ;;  %v2176_v63 = vsel %vm16244_vm11, %v8265_v46, %v8266_v47  ;;  %v2261_v30 = vpack.c.bf16 %v1603_v29, %v12034_v0  ;;  %v2260_v18 = vpack.c.bf16 %v1596_v37, %v1595_v59  ;;  %7131 = vmatpush3.bf16.msra.mxu0 %v16247_v24  ;;  %v8414_v33 = vpop.permute.xlu0 %8413 }
 0x396   : > { %v12146_v4 = vsel %vm799_vm7, %v2127_v10, %v16242_v28  ;;  %v2305_v34 = vpack.c.bf16 %v12129_v13, %v2238_v57  ;;  %v8421_v61 = vunpack.i.h.bf16 %v8419_v31  ;;  %v8420_v19 = vunpack.i.l.bf16 %v8419_v31  ;;  %v12162_v10 = vld [vmem:[%s16079_s1 + $0xc8] ss:$16 sps:$4 sm:$0xff]   ;;  %v8424_v27 = vpop.permute.xlu1 %8423  ;;  %v16257_v57 = vld [vmem:[#allocation23_spill] sm:$0xff] }
 0x397   : > { %2414 = vmatpush1.bf16.msra.mxu1 %v2263_v42  ;;  %v2306_v23 = vpack.c.bf16 %v2245_v12, %v2244_v14  ;;  %vm16245_vm6 = vcmask 900096   ;;  %v2297_v0 = vpack.c.bf16 %v12150_v56, %v12146_v4  ;;  %v16248_v46 = vpack.c.bf16 %v16193_v8, %v16193_v8 }
 0x398   : > { %v2088_v47 = vsel %vm16245_vm6, %v8215_v60, %v8275_v7  ;;  %vm16246_vm0 = vmmov %vm16245_vm6  ;;  %2415 = vmatprep.subr.bf16.mxu1 %v2261_v30  ;;  %v8311_v29 = vunpack.i.h.bf16 %v11878_v2  ;;  %v8310_v7 = vunpack.i.l.bf16 %v11878_v2  ;;  %v8416_v32 = vunpack.i.h.bf16 %v8414_v33  ;;  %6944 = vmatmul.mubr.msk.bf16.gmra.mxu0 %vm1259_vm8, %v12162_v10  ;;  %v16253_v60 = vld [vmem:[#allocation36_spill] sm:$0xff] }
 0x399   : > { %v2089_v43 = vsel %vm16246_vm0, %v8216_v15, %v8276_v16  ;;  %v12175_v6 = vsel %vm15969_vm14, %v16248_v46, 0  ;;  %v8415_v52 = vunpack.i.l.bf16 %v8414_v33  ;;  %v16249_v16 = vld [vmem:[#allocation46_spill] sm:$0xff]  ;;  %v8316_v59 = vunpack.i.h.bf16 %v11892_v9  ;;  %v12192_v20 = vpop.permute.xlu0 %8438  ;;  %2559 = vmatprep.mubr.bf16.mxu0 %v16257_v57 }
 0x39a   : > { %7132 = vmatprep.subr.bf16.mxu0 %v16249_v16  ;;  %v8361_v26 = vunpack.i.h.bf16 %v11899_v25  ;;  %v8360_v37 = vunpack.i.l.bf16 %v11899_v25  ;;  %v2194_v8 = vsel %vm1598_vm1, %v8420_v19, %v2176_v63  ;;  %v8321_v15 = vunpack.i.h.bf16 %v11913_v39  ;;  %v16252_v25 = vld [vmem:[#allocation39_spill] sm:$0xff]  ;;  %v8429_v30 = vpop.permute.xlu1 %8428  ;;  %v16260_v16 = vld [vmem:[#allocation45_spill] sm:$0xff] }
 0x39b   : > { %vm16250_vm10 = vcmask 891904   ;;  %v2177_v2 = vsel %vm16244_vm11, %v8415_v52, %v8416_v32  ;;  %2416 = vmatpush1.bf16.msra.mxu1 %v2260_v18  ;;  %v8315_v51 = vunpack.i.l.bf16 %v11892_v9  ;;  %v8426_v48 = vunpack.i.h.bf16 %v8424_v27  ;;  %7133 = vmatpush3.bf16.msra.mxu0 %v16252_v25  ;;  %v16259_v32 = vld [vmem:[#allocation43_spill] sm:$0xff] }
 0x39c   : > { %v2156_v13 = vsel %vm16250_vm10, %v8311_v29, %v8421_v61  ;;  %vm16251_vm9 = vmmov %vm16250_vm10  ;;  %v8425_v14 = vunpack.i.l.bf16 %v8424_v27  ;;  %2417 = vmatprep.subr.bf16.mxu1 %v2306_v23  ;;  %v2195_v12 = vsel %vm1598_vm1, %v8421_v61, %v2177_v2  ;;  %7134 = vmatprep.subr.bf16.mxu0 %v16253_v60  ;;  %v16255_v42 = vunpack.i.l.bf16 %v16254_v62 }
 0x39d   : > { %v2155_v11 = vsel %vm16251_vm9, %v8310_v7, %v8420_v19  ;;  %v16256_v54 = vunpack.i.h.bf16 %v16254_v62  ;;  %v2265_v9 = vpack.c.bf16 %v11471_v50, %v11940_v58  ;;  %v12206_v31 = vsel %vm902_vm4, %v8360_v37, %v8361_v26  ;;  %v8444_v52 = vpop.permute.xlu0 %8443  ;;  %v16262_v62 = vld [vmem:[#allocation37_spill] sm:$0xff] }
 0x39e   : > { %v2197_v28 = vsel %vm799_vm7, %v2194_v8, %v16255_v42  ;;  %v2191_v61 = vsel %vm1594_vm5, %v8315_v51, %v2155_v11  ;;  %v2192_v19 = vsel %vm1594_vm5, %v8316_v59, %v2156_v13  ;;  %v8320_v23 = vunpack.i.l.bf16 %v11913_v39 }
 0x39f   : > { %v2198_v63 = vsel %vm799_vm7, %v2195_v12, %v16256_v54  ;;  %v12212_v24 = vsel %vm1594_vm5, %v8321_v15, %v2088_v47  ;;  %v8431_v33 = vunpack.i.h.bf16 %v8429_v30  ;;  %v8430_v46 = vunpack.i.l.bf16 %v8429_v30  ;;  %2418 = vmatpush2.bf16.msra.mxu1 %v2305_v34  ;;  %7135 = vmatpush3.bf16.msra.mxu0 %v16259_v32  ;;  %v12251_v30 = vld [vmem:[%s16079_s1 + $0x80] ss:$16 sps:$4 sm:$0xff]  }
 0x3a0   : > { %v2303_v18 = vpack.c.bf16 %v2198_v63, %v2197_v28  ;;  %v12216_v50 = vsel %vm1594_vm5, %v11991_v49, %v2089_v43  ;;  %v8391_v58 = vunpack.i.h.bf16 %v12011_v44  ;;  %v8390_v29 = vunpack.i.l.bf16 %v12011_v44  ;;  %7136 = vmatprep.subr.bf16.mxu0 %v16260_v16  ;;  %v8434_v44 = vpop.permute.xlu1 %8433 }
 0x3a1   : > { %vm16258_vm6 = vcmask 818176   ;;  %v8386_v39 = vunpack.i.h.bf16 %v11974_v21  ;;  %v2090_v47 = vsel %vm16246_vm0, %v8431_v33, %v8430_v46  ;;  %v2302_v34 = vpack.c.bf16 %v2192_v19, %v2191_v61  ;;  %v12265_v33 = vld [vmem:[%s16079_s1 + $0xa4] ss:$16 sps:$4 sm:$0xff]  }
 0x3a2   : > { %v2111_v7 = vsel %vm16258_vm6, %v8425_v14, %v8426_v48  ;;  %2419 = vmatprep.subr.bf16.mxu1 %v2303_v18  ;;  %v8385_v43 = vunpack.i.l.bf16 %v11974_v21  ;;  %v8400_v59 = vunpack.i.l.bf16 %v12064_v22  ;;  %v16261_v26 = vunpack.i.l.bf16 %v16241_v1  ;;  %v8459_v48 = vpop.permute.xlu0 %8458 }
 0x3a3   : > { %v2129_v49 = vsel %vm1598_vm1, %v8430_v46, %v2111_v7  ;;  %v2126_v27 = vsel %vm1594_vm5, %v8320_v23, %v2090_v47  ;;  %v2296_v8 = vpack.c.bf16 %v12216_v50, %v12212_v24  ;;  %v8436_v15 = vunpack.i.h.bf16 %v8434_v44  ;;  %2420 = vmatpush2.bf16.msra.mxu1 %v2302_v34  ;;  %7137 = vmatpush3.bf16.msra.mxu0 %v2265_v9  ;;  %v16264_v47 = vld [vmem:[#allocation20_spill] sm:$0xff] }
 0x3a4   : > { %v2132_v37 = vsel %vm799_vm7, %v2129_v49, %v16261_v26  ;;  %v8435_v13 = vunpack.i.l.bf16 %v8434_v44  ;;  %v2043_v2 = vsel %vm902_vm4, %v8390_v29, %v8391_v58  ;;  %v8446_v21 = vunpack.i.h.bf16 %v8444_v52  ;;  %7138 = vmatprep.subr.bf16.mxu0 %v16262_v62  ;;  %v8449_v54 = vpop.permute.xlu1 %8448 }
 0x3a5   : > { %v2300_v11 = vpack.c.bf16 %v11930_v38, %v2132_v37  ;;  %v8445_v51 = vunpack.i.l.bf16 %v8444_v52  ;;  %v2299_v1 = vpack.c.bf16 %v11934_v17, %v2126_v27  ;;  %v8381_v14 = vunpack.i.h.bf16 %v12055_v53 }
 0x3a6   : > { %v8380_v25 = vunpack.i.l.bf16 %v12055_v53  ;;  %v8401_v12 = vunpack.i.h.bf16 %v12064_v22  ;;  %v1978_v60 = vsel %vm821_vm13, %v8435_v13, %v8436_v15  ;;  %v8405_v38 = vunpack.i.l.bf16 %v12097_v41  ;;  %v8464_v24 = vpop.permute.xlu0 %8463 }
 0x3a7   : > { %2421 = vmatprep.subr.bf16.mxu1 %v2300_v11  ;;  %v8411_v42 = vunpack.i.h.bf16 %v12132_v45  ;;  %v8441_v28 = vunpack.i.h.bf16 %v12192_v20  ;;  %v2061_v17 = vsel %vm1598_vm1, %v8400_v59, %v2043_v2  ;;  %v8461_v63 = vunpack.i.h.bf16 %v8459_v48  ;;  %v16269_v11 = vld [vmem:[#allocation12_spill] sm:$0xff] }
 0x3a8   : > { %v8460_v53 = vunpack.i.l.bf16 %v8459_v48  ;;  %v8451_v9 = vunpack.i.h.bf16 %v8449_v54  ;;  %v8450_v57 = vunpack.i.l.bf16 %v8449_v54  ;;  %2422 = vmatpush2.bf16.msra.mxu1 %v2299_v1  ;;  %v8410_v18 = vunpack.i.l.bf16 %v12132_v45  ;;  %v8454_v56 = vpop.permute.xlu1 %8453 }
 0x3a9   : > { %v8440_v61 = vunpack.i.l.bf16 %v12192_v20  ;;  %v2045_v19 = vsel %vm902_vm4, %v8445_v51, %v8446_v21  ;;  %2423 = vmatprep.subr.bf16.mxu1 %v2297_v0  ;;  %v16263_v23 = vpack.c.bf16 %v11741_v5, %v11744_v40  ;;  %v1996_v45 = vsel %vm1598_vm1, %v8441_v28, %v1978_v60  ;;  %v16270_v60 = vld [vmem:[#allocation21_spill] sm:$0xff] }
 0x3aa   : > { %v2024_v20 = vsel %vm880_vm15, %v8381_v14, %v8451_v9  ;;  %v2023_v46 = vsel %vm880_vm15, %v8380_v25, %v8450_v57  ;;  %v8466_v50 = vunpack.i.h.bf16 %v8464_v24  ;;  %v8465_v58 = vunpack.i.l.bf16 %v8464_v24  ;;  %v9985_v25 = vld [vmem:[%s16079_s1 + $0xa0] ss:$16 sps:$4 sm:$0xff]  }
 0x3ab   : > { %7139 = vmatpush3.bf16.msra.mxu0 %v16263_v23  ;;  %v15910_v4 = vmov 0.0   ;;  %v2062_v40 = vsel %vm1598_vm1, %v8450_v57, %v12206_v31  ;;  %v2063_v5 = vsel %vm1598_vm1, %v8451_v9, %v2045_v19  ;;  %v2059_v0 = vsel %vm1594_vm5, %v8385_v43, %v2023_v46  ;;  %v1938_v31 = vpop.permute.xlu0 %1937 }
 0x3ac   : > { %7351 = vmatprep.subr.bf16.mxu0 %v15910_v4  ;;  %v2060_v29 = vsel %vm1594_vm5, %v8386_v39, %v2024_v20  ;;  %v1979_v7 = vsel %vm821_vm13, %v8460_v53, %v8461_v63  ;;  %v1958_v32 = vsel %vm799_vm7, %v8466_v50, %v8465_v58  ;;  %v8455_v52 = vunpack.i.l.bf16 %v8454_v56  ;;  %2424 = vmatpush2.bf16.msra.mxu1 %v2296_v8  ;;  %v16267_v8 = vld [vmem:[#allocation15_spill] sm:$0xff]  ;;  %v8469_v21 = vpop.permute.xlu1 %8468 }
 0x3ad   : > { %v16265_v16 = vunpack.i.l.bf16 %v16264_v47  ;;  %v8456_v49 = vunpack.i.h.bf16 %v8454_v56  ;;  %v16266_v43 = vunpack.i.h.bf16 %v16264_v47  ;;  %v2293_v44 = vpack.c.bf16 %v2060_v29, %v2059_v0  ;;  %v16275_v47 = vld [vmem:[#allocation10_spill] sm:$0xff] }
 0x3ae   : > { %2560 = vmatmul.mubr.bf16.vlgmr.msra.gmra.mxu0 %v12251_v30  ;;  %v1997_v26 = vsel %vm1598_vm1, %v8465_v58, %v1979_v7  ;;  %v1977_v37 = vsel %vm821_vm13, %v8410_v18, %v8411_v42  ;;  %v16268_v15 = vunpack.i.l.bf16 %v16267_v8  ;;  %v2022_v2 = vsel %vm880_vm15, %v8401_v12, %v8400_v59  ;;  %v16273_v7 = vld [vmem:[#allocation14_spill] sm:$0xff] }
 0x3af   : > { %v2065_v34 = vsel %vm799_vm7, %v2062_v40, %v16265_v16  ;;  %7352 = vmatpush3.bf16.msra.mxu0 %v12175_v6  ;;  %v2066_v39 = vsel %vm799_vm7, %v2063_v5, %v16266_v43  ;;  %2567 = vmatprep.mubr.bf16.mxu0 %v12265_v33  ;;  %v2064_v6 = vsel %vm799_vm7, %v2061_v17, %v16269_v11  ;;  %v8406_v22 = vunpack.i.h.bf16 %v12097_v41  ;;  %v8474_v54 = vpop.permute.xlu0 %8473  ;;  %v9986_v17 = vld [vmem:[%s16079_s1 + $0xc4] ss:$16 sps:$4 sm:$0xff]   ;;  %v16272_v40 = vld [vmem:[#allocation26_spill] sm:$0xff]  ;;  %v9988_v43 = vld [vmem:[%s16079_s1 + $0xc0] ss:$16 sps:$4 sm:$0xff]   ;;  %s16285_s1 = smov 109  }
 0x3b0   : > { %v2294_v27 = vpack.c.bf16 %v2066_v39, %v2065_v34  ;;  %v2000_v13 = vsel %vm799_vm7, %v1997_v26, %v16268_v15  ;;  %v1995_v48 = vsel %vm1598_vm1, %v8440_v61, %v1977_v37  ;;  %v1956_v1 = vsel %vm799_vm7, %v8455_v52, %v8440_v61  ;;  %v8479_v57 = vpop.permute.xlu1 %8478 }
 0x3b1   : > { %v2291_v51 = vpack.c.bf16 %v2064_v6, %v2000_v13  ;;  %v1994_v14 = vsel %vm1594_vm5, %v8405_v38, %v1958_v32  ;;  %v1999_v62 = vsel %vm799_vm7, %v1996_v45, %v16270_v60  ;;  %v1957_v59 = vsel %vm799_vm7, %v8456_v49, %v8441_v28 }
 0x3b2   : > { %2425 = vmatprep.subr.bf16.mxu1 %v2294_v27  ;;  %v8471_v12 = vunpack.i.h.bf16 %v8469_v21  ;;  %v8470_v42 = vunpack.i.l.bf16 %v8469_v21  ;;  %v2058_v38 = vsel %vm1594_vm5, %v12106_v55, %v2022_v2  ;;  %v8476_v63 = vunpack.i.h.bf16 %v8474_v54 }
 0x3b3   : > { %2426 = vmatpush2.bf16.msra.mxu1 %v2293_v44  ;;  %v8475_v53 = vunpack.i.l.bf16 %v8474_v54  ;;  %v16271_v9 = vunpack.i.h.bf16 %v16267_v8  ;;  %v1992_v28 = vsel %vm1594_vm5, %v8406_v22, %v1956_v1  ;;  %v2290_v18 = vpack.c.bf16 %v2058_v38, %v1994_v14  ;;  %v8484_v20 = vpop.permute.xlu0 %8483 }
 0x3b4   : > { %2427 = vmatprep.subr.bf16.mxu1 %v2291_v51  ;;  %v1993_v19 = vsel %vm1594_vm5, %v1938_v31, %v1957_v59  ;;  %v8481_v24 = vunpack.i.h.bf16 %v8479_v57  ;;  %v8480_v45 = vunpack.i.l.bf16 %v8479_v57  ;;  %v1912_v55 = vsel %vm740_vm2, %v8470_v42, %v8471_v12  ;;  %v1874_v29 = vpop.permute.xlu1 %1873 }
 0x3b5   : > { %v1998_v41 = vsel %vm799_vm7, %v1995_v48, %v16271_v9  ;;  %v1913_v23 = vsel %vm740_vm2, %v8475_v53, %v8476_v63  ;;  %v8486_v46 = vunpack.i.h.bf16 %v8484_v20  ;;  %v8485_v50 = vunpack.i.l.bf16 %v8484_v20 }
 0x3b6   : > { %v2288_v61 = vpack.c.bf16 %v1999_v62, %v1998_v41  ;;  %2568 = vmatmul.mubr.bf16.gmra.mxu0 %v9985_v25  ;;  %v1930_v58 = vsel %vm1598_vm1, %v8480_v45, %v1912_v55  ;;  %v1931_v56 = vsel %vm1598_vm1, %v8481_v24, %v1913_v23  ;;  %v8196_v5 = vunpack.i.h.bf16 %v16272_v40 }
 0x3b7   : > { %2428 = vmatpush2.bf16.msra.mxu1 %v2290_v18  ;;  %2575 = vmatprep.mubr.bf16.mxu0 %v9986_v17  ;;  %v2287_v0 = vpack.c.bf16 %v1993_v19, %v1992_v28  ;;  %v16274_v32 = vunpack.i.h.bf16 %v16273_v7  ;;  %v1934_v16 = vsel %vm799_vm7, %v1931_v56, %v16275_v47  ;;  %v1891_v34 = vsel %vm718_vm3, %v8485_v50, %v8480_v45 }
 0x3b8   : > { %2429 = vmatprep.subr.bf16.mxu1 %v2288_v61  ;;  %v1892_v49 = vsel %vm718_vm3, %v8486_v46, %v8481_v24  ;;  %v1927_v39 = vsel %vm1594_vm5, %v8196_v5, %v1891_v34  ;;  %vm15970_vm15 = vmmov 0   ;;  %vm2888_vm10 = vcmask 588800  }
 0x3b9   : > { %v1933_v52 = vsel %vm799_vm7, %v1930_v58, %v16274_v32  ;;  %v1928_v44 = vsel %vm1594_vm5, %v1874_v29, %v1892_v49  ;;  %vm16342_vm5 = vmmov %vm16244_vm11  ;;  %vm16349_vm9 = vcmask 965632   ;;  %vm2950_vm6 = vcmask 973824  }
 0x3ba   : > { %v2285_v31 = vpack.c.bf16 %v1934_v16, %v1933_v52  ;;  %v2284_v26 = vpack.c.bf16 %v1928_v44, %v1927_v39  ;;  %vm16350_vm11 = vmmov %vm16349_vm9  ;;  %vm16353_vm0 = vcmask 719872  }
 0x3bb   : > { %2430 = vmatpush2.bf16.msra.mxu1 %v2287_v0  ;;  %vm16356_vm14 = vmmov %vm16353_vm0 }
 0x3bc   : > { %2431 = vmatprep.subr.bf16.mxu1 %v2285_v31 }
 0x3bd   : > { %v12366_v54 = vpop.permute.xlu0 %2320 }
 0x3be   : > { %2576 = vmatmul.mubr.bf16.gmra.mxu0 %v9988_v43 }
 0x3bf   : > { %2432 = vmatpush2.bf16.msra.mxu1 %v2284_v26  ;;  %7353 = vmatprep.mubr.msk.bf16.mxu0 %vm15970_vm15, %v15910_v4  ;;  %v12364_v22 = vpop.permute.xlu1 %2325 }
 0x3c2   : > { %2434 = vmatmul.mubr.bf16.vlgmr.msra.gmra.mxu1 %v12251_v30 }
 0x3c3   : > { %2443 = vmatprep.mubr.bf16.mxu1 %v12265_v33  ;;  %v2313_v63 = vpop.permute.xlu1 %2312 }
 0x3c6   : > { %7354 = vmatmul.mubr.msk.bf16.vlgmr.msra.gmra.mxu0 %vm1259_vm8, %v12022_v35 }
 0x3c7   : > { %7357 = vmatprep.mubr.msk.bf16.mxu0 %vm15970_vm15, %v15910_v4 }
 0x3c9   : > { %v2317_v61 = vpop.permute.xlu0 %2316 }
 0x3ca   : > { %2444 = vmatmul.mubr.bf16.gmra.mxu1 %v9985_v25 }
 0x3cb   : > { %2453 = vmatprep.mubr.bf16.mxu1 %v9986_v17 }
 0x3ce   : > { %7358 = vmatmul.mubr.msk.bf16.gmra.mxu0 %vm1259_vm8, %v12084_v3 }
 0x3cf   : > { %7361 = vmatprep.mubr.msk.bf16.mxu0 %vm15970_vm15, %v15910_v4  ;;  %vm16357_vm15 = vmmov %vm16353_vm0 }
 0x3d2   : > { %2454 = vmatmul.mubr.bf16.gmra.mxu1 %v9988_v43 }
 0x3d6   : > { %7362 = vmatmul.mubr.msk.bf16.gmra.mxu0 %vm1259_vm8, %v12162_v10  ;;  %vm2895_vm8 = vcmask 130048  }
 0x448   : > { %v2498_v30 = vpop.f32.mrf.mxu0 }
 0x44a   : > { %v2500_v33 = vpop.f32.mrf.mxu0 }
 0x44c   : > { %v2502_v37 = vpop.f32.mrf.mxu0 }
 0x44e   : > { %v2504_v27 = vpop.f32.mrf.mxu0 }
 0x450   : > { %v12348_v35 = vpop.f32.mrf.mxu0 }
 0x452   : > { %v12350_v8 = vpop.f32.mrf.mxu0 }
 0x454   : > { %v12352_v15 = vpop.f32.mrf.mxu0 }
 0x456   : > { %v12354_v13 = vpop.f32.mrf.mxu0 }
 0x458   : > { %v12356_v3 = vpop.f32.mrf.mxu0 }
 0x45a   : > { %v12358_v11 = vpop.f32.mrf.mxu0 }
 0x45c   : > { %v12360_v6 = vpop.f32.mrf.mxu0 }
 0x45e   : > { %v12362_v2 = vpop.f32.mrf.mxu0 }
 0x46e   : > { %v7140_v10 = vpop.f32.mrf.mxu0 }
 0x470   : > { %v7141_v21 = vpop.f32.mrf.mxu0 }
 0x471   : > { %v7142_v38 = vadd.f32 %v7141_v21, %v7140_v10 }
 0x472   : > { %v7143_v51 = vpop.f32.mrf.mxu0 }
 0x473   : > { %v2562_v24 = vadd.f32 %v7142_v38, %v2313_v63 }
 0x474   : > { %v7144_v48 = vpop.f32.mrf.mxu0 }
 0x475   : > { %v7145_v1 = vadd.f32 %v7144_v48, %v7143_v51 }
 0x476   : > { %v7146_v14 = vpop.f32.mrf.mxu0 }
 0x477   : > { %v2565_v7 = vadd.f32 %v7145_v1, %v2317_v61 }
 0x478   : > { %v7147_v25 = vpop.f32.mrf.mxu0 }
 0x479   : > { %v7148_v60 = vadd.f32 %v7147_v25, %v7146_v14 }
 0x47a   : > { %v7149_v62 = vpop.f32.mrf.mxu0 }
 0x47c   : > { %v7150_v59 = vpop.f32.mrf.mxu0 }
 0x47d   : > { %v7151_v12 = vadd.f32 %v7150_v59, %v7149_v62 }
 0x47e   : > { %v7152_v42 = vpop.f32.mrf.mxu0 }
 0x480   : > { %v7153_v17 = vpop.f32.mrf.mxu0 }
 0x481   : > { %v12368_v53 = vadd.f32 %v7153_v17, %v7152_v42  ;;  %v12407_v42 = vpop.permute.xlu1 %2330 }
 0x482   : > { %v2435_v9 = vpop.f32.mrf.mxu1  ;;  %v7155_v41 = vpop.f32.mrf.mxu0 }
 0x483   : > { %v2436_v28 = vadd.f32 %v2435_v9, %v2313_v63  ;;  %v12414_v9 = vpop.permute.xlu0 %2335 }
 0x484   : > { %v2437_v57 = vpop.f32.mrf.mxu1  ;;  %v7156_v18 = vpop.f32.mrf.mxu0 }
 0x485   : > { %v2438_v19 = vadd.f32 %v2437_v57, %v2313_v63  ;;  %v12370_v23 = vadd.f32 %v7156_v18, %v7155_v41  ;;  %v12372_v45 = vadd.f32 %v2498_v30, %v2436_v28  ;;  %v2578_v18 = vadd.f32 %v12368_v53, %v12407_v42 }
 0x486   : > { %v2439_v55 = vpop.f32.mrf.mxu1  ;;  %v2618_v20 = vpop.f32.mrf.mxu0 }
 0x487   : > { %v12374_v46 = vadd.f32 %v2500_v33, %v2438_v19  ;;  %v2440_v50 = vadd.f32 %v2439_v55, %v2317_v61  ;;  %v12376_v58 = vadd.f32 %v2618_v20, %v2562_v24  ;;  %v6948_v32 = vmul.f32 -1.442695, %v12372_v45 }
 0x488   : > { %v2441_v56 = vpop.f32.mrf.mxu1  ;;  %v7355_v40 = vpop.f32.mrf.mxu0 }
 0x489   : > { %v6949_v5 = vmul.f32 -1.442695, %v12374_v46  ;;  %v12379_v0 = vadd.f32 %v2502_v37, %v2440_v50  ;;  %v6950_v29 = vmul.f32 -1.442695, %v12376_v58  ;;  %v2442_v52 = vadd.f32 %v2441_v56, %v2317_v61 }
 0x48a   : > { %v12383_v47 = vpop.f32.mrf.mxu1  ;;  %v2621_v16 = vpop.f32.mrf.mxu0  ;;  %v2570_v37 = vadd.f32 %v7148_v60, %v12366_v54  ;;  %v2573_v60 = vadd.f32 %v7151_v12, %v12364_v22  ;;  %v2581_v56 = vadd.f32 %v12370_v23, %v12414_v9 }
 0x48b   : > { %10067 = vpow2.f32 %v6949_v5  ;;  %v6951_v34 = vmul.f32 -1.442695, %v12379_v0  ;;  %v12386_v49 = vadd.f32 %v2621_v16, %v2565_v7  ;;  %v12388_v31 = vadd.f32 %v2504_v27, %v2442_v52 }
 0x48c   : > { %10069 = vpow2.f32 %v6950_v29  ;;  %v2447_v43 = vpop.f32.mrf.mxu1  ;;  %v7356_v39 = vpop.f32.mrf.mxu0 }
 0x48d   : > { %10071 = vpow2.f32 %v6951_v34  ;;  %v6953_v44 = vmul.f32 -1.442695, %v12386_v49  ;;  %v2448_v26 = vadd.f32 %v2447_v43, %v12366_v54  ;;  %v6952_v30 = vmul.f32 -1.442695, %v12388_v31 }
 0x48e   : > { %10073 = vpow2.f32 %v6948_v32  ;;  %v12393_v33 = vpop.f32.mrf.mxu1  ;;  %v2626_v10 = vpop.f32.mrf.mxu0 }
 0x48f   : > { %10075 = vpow2.f32 %v6953_v44  ;;  %v12397_v21 = vadd.f32 %v12350_v8, %v2448_v26  ;;  %v12399_v27 = vadd.f32 %v2626_v10, %v2570_v37 }
 0x490   : > { %10077 = vpow2.f32 %v6952_v30  ;;  %v2451_v51 = vpop.f32.mrf.mxu1  ;;  %v7359_v48 = vpop.f32.mrf.mxu0 }
 0x491   : > { %v6955_v1 = vmul.f32 -1.442695, %v12397_v21  ;;  %v2452_v14 = vadd.f32 %v2451_v51, %v12364_v22  ;;  %v6956_v25 = vmul.f32 -1.442695, %v12399_v27 }
 0x492   : > { %v12404_v62 = vpop.f32.mrf.mxu1  ;;  %v2629_v59 = vpop.f32.mrf.mxu0 }
 0x493   : > { %10079 = vpow2.f32 %v6955_v1  ;;  %v12410_v8 = vadd.f32 %v12354_v13, %v2452_v14  ;;  %v12412_v17 = vadd.f32 %v2629_v59, %v2573_v60 }
 0x494   : > { %10081 = vpow2.f32 %v6956_v25  ;;  %v2457_v38 = vpop.f32.mrf.mxu1  ;;  %v7360_v63 = vpop.f32.mrf.mxu0 }
 0x495   : > { %v6958_v41 = vmul.f32 -1.442695, %v12410_v8  ;;  %v2458_v28 = vadd.f32 %v2457_v38, %v12407_v42  ;;  %v6959_v12 = vmul.f32 -1.442695, %v12412_v17 }
 0x496   : > { %v12419_v57 = vpop.f32.mrf.mxu1  ;;  %v2634_v13 = vpop.f32.mrf.mxu0 }
 0x497   : > { %v12424_v19 = vadd.f32 %v12358_v11, %v2458_v28  ;;  %v12426_v24 = vadd.f32 %v2634_v13, %v2578_v18  ;;  %10083 = vpow2.f32 %v6958_v41 }
 0x498   : > { %v10068_v61 = vpop.eup %10067  ;;  %v7363_v55 = vpop.f32.mrf.mxu0  ;;  %10085 = vpow2.f32 %v6959_v12 }
 0x499   : > { %v10070_v20 = vpop.eup %10069  ;;  %v2696_v50 = vadd.f32 1.0, %v10068_v61  ;;  %v2461_v29 = vpop.f32.mrf.mxu1  ;;  %v6961_v16 = vmul.f32 -1.442695, %v12424_v19  ;;  %v6962_v51 = vmul.f32 -1.442695, %v12426_v24 }
 0x49a   : > { %v10072_v40 = vpop.eup %10071  ;;  %v2697_v5 = vadd.f32 1.0, %v10070_v20  ;;  %v2637_v7 = vpop.f32.mrf.mxu0  ;;  %v2462_v44 = vadd.f32 %v2461_v29, %v12414_v9 }
 0x49b   : > { %v10074_v53 = vpop.eup %10073  ;;  %10087 = vrcp.f32 %v2696_v50  ;;  %v2698_v32 = vadd.f32 1.0, %v10072_v40  ;;  %v12430_v52 = vadd.f32 %v2637_v7, %v2581_v56 }
 0x49c   : > { %v10076_v11 = vpop.eup %10075  ;;  %10089 = vrcp.f32 %v2697_v5  ;;  %v7364_v34 = vpop.f32.mrf.mxu0  ;;  %v2695_v26 = vadd.f32 1.0, %v10074_v53  ;;  %v12435_v10 = vadd.f32 %v12362_v2, %v2462_v44 }
 0x49d   : > { %v10078_v43 = vpop.eup %10077  ;;  %v2700_v39 = vadd.f32 1.0, %v10076_v11  ;;  %10091 = vrcp.f32 %v2698_v32  ;;  %v6965_v59 = vmul.f32 -1.442695, %v12430_v52 }
 0x49e   : > { %v2699_v23 = vadd.f32 1.0, %v10078_v43  ;;  %10093 = vpow2.f32 %v6961_v16  ;;  %v6964_v14 = vmul.f32 -1.442695, %v12435_v10 }
 0x49f   : > { %10095 = vrcp.f32 %v2700_v39 }
 0x4a0   : > { %v10080_v30 = vpop.eup %10079  ;;  %10097 = vrcp.f32 %v2699_v23 }
 0x4a1   : > { %v10082_v37 = vpop.eup %10081  ;;  %10099 = vrcp.f32 %v2695_v26  ;;  %v2702_v48 = vadd.f32 1.0, %v10080_v30 }
 0x4a2   : > { %v2703_v1 = vadd.f32 1.0, %v10082_v37  ;;  %10101 = vpow2.f32 %v6962_v51 }
 0x4a3   : > { %10103 = vrcp.f32 %v2702_v48 }
 0x4a4   : > { %v10084_v25 = vpop.eup %10083  ;;  %10105 = vrcp.f32 %v2703_v1 }
 0x4a5   : > { %v10086_v60 = vpop.eup %10085  ;;  %10107 = vpow2.f32 %v6964_v14  ;;  %v2705_v28 = vadd.f32 1.0, %v10084_v25 }
 0x4a6   : > { %10109 = vpow2.f32 %v6965_v59  ;;  %v2706_v18 = vadd.f32 1.0, %v10086_v60 }
 0x4a7   : > { %10111 = vrcp.f32 %v2705_v28 }
 0x4a8   : > { %v10088_v38 = vpop.eup %10087  ;;  %10113 = vrcp.f32 %v2706_v18 }
 0x4a9   : > { %v10090_v63 = vpop.eup %10089  ;;  %v2750_v2 = vmul.f32 %v10088_v38, %v12374_v46 }
 0x4aa   : > { %v2751_v41 = vmul.f32 %v10090_v63, %v12376_v58  ;;  %v10092_v12 = vpop.eup %10091 }
 0x4ab   : > { %v10094_v61 = vpop.eup %10093  ;;  %v12449_v58 = vmul.f32 %v10092_v12, %v12379_v0 }
 0x4ac   : > { %v12442_v13 = vpack.i.bf16 %v2751_v41, %v2750_v2  ;;  %v10096_v55 = vpop.eup %10095  ;;  %v2708_v50 = vadd.f32 1.0, %v10094_v61 }
 0x4ad   : > { %v10098_v20 = vpop.eup %10097  ;;  %v2754_v40 = vmul.f32 %v10096_v55, %v12386_v49 }
 0x4ae   : > { %16276 = vst [vmem:[#allocation31_spill] sm:$0xff] %v12442_v13  ;;  %8505 = vrot.lane.b32.xlu0 %v12442_v13, %s16098_s20  ;;  %8490 = vrot.lane.b32.xlu1 %v12442_v13, %s16122_s3  ;;  %v10100_v46 = vpop.eup %10099  ;;  %v2753_v56 = vmul.f32 %v10098_v20, %v12388_v31  ;;  %10115 = vrcp.f32 %v2708_v50 }
 0x4af   : > { %v10102_v5 = vpop.eup %10101  ;;  %v12458_v29 = vmul.f32 %v10100_v46, %v12372_v45 }
 0x4b0   : > { %v10104_v7 = vpop.eup %10103  ;;  %v2709_v53 = vadd.f32 1.0, %v10102_v5  ;;  %v12468_v31 = vpack.i.bf16 %v2754_v40, %v2753_v56  ;;  %v12471_v34 = vpack.i.bf16 %v2753_v56, %v2750_v2 }
 0x4b1   : > { %v10106_v32 = vpop.eup %10105  ;;  %v12466_v49 = vpack.i.bf16 %v12449_v58, %v12458_v29  ;;  %v2756_v16 = vmul.f32 %v10104_v7, %v12397_v21 }
 0x4b2   : > { %8510 = vrot.lane.b32.xlu0 %v12442_v13, %s16277_s4  ;;  %8495 = vrot.lane.b32.xlu1 %v12442_v13, %s16128_s6  ;;  %v10108_v0 = vpop.eup %10107  ;;  %10117 = vrcp.f32 %v2709_v53  ;;  %16279 = vst [vmem:[#allocation27_spill] sm:$0xff] %v12468_v31  ;;  %v2757_v43 = vmul.f32 %v10106_v32, %v12399_v27 }
 0x4b3   : > { %16278 = vst [vmem:[#allocation24_spill] sm:$0xff] %v12466_v49  ;;  %v2711_v45 = vadd.f32 1.0, %v10108_v0  ;;  %v10110_v11 = vpop.eup %10109 }
 0x4b4   : > { %v2712_v39 = vadd.f32 1.0, %v10110_v11  ;;  %v10112_v44 = vpop.eup %10111  ;;  %v12478_v26 = vpack.i.bf16 %v2757_v43, %v2756_v16  ;;  %v2460_v43 = vadd.f32 %v12419_v57, %v12414_v9 }
 0x4b5   : > { %10119 = vrcp.f32 %v2711_v45  ;;  %v10114_v23 = vpop.eup %10113  ;;  %v2759_v30 = vmul.f32 %v10112_v44, %v12410_v8 }
 0x4b6   : > { %8515 = vrot.lane.b32.xlu0 %v12442_v13, %s16101_s18  ;;  %8500 = vrot.lane.b32.xlu1 %v12442_v13, %s16088_s26  ;;  %10121 = vrcp.f32 %v2712_v39  ;;  %v2760_v21 = vmul.f32 %v10114_v23, %v12412_v17  ;;  %v2456_v23 = vadd.f32 %v12404_v62, %v12407_v42 }
 0x4b7   : > { %v12490_v37 = vpack.i.bf16 %v2759_v30, %v2756_v16 }
 0x4b8   : > { %v12494_v1 = vpack.i.bf16 %v2760_v21, %v2759_v30  ;;  %v12687_v30 = vadd.f32 %v12360_v6, %v2460_v43  ;;  %v12694_v9 = vadd.f32 %v12356_v3, %v2456_v23 }
 0x4ba   : > { %8520 = vrot.lane.b32.xlu0 %v12442_v13, %s16280_s23  ;;  %8530 = vrot.lane.b32.xlu1 %v12466_v49, %s16102_s14  ;;  %16281 = vst [vmem:[#allocation40_spill] sm:$0xff] %v12494_v1  ;;  %v6963_v62 = vmul.f32 -1.442695, %v12687_v30  ;;  %v6960_v6 = vmul.f32 -1.442695, %v12694_v9 }
 0x4bb   : > { %v10116_v27 = vpop.eup %10115 }
 0x4bc   : > { %v2762_v8 = vmul.f32 %v10116_v27, %v12424_v19 }
 0x4be   : > { %8525 = vrot.lane.b32.xlu0 %v12442_v13, %s16111_s19  ;;  %8540 = vrot.lane.b32.xlu1 %v12466_v49, %s16087_s25 }
 0x4bf   : > { %v10118_v51 = vpop.eup %10117 }
 0x4c0   : > { %v2763_v48 = vmul.f32 %v10118_v51, %v12426_v24 }
 0x4c2   : > { %8535 = vrot.lane.b32.xlu0 %v12466_v49, %s16095_s27  ;;  %8550 = vrot.lane.b32.xlu1 %v12466_v49, %s16112_s28  ;;  %v10120_v17 = vpop.eup %10119  ;;  %v12504_v25 = vpack.i.bf16 %v2763_v48, %v2762_v8 }
 0x4c3   : > { %v10122_v14 = vpop.eup %10121  ;;  %v2765_v19 = vmul.f32 %v10120_v17, %v12435_v10  ;;  %v2446_v10 = vadd.f32 %v12383_v47, %v12366_v54 }
 0x4c4   : > { %v2766_v24 = vmul.f32 %v10122_v14, %v12430_v52  ;;  %v2450_v52 = vadd.f32 %v12393_v33, %v12364_v22 }
 0x4c5   : > { %v12512_v60 = vpack.i.bf16 %v2765_v19, %v2762_v8  ;;  %v2509_v63 = vadd.f32 %v12348_v35, %v2446_v10 }
 0x4c6   : > { %8545 = vrot.lane.b32.xlu0 %v12466_v49, %s16085_s15  ;;  %8565 = vrot.lane.b32.xlu1 %v12466_v49, %s16130_s22  ;;  %v12514_v59 = vpack.i.bf16 %v2766_v24, %v2765_v19  ;;  %v2513_v38 = vadd.f32 %v12352_v15, %v2450_v52 }
 0x4c7   : > { %v6954_v33 = vmul.f32 -1.442695, %v2509_v63 }
 0x4c8   : > { %v6957_v22 = vmul.f32 -1.442695, %v2513_v38 }
 0x4ca   : > { %8555 = vrot.lane.b32.xlu0 %v12466_v49, %s16092_s8  ;;  %8570 = vrot.lane.b32.xlu1 %v12466_v49, %s16121_s0  ;;  %10123 = vpow2.f32 %v6957_v22 }
 0x4cb   : > { %10125 = vpow2.f32 %v6954_v33 }
 0x4ce   : > { %8560 = vrot.lane.b32.xlu0 %v12466_v49, %s16131_s5  ;;  %8585 = vrot.lane.b32.xlu1 %v12466_v49, %s16099_s10 }
 0x4d2   : > { %8575 = vrot.lane.b32.xlu0 %v12466_v49, %s16093_s9  ;;  %8590 = vrot.lane.b32.xlu1 %v12466_v49, %s16120_s11 }
 0x4d6   : > { %8580 = vrot.lane.b32.xlu0 %v12466_v49, %s16103_s13  ;;  %8605 = vrot.lane.b32.xlu1 %v12471_v34, %s16102_s14 }
 0x4d7   : > { %v10124_v35 = vpop.eup %10123 }
 0x4d8   : > { %v10126_v15 = vpop.eup %10125  ;;  %v2704_v54 = vadd.f32 1.0, %v10124_v35 }
 0x4d9   : > { %v2701_v47 = vadd.f32 1.0, %v10126_v15 }
 0x4da   : > { %8595 = vrot.lane.b32.xlu0 %v12466_v49, %s16091_s7  ;;  %8620 = vrot.lane.b32.xlu1 %v12471_v34, %s16087_s25  ;;  %10127 = vrcp.f32 %v2704_v54 }
 0x4db   : > { %10129 = vrcp.f32 %v2701_v47 }
 0x4dc   : > { %10131 = vpow2.f32 %v6963_v62 }
 0x4dd   : > { %10133 = vpow2.f32 %v6960_v6 }
 0x4de   : > { %8600 = vrot.lane.b32.xlu0 %v12466_v49, %s16282_s12  ;;  %8635 = vrot.lane.b32.xlu1 %v12471_v34, %s16112_s28 }
 0x4e2   : > { %8610 = vrot.lane.b32.xlu0 %v12471_v34, %s16097_s30  ;;  %8655 = vrot.lane.b32.xlu1 %v12471_v34, %s16096_s17 }
 0x4e6   : > { %8615 = vrot.lane.b32.xlu0 %v12468_v31, %s16122_s3  ;;  %8660 = vrot.lane.b32.xlu1 %v12468_v31, %s16098_s20 }
 0x4e7   : > { %v10128_v2 = vpop.eup %10127 }
 0x4e8   : > { %v10130_v41 = vpop.eup %10129  ;;  %v12582_v28 = vmul.f32 %v10128_v2, %v2513_v38 }
 0x4e9   : > { %v12584_v12 = vmul.f32 %v10130_v41, %v2509_v63  ;;  %v10132_v52 = vpop.eup %10131 }
 0x4ea   : > { %8625 = vrot.lane.b32.xlu0 %v12471_v34, %s16119_s16  ;;  %8670 = vrot.lane.b32.xlu1 %v12471_v34, %s16090_s24  ;;  %16286 = vst [vmem:[#allocation30_spill] sm:$0xff] %v12582_v28  ;;  %v10134_v63 = vpop.eup %10133  ;;  %v2710_v33 = vadd.f32 1.0, %v10132_v52 }
 0x4eb   : > { %16287 = vst [vmem:[#allocation47_spill] sm:$0xff] %v12584_v12  ;;  %v12592_v18 = vpack.i.bf16 %v12582_v28, %v12584_v12  ;;  %v2707_v54 = vadd.f32 1.0, %v10134_v63 }
 0x4ec   : > { %10135 = vrcp.f32 %v2710_v33 }
 0x4ed   : > { %16288 = vst [vmem:[#allocation22_spill] sm:$0xff] %v12592_v18  ;;  %10137 = vrcp.f32 %v2707_v54 }
 0x4ee   : > { %8630 = vrot.lane.b32.xlu0 %v12468_v31, %s16128_s6  ;;  %8675 = vrot.lane.b32.xlu1 %v12468_v31, %s16277_s4 }
 0x4f2   : > { %8640 = vrot.lane.b32.xlu0 %v12471_v34, %s16124_s21  ;;  %8685 = vrot.lane.b32.xlu1 %v12471_v34, %s16283_s29 }
 0x4f6   : > { %8645 = vrot.lane.b32.xlu0 %v12468_v31, %s16088_s26  ;;  %8690 = vrot.lane.b32.xlu1 %v12468_v31, %s16101_s18 }
 0x4fa   : > { %8650 = vrot.lane.b32.xlu0 %v12471_v34, %s16092_s8  ;;  %8700 = vrot.lane.b32.xlu1 %v12471_v34, %s16284_s2 }
 0x4fe   : > { %8665 = vrot.lane.b32.xlu0 %v12471_v34, %s16130_s22  ;;  %8705 = vrot.lane.b32.xlu1 %v12468_v31, %s16280_s23 }
 0x502   : > { %8680 = vrot.lane.b32.xlu0 %v12471_v34, %s16093_s9  ;;  %8715 = vrot.lane.b32.xlu1 %v12471_v34, %s16285_s1 }
 0x506   : > { %8695 = vrot.lane.b32.xlu0 %v12471_v34, %s16099_s10  ;;  %8720 = vrot.lane.b32.xlu1 %v12468_v31, %s16111_s19 }
 0x50a   : > { %8710 = vrot.lane.b32.xlu0 %v12471_v34, %s16091_s7  ;;  %8725 = vrot.lane.b32.xlu1 %v12478_v26, %s16122_s3 }
 0x50e   : > { %8735 = vrot.lane.b32.xlu0 %v12478_v26, %s16088_s26  ;;  %8730 = vrot.lane.b32.xlu1 %v12478_v26, %s16128_s6 }
 0x512   : > { %8740 = vrot.lane.b32.xlu0 %v12478_v26, %s16277_s4  ;;  %8765 = vrot.lane.b32.xlu1 %v12592_v18, %s16102_s14 }
 0x516   : > { %8745 = vrot.lane.b32.xlu0 %v12478_v26, %s16101_s18  ;;  %8775 = vrot.lane.b32.xlu1 %v12592_v18, %s16087_s25 }
 0x51a   : > { %8750 = vrot.lane.b32.xlu0 %v12478_v26, %s16280_s23  ;;  %8790 = vrot.lane.b32.xlu1 %v12592_v18, %s16130_s22 }
 0x51e   : > { %8755 = vrot.lane.b32.xlu0 %v12478_v26, %s16111_s19  ;;  %8795 = vrot.lane.b32.xlu1 %v12592_v18, %s16121_s0 }
 0x520   : > { %v12610_v61 = vpop.permute.xlu0 %8505  ;;  %v12612_v55 = vpop.permute.xlu1 %8490 }
 0x521   : > { %16289 = vst [vmem:[#allocation33_spill] sm:$0xff] %v12610_v61  ;;  %v15915_v10 = vunpack.i.h.bf16 %v12612_v55  ;;  %v8507_v31 = vunpack.i.l.bf16 %v12610_v61 }
 0x522   : > { %8760 = vrot.lane.b32.xlu0 %v12478_v26, %s16098_s20  ;;  %8810 = vrot.lane.b32.xlu1 %v12592_v18, %s16099_s10 }
 0x524   : > { %v12618_v20 = vpop.permute.xlu0 %8510  ;;  %v12620_v46 = vpop.permute.xlu1 %8495 }
 0x525   : > { %16290 = vst [vmem:[#allocation41_spill] sm:$0xff] %v12618_v20  ;;  %v15913_v41 = vunpack.i.h.bf16 %v12620_v46 }
 0x526   : > { %8770 = vrot.lane.b32.xlu0 %v12592_v18, %s16095_s27  ;;  %8815 = vrot.lane.b32.xlu1 %v12592_v18, %s16120_s11 }
 0x528   : > { %v12626_v50 = vpop.permute.xlu0 %8515  ;;  %v12628_v56 = vpop.permute.xlu1 %8500 }
 0x529   : > { %16291 = vst [vmem:[#allocation42_spill] sm:$0xff] %v12626_v50  ;;  %16292 = vst [vmem:[#allocation18_spill] sm:$0xff] %v12628_v56  ;;  %v15917_v33 = vunpack.i.h.bf16 %v12628_v56 }
 0x52a   : > { %8780 = vrot.lane.b32.xlu0 %v12592_v18, %s16085_s15  ;;  %8830 = vrot.lane.b32.xlu1 %v12592_v18, %s16092_s8 }
 0x52c   : > { %v12634_v40 = vpop.permute.xlu0 %8520  ;;  %v12636_v5 = vpop.permute.xlu1 %8530 }
 0x52d   : > { %16293 = vst [vmem:[#allocation38_spill] sm:$0xff] %v12634_v40  ;;  %v8532_v49 = vunpack.i.l.bf16 %v12636_v5 }
 0x52e   : > { %8785 = vrot.lane.b32.xlu0 %v12592_v18, %s16112_s28  ;;  %8835 = vrot.lane.b32.xlu1 %v12592_v18, %s16131_s5 }
 0x530   : > { %v12642_v7 = vpop.permute.xlu0 %8525  ;;  %v12644_v53 = vpop.permute.xlu1 %8540 }
 0x531   : > { %16294 = vst [vmem:[#allocation28_spill] sm:$0xff] %v12642_v7 }
 0x532   : > { %8800 = vrot.lane.b32.xlu0 %v12592_v18, %s16093_s9  ;;  %8840 = vrot.lane.b32.xlu1 %v12490_v37, %s16102_s14 }
 0x534   : > { %v12650_v32 = vpop.permute.xlu0 %8535  ;;  %v12652_v0 = vpop.permute.xlu1 %8550 }
 0x535   : > { %16295 = vst [vmem:[#allocation29_spill] sm:$0xff] %v12652_v0 }
 0x536   : > { %8805 = vrot.lane.b32.xlu0 %v12592_v18, %s16103_s13  ;;  %8855 = vrot.lane.b32.xlu1 %v12490_v37, %s16087_s25 }
 0x538   : > { %v12658_v45 = vpop.permute.xlu0 %8545  ;;  %v12660_v11 = vpop.permute.xlu1 %8565 }
 0x53a   : > { %8820 = vrot.lane.b32.xlu0 %v12592_v18, %s16091_s7  ;;  %8875 = vrot.lane.b32.xlu1 %v12490_v37, %s16124_s21 }
 0x53c   : > { %v12666_v16 = vpop.permute.xlu0 %8555  ;;  %v12668_v34 = vpop.permute.xlu1 %8570 }
 0x53e   : > { %8825 = vrot.lane.b32.xlu0 %v12592_v18, %s16282_s12  ;;  %8880 = vrot.lane.b32.xlu1 %v12494_v1, %s16088_s26 }
 0x540   : > { %v12676_v39 = vpop.permute.xlu0 %8560  ;;  %v12678_v44 = vpop.permute.xlu1 %8585 }
 0x542   : > { %8845 = vrot.lane.b32.xlu0 %v12490_v37, %s16097_s30  ;;  %8890 = vrot.lane.b32.xlu1 %v12490_v37, %s16090_s24 }
 0x544   : > { %v12689_v21 = vpop.permute.xlu0 %8575  ;;  %v12691_v27 = vpop.permute.xlu1 %8590 }
 0x546   : > { %8850 = vrot.lane.b32.xlu0 %v12494_v1, %s16122_s3  ;;  %8895 = vrot.lane.b32.xlu1 %v12494_v1, %s16277_s4 }
 0x548   : > { %v12701_v42 = vpop.permute.xlu0 %8580  ;;  %v12703_v57 = vpop.permute.xlu1 %8605 }
 0x54a   : > { %8860 = vrot.lane.b32.xlu0 %v12490_v37, %s16119_s16  ;;  %8905 = vrot.lane.b32.xlu1 %v12490_v37, %s16283_s29 }
 0x54c   : > { %v12710_v3 = vpop.permute.xlu0 %8595  ;;  %v12712_v51 = vpop.permute.xlu1 %8620 }
 0x54e   : > { %8865 = vrot.lane.b32.xlu0 %v12494_v1, %s16128_s6  ;;  %8910 = vrot.lane.b32.xlu1 %v12494_v1, %s16101_s18 }
 0x550   : > { %v12718_v8 = vpop.permute.xlu0 %8600  ;;  %v12720_v48 = vpop.permute.xlu1 %8635 }
 0x552   : > { %8870 = vrot.lane.b32.xlu0 %v12490_v37, %s16112_s28  ;;  %8920 = vrot.lane.b32.xlu1 %v12490_v37, %s16284_s2 }
 0x554   : > { %v12726_v17 = vpop.permute.xlu0 %8610  ;;  %v12728_v14 = vpop.permute.xlu1 %8655 }
 0x556   : > { %8885 = vrot.lane.b32.xlu0 %v12490_v37, %s16130_s22  ;;  %8925 = vrot.lane.b32.xlu1 %v12494_v1, %s16280_s23 }
 0x558   : > { %v12734_v19 = vpop.permute.xlu0 %8615  ;;  %v12736_v24 = vpop.permute.xlu1 %8660 }
 0x559   : > { %16296 = vst [vmem:[#allocation34_spill] sm:$0xff] %v12736_v24  ;;  %v15914_v38 = vunpack.i.h.bf16 %v12734_v19 }
 0x55a   : > { %8900 = vrot.lane.b32.xlu0 %v12490_v37, %s16093_s9  ;;  %8935 = vrot.lane.b32.xlu1 %v12490_v37, %s16285_s1 }
 0x55b   : > { %v12748_v22 = vpack.c.bf16 %v15914_v38, %v15915_v10 }
 0x55c   : > { %v12750_v35 = vpop.permute.xlu0 %8625  ;;  %v12752_v15 = vpop.permute.xlu1 %8670 }
 0x55d   : > { %16297 = vst [vmem:[#allocation9_spill] sm:$0xff] %v12748_v22  ;;  %16298 = vst [vmem:[#allocation7_spill] sm:$0xff] %v12752_v15 }
 0x55e   : > { %8915 = vrot.lane.b32.xlu0 %v12490_v37, %s16099_s10  ;;  %8940 = vrot.lane.b32.xlu1 %v12494_v1, %s16111_s19 }
 0x560   : > { %v12758_v47 = vpop.permute.xlu0 %8630  ;;  %v12760_v2 = vpop.permute.xlu1 %8675 }
 0x561   : > { %16299 = vst [vmem:[#allocation8_spill] sm:$0xff] %v12760_v2  ;;  %v15912_v43 = vunpack.i.h.bf16 %v12758_v47 }
 0x562   : > { %8930 = vrot.lane.b32.xlu0 %v12490_v37, %s16091_s7  ;;  %8950 = vrot.lane.b32.xlu1 %v12490_v37, %s16096_s17 }
 0x563   : > { %v12772_v23 = vpack.c.bf16 %v15912_v43, %v15913_v41  ;;  %v10136_v41 = vpop.eup %10135 }
 0x564   : > { %v12774_v62 = vpop.permute.xlu0 %8640  ;;  %v12776_v6 = vpop.permute.xlu1 %8685  ;;  %v12807_v10 = vmul.f32 %v10136_v41, %v12687_v30 }
 0x565   : > { %16300 = vst [vmem:[#allocation25_spill] sm:$0xff] %v12772_v23  ;;  %16301 = vst [vmem:[#allocation35_spill] sm:$0xff] %v12774_v62  ;;  %v10138_v38 = vpop.eup %10137 }
 0x566   : > { %16302 = vst [vmem:[#allocation11_spill] sm:$0xff] %v12776_v6  ;;  %8945 = vrot.lane.b32.xlu0 %v12490_v37, %s16092_s8  ;;  %8955 = vrot.lane.b32.xlu1 %v12494_v1, %s16098_s20  ;;  %16308 = vst [vmem:[#allocation46_spill] sm:$0xff] %v12807_v10  ;;  %v8533_v6 = vunpack.i.h.bf16 %v12636_v5 }
 0x568   : > { %v12782_v52 = vpop.permute.xlu0 %8645  ;;  %v12784_v63 = vpop.permute.xlu1 %8690 }
 0x569   : > { %16303 = vst [vmem:[#allocation16_spill] sm:$0xff] %v12782_v52  ;;  %16304 = vst [vmem:[#allocation44_spill] sm:$0xff] %v12784_v63  ;;  %v15916_v54 = vunpack.i.h.bf16 %v12782_v52 }
 0x56a   : > { %8975 = vrot.lane.b32.xlu0 %v12504_v25, %s16101_s18  ;;  %8960 = vrot.lane.b32.xlu1 %v12504_v25, %s16128_s6 }
 0x56b   : > { %v12796_v37 = vpack.c.bf16 %v15916_v54, %v15917_v33  ;;  %v12814_v54 = vmul.f32 %v10138_v38, %v12694_v9 }
 0x56c   : > { %v12798_v4 = vpop.permute.xlu0 %8650  ;;  %v12800_v43 = vpop.permute.xlu1 %8700 }
 0x56d   : > { %16305 = vst [vmem:[#allocation13_spill] sm:$0xff] %v12796_v37  ;;  %16306 = vst [vmem:[#allocation19_spill] sm:$0xff] %v12798_v4  ;;  %v12826_v30 = vpack.i.bf16 %v12807_v10, %v12814_v54 }
 0x56e   : > { %16307 = vst [vmem:[#allocation32_spill] sm:$0xff] %v12800_v43  ;;  %8980 = vrot.lane.b32.xlu0 %v12504_v25, %s16280_s23  ;;  %8965 = vrot.lane.b32.xlu1 %v12504_v25, %s16088_s26  ;;  %16311 = vst [vmem:[#allocation17_spill] sm:$0xff] %v12814_v54  ;;  %v8492_v43 = vunpack.i.l.bf16 %v12612_v55 }
 0x570   : > { %v12809_v23 = vpop.permute.xlu0 %8665  ;;  %v12811_v22 = vpop.permute.xlu1 %8705 }
 0x571   : > { %16309 = vst [vmem:[#allocation39_spill] sm:$0xff] %v12809_v23  ;;  %16310 = vst [vmem:[#allocation36_spill] sm:$0xff] %v12811_v22 }
 0x572   : > { %8985 = vrot.lane.b32.xlu0 %v12504_v25, %s16111_s19  ;;  %8970 = vrot.lane.b32.xlu1 %v12504_v25, %s16277_s4 }
 0x574   : > { %v12820_v33 = vpop.permute.xlu0 %8680  ;;  %v12822_v37 = vpop.permute.xlu1 %8715 }
 0x575   : > { %16312 = vst [vmem:[#allocation23_spill] sm:$0xff] %v12820_v33  ;;  %16313 = vst [vmem:[#allocation43_spill] sm:$0xff] %v12822_v37 }
 0x576   : > { %8990 = vrot.lane.b32.xlu0 %v12504_v25, %s16098_s20  ;;  %8995 = vrot.lane.b32.xlu1 %v12826_v30, %s16087_s25 }
 0x578   : > { %v12832_v9 = vpop.permute.xlu0 %8695  ;;  %v12834_v38 = vpop.permute.xlu1 %8720 }
 0x579   : > { %16314 = vst [vmem:[#allocation45_spill] sm:$0xff] %v12832_v9  ;;  %16315 = vst [vmem:[#allocation37_spill] sm:$0xff] %v12834_v38 }
 0x57a   : > { %9000 = vrot.lane.b32.xlu0 %v12826_v30, %s16085_s15  ;;  %9005 = vrot.lane.b32.xlu1 %v12826_v30, %s16112_s28 }
 0x57c   : > { %v12840_v41 = vpop.permute.xlu0 %8710  ;;  %v12842_v36 = vpop.permute.xlu1 %8725 }
 0x57d   : > { %16316 = vst [vmem:[#allocation20_spill] sm:$0xff] %v12840_v41 }
 0x57e   : > { %9010 = vrot.lane.b32.xlu0 %v12826_v30, %s16130_s22  ;;  %9015 = vrot.lane.b32.xlu1 %v12826_v30, %s16121_s0 }
 0x580   : > { %v12848_v10 = vpop.permute.xlu0 %8735  ;;  %v12850_v54 = vpop.permute.xlu1 %8730 }
 0x581   : > { %16317 = vst [vmem:[#allocation15_spill] sm:$0xff] %v12848_v10  ;;  %v16344_v23 = vunpack.i.h.bf16 %v12848_v10  ;;  %v8727_v10 = vunpack.i.l.bf16 %v12842_v36 }
 0x582   : > { %9020 = vrot.lane.b32.xlu0 %v12826_v30, %s16093_s9  ;;  %9030 = vrot.lane.b32.xlu1 %v12826_v30, %s16099_s10 }
 0x584   : > { %v12856_v28 = vpop.permute.xlu0 %8740  ;;  %v12858_v12 = vpop.permute.xlu1 %8765 }
 0x585   : > { %16318 = vst [vmem:[#allocation12_spill] sm:$0xff] %v12856_v28  ;;  %v8768_v5 = vunpack.i.h.bf16 %v12858_v12 }
 0x586   : > { %9025 = vrot.lane.b32.xlu0 %v12826_v30, %s16103_s13  ;;  %9035 = vrot.lane.b32.xlu1 %v12826_v30, %s16120_s11 }
 0x588   : > { %v12864_v38 = vpop.permute.xlu0 %8745  ;;  %v12866_v41 = vpop.permute.xlu1 %8775 }
 0x589   : > { %16319 = vst [vmem:[#allocation21_spill] sm:$0xff] %v12864_v38  ;;  %16320 = vst [vmem:[#allocation26_spill] sm:$0xff] %v12866_v41 }
 0x58a   : > { %9040 = vrot.lane.b32.xlu0 %v12826_v30, %s16091_s7  ;;  %9050 = vrot.lane.b32.xlu1 %v12826_v30, %s16092_s8 }
 0x58c   : > { %v12872_v37 = vpop.permute.xlu0 %8750  ;;  %v12874_v28 = vpop.permute.xlu1 %8790 }
 0x58d   : > { %16321 = vst [vmem:[#allocation14_spill] sm:$0xff] %v12872_v37  ;;  %16322 = vst [vmem:[#allocation10_spill] sm:$0xff] %v12874_v28 }
 0x58e   : > { %9045 = vrot.lane.b32.xlu0 %v12826_v30, %s16282_s12  ;;  %9055 = vrot.lane.b32.xlu1 %v12826_v30, %s16131_s5 }
 0x590   : > { %v12880_v9 = vpop.permute.xlu0 %8755  ;;  %v12882_v38 = vpop.permute.xlu1 %8795 }
 0x591   : > { %16323 = vst [vmem:[#allocation48_spill] sm:$0xff] %v12880_v9  ;;  %16324 = vst [vmem:[#allocation49_spill] sm:$0xff] %v12882_v38 }
 0x592   : > { %9065 = vrot.lane.b32.xlu0 %v12512_v60, %s16119_s16  ;;  %9060 = vrot.lane.b32.xlu1 %v12512_v60, %s16087_s25  ;;  %s16337_s16 = smov 96  }
 0x594   : > { %v12888_v41 = vpop.permute.xlu0 %8760  ;;  %v12890_v37 = vpop.permute.xlu1 %8810 }
 0x595   : > { %16325 = vst [vmem:[#allocation50_spill] sm:$0xff] %v12888_v41  ;;  %16326 = vst [vmem:[#allocation51_spill] sm:$0xff] %v12890_v37 }
 0x596   : > { %9070 = vrot.lane.b32.xlu0 %v12514_v59, %s16128_s6  ;;  %9080 = vrot.lane.b32.xlu1 %v12512_v60, %s16112_s28  ;;  %s16817_s6 = sld [smem:[#allocation95_spill]] }
 0x598   : > { %v12896_v28 = vpop.permute.xlu0 %8770  ;;  %v12898_v9 = vpop.permute.xlu1 %8815 }
 0x599   : > { %16327 = vst [vmem:[#allocation52_spill] sm:$0xff] %v12898_v9 }
 0x59a   : > { %9075 = vrot.lane.b32.xlu0 %v12504_v25, %s16122_s3  ;;  %9095 = vrot.lane.b32.xlu1 %v12512_v60, %s16130_s22 }
 0x59c   : > { %v12904_v38 = vpop.permute.xlu0 %8780  ;;  %v12906_v41 = vpop.permute.xlu1 %8830 }
 0x59d   : > { %16328 = vst [vmem:[#allocation53_spill] sm:$0xff] %v12904_v38  ;;  %16329 = vst [vmem:[#allocation54_spill] sm:$0xff] %v12906_v41 }
 0x59e   : > { %9085 = vrot.lane.b32.xlu0 %v12512_v60, %s16124_s21  ;;  %9120 = vrot.lane.b32.xlu1 %v12512_v60, %s16283_s29 }
 0x5a0   : > { %v12912_v37 = vpop.permute.xlu0 %8785  ;;  %v12914_v22 = vpop.permute.xlu1 %8835 }
 0x5a1   : > { %16330 = vst [vmem:[#allocation55_spill] sm:$0xff] %v12912_v37  ;;  %16331 = vst [vmem:[#allocation56_spill] sm:$0xff] %v12914_v22 }
 0x5a2   : > { %9090 = vrot.lane.b32.xlu0 %v12514_v59, %s16088_s26  ;;  %9125 = vrot.lane.b32.xlu1 %v12514_v59, %s16101_s18  ;;  %s16375_s18 = sld [smem:[#allocation92_spill]] }
 0x5a4   : > { %v12920_v9 = vpop.permute.xlu0 %8800  ;;  %v12922_v38 = vpop.permute.xlu1 %8840 }
 0x5a5   : > { %16332 = vst [vmem:[#allocation57_spill] sm:$0xff] %v12920_v9 }
 0x5a6   : > { %9100 = vrot.lane.b32.xlu0 %v12512_v60, %s16090_s24  ;;  %9140 = vrot.lane.b32.xlu1 %v12826_v30, %s16124_s21 }
 0x5a8   : > { %v12928_v41 = vpop.permute.xlu0 %8805  ;;  %v12930_v37 = vpop.permute.xlu1 %8855 }
 0x5a9   : > { %16333 = vst [vmem:[#allocation58_spill] sm:$0xff] %v12928_v41  ;;  %16334 = vst [vmem:[#allocation59_spill] sm:$0xff] %v12930_v37 }
 0x5aa   : > { %9105 = vrot.lane.b32.xlu0 %v12514_v59, %s16277_s4  ;;  %9145 = vrot.lane.b32.xlu1 %v12512_v60, %s16284_s2  ;;  %s16791_s4 = sld [smem:[#allocation93_spill]] }
 0x5ac   : > { %v12936_v22 = vpop.permute.xlu0 %8820  ;;  %v12938_v9 = vpop.permute.xlu1 %8875 }
 0x5ad   : > { %16335 = vst [vmem:[#allocation60_spill] sm:$0xff] %v12936_v22  ;;  %16336 = vst [vmem:[#allocation61_spill] sm:$0xff] %v12938_v9  ;;  %v16341_v22 = vunpack.i.h.bf16 %v12610_v61  ;;  %v8843_v61 = vunpack.i.h.bf16 %v12922_v38 }
 0x5ae   : > { %9110 = vrot.lane.b32.xlu0 %v12504_v25, %s16337_s16  ;;  %9150 = vrot.lane.b32.xlu1 %v12514_v59, %s16280_s23  ;;  %v16340_v25 = vunpack.i.h.bf16 %v12612_v55  ;;  %v8607_v55 = vunpack.i.l.bf16 %v12703_v57 }
 0x5af   : > { %v12967_v9 = vsel %vm16342_vm5, %v8507_v31, %v16341_v22  ;;  %v8612_v22 = vunpack.i.l.bf16 %v12726_v17  ;;  %vm16354_vm5 = vmmov %vm16349_vm9 }
 0x5b0   : > { %v12947_v41 = vpop.permute.xlu0 %8825  ;;  %v12949_v37 = vpop.permute.xlu1 %8880  ;;  %16343 = vst [vmem:[#allocation64_spill] sm:$0xff] %v12967_v9 }
 0x5b1   : > { %16338 = vst [vmem:[#allocation62_spill] sm:$0xff] %v12947_v41  ;;  %16339 = vst [vmem:[#allocation63_spill] sm:$0xff] %v12949_v37  ;;  %v12962_v41 = vsel %vm821_vm13, %v8492_v43, %v16340_v25  ;;  %v16345_v18 = vunpack.i.h.bf16 %v12949_v37  ;;  %v8617_v43 = vunpack.i.l.bf16 %v12734_v19  ;;  %v8728_v37 = vunpack.i.h.bf16 %v12842_v36 }
 0x5b2   : > { %9115 = vrot.lane.b32.xlu0 %v12512_v60, %s16093_s9  ;;  %9160 = vrot.lane.b32.xlu1 %v12512_v60, %s16285_s1  ;;  %v3173_v15 = vsel %vm2895_vm8, %v8607_v55, %v8612_v22 }
 0x5b3   : > { %v12976_v13 = vpack.c.bf16 %v16345_v18, %v16344_v23  ;;  %v8842_v18 = vunpack.i.l.bf16 %v12922_v38  ;;  %v8608_v23 = vunpack.i.h.bf16 %v12703_v57  ;;  %v16351_v57 = vunpack.i.h.bf16 %v12734_v19 }
 0x5b4   : > { %v8846_v25 = vpop.permute.xlu0 %8845  ;;  %v12982_v33 = vpop.permute.xlu1 %8890 }
 0x5b5   : > { %16346 = vst [vmem:[#allocation65_spill] sm:$0xff] %v12976_v13  ;;  %16347 = vst [vmem:[#allocation66_spill] sm:$0xff] %v12982_v33  ;;  %v8847_v31 = vunpack.i.l.bf16 %v8846_v25  ;;  %v8613_v13 = vunpack.i.h.bf16 %v12726_v17  ;;  %v8767_v33 = vunpack.i.l.bf16 %v12858_v12  ;;  %v8848_v38 = vunpack.i.h.bf16 %v8846_v25 }
 0x5b6   : > { %9130 = vrot.lane.b32.xlu0 %v12512_v60, %s16099_s10  ;;  %9165 = vrot.lane.b32.xlu1 %v12514_v59, %s16111_s19  ;;  %v3092_v17 = vsel %vm16350_vm11, %v8768_v5, %v8843_v61  ;;  %v8773_v12 = vunpack.i.h.bf16 %v12896_v28  ;;  %v8772_v25 = vunpack.i.l.bf16 %v12896_v28  ;;  %vm2803_vm11 = vcmask 982016  }
 0x5b7   : > { %v3091_v4 = vsel %vm16349_vm9, %v8767_v33, %v8842_v18  ;;  %v3175_v36 = vsel %vm2895_vm8, %v8842_v18, %v8847_v31  ;;  %v3150_v33 = vsel %vm821_vm13, %v8617_v43, %v16351_v57  ;;  %v3176_v5 = vsel %vm2895_vm8, %v8843_v61, %v8848_v38  ;;  %vm16355_vm9 = vmmov %vm16354_vm5 }
 0x5b8   : > { %v8851_v9 = vpop.permute.xlu0 %8850  ;;  %v13001_v63 = vpop.permute.xlu1 %8895  ;;  %v3174_v28 = vsel %vm2895_vm8, %v8608_v23, %v8613_v13  ;;  %v3169_v19 = vsel %vm2888_vm10, %v8772_v25, %v3091_v4  ;;  %v3170_v43 = vsel %vm2888_vm10, %v8773_v12, %v3092_v17  ;;  %v3089_v18 = vsel %vm16354_vm5, %v8532_v49, %v8607_v55 }
 0x5b9   : > { %16348 = vst [vmem:[#allocation67_spill] sm:$0xff] %v13001_v63  ;;  %v8853_v62 = vunpack.i.h.bf16 %v8851_v9  ;;  %v8852_v2 = vunpack.i.l.bf16 %v8851_v9  ;;  %v3180_v61 = vsel %vm16357_vm15, %v3174_v28, %v3150_v33  ;;  %v8538_v38 = vunpack.i.h.bf16 %v12650_v32 }
 0x5ba   : > { %9135 = vrot.lane.b32.xlu0 %v12826_v30, %s16102_s14  ;;  %9180 = vrot.lane.b32.xlu1 %v12478_v26, %s16337_s16  ;;  %v3151_v26 = vsel %vm821_vm13, %v8727_v10, %v8728_v37  ;;  %v8537_v10 = vunpack.i.l.bf16 %v12650_v32  ;;  %v4009_v49 = vpack.c.bf16 %v3170_v43, %v3169_v19  ;;  %v16359_v55 = vunpack.i.l.bf16 %v12620_v46 }
 0x5bb   : > { %v13016_v22 = vpack.c.bf16 %v8853_v62, %v8728_v37  ;;  %v3152_v9 = vsel %vm821_vm13, %v8852_v2, %v8853_v62  ;;  %v3090_v2 = vsel %vm16355_vm9, %v8533_v6, %v8608_v23  ;;  %v3181_v13 = vsel %vm16356_vm14, %v3175_v36, %v3151_v26 }
 0x5bc   : > { %v13021_v63 = vpop.permute.xlu0 %8860  ;;  %v13023_v1 = vpop.permute.xlu1 %8905  ;;  %v3182_v31 = vsel %vm16353_vm0, %v3176_v5, %v3152_v9  ;;  %v8527_v62 = vunpack.i.l.bf16 %v12642_v7  ;;  %v3179_v6 = vsel %vm16353_vm0, %v3173_v15, %v12962_v41  ;;  %v16358_v37 = vunpack.i.h.bf16 %v12620_v46 }
 0x5bd   : > { %16352 = vst [vmem:[#allocation68_spill] sm:$0xff] %v13016_v22  ;;  %v4010_v4 = vpack.c.bf16 %v3182_v31, %v3181_v13  ;;  %v16360_v32 = vunpack.i.h.bf16 %v12618_v20  ;;  %v16361_v17 = vunpack.i.l.bf16 %v12618_v20  ;;  %vm16362_vm14 = vcmask 793600   ;;  %v16392_v22 = vld [vmem:[#allocation44_spill] sm:$0xff] }
 0x5be   : > { %9155 = vrot.lane.b32.xlu0 %v12512_v60, %s16091_s7  ;;  %9185 = vrot.lane.b32.xlu1 %v12512_v60, %s16096_s17  ;;  %v13047_v23 = vsel %vm740_vm2, %v16359_v55, %v16358_v37  ;;  %v4007_v15 = vpack.c.bf16 %v3180_v61, %v3179_v6  ;;  %v3167_v41 = vsel %vm2888_vm10, %v8537_v10, %v3089_v18  ;;  %v16364_v57 = vunpack.i.h.bf16 %v12628_v56 }
 0x5bf   : > { %v13054_v12 = vsel %vm16362_vm14, %v16361_v17, %v16360_v32  ;;  %4158 = vmatprep.subr.bf16.mxu1 %v4010_v4  ;;  %v3168_v46 = vsel %vm2888_vm10, %v8538_v38, %v3090_v2  ;;  %v16365_v33 = vunpack.i.l.bf16 %v12628_v56  ;;  %vm16366_vm15 = vcmask 850944  }
 0x5c0   : > { %v13056_v25 = vpop.permute.xlu0 %8865  ;;  %v13058_v36 = vpop.permute.xlu1 %8910  ;;  %v15972_v5 = vunpack.i.h.bf16 %v12850_v54  ;;  %4159 = vmatpush1.bf16.msra.mxu1 %v4009_v49  ;;  %v16367_v26 = vunpack.i.h.bf16 %v12626_v50  ;;  %v16368_v31 = vunpack.i.l.bf16 %v12626_v50  ;;  %vm16369_vm5 = vcmask 818176   ;;  %vm16396_vm14 = vmmov %vm16366_vm15 }
 0x5c1   : > { %16363 = vst [vmem:[#allocation69_spill] sm:$0xff] %v13058_v36  ;;  %v13067_v9 = vsel %vm16366_vm15, %v16365_v33, %v16364_v57  ;;  %v15971_v28 = vunpack.i.h.bf16 %v13056_v25  ;;  %v16370_v43 = vunpack.i.h.bf16 %v12634_v40  ;;  %v16371_v18 = vunpack.i.l.bf16 %v12634_v40  ;;  %4160 = vmatprep.subr.bf16.mxu1 %v4007_v15 }
 0x5c2   : > { %v13076_v19 = vsel %vm16369_vm5, %v16368_v31, %v16367_v26  ;;  %v8543_v13 = vunpack.i.h.bf16 %v12644_v53  ;;  %v8542_v61 = vunpack.i.l.bf16 %v12644_v53  ;;  %v15974_v38 = vunpack.i.h.bf16 %v12652_v0  ;;  %9170 = vrot.lane.b32.xlu0 %v12512_v60, %s16092_s8  ;;  %9190 = vrot.lane.b32.xlu1 %v12514_v59, %s16098_s20  ;;  %v16380_v26 = vld [vmem:[#allocation40_spill] sm:$0xff]  ;;  %vm16398_vm5 = vmmov %vm16353_vm0 }
 0x5c3   : > { %v13083_v2 = vsel %vm354_vm12, %v16371_v18, %v16370_v43  ;;  %v16372_v10 = vunpack.i.h.bf16 %v12642_v7  ;;  %v15977_v49 = vunpack.i.h.bf16 %v12712_v51  ;;  %v8622_v6 = vunpack.i.l.bf16 %v12712_v51  ;;  %v9991_v43 = vld [vmem:[%s16375_s18 + $0x104] ss:$16 sps:$4 sm:$0xff]  }
 0x5c4   : > { %v13101_v53 = vpack.c.bf16 %v15971_v28, %v15972_v5  ;;  %v4006_v37 = vpack.c.bf16 %v3168_v46, %v3167_v41  ;;  %v15973_v55 = vunpack.i.l.bf16 %v12652_v0  ;;  %v8548_v32 = vunpack.i.h.bf16 %v12658_v45  ;;  %v13109_v15 = vpop.permute.xlu0 %8870  ;;  %v13111_v57 = vpop.permute.xlu1 %8920  ;;  %4190 = vmatprep.mubr.bf16.mxu1 %v9991_v43  ;;  %v16389_v7 = vld [vmem:[#allocation7_spill] sm:$0xff] }
 0x5c5   : > { %v13093_v4 = vsel %vm902_vm4, %v8527_v62, %v16372_v10  ;;  %v15975_v62 = vunpack.i.h.bf16 %v12720_v48  ;;  %v15976_v17 = vunpack.i.l.bf16 %v12720_v48  ;;  %v8547_v33 = vunpack.i.l.bf16 %v12658_v45 }
 0x5c6   : > { %16373 = vst [vmem:[#allocation70_spill] sm:$0xff] %v13101_v53  ;;  %4161 = vmatpush1.bf16.msra.mxu1 %v4006_v37  ;;  %9175 = vrot.lane.b32.xlu0 %v12826_v30, %s16095_s27  ;;  %v2951_v5 = vsel %vm2950_vm6, %v8542_v61, %v8622_v6  ;;  %v2952_v37 = vsel %vm2950_vm6, %v8543_v13, %v15977_v49  ;;  %v8632_v43 = vunpack.i.l.bf16 %v12758_v47  ;;  %vm16388_vm9 = vcmask 809984  }
 0x5c7   : > { %9205 = vrot.lane.b32.xlu1 %v12512_v60, %s16097_s30  ;;  %v2804_v30 = vsel %vm2803_vm11, %v15973_v55, %v15976_v17  ;;  %v2805_v61 = vsel %vm2803_vm11, %v15974_v38, %v15975_v62  ;;  %v8627_v38 = vunpack.i.l.bf16 %v12750_v35  ;;  %v13159_v31 = vsel %vm2888_vm10, %v8547_v33, %v2951_v5  ;;  %v16381_v55 = vld [vmem:[#allocation8_spill] sm:$0xff] }
 0x5c8   : > { %v13143_v13 = vpop.permute.xlu0 %8885  ;;  %v13145_v28 = vpop.permute.xlu1 %8925  ;;  %16376 = vst [vmem:[#allocation72_spill] sm:$0xff] %v13159_v31  ;;  %v13162_v41 = vsel %vm2888_vm10, %v8548_v32, %v2952_v37  ;;  %v13170_v45 = vsel %vm2888_vm10, %v12458_v29, %v2804_v30  ;;  %v15981_v32 = vunpack.i.h.bf16 %v12736_v24  ;;  %v8662_v33 = vunpack.i.l.bf16 %v12736_v24  ;;  %v16403_v24 = vld [vmem:[#allocation39_spill] sm:$0xff] }
 0x5c9   : > { %16374 = vst [vmem:[#allocation71_spill] sm:$0xff] %v13145_v28  ;;  %16377 = vst [vmem:[#allocation73_spill] sm:$0xff] %v13162_v41  ;;  %v8658_v29 = vunpack.i.h.bf16 %v12728_v14  ;;  %v8628_v30 = vunpack.i.h.bf16 %v12750_v35  ;;  %v3035_v18 = vsel %vm2895_vm8, %v8622_v6, %v8627_v38  ;;  %v8677_v17 = vunpack.i.l.bf16 %v16381_v55  ;;  %v16382_v35 = vld [vmem:[#allocation35_spill] sm:$0xff] }
 0x5ca   : > { %9195 = vrot.lane.b32.xlu0 %v12512_v60, %s16102_s14  ;;  %16378 = vst [vmem:[#allocation74_spill] sm:$0xff] %v13170_v45  ;;  %v13174_v60 = vsel %vm2888_vm10, %v12449_v58, %v2805_v61  ;;  %v8657_v61 = vunpack.i.l.bf16 %v12728_v14  ;;  %v13199_v49 = vunpack.i.h.bf16 %v16382_v35  ;;  %v13202_v58 = vunpack.i.l.bf16 %v16382_v35  ;;  %v16385_v14 = vld [vmem:[#allocation19_spill] sm:$0xff] }
 0x5cb   : > { %9210 = vrot.lane.b32.xlu1 %v12514_v59, %s16122_s3  ;;  %16379 = vst [vmem:[#allocation75_spill] sm:$0xff] %v13174_v60  ;;  %v8652_v38 = vunpack.i.l.bf16 %v16385_v14  ;;  %v16387_v62 = vunpack.i.h.bf16 %v12758_v47  ;;  %v3564_v35 = vsel %vm16388_vm9, %v8662_v33, %v15981_v32  ;;  %v8673_v53 = vunpack.i.h.bf16 %v16389_v7 }
 0x5cc   : > { %v13180_v37 = vpop.permute.xlu0 %8900  ;;  %v13182_v10 = vpop.permute.xlu1 %8935  ;;  %16383 = vst [vmem:[#allocation40_spill] sm:$0xff] %v13199_v49  ;;  %16384 = vst [vmem:[#allocation35_spill] sm:$0xff] %v13202_v58  ;;  %v16390_v50 = vunpack.i.h.bf16 %v12712_v51  ;;  %v13225_v40 = vsel %vm16353_vm0, %v3035_v18, %v13047_v23  ;;  %v16394_v33 = vunpack.i.h.bf16 %v12782_v52  ;;  %v16395_v32 = vunpack.i.l.bf16 %v12782_v52  ;;  %v16397_v51 = vld [vmem:[#allocation22_spill] sm:$0xff] }
 0x5cd   : > { %v3012_v5 = vsel %vm740_vm2, %v8632_v43, %v16387_v62  ;;  %16391 = vst [vmem:[#allocation7_spill] sm:$0xff] %v13225_v40  ;;  %v8692_v62 = vunpack.i.l.bf16 %v16392_v22  ;;  %v16393_v43 = vld [vmem:[#allocation31_spill] sm:$0xff]  ;;  %vm4145_vm15 = vcmask 392192   ;;  %v16399_v18 = vunpack.i.l.bf16 %v12720_v48 }
 0x5ce   : > { %9200 = vrot.lane.b32.xlu0 %v16380_v26, %s16337_s16  ;;  %v8653_v26 = vunpack.i.h.bf16 %v16385_v14  ;;  %v3036_v14 = vsel %vm2895_vm8, %v16390_v50, %v8628_v30  ;;  %v9994_v50 = vld [vmem:[%s16375_s18 + $0x10c] ss:$16 sps:$4 sm:$0xff]   ;;  %vm16402_vm9 = vcmask 793600   ;;  %v8668_v20 = vunpack.i.h.bf16 %v16403_v24 }
 0x5cf   : > { %9215 = vrot.lane.b32.xlu1 %v12514_v59, %s16337_s16  ;;  %v8672_v59 = vunpack.i.l.bf16 %v16389_v7  ;;  %v2871_v7 = vsel %vm16396_vm14, %v16395_v32, %v16394_v33  ;;  %v13242_v23 = vsel %vm16398_vm5, %v3036_v14, %v3012_v5  ;;  %v2896_v30 = vsel %vm2895_vm8, %v16399_v18, %v13202_v58  ;;  %6998 = vmatprep.mubr.msk.bf16.mxu0 %vm4145_vm15, %v9994_v50  ;;  %vm16407_vm14 = vmmov %vm16398_vm5 }
 0x5d0   : > { %v13208_v6 = vpop.permute.xlu0 %8915  ;;  %v13210_v46 = vpop.permute.xlu1 %8940  ;;  %v16401_v33 = vunpack.i.h.bf16 %v16381_v55  ;;  %v3587_v0 = vsel %vm2895_vm8, %v8652_v38, %v8657_v61  ;;  %v3588_v18 = vsel %vm2895_vm8, %v8653_v26, %v8658_v29  ;;  %vm16406_vm0 = vcmask 941056   ;;  %v16411_v61 = vld [vmem:[#allocation24_spill] sm:$0xff] }
 0x5d1   : > { %16386 = vst [vmem:[#allocation19_spill] sm:$0xff] %v13210_v46  ;;  %v16409_v52 = vunpack.i.h.bf16 %v12666_v16  ;;  %vm16410_vm5 = vmmov %vm16406_vm0  ;;  %v16531_v31 = vunpack.i.h.bf16 %v13056_v25 }
 0x5d2   : > { %9225 = vrot.lane.b32.xlu0 %v16393_v43, %s16337_s16  ;;  %v16400_v43 = vunpack.i.h.bf16 %v12720_v48  ;;  %v3840_v47 = vsel %vm16402_vm9, %v8677_v17, %v16401_v33  ;;  %v16404_v48 = vld [vmem:[#allocation11_spill] sm:$0xff]  ;;  %v16405_v17 = vunpack.i.l.bf16 %v12666_v16  ;;  %vm16412_vm9 = vmmov %vm16407_vm14 }
 0x5d3   : > { %9220 = vrot.lane.b32.xlu1 %v16397_v51, %s16124_s21  ;;  %v8667_v51 = vunpack.i.l.bf16 %v16403_v24  ;;  %v8687_v55 = vunpack.i.l.bf16 %v16404_v48  ;;  %v3504_v56 = vsel %vm16410_vm5, %v16409_v52, %v8653_v26  ;;  %v13281_v50 = vsel %vm16412_vm9, %v2896_v30, %v13067_v9  ;;  %v16417_v52 = vld [vmem:[#allocation27_spill] sm:$0xff]  ;;  %v16418_v26 = vld [vmem:[#allocation64_spill] sm:$0xff]  ;;  %vm16421_vm5 = vmmov %vm16412_vm9 }
 0x5d4   : > { %v2897_v32 = vsel %vm2895_vm8, %v16400_v43, %v13199_v49  ;;  %v13257_v5 = vpop.permute.xlu0 %8930  ;;  %v13259_v14 = vpop.permute.xlu1 %8950  ;;  %v8688_v43 = vunpack.i.h.bf16 %v16404_v48  ;;  %v3503_v33 = vsel %vm16406_vm0, %v16405_v17, %v8652_v38  ;;  %16413 = vst [vmem:[#allocation22_spill] sm:$0xff] %v13281_v50  ;;  %v16414_v48 = vunpack.i.h.bf16 %v16392_v22  ;;  %v16431_v49 = vld [vmem:[#allocation36_spill] sm:$0xff] }
 0x5d5   : > { %v13270_v24 = vsel %vm16407_vm14, %v2897_v32, %v2871_v7  ;;  %vm16415_vm0 = vcmask 818176   ;;  %v16416_v7 = vld [vmem:[#allocation32_spill] sm:$0xff]  ;;  %vm16419_vm14 = vmmov %vm16412_vm9  ;;  %v16423_v9 = vunpack.i.l.bf16 %v12660_v11  ;;  %v3864_v22 = vsel %vm2895_vm8, %v8668_v20, %v8673_v53 }
 0x5d6   : > { %16408 = vst [vmem:[#allocation31_spill] sm:$0xff] %v13270_v24  ;;  %9235 = vrot.lane.b32.xlu0 %v16411_v61, %s16124_s21  ;;  %v3426_v38 = vsel %vm16415_vm0, %v8692_v62, %v16414_v48  ;;  %v8703_v32 = vunpack.i.h.bf16 %v16416_v7  ;;  %v8702_v16 = vunpack.i.l.bf16 %v16416_v7  ;;  %v13292_v17 = vsel %vm16419_vm14, %v3587_v0, %v16418_v26  ;;  %vm16439_vm9 = vmmov %vm16421_vm5  ;;  %v16517_v24 = vld [vmem:[#allocation61_spill] sm:$0xff] }
 0x5d7   : > { %9230 = vrot.lane.b32.xlu1 %v16417_v52, %s16337_s16  ;;  %16420 = vst [vmem:[#allocation39_spill] sm:$0xff] %v13292_v17  ;;  %v13295_v61 = vsel %vm16421_vm5, %v3588_v18, %v3564_v35  ;;  %v3779_v30 = vsel %vm718_vm3, %v16423_v9, %v8667_v51  ;;  %v16424_v62 = vunpack.i.h.bf16 %v12660_v11  ;;  %v16426_v0 = vunpack.i.l.bf16 %v12676_v39  ;;  %v16428_v18 = vld [vmem:[#allocation23_spill] sm:$0xff]  ;;  %vm16441_vm0 = vmmov %vm16421_vm5 }
 0x5d8   : > { %16422 = vst [vmem:[#allocation11_spill] sm:$0xff] %v13295_v61  ;;  %v13303_v29 = vpop.permute.xlu0 %8945  ;;  %v13305_v7 = vpop.permute.xlu1 %8955  ;;  %v8682_v26 = vunpack.i.l.bf16 %v16428_v18  ;;  %v16429_v9 = vunpack.i.h.bf16 %v12676_v39  ;;  %v8707_v52 = vunpack.i.l.bf16 %v16431_v49  ;;  %v8683_v45 = vunpack.i.h.bf16 %v16428_v18 }
 0x5d9   : > { %v3780_v48 = vsel %vm718_vm3, %v16424_v62, %v8668_v20  ;;  %16425 = vst [vmem:[#allocation24_spill] sm:$0xff] %v13305_v7  ;;  %v13312_v35 = vsel %vm2888_vm10, %v16426_v0, %v3503_v33  ;;  %v3863_v62 = vsel %vm2895_vm8, %v8667_v51, %v8672_v59  ;;  %v16432_v0 = vld [vmem:[#allocation45_spill] sm:$0xff]  ;;  %v16435_v20 = vunpack.i.h.bf16 %v12668_v34  ;;  %v16437_v59 = vld [vmem:[#allocation43_spill] sm:$0xff] }
 0x5da   : > { %16427 = vst [vmem:[#allocation32_spill] sm:$0xff] %v13312_v35  ;;  %v13318_v11 = vsel %vm2888_vm10, %v16429_v9, %v3504_v56  ;;  %v8698_v60 = vunpack.i.h.bf16 %v16432_v0  ;;  %v8697_v39 = vunpack.i.l.bf16 %v16432_v0  ;;  %v16433_v56 = vunpack.i.l.bf16 %v12668_v34 }
 0x5db   : > { %16430 = vst [vmem:[#allocation27_spill] sm:$0xff] %v13318_v11  ;;  %v13337_v53 = vsel %vm2888_vm10, %v16435_v20, %v3780_v48  ;;  %v8718_v51 = vunpack.i.h.bf16 %v16437_v59  ;;  %v13348_v0 = vsel %vm16439_vm9, %v3863_v62, %v13054_v12  ;;  %v16443_v34 = vunpack.i.l.bf16 %v12689_v21  ;;  %v16516_v11 = vld [vmem:[#allocation58_spill] sm:$0xff] }
 0x5dc   : > { %v13332_v9 = vsel %vm2888_vm10, %v16433_v56, %v3779_v30  ;;  %16436 = vst [vmem:[#allocation23_spill] sm:$0xff] %v13337_v53  ;;  %v13340_v18 = vpop.permute.xlu0 %8975  ;;  %v13342_v58 = vpop.permute.xlu1 %8960  ;;  %16440 = vst [vmem:[#allocation43_spill] sm:$0xff] %v13348_v0  ;;  %v13351_v30 = vsel %vm16441_vm0, %v3864_v22, %v3840_v47  ;;  %vm16444_vm14 = vcmask 949248   ;;  %v16445_v56 = vld [vmem:[#allocation20_spill] sm:$0xff]  ;;  %v3449_v61 = vsel %vm2895_vm8, %v8682_v26, %v8687_v55  ;;  %v16458_v22 = vld [vmem:[#allocation37_spill] sm:$0xff] }
 0x5dd   : > { %16434 = vst [vmem:[#allocation64_spill] sm:$0xff] %v13332_v9  ;;  %16438 = vst [vmem:[#allocation45_spill] sm:$0xff] %v13340_v18  ;;  %v3365_v48 = vsel %vm16444_vm14, %v16443_v34, %v8682_v26  ;;  %v8713_v20 = vunpack.i.h.bf16 %v16445_v56  ;;  %v8712_v17 = vunpack.i.l.bf16 %v16445_v56  ;;  %v16446_v50 = vunpack.i.h.bf16 %v12689_v21  ;;  %v16522_v53 = vld [vmem:[#allocation67_spill] sm:$0xff] }
 0x5de   : > { %16442 = vst [vmem:[#allocation76_spill] sm:$0xff] %v13351_v30  ;;  %vm16447_vm5 = vmmov %vm16444_vm14  ;;  %v8717_v12 = vunpack.i.l.bf16 %v16437_v59  ;;  %v16448_v47 = vunpack.i.h.bf16 %v16431_v49  ;;  %v16449_v34 = vunpack.i.l.bf16 %v12678_v44  ;;  %vm16450_vm9 = vcmask 932864  }
 0x5df   : > { %v3366_v33 = vsel %vm16447_vm5, %v16446_v50, %v8683_v45  ;;  %v16451_v56 = vunpack.i.h.bf16 %v12678_v44  ;;  %vm16452_vm0 = vmmov %vm16450_vm9  ;;  %v3450_v50 = vsel %vm2895_vm8, %v8683_v45, %v8688_v43  ;;  %vm16454_vm14 = vcmask 719872  }
 0x5e0   : > { %v3702_v62 = vsel %vm354_vm12, %v8707_v52, %v16448_v47  ;;  %v3641_v35 = vsel %vm16450_vm9, %v16449_v34, %v8697_v39  ;;  %v13377_v26 = vpop.permute.xlu0 %8980  ;;  %v13379_v59 = vpop.permute.xlu1 %8965  ;;  %v13383_v52 = vsel %vm16454_vm14, %v3449_v61, %v13076_v19  ;;  %v16456_v47 = vunpack.i.l.bf16 %v12701_v42 }
 0x5e1   : > { %v3642_v55 = vsel %vm16452_vm0, %v16451_v56, %v8698_v60  ;;  %16453 = vst [vmem:[#allocation20_spill] sm:$0xff] %v13377_v26  ;;  %16455 = vst [vmem:[#allocation77_spill] sm:$0xff] %v13383_v52  ;;  %v3725_v44 = vsel %vm2895_vm8, %v8697_v39, %v8702_v16  ;;  %v3726_v56 = vsel %vm2895_vm8, %v8698_v60, %v8703_v32  ;;  %v16002_v21 = vunpack.i.h.bf16 %v16458_v22  ;;  %v16527_v26 = vld [vmem:[#allocation62_spill] sm:$0xff] }
 0x5e2   : > { %v13388_v34 = vsel %vm2888_vm10, %v16456_v47, %v3365_v48  ;;  %v8722_v45 = vunpack.i.l.bf16 %v16458_v22  ;;  %v16459_v43 = vunpack.i.l.bf16 %v12710_v3  ;;  %vm16460_vm5 = vcmask 957440   ;;  %vm16463_vm0 = vmmov %vm16454_vm14 }
 0x5e3   : > { %16457 = vst [vmem:[#allocation78_spill] sm:$0xff] %v13388_v34  ;;  %v16461_v19 = vunpack.i.h.bf16 %v12710_v3  ;;  %vm16462_vm9 = vmmov %vm16460_vm5  ;;  %v13401_v9 = vsel %vm16463_vm0, %v3450_v50, %v3426_v38  ;;  %v16465_v48 = vunpack.i.h.bf16 %v12701_v42  ;;  %v16467_v60 = vunpack.i.l.bf16 %v12691_v27  ;;  %v16475_v50 = vld [vmem:[#allocation15_spill] sm:$0xff] }
 0x5e4   : > { %v3227_v49 = vsel %vm16460_vm5, %v16459_v43, %v8712_v17  ;;  %16464 = vst [vmem:[#allocation79_spill] sm:$0xff] %v13401_v9  ;;  %v16469_v39 = vunpack.i.h.bf16 %v12691_v27  ;;  %vm16471_vm14 = vmmov %vm16463_vm0  ;;  %v3311_v42 = vsel %vm2895_vm8, %v8712_v17, %v8717_v12  ;;  %v16007_v43 = vunpack.i.l.bf16 %v16475_v50  ;;  %v13431_v27 = vpop.permute.xlu1 %8970  ;;  %v16510_v9 = vld [vmem:[#allocation54_spill] sm:$0xff] }
 0x5e5   : > { %v3228_v61 = vsel %vm16462_vm9, %v16461_v19, %v8713_v20  ;;  %v13406_v16 = vsel %vm2888_vm10, %v16465_v48, %v3366_v33  ;;  %v13411_v32 = vsel %vm2888_vm10, %v16467_v60, %v3641_v35  ;;  %v13420_v3 = vsel %vm16471_vm14, %v3725_v44, %v13083_v2  ;;  %vm16473_vm5 = vmmov %vm16463_vm0  ;;  %v13429_v19 = vpop.permute.xlu0 %8985  ;;  %16477 = vst [vmem:[#allocation85_spill] sm:$0xff] %v13431_v27  ;;  %v16485_v60 = vld [vmem:[#allocation21_spill] sm:$0xff] }
 0x5e6   : > { %16466 = vst [vmem:[#allocation80_spill] sm:$0xff] %v13406_v16  ;;  %16468 = vst [vmem:[#allocation81_spill] sm:$0xff] %v13411_v32  ;;  %v13416_v47 = vsel %vm2888_vm10, %v16469_v39, %v3642_v55  ;;  %v13423_v38 = vsel %vm16473_vm5, %v3726_v56, %v3702_v62  ;;  %v3312_v33 = vsel %vm2895_vm8, %v8713_v20, %v8718_v51  ;;  %v8732_v35 = vunpack.i.l.bf16 %v12850_v54  ;;  %v16493_v56 = vld [vmem:[#allocation50_spill] sm:$0xff] }
 0x5e7   : > { %16470 = vst [vmem:[#allocation82_spill] sm:$0xff] %v13416_v47  ;;  %16472 = vst [vmem:[#allocation83_spill] sm:$0xff] %v13420_v3  ;;  %v16478_v55 = vunpack.i.l.bf16 %v12718_v8  ;;  %v16480_v62 = vunpack.i.h.bf16 %v12718_v8  ;;  %v3288_v12 = vsel %vm902_vm4, %v8722_v45, %v16002_v21  ;;  %v16487_v21 = vld [vmem:[#allocation14_spill] sm:$0xff]  ;;  %v16490_v39 = vunpack.i.h.bf16 %v16475_v50  ;;  %v16498_v47 = vld [vmem:[#allocation59_spill] sm:$0xff] }
 0x5e8   : > { %16474 = vst [vmem:[#allocation84_spill] sm:$0xff] %v13423_v38  ;;  %16476 = vst [vmem:[#allocation15_spill] sm:$0xff] %v13429_v19  ;;  %v8752_v51 = vunpack.i.l.bf16 %v16487_v21  ;;  %vm16491_vm14 = vcmask 850944   ;;  %vm16496_vm5 = vcmask 793600   ;;  %v8858_v3 = vunpack.i.h.bf16 %v16498_v47  ;;  %v16520_v19 = vld [vmem:[#allocation60_spill] sm:$0xff] }
 0x5e9   : > { %v13436_v2 = vsel %vm2888_vm10, %v16478_v55, %v3227_v49  ;;  %v13441_v44 = vsel %vm2888_vm10, %v16480_v62, %v3228_v61  ;;  %v16482_v49 = vld [vmem:[#allocation12_spill] sm:$0xff]  ;;  %vm16483_vm9 = vmmov %vm16463_vm0  ;;  %v8747_v55 = vunpack.i.l.bf16 %v16485_v60  ;;  %v13463_v62 = vsel %vm16463_vm0, %v3312_v33, %v3288_v12  ;;  %v13469_v17 = vpop.permute.xlu0 %8990  ;;  %v13471_v61 = vpop.permute.xlu1 %8995 }
 0x5ea   : > { %16479 = vst [vmem:[#allocation86_spill] sm:$0xff] %v13436_v2  ;;  %16481 = vst [vmem:[#allocation87_spill] sm:$0xff] %v13441_v44  ;;  %v8742_v8 = vunpack.i.l.bf16 %v16482_v49  ;;  %v13458_v48 = vsel %vm16483_vm9, %v3311_v42, %v13093_v4  ;;  %v16489_v4 = vunpack.i.h.bf16 %v12850_v54  ;;  %v13483_v33 = vsel %vm16491_vm14, %v16007_v43, %v16490_v39  ;;  %v16492_v12 = vld [vmem:[#allocation48_spill] sm:$0xff]  ;;  %v16494_v44 = vld [vmem:[#allocation26_spill] sm:$0xff] }
 0x5eb   : > { %16484 = vst [vmem:[#allocation88_spill] sm:$0xff] %v13458_v48  ;;  %16486 = vst [vmem:[#allocation89_spill] sm:$0xff] %v13463_v62  ;;  %v8757_v20 = vunpack.i.l.bf16 %v16492_v12  ;;  %v8762_v2 = vunpack.i.l.bf16 %v16493_v56  ;;  %v8778_v54 = vunpack.i.h.bf16 %v16494_v44  ;;  %v16497_v43 = vld [vmem:[#allocation10_spill] sm:$0xff]  ;;  %v8857_v22 = vunpack.i.l.bf16 %v16498_v47  ;;  %v16503_v47 = vld [vmem:[#allocation51_spill] sm:$0xff] }
 0x5ec   : > { %16488 = vst [vmem:[#allocation90_spill] sm:$0xff] %v13469_v17  ;;  %v13476_v42 = vsel %vm740_vm2, %v8732_v35, %v16489_v4  ;;  %v8777_v35 = vunpack.i.l.bf16 %v16494_v44  ;;  %v16495_v4 = vunpack.i.h.bf16 %v16482_v49  ;;  %v16499_v38 = vunpack.i.h.bf16 %v16485_v60  ;;  %v16501_v49 = vld [vmem:[#allocation49_spill] sm:$0xff]  ;;  %v16508_v62 = vld [vmem:[#allocation52_spill] sm:$0xff] }
 0x5ed   : > { %vm16500_vm9 = vcmask 818176   ;;  %v13511_v39 = vpop.permute.xlu1 %9005  ;;  %v16502_v45 = vunpack.i.h.bf16 %v16487_v21  ;;  %v16505_v16 = vunpack.i.h.bf16 %v16493_v56  ;;  %vm16506_vm0 = vcmask 809984   ;;  %v16511_v56 = vld [vmem:[#allocation55_spill] sm:$0xff] }
 0x5ee   : > { %v13494_v32 = vsel %vm16496_vm5, %v8742_v8, %v16495_v4  ;;  %v13504_v34 = vsel %vm16500_vm9, %v8747_v55, %v16499_v38  ;;  %v13509_v4 = vpop.permute.xlu0 %9000  ;;  %v16504_v55 = vunpack.i.h.bf16 %v16492_v12  ;;  %v8862_v12 = vunpack.i.l.bf16 %v13021_v63 }
 0x5ef   : > { %v13516_v48 = vsel %vm354_vm12, %v8752_v51, %v16502_v45  ;;  %v13528_v8 = vsel %vm16506_vm0, %v8762_v2, %v16505_v16  ;;  %v16509_v51 = vld [vmem:[#allocation53_spill] sm:$0xff]  ;;  %v16519_v16 = vld [vmem:[#allocation63_spill] sm:$0xff]  ;;  %v8897_v17 = vunpack.i.l.bf16 %v16522_v53  ;;  %vm16534_vm9 = vcmask 719872  }
 0x5f0   : > { %v13523_v44 = vsel %vm902_vm4, %v8757_v20, %v16504_v55  ;;  %16507 = vst [vmem:[#allocation26_spill] sm:$0xff] %v13528_v8  ;;  %v8783_v45 = vunpack.i.h.bf16 %v16509_v51  ;;  %v8782_v60 = vunpack.i.l.bf16 %v16509_v51  ;;  %v2953_v20 = vsel %vm2950_vm6, %v8777_v35, %v8857_v22  ;;  %v16515_v51 = vld [vmem:[#allocation57_spill] sm:$0xff]  ;;  %vm16535_vm0 = vmmov %vm16534_vm9 }
 0x5f1   : > { %v2954_v55 = vsel %vm2950_vm6, %v8778_v54, %v8858_v3  ;;  %v13544_v30 = vpop.permute.xlu1 %9015  ;;  %v13550_v54 = vunpack.i.l.bf16 %v16517_v24  ;;  %v8867_v35 = vunpack.i.l.bf16 %v13056_v25  ;;  %v8872_v8 = vunpack.i.l.bf16 %v13109_v15 }
 0x5f2   : > { %v13542_v0 = vpop.permute.xlu0 %9010  ;;  %16514 = vst [vmem:[#allocation59_spill] sm:$0xff] %v13544_v30  ;;  %v13555_v52 = vsel %vm2888_vm10, %v8782_v60, %v2953_v20  ;;  %v13558_v21 = vsel %vm2888_vm10, %v8783_v45, %v2954_v55  ;;  %v13565_v30 = vunpack.i.h.bf16 %v16517_v24  ;;  %v8863_v60 = vunpack.i.h.bf16 %v13021_v63 }
 0x5f3   : > { %16513 = vst [vmem:[#allocation10_spill] sm:$0xff] %v13542_v0  ;;  %16518 = vst [vmem:[#allocation49_spill] sm:$0xff] %v13550_v54  ;;  %v8873_v55 = vunpack.i.h.bf16 %v13109_v15  ;;  %v16525_v24 = vunpack.i.l.bf16 %v16475_v50  ;;  %v16530_v2 = vunpack.i.l.bf16 %v16519_v16  ;;  %v8912_v50 = vunpack.i.l.bf16 %v13058_v36 }
 0x5f4   : > { %16521 = vst [vmem:[#allocation51_spill] sm:$0xff] %v13565_v30  ;;  %v3037_v0 = vsel %vm2895_vm8, %v8857_v22, %v8862_v12  ;;  %v8888_v25 = vunpack.i.h.bf16 %v13143_v13  ;;  %v2898_v22 = vsel %vm2895_vm8, %v8872_v8, %v13550_v54 }
 0x5f5   : > { %v13572_v45 = vpop.permute.xlu1 %9030  ;;  %v13582_v27 = vsel %vm2895_vm8, %v13550_v54, %v16525_v24  ;;  %v3014_v24 = vsel %vm740_vm2, %v8867_v35, %v16531_v31  ;;  %v8887_v31 = vunpack.i.l.bf16 %v13143_v13  ;;  %v2899_v12 = vsel %vm2895_vm8, %v8873_v55, %v13565_v30 }
 0x5f6   : > { %v13570_v20 = vpop.permute.xlu0 %9020  ;;  %16524 = vst [vmem:[#allocation53_spill] sm:$0xff] %v13572_v45  ;;  %16526 = vst [vmem:[#allocation54_spill] sm:$0xff] %v13582_v27  ;;  %v16529_v45 = vunpack.i.h.bf16 %v16519_v16  ;;  %v8908_v27 = vunpack.i.h.bf16 %v13023_v1  ;;  %v8907_v35 = vunpack.i.l.bf16 %v13023_v1  ;;  %v16536_v13 = vunpack.i.h.bf16 %v16511_v56 }
 0x5f7   : > { %16523 = vst [vmem:[#allocation52_spill] sm:$0xff] %v13570_v20  ;;  %v16528_v20 = vld [vmem:[#allocation66_spill] sm:$0xff]  ;;  %v8902_v54 = vunpack.i.l.bf16 %v13180_v37  ;;  %v16537_v1 = vunpack.i.h.bf16 %v13058_v36 }
 0x5f8   : > { %v8893_v18 = vunpack.i.h.bf16 %v16528_v20  ;;  %v2873_v15 = vsel %vm16491_vm14, %v16530_v2, %v16529_v45  ;;  %v8892_v63 = vunpack.i.l.bf16 %v16528_v20  ;;  %v3038_v2 = vsel %vm2895_vm8, %v8858_v3, %v8863_v60 }
 0x5f9   : > { %v13602_v40 = vpop.permute.xlu1 %9035  ;;  %v16532_v45 = vunpack.i.h.bf16 %v16522_v53  ;;  %v16533_v20 = vunpack.i.l.bf16 %v16511_v56  ;;  %v13620_v60 = vsel %vm16534_vm9, %v3037_v0, %v13476_v42  ;;  %v8903_v53 = vunpack.i.h.bf16 %v13180_v37  ;;  %vm16540_vm9 = vmmov %vm16535_vm0 }
 0x5fa   : > { %v13600_v41 = vpop.permute.xlu0 %9025  ;;  %vm16538_vm14 = vcmask 818176   ;;  %v8922_v0 = vunpack.i.l.bf16 %v13111_v57  ;;  %v16541_v37 = vunpack.i.l.bf16 %v16497_v43  ;;  %v16547_v56 = vunpack.i.h.bf16 %v16515_v51 }
 0x5fb   : > { %v3842_v38 = vsel %vm16496_vm5, %v8897_v17, %v16532_v45  ;;  %v2806_v3 = vsel %vm2803_vm11, %v16533_v20, %v8872_v8  ;;  %v13623_v17 = vsel %vm16535_vm0, %v3038_v2, %v3014_v24  ;;  %v2807_v45 = vsel %vm2803_vm11, %v16536_v13, %v8873_v55  ;;  %vm16539_vm5 = vmmov %vm16535_vm0 }
 0x5fc   : > { %v3428_v30 = vsel %vm16538_vm14, %v8912_v50, %v16537_v1  ;;  %v8923_v8 = vunpack.i.h.bf16 %v13111_v57  ;;  %v13641_v2 = vsel %vm16539_vm5, %v2898_v22, %v13483_v33  ;;  %v13644_v55 = vsel %vm16540_vm9, %v2899_v12, %v2873_v15  ;;  %v16543_v1 = vld [vmem:[#allocation47_spill] sm:$0xff]  ;;  %v16544_v22 = vld [vmem:[#allocation30_spill] sm:$0xff]  ;;  %vm16553_vm9 = vmmov %vm16539_vm5 }
 0x5fd   : > { %v13637_v24 = vpop.permute.xlu1 %9050  ;;  %v3781_v20 = vsel %vm718_vm3, %v16541_v37, %v8887_v31  ;;  %v16542_v50 = vunpack.i.h.bf16 %v16497_v43  ;;  %v13656_v36 = vsel %vm2888_vm10, %v16543_v1, %v2806_v3  ;;  %v13661_v15 = vsel %vm2888_vm10, %v16544_v22, %v2807_v45 }
 0x5fe   : > { %v13635_v42 = vpop.permute.xlu0 %9040  ;;  %v3865_v12 = vsel %vm2895_vm8, %v8887_v31, %v8892_v63  ;;  %v3866_v37 = vsel %vm2895_vm8, %v8888_v25, %v8893_v18  ;;  %v8927_v43 = vunpack.i.l.bf16 %v13145_v28  ;;  %vm16546_vm0 = vcmask 949248  }
 0x5ff   : > { %v3782_v13 = vsel %vm718_vm3, %v16542_v50, %v8888_v25  ;;  %v16545_v50 = vunpack.i.l.bf16 %v16515_v51  ;;  %vm16548_vm14 = vmmov %vm16546_vm0  ;;  %v16551_v63 = vunpack.i.l.bf16 %v16501_v49  ;;  %v16552_v25 = vunpack.i.h.bf16 %v16501_v49 }
 0x600   : > { %v3368_v3 = vsel %vm16548_vm14, %v16547_v56, %v8903_v53  ;;  %v3451_v51 = vsel %vm2895_vm8, %v8902_v54, %v8907_v35  ;;  %v3452_v56 = vsel %vm2895_vm8, %v8903_v53, %v8908_v27  ;;  %v8917_v22 = vunpack.i.l.bf16 %v13208_v6 }
 0x601   : > { %v3367_v57 = vsel %vm16546_vm0, %v16545_v50, %v8902_v54  ;;  %v13676_v45 = vpop.permute.xlu1 %9055  ;;  %v13681_v18 = vsel %vm2888_vm10, %v16551_v63, %v3781_v20  ;;  %v13686_v31 = vsel %vm2888_vm10, %v16552_v25, %v3782_v13  ;;  %v13695_v1 = vsel %vm16539_vm5, %v3865_v12, %v13494_v32  ;;  %vm16558_vm0 = vmmov %vm16539_vm5 }
 0x602   : > { %v13674_v33 = vpop.permute.xlu0 %9045  ;;  %16550 = vst [vmem:[#allocation58_spill] sm:$0xff] %v13676_v45  ;;  %v13698_v20 = vsel %vm16553_vm9, %v3866_v37, %v3842_v38  ;;  %v8918_v13 = vunpack.i.h.bf16 %v13208_v6  ;;  %v16554_v54 = vunpack.i.l.bf16 %v16516_v11  ;;  %v16556_v27 = vunpack.i.h.bf16 %v16516_v11  ;;  %vm16559_vm14 = vmmov %vm16558_vm0 }
 0x603   : > { %16549 = vst [vmem:[#allocation57_spill] sm:$0xff] %v13674_v33  ;;  %v8937_v32 = vunpack.i.l.bf16 %v13182_v10  ;;  %v13717_v12 = vsel %vm16558_vm0, %v3451_v51, %v13504_v34  ;;  %v13720_v6 = vsel %vm16559_vm14, %v3452_v56, %v3428_v30  ;;  %v8942_v37 = vunpack.i.l.bf16 %v13210_v46  ;;  %vm16569_vm14 = vmmov %vm16558_vm0 }
 0x604   : > { %v13705_v53 = vsel %vm2888_vm10, %v16554_v54, %v3367_v57  ;;  %v13710_v35 = vsel %vm2888_vm10, %v16556_v27, %v3368_v3  ;;  %v16560_v25 = vunpack.i.h.bf16 %v13145_v28  ;;  %v16561_v27 = vunpack.i.l.bf16 %v16503_v47 }
 0x605   : > { %16555 = vst [vmem:[#allocation61_spill] sm:$0xff] %v13705_v53  ;;  %16557 = vst [vmem:[#allocation60_spill] sm:$0xff] %v13710_v35  ;;  %v9061_v63 = vpop.permute.xlu1 %9060  ;;  %vm16562_vm5 = vcmask 932864   ;;  %v16563_v38 = vunpack.i.h.bf16 %v16503_v47  ;;  %v3727_v57 = vsel %vm2895_vm8, %v8917_v22, %v8922_v0  ;;  %v8932_v28 = vunpack.i.l.bf16 %v13257_v5 }
 0x606   : > { %v9066_v11 = vpop.permute.xlu0 %9065  ;;  %v3704_v54 = vsel %vm354_vm12, %v8927_v43, %v16560_v25  ;;  %v3643_v34 = vsel %vm16562_vm5, %v16561_v27, %v8917_v22  ;;  %v9063_v51 = vunpack.i.h.bf16 %v9061_v63  ;;  %v9062_v30 = vunpack.i.l.bf16 %v9061_v63  ;;  %vm16564_vm9 = vmmov %vm16562_vm5 }
 0x607   : > { %v3644_v50 = vsel %vm16564_vm9, %v16563_v38, %v8918_v13  ;;  %v9067_v49 = vunpack.i.l.bf16 %v9066_v11  ;;  %v8998_v43 = vunpack.i.h.bf16 %v13471_v61  ;;  %v8997_v25 = vunpack.i.l.bf16 %v13471_v61  ;;  %vm16570_vm5 = vmmov %vm16558_vm0 }
 0x608   : > { %v9068_v27 = vunpack.i.h.bf16 %v9066_v11  ;;  %v3728_v63 = vsel %vm2895_vm8, %v8918_v13, %v8923_v8  ;;  %v8963_v56 = vunpack.i.h.bf16 %v13342_v58  ;;  %v8962_v47 = vunpack.i.l.bf16 %v13342_v58 }
 0x609   : > { %v13746_v16 = vpop.permute.xlu1 %9080  ;;  %v16565_v3 = vunpack.i.l.bf16 %v16508_v62  ;;  %v2955_v22 = vsel %vm2950_vm6, %v8997_v25, %v9062_v30  ;;  %v2956_v61 = vsel %vm2950_vm6, %v8998_v43, %v9063_v51  ;;  %v8933_v13 = vunpack.i.h.bf16 %v13257_v5  ;;  %vm16568_vm6 = vmmov %vm16558_vm0 }
 0x60a   : > { %v9071_v38 = vpop.permute.xlu0 %9070  ;;  %v9003_v53 = vunpack.i.h.bf16 %v13509_v4  ;;  %v9002_v58 = vunpack.i.l.bf16 %v13509_v4  ;;  %v3039_v35 = vsel %vm2895_vm8, %v9062_v30, %v9067_v49 }
 0x60b   : > { %v13751_v0 = vsel %vm2888_vm10, %v16565_v3, %v3643_v34  ;;  %v9073_v11 = vunpack.i.h.bf16 %v9071_v38  ;;  %v9072_v8 = vunpack.i.l.bf16 %v9071_v38  ;;  %v3040_v3 = vsel %vm2895_vm8, %v9063_v51, %v9068_v27 }
 0x60c   : > { %v16567_v34 = vunpack.i.h.bf16 %v16508_v62  ;;  %v3015_v38 = vsel %vm740_vm2, %v8962_v47, %v8963_v56  ;;  %v3033_v49 = vsel %vm2888_vm10, %v9002_v58, %v2955_v22  ;;  %v3034_v30 = vsel %vm2888_vm10, %v9003_v53, %v2956_v61 }
 0x60d   : > { %v13759_v45 = vpack.c.bf16 %v9073_v11, %v8963_v56  ;;  %v3016_v33 = vsel %vm740_vm2, %v9072_v8, %v9073_v11  ;;  %v13770_v5 = vpop.permute.xlu1 %9095  ;;  %v3045_v11 = vsel %vm16558_vm0, %v3039_v35, %v3015_v38  ;;  %v13779_v62 = vsel %vm16569_vm14, %v3727_v57, %v13516_v48 }
 0x60e   : > { %v13766_v43 = vsel %vm2888_vm10, %v16567_v34, %v3644_v50  ;;  %v13768_v25 = vpop.permute.xlu0 %9075  ;;  %v3046_v4 = vsel %vm16568_vm6, %v3040_v3, %v3016_v33  ;;  %v13782_v50 = vsel %vm16570_vm5, %v3728_v63, %v3704_v54  ;;  %v3313_v51 = vsel %vm2895_vm8, %v8932_v28, %v8937_v32  ;;  %vm16577_vm6 = vmmov %vm16558_vm0 }
 0x60f   : > { %16566 = vst [vmem:[#allocation62_spill] sm:$0xff] %v13759_v45  ;;  %v16571_v27 = vunpack.i.l.bf16 %v16520_v19  ;;  %vm16572_vm2 = vcmask 957440   ;;  %v16573_v33 = vunpack.i.h.bf16 %v16520_v19  ;;  %v8953_v53 = vunpack.i.h.bf16 %v13259_v14 }
 0x610   : > { %vm16574_vm9 = vmmov %vm16572_vm2  ;;  %v4004_v35 = vpack.c.bf16 %v3046_v4, %v3045_v11  ;;  %v8952_v22 = vunpack.i.l.bf16 %v13259_v14  ;;  %v4003_v48 = vpack.c.bf16 %v3034_v30, %v3033_v49  ;;  %v16575_v54 = vunpack.i.h.bf16 %v13210_v46  ;;  %v16607_v46 = vld [vmem:[#allocation26_spill] sm:$0xff] }
 0x611   : > { %v3229_v56 = vsel %vm16572_vm2, %v16571_v27, %v8932_v28  ;;  %v3230_v47 = vsel %vm16574_vm9, %v16573_v33, %v8933_v13  ;;  %v8947_v63 = vunpack.i.l.bf16 %v13303_v29  ;;  %v13799_v19 = vpop.permute.xlu1 %9120  ;;  %v16576_v8 = vunpack.i.h.bf16 %v13182_v10 }
 0x612   : > { %v3290_v32 = vsel %vm902_vm4, %v8942_v37, %v16575_v54  ;;  %4162 = vmatprep.subr.bf16.mxu1 %v4004_v35  ;;  %v9086_v28 = vpop.permute.xlu0 %9085  ;;  %v13808_v58 = vsel %vm16577_vm6, %v3313_v51, %v13523_v44  ;;  %v9083_v3 = vunpack.i.h.bf16 %v13746_v16  ;;  %v9082_v37 = vunpack.i.l.bf16 %v13746_v16  ;;  %vm16592_vm6 = vmmov %vm16558_vm0 }
 0x613   : > { %v3314_v14 = vsel %vm2895_vm8, %v8933_v13, %v16576_v8  ;;  %4163 = vmatpush1.bf16.msra.mxu1 %v4003_v48  ;;  %v16578_v34 = vunpack.i.l.bf16 %v16527_v26  ;;  %v16579_v4 = vunpack.i.h.bf16 %v16527_v26  ;;  %v8948_v13 = vunpack.i.h.bf16 %v13303_v29 }
 0x614   : > { %v16054_v44 = vunpack.i.h.bf16 %v13305_v7  ;;  %v8957_v49 = vunpack.i.l.bf16 %v13305_v7  ;;  %v13825_v30 = vunpack.i.l.bf16 %v9086_v28  ;;  %v16580_v16 = vpack.c.bf16 %v13623_v17, %v13620_v60  ;;  %v16598_v17 = vld [vmem:[#allocation56_spill] sm:$0xff] }
 0x615   : > { %v13815_v38 = vsel %vm2888_vm10, %v16578_v34, %v3229_v56  ;;  %v13820_v10 = vsel %vm2888_vm10, %v16579_v4, %v3230_v47  ;;  %v16052_v11 = vunpack.i.h.bf16 %v13511_v39  ;;  %v16053_v51 = vunpack.i.l.bf16 %v13511_v39  ;;  %v13844_v60 = vpop.permute.xlu1 %9125  ;;  %v16586_v4 = vld [vmem:[#allocation7_spill] sm:$0xff] }
 0x616   : > { %4164 = vmatprep.subr.bf16.mxu1 %v16580_v16  ;;  %v13832_v26 = vunpack.i.h.bf16 %v9086_v28  ;;  %v13835_v27 = vsel %vm16558_vm0, %v3314_v14, %v3290_v32  ;;  %v16581_v29 = vunpack.i.l.bf16 %v16510_v9  ;;  %vm16582_vm14 = vcmask 941056   ;;  %v13842_v35 = vpop.permute.xlu0 %9090 }
 0x617   : > { %v8968_v33 = vunpack.i.h.bf16 %v13379_v59  ;;  %v16056_v47 = vunpack.i.l.bf16 %v13379_v59  ;;  %v2808_v48 = vsel %vm2803_vm11, %v16053_v51, %v9082_v37  ;;  %v2809_v54 = vsel %vm2803_vm11, %v16052_v11, %v9083_v3  ;;  %vm16585_vm5 = vmmov %vm16582_vm14 }
 0x618   : > { %v3505_v56 = vsel %vm16582_vm14, %v16581_v29, %v8947_v63  ;;  %v9093_v32 = vunpack.i.h.bf16 %v13842_v35  ;;  %v16055_v28 = vunpack.i.l.bf16 %v13842_v35  ;;  %v16583_v8 = vpack.c.bf16 %v13558_v21, %v13555_v52  ;;  %vm16608_vm14 = vmmov %vm16558_vm0 }
 0x619   : > { %v16584_v14 = vunpack.i.h.bf16 %v16510_v9  ;;  %v16587_v16 = vpack.c.bf16 %v13242_v23, %v16586_v4  ;;  %v2900_v29 = vsel %vm2895_vm8, %v9082_v37, %v13825_v30  ;;  %vm16588_vm11 = vcmask 809984   ;;  %v16594_v4 = vld [vmem:[#allocation46_spill] sm:$0xff] }
 0x61a   : > { %4165 = vmatpush1.bf16.msra.mxu1 %v16583_v8  ;;  %v3566_v11 = vsel %vm16588_vm11, %v8957_v49, %v16054_v44  ;;  %v3589_v51 = vsel %vm2895_vm8, %v8947_v63, %v8952_v22  ;;  %v13873_v21 = vpack.c.bf16 %v9093_v32, %v8968_v33  ;;  %vm16590_vm2 = vcmask 850944   ;;  %v9101_v8 = vpop.permute.xlu0 %9100  ;;  %v16593_v63 = vld [vmem:[#allocation17_spill] sm:$0xff]  ;;  %vm16612_vm11 = vmmov %vm16558_vm0 }
 0x61b   : > { %v13862_v34 = vsel %vm16585_vm5, %v16584_v14, %v8948_v13  ;;  %4166 = vmatprep.subr.bf16.mxu1 %v16587_v16  ;;  %v2875_v9 = vsel %vm16590_vm2, %v16055_v28, %v9093_v32  ;;  %v2901_v52 = vsel %vm2895_vm8, %v9083_v3, %v13832_v26  ;;  %v3590_v23 = vsel %vm2895_vm8, %v8948_v13, %v8953_v53  ;;  %v13881_v14 = vpop.permute.xlu1 %9140  ;;  %vm16591_vm9 = vmmov %vm16590_vm2  ;;  %v16595_v53 = vld [vmem:[#allocation73_spill] sm:$0xff]  ;;  %v16596_v13 = vld [vmem:[#allocation72_spill] sm:$0xff] }
 0x61c   : > { %16589 = vst [vmem:[#allocation66_spill] sm:$0xff] %v13873_v21  ;;  %v2874_v37 = vsel %vm16591_vm9, %v16056_v47, %v8968_v33  ;;  %v2907_v22 = vsel %vm16592_vm6, %v2901_v52, %v2875_v9  ;;  %v2893_v49 = vsel %vm2888_vm10, %v16593_v63, %v2808_v48  ;;  %v2894_v32 = vsel %vm2888_vm10, %v16594_v4, %v2809_v54  ;;  %v16600_v52 = vld [vmem:[#allocation45_spill] sm:$0xff]  ;;  %v16601_v47 = vld [vmem:[#allocation10_spill] sm:$0xff]  ;;  %vm16615_vm9 = vmmov %vm16558_vm0 }
 0x61d   : > { %v9098_v16 = vunpack.i.h.bf16 %v13770_v5  ;;  %v9097_v3 = vunpack.i.l.bf16 %v13770_v5  ;;  %v16597_v44 = vpack.c.bf16 %v16595_v53, %v16596_v13  ;;  %v2906_v28 = vsel %vm16558_vm0, %v2900_v29, %v2874_v37  ;;  %v16603_v37 = vld [vmem:[#allocation85_spill] sm:$0xff]  ;;  %vm16618_vm6 = vmmov %vm16558_vm0 }
 0x61e   : > { %v16599_v33 = vunpack.i.l.bf16 %v16598_v17  ;;  %v8977_v63 = vunpack.i.l.bf16 %v16600_v52  ;;  %v9102_v54 = vunpack.i.l.bf16 %v9101_v8  ;;  %v3995_v4 = vpack.c.bf16 %v2907_v22, %v2906_v28 }
 0x61f   : > { %4167 = vmatpush1.bf16.msra.mxu1 %v16597_v44  ;;  %v9013_v57 = vunpack.i.h.bf16 %v16601_v47  ;;  %v9012_v5 = vunpack.i.l.bf16 %v16601_v47  ;;  %v9103_v61 = vunpack.i.h.bf16 %v9101_v8  ;;  %v3994_v53 = vpack.c.bf16 %v2894_v32, %v2893_v49  ;;  %v16602_v44 = vld [vmem:[#allocation20_spill] sm:$0xff]  ;;  %v13912_v48 = vpop.permute.xlu1 %9145  ;;  %v16605_v49 = vld [vmem:[#allocation59_spill] sm:$0xff] }
 0x620   : > { %v13900_v9 = vsel %vm2888_vm10, %v16599_v33, %v3505_v56  ;;  %v8982_v29 = vunpack.i.l.bf16 %v16602_v44  ;;  %v8972_v56 = vunpack.i.l.bf16 %v16603_v37  ;;  %4168 = vmatprep.subr.bf16.mxu1 %v3995_v4  ;;  %v13910_v33 = vpop.permute.xlu0 %9105  ;;  %v9018_v32 = vunpack.i.h.bf16 %v16605_v49 }
 0x621   : > { %16604 = vst [vmem:[#allocation47_spill] sm:$0xff] %v13910_v33  ;;  %v3784_v28 = vsel %vm718_vm3, %v9013_v57, %v9098_v16  ;;  %v3783_v22 = vsel %vm718_vm3, %v9012_v5, %v9097_v3  ;;  %v16059_v47 = vunpack.i.h.bf16 %v13910_v33  ;;  %v9107_v8 = vunpack.i.l.bf16 %v13910_v33 }
 0x622   : > { %v9017_v13 = vunpack.i.l.bf16 %v16605_v49  ;;  %v16606_v4 = vpack.c.bf16 %v13644_v55, %v13641_v2  ;;  %v3867_v21 = vsel %vm2895_vm8, %v9097_v3, %v9102_v54  ;;  %v13926_v57 = vsel %vm16608_vm14, %v3589_v51, %v16607_v46 }
 0x623   : > { %4169 = vmatpush1.bf16.msra.mxu1 %v3994_v53  ;;  %vm16609_vm3 = vcmask 793600   ;;  %v3868_v53 = vsel %vm2895_vm8, %v9098_v16, %v9103_v61  ;;  %v16610_v7 = vunpack.i.h.bf16 %v16600_v52  ;;  %vm16611_vm5 = vcmask 818176   ;;  %v13940_v55 = vpop.permute.xlu1 %9150  ;;  %v16616_v16 = vld [vmem:[#allocation15_spill] sm:$0xff] }
 0x624   : > { %4170 = vmatprep.subr.bf16.mxu1 %v16606_v4  ;;  %v3844_v5 = vsel %vm16609_vm3, %v9107_v8, %v16059_v47  ;;  %v13936_v45 = vsel %vm16612_vm11, %v3590_v23, %v3566_v11  ;;  %v13938_v2 = vpop.permute.xlu0 %9110  ;;  %v16613_v46 = vunpack.i.h.bf16 %v16603_v37  ;;  %vm16614_vm2 = vmmov %vm16609_vm3  ;;  %v3861_v54 = vsel %vm2888_vm10, %v9017_v13, %v3783_v22  ;;  %v16620_v4 = vld [vmem:[#allocation90_spill] sm:$0xff]  ;;  %v16621_v22 = vld [vmem:[#allocation31_spill] sm:$0xff] }
 0x625   : > { %v3429_v49 = vsel %vm16611_vm5, %v8977_v63, %v16610_v7  ;;  %v3874_v3 = vsel %vm16615_vm9, %v3868_v53, %v3844_v5  ;;  %v3862_v61 = vsel %vm2888_vm10, %v9018_v32, %v3784_v28  ;;  %v16617_v11 = vpack.c.bf16 %v13661_v15, %v13656_v36  ;;  %v16622_v32 = vld [vmem:[#allocation22_spill] sm:$0xff]  ;;  %v16624_v15 = vld [vmem:[#allocation52_spill] sm:$0xff]  ;;  %v16625_v47 = vld [vmem:[#allocation53_spill] sm:$0xff] }
 0x626   : > { %v3843_v51 = vsel %vm16614_vm2, %v8972_v56, %v16613_v46  ;;  %v16619_v63 = vunpack.i.h.bf16 %v16602_v44  ;;  %v9127_v28 = vunpack.i.l.bf16 %v13844_v60  ;;  %v16623_v53 = vpack.c.bf16 %v16621_v22, %v16622_v32  ;;  %v16630_v52 = vld [vmem:[#allocation39_spill] sm:$0xff]  ;;  %vm16634_vm0 = vmmov %vm16611_vm5 }
 0x627   : > { %4171 = vmatpush1.bf16.msra.mxu1 %v16617_v11  ;;  %v3873_v23 = vsel %vm16618_vm6, %v3867_v21, %v3843_v51  ;;  %v8992_v36 = vunpack.i.l.bf16 %v16620_v4  ;;  %v9023_v11 = vunpack.i.h.bf16 %v16624_v15  ;;  %v9022_v21 = vunpack.i.l.bf16 %v16624_v15  ;;  %v13970_v22 = vpop.permute.xlu1 %9160  ;;  %v16626_v15 = vld [vmem:[#allocation75_spill] sm:$0xff]  ;;  %vm16637_vm5 = vmmov %vm16618_vm6 }
 0x628   : > { %v3705_v56 = vsel %vm354_vm12, %v8982_v29, %v16619_v63  ;;  %4172 = vmatprep.subr.bf16.mxu1 %v16623_v53  ;;  %v4058_v46 = vpack.c.bf16 %v3874_v3, %v3873_v23  ;;  %v4057_v51 = vpack.c.bf16 %v3862_v61, %v3861_v54  ;;  %v9033_v29 = vunpack.i.h.bf16 %v16625_v47  ;;  %v9116_v8 = vpop.permute.xlu0 %9115  ;;  %v16627_v54 = vld [vmem:[#allocation74_spill] sm:$0xff]  ;;  %vm16638_vm11 = vmmov %vm16637_vm5 }
 0x629   : > { %v9032_v63 = vunpack.i.l.bf16 %v16625_v47  ;;  %v9028_v5 = vunpack.i.h.bf16 %v13600_v41  ;;  %v9027_v7 = vunpack.i.l.bf16 %v13600_v41  ;;  %v9123_v3 = vunpack.i.h.bf16 %v13799_v19  ;;  %vm16649_vm6 = vmmov %vm16637_vm5 }
 0x62a   : > { %4231 = vmatprep.subr.bf16.mxu0 %v4058_v46  ;;  %v9122_v23 = vunpack.i.l.bf16 %v13799_v19  ;;  %v9118_v32 = vunpack.i.h.bf16 %v9116_v8  ;;  %v9117_v53 = vunpack.i.l.bf16 %v9116_v8  ;;  %v16628_v61 = vpack.c.bf16 %v16626_v15, %v16627_v54  ;;  %v16629_v46 = vld [vmem:[#allocation11_spill] sm:$0xff] }
 0x62b   : > { %4232 = vmatpush1.bf16.msra.mxu0 %v4057_v51  ;;  %v9038_v47 = vunpack.i.h.bf16 %v13602_v40  ;;  %v9152_v41 = vunpack.i.l.bf16 %v13940_v55  ;;  %v16631_v44 = vpack.c.bf16 %v16629_v46, %v16630_v52  ;;  %v16632_v19 = vpack.c.bf16 %v13698_v20, %v13695_v1  ;;  %v13993_v37 = vpop.permute.xlu1 %9165 }
 0x62c   : > { %4173 = vmatpush1.bf16.msra.mxu1 %v16628_v61  ;;  %v16633_v8 = vunpack.i.h.bf16 %v13844_v60  ;;  %vm16635_vm14 = vcmask 949248   ;;  %v3453_v61 = vsel %vm2895_vm8, %v9117_v53, %v9122_v23  ;;  %v3454_v13 = vsel %vm2895_vm8, %v9118_v32, %v9123_v3  ;;  %v9131_v33 = vpop.permute.xlu0 %9130  ;;  %v16639_v23 = vld [vmem:[#allocation27_spill] sm:$0xff] }
 0x62d   : > { %4174 = vmatprep.subr.bf16.mxu1 %v16631_v44  ;;  %4233 = vmatprep.subr.bf16.mxu0 %v16632_v19  ;;  %v3369_v51 = vsel %vm16635_vm14, %v9022_v21, %v9117_v53  ;;  %vm16636_vm3 = vmmov %vm16635_vm14  ;;  %v3459_v52 = vsel %vm16637_vm5, %v3453_v61, %v3429_v49  ;;  %v9147_v21 = vunpack.i.l.bf16 %v13912_v48  ;;  %v9132_v46 = vunpack.i.l.bf16 %v9131_v33  ;;  %v16640_v53 = vld [vmem:[#allocation32_spill] sm:$0xff] }
 0x62e   : > { %v3430_v15 = vsel %vm16634_vm0, %v9127_v28, %v16633_v8  ;;  %v3370_v54 = vsel %vm16636_vm3, %v9023_v11, %v9118_v32  ;;  %v3447_v20 = vsel %vm2888_vm10, %v9027_v7, %v3369_v51  ;;  %v9148_v28 = vunpack.i.h.bf16 %v13912_v48  ;;  %v16644_v7 = vld [vmem:[#allocation43_spill] sm:$0xff]  ;;  %vm16650_vm0 = vmmov %vm16637_vm5 }
 0x62f   : > { %v3460_v1 = vsel %vm16638_vm11, %v3454_v13, %v3430_v15  ;;  %v3448_v44 = vsel %vm2888_vm10, %v9028_v5, %v3370_v54  ;;  %v9133_v11 = vunpack.i.h.bf16 %v9131_v33  ;;  %v16641_v3 = vpack.c.bf16 %v16639_v23, %v16640_v53  ;;  %v16643_v13 = vld [vmem:[#allocation76_spill] sm:$0xff]  ;;  %vm16671_vm5 = vmmov %vm16650_vm0 }
 0x630   : > { %v16642_v32 = vpack.c.bf16 %v13686_v31, %v13681_v18  ;;  %v9037_v49 = vunpack.i.l.bf16 %v13602_v40  ;;  %v16645_v19 = vpack.c.bf16 %v16643_v13, %v16644_v7  ;;  %v4031_v5 = vpack.c.bf16 %v3460_v1, %v3459_v52  ;;  %v14018_v40 = vpop.permute.xlu0 %9135  ;;  %v14020_v31 = vpop.permute.xlu1 %9180  ;;  %vm16672_vm11 = vmmov %vm16650_vm0 }
 0x631   : > { %4175 = vmatpush2.bf16.msra.mxu1 %v16641_v3  ;;  %v4030_v8 = vpack.c.bf16 %v3448_v44, %v3447_v20  ;;  %v16646_v48 = vunpack.i.h.bf16 %v13940_v55  ;;  %vm16647_vm2 = vcmask 932864   ;;  %v3729_v54 = vsel %vm2895_vm8, %v9132_v46, %v9147_v21  ;;  %v16652_v20 = vld [vmem:[#allocation64_spill] sm:$0xff] }
 0x632   : > { %4234 = vmatpush1.bf16.msra.mxu0 %v16642_v32  ;;  %v3645_v15 = vsel %vm16647_vm2, %v9032_v63, %v9132_v46  ;;  %vm16648_vm9 = vmmov %vm16647_vm2  ;;  %v3730_v18 = vsel %vm2895_vm8, %v9133_v11, %v9148_v28  ;;  %4176 = vmatprep.subr.bf16.mxu1 %v4031_v5  ;;  %v3735_v61 = vsel %vm16649_vm6, %v3729_v54, %v3705_v56  ;;  %v9043_v63 = vunpack.i.h.bf16 %v13635_v42 }
 0x633   : > { %4235 = vmatprep.subr.bf16.mxu0 %v16645_v19  ;;  %v3706_v33 = vsel %vm354_vm12, %v9152_v41, %v16646_v48  ;;  %v3646_v51 = vsel %vm16648_vm9, %v9033_v29, %v9133_v11  ;;  %v3723_v1 = vsel %vm2888_vm10, %v9037_v49, %v3645_v15  ;;  %v16651_v29 = vld [vmem:[#allocation23_spill] sm:$0xff]  ;;  %v16654_v28 = vunpack.i.h.bf16 %v16616_v16  ;;  %vm16683_vm6 = vmmov %vm16650_vm0 }
 0x634   : > { %v3736_v52 = vsel %vm16650_vm0, %v3730_v18, %v3706_v33  ;;  %v3724_v41 = vsel %vm2888_vm10, %v9038_v47, %v3646_v51  ;;  %v16653_v44 = vpack.c.bf16 %v16651_v29, %v16652_v20  ;;  %v16655_v21 = vunpack.i.l.bf16 %v16616_v16  ;;  %v16665_v20 = vld [vmem:[#allocation79_spill] sm:$0xff] }
 0x635   : > { %4177 = vmatpush2.bf16.msra.mxu1 %v4030_v8  ;;  %v16656_v56 = vunpack.i.h.bf16 %v16620_v4  ;;  %vm16657_vm12 = vcmask 809984   ;;  %v16658_v47 = vunpack.i.h.bf16 %v16598_v17  ;;  %v9168_v53 = vunpack.i.h.bf16 %v13993_v37  ;;  %v16660_v17 = vld [vmem:[#allocation57_spill] sm:$0xff]  ;;  %v16661_v8 = vld [vmem:[#allocation58_spill] sm:$0xff] }
 0x636   : > { %4236 = vmatpush1.bf16.msra.mxu0 %v16653_v44  ;;  %v3291_v11 = vsel %vm902_vm4, %v16655_v21, %v16654_v28  ;;  %v9167_v3 = vunpack.i.l.bf16 %v13993_v37  ;;  %v16659_v32 = vpack.c.bf16 %v13720_v6, %v13717_v12  ;;  %v4049_v49 = vpack.c.bf16 %v3736_v52, %v3735_v61  ;;  %v9156_v12 = vpop.permute.xlu0 %9155  ;;  %v9186_v6 = vpop.permute.xlu1 %9185  ;;  %v16663_v61 = vld [vmem:[#allocation61_spill] sm:$0xff]  ;;  %vm16682_vm9 = vmmov %vm16657_vm12  ;;  %v14379_v37 = vld [vmem:[%s16375_s18 + $0x16c] ss:$16 sps:$4 sm:$0xff]  }
 0x637   : > { %v3567_v46 = vsel %vm16657_vm12, %v8992_v36, %v16656_v56  ;;  %v14042_v23 = vsel %vm2888_vm10, %v16658_v47, %v13862_v34  ;;  %v4048_v13 = vpack.c.bf16 %v3724_v41, %v3723_v1  ;;  %v9042_v7 = vunpack.i.l.bf16 %v13635_v42  ;;  %v16666_v44 = vld [vmem:[#allocation77_spill] sm:$0xff] }
 0x638   : > { %4178 = vmatprep.subr.bf16.mxu1 %v16659_v32  ;;  %v9053_v36 = vunpack.i.h.bf16 %v13637_v24  ;;  %v9052_v19 = vunpack.i.l.bf16 %v13637_v24  ;;  %v9048_v5 = vunpack.i.h.bf16 %v16660_v17  ;;  %v9047_v34 = vunpack.i.l.bf16 %v16660_v17  ;;  %4237 = vmatprep.subr.bf16.mxu0 %v4049_v49  ;;  %v16662_v24 = vld [vmem:[#allocation60_spill] sm:$0xff] }
 0x639   : > { %v9058_v48 = vunpack.i.h.bf16 %v16661_v8  ;;  %v9057_v33 = vunpack.i.l.bf16 %v16661_v8  ;;  %v9078_v15 = vunpack.i.h.bf16 %v13768_v25  ;;  %v9163_v51 = vunpack.i.h.bf16 %v13970_v22 }
 0x63a   : > { %v9162_v42 = vunpack.i.l.bf16 %v13970_v22  ;;  %v9158_v54 = vunpack.i.h.bf16 %v9156_v12  ;;  %v9157_v18 = vunpack.i.l.bf16 %v9156_v12  ;;  %v16664_v52 = vpack.c.bf16 %v16662_v24, %v16663_v61  ;;  %4238 = vmatpush1.bf16.msra.mxu0 %v4048_v13  ;;  %v9171_v13 = vpop.permute.xlu0 %9170  ;;  %v16674_v24 = vld [vmem:[#allocation78_spill] sm:$0xff]  ;;  %v16677_v61 = vld [vmem:[#allocation84_spill] sm:$0xff] }
 0x63b   : > { %v9077_v1 = vunpack.i.l.bf16 %v13768_v25  ;;  %v9188_v41 = vunpack.i.h.bf16 %v9186_v6  ;;  %v9187_v29 = vunpack.i.l.bf16 %v9186_v6  ;;  %v16667_v28 = vpack.c.bf16 %v16665_v20, %v16666_v44  ;;  %v4465_v25 = vld [vmem:[#allocation2 + $0xf8] sm:$0xff] }
 0x63c   : > { %4179 = vmatpush2.bf16.msra.mxu1 %v16664_v52  ;;  %v16668_v21 = vpack.c.bf16 %v13782_v50, %v13779_v62  ;;  %v3292_v22 = vsel %vm902_vm4, %v9167_v3, %v9168_v53  ;;  %vm16669_vm14 = vcmask 957440   ;;  %v3315_v32 = vsel %vm2895_vm8, %v9157_v18, %v9162_v42  ;;  %v14080_v3 = vpop.permute.xlu1 %9190  ;;  %v16678_v52 = vld [vmem:[#allocation83_spill] sm:$0xff] }
 0x63d   : > { %4180 = vmatprep.subr.bf16.mxu1 %v16667_v28  ;;  %v3231_v56 = vsel %vm16669_vm14, %v9042_v7, %v9157_v18  ;;  %vm16670_vm3 = vmmov %vm16669_vm14  ;;  %v3316_v49 = vsel %vm2895_vm8, %v9158_v54, %v9163_v51  ;;  %v3321_v17 = vsel %vm16671_vm5, %v3315_v32, %v3291_v11  ;;  %v9173_v12 = vunpack.i.h.bf16 %v9171_v13  ;;  %v16673_v7 = vld [vmem:[#allocation80_spill] sm:$0xff]  ;;  %v16685_v32 = vld [vmem:[#allocation81_spill] sm:$0xff] }
 0x63e   : > { %4239 = vmatprep.subr.bf16.mxu0 %v16668_v21  ;;  %v3232_v47 = vsel %vm16670_vm3, %v9043_v63, %v9158_v54  ;;  %v3322_v8 = vsel %vm16672_vm11, %v3316_v49, %v3292_v22  ;;  %v3309_v62 = vsel %vm2888_vm10, %v9047_v34, %v3231_v56  ;;  %v9172_v6 = vunpack.i.l.bf16 %v9171_v13  ;;  %v9176_v21 = vpop.permute.xlu0 %9175  ;;  %vm16693_vm3 = vmmov %vm16650_vm0 }
 0x63f   : > { %v3310_v50 = vsel %vm2888_vm10, %v9048_v5, %v3232_v47  ;;  %v16675_v63 = vpack.c.bf16 %v16673_v7, %v16674_v24  ;;  %v16676_v51 = vpack.c.bf16 %v13766_v43, %v13751_v0  ;;  %v4022_v42 = vpack.c.bf16 %v3322_v8, %v3321_v17  ;;  %vm16697_vm5 = vmmov %vm16650_vm0 }
 0x640   : > { %v4021_v11 = vpack.c.bf16 %v3310_v50, %v3309_v62  ;;  %v9143_v54 = vunpack.i.h.bf16 %v13881_v14  ;;  %v9142_v34 = vunpack.i.l.bf16 %v13881_v14  ;;  %v9193_v5 = vunpack.i.h.bf16 %v14080_v3 }
 0x641   : > { %4181 = vmatpush2.bf16.msra.mxu1 %v16675_v63  ;;  %4240 = vmatpush1.bf16.msra.mxu0 %v16676_v51  ;;  %v9192_v18 = vunpack.i.l.bf16 %v14080_v3  ;;  %v16679_v20 = vpack.c.bf16 %v16677_v61, %v16678_v52  ;;  %vm16680_vm4 = vcmask 941056   ;;  %v3591_v0 = vsel %vm2895_vm8, %v9172_v6, %v9187_v29 }
 0x642   : > { %v3507_v44 = vsel %vm16680_vm4, %v9052_v19, %v9172_v6  ;;  %vm16681_vm2 = vmmov %vm16680_vm4  ;;  %4182 = vmatprep.subr.bf16.mxu1 %v4022_v42  ;;  %v3592_v43 = vsel %vm2895_vm8, %v9173_v12, %v9188_v41  ;;  %v4019_v14 = vpack.c.bf16 %v13835_v27, %v13808_v58  ;;  %v3597_v56 = vsel %vm16683_vm6, %v3591_v0, %v3567_v46  ;;  %v9206_v19 = vpop.permute.xlu1 %9205 }
 0x643   : > { %4241 = vmatprep.subr.bf16.mxu0 %v16679_v20  ;;  %v3508_v28 = vsel %vm16681_vm2, %v9053_v36, %v9173_v12  ;;  %v3568_v22 = vsel %vm16682_vm9, %v9192_v18, %v9193_v5  ;;  %v3585_v47 = vsel %vm2888_vm10, %v9057_v33, %v3507_v44  ;;  %v16684_v36 = vld [vmem:[#allocation82_spill] sm:$0xff]  ;;  %v4037_v58 = vpack.c.bf16 %v13936_v45, %v13926_v57  ;;  %vm16709_vm9 = vmmov %vm16650_vm0 }
 0x644   : > { %v16686_v49 = vpack.c.bf16 %v16684_v36, %v16685_v32  ;;  %v3598_v41 = vsel %vm16650_vm0, %v3592_v43, %v3568_v22  ;;  %v3586_v29 = vsel %vm2888_vm10, %v9058_v48, %v3508_v28  ;;  %v4036_v46 = vpack.c.bf16 %v14042_v23, %v13900_v9  ;;  %vm16710_vm6 = vmmov %vm16650_vm0 }
 0x645   : > { %4183 = vmatpush2.bf16.msra.mxu1 %v4021_v11  ;;  %v4040_v27 = vpack.c.bf16 %v3598_v41, %v3597_v56  ;;  %v4039_v13 = vpack.c.bf16 %v3586_v29, %v3585_v47  ;;  %v3153_v33 = vsel %vm821_vm13, %v9077_v1, %v9078_v15  ;;  %v3898_v17 = vsel %vm799_vm7, %v9143_v54, %v13832_v26  ;;  %v9196_v1 = vpop.permute.xlu0 %9195  ;;  %v16688_v54 = vld [vmem:[#allocation89_spill] sm:$0xff]  ;;  %v16694_v56 = vld [vmem:[#allocation87_spill] sm:$0xff]  ;;  %v16695_v47 = vld [vmem:[#allocation86_spill] sm:$0xff] }
 0x646   : > { %4242 = vmatpush1.bf16.msra.mxu0 %v16686_v49  ;;  %4184 = vmatprep.subr.bf16.mxu1 %v4019_v14  ;;  %v3897_v8 = vsel %vm799_vm7, %v9142_v34, %v13825_v30  ;;  %v9113_v48 = vunpack.i.h.bf16 %v13938_v2  ;;  %v9112_v45 = vunpack.i.l.bf16 %v13938_v2  ;;  %v9138_v57 = vunpack.i.h.bf16 %v14018_v40  ;;  %v14128_v24 = vpop.permute.xlu1 %9210  ;;  %v16689_v34 = vld [vmem:[#allocation88_spill] sm:$0xff] }
 0x647   : > { %v9137_v62 = vunpack.i.l.bf16 %v14018_v40  ;;  %v9183_v9 = vunpack.i.h.bf16 %v14020_v31  ;;  %v9182_v23 = vunpack.i.l.bf16 %v14020_v31  ;;  %4243 = vmatprep.subr.bf16.mxu0 %v4040_v27  ;;  %v9208_v50 = vunpack.i.h.bf16 %v9206_v19 }
 0x648   : > { %v9207_v12 = vunpack.i.l.bf16 %v9206_v19  ;;  %v9198_v6 = vunpack.i.h.bf16 %v9196_v1  ;;  %v9197_v7 = vunpack.i.l.bf16 %v9196_v1  ;;  %v16687_v63 = vpack.c.bf16 %v13820_v10, %v13815_v38 }
 0x649   : > { %v9178_v51 = vunpack.i.h.bf16 %v9176_v21  ;;  %v9177_v42 = vunpack.i.l.bf16 %v9176_v21  ;;  %v9213_v40 = vunpack.i.h.bf16 %v14128_v24  ;;  %v9212_v11 = vunpack.i.l.bf16 %v14128_v24  ;;  %v14142_v10 = vpop.permute.xlu0 %9200  ;;  %v4464_v24 = vld [vmem:[#allocation2 + $0xf0] sm:$0xff] }
 0x64a   : > { %4185 = vmatpush2.bf16.msra.mxu1 %v16687_v63  ;;  %4244 = vmatpush1.bf16.msra.mxu0 %v4039_v13  ;;  %v16690_v18 = vpack.c.bf16 %v16688_v54, %v16689_v34  ;;  %vm16691_vm12 = vcmask 965632   ;;  %v3177_v20 = vsel %vm2895_vm8, %v9197_v7, %v9207_v12  ;;  %v3178_v38 = vsel %vm2895_vm8, %v9198_v6, %v9208_v50  ;;  %v14152_v22 = vpop.permute.xlu1 %9215  ;;  %v16704_v50 = vld [vmem:[#allocation51_spill] sm:$0xff] }
 0x64b   : > { %4245 = vmatprep.subr.bf16.mxu0 %v4037_v58  ;;  %v3093_v61 = vsel %vm16691_vm12, %v9137_v62, %v9197_v7  ;;  %vm16692_vm14 = vmmov %vm16691_vm12  ;;  %v3154_v44 = vsel %vm821_vm13, %v9212_v11, %v9213_v40  ;;  %v3183_v28 = vsel %vm16693_vm3, %v3177_v20, %v3153_v33  ;;  %v9203_v21 = vunpack.i.h.bf16 %v14142_v10  ;;  %v16702_v62 = vld [vmem:[#allocation63_spill] sm:$0xff] }
 0x64c   : > { %4186 = vmatprep.subr.bf16.mxu1 %v16690_v18  ;;  %v3094_v52 = vsel %vm16692_vm14, %v9138_v57, %v9198_v6  ;;  %v3171_v0 = vsel %vm2888_vm10, %v9177_v42, %v3093_v61  ;;  %v9202_v14 = vunpack.i.l.bf16 %v14142_v10  ;;  %v16696_v19 = vpack.c.bf16 %v16694_v56, %v16695_v47  ;;  %vm16717_vm12 = vmmov %vm16650_vm0  ;;  %v16718_v56 = vld [vmem:[#allocation49_spill] sm:$0xff] }
 0x64d   : > { %v3172_v43 = vsel %vm2888_vm10, %v9178_v51, %v3094_v52  ;;  %v3184_v36 = vsel %vm16697_vm5, %v3178_v38, %v3154_v44  ;;  %v9218_v49 = vunpack.i.h.bf16 %v14152_v22  ;;  %v9217_v41 = vunpack.i.l.bf16 %v14152_v22  ;;  %v16712_v52 = vld [vmem:[#allocation85_spill] sm:$0xff]  ;;  %vm16738_vm5 = vmmov %vm16650_vm0 }
 0x64e   : > { %4187 = vmatpush2.bf16.msra.mxu1 %v16696_v19  ;;  %4246 = vmatpush1.bf16.msra.mxu0 %v4036_v46  ;;  %v4012_v32 = vpack.c.bf16 %v3172_v43, %v3171_v0  ;;  %v4013_v29 = vpack.c.bf16 %v3184_v36, %v3183_v28  ;;  %vm16698_vm13 = vcmask 785408   ;;  %v16699_v27 = vunpack.i.l.bf16 %v13379_v59  ;;  %v14183_v59 = vld [vmem:[%s16375_s18 + $0x100] ss:$16 sps:$4 sm:$0xff]   ;;  %v9221_v42 = vpop.permute.xlu1 %9220  ;;  %v16716_v0 = vld [vmem:[#allocation54_spill] sm:$0xff] }
 0x64f   : > { %v3939_v58 = vsel %vm16698_vm13, %v9112_v45, %v9113_v48  ;;  %v16700_v33 = vunpack.i.l.bf16 %v13842_v35  ;;  %vm16701_vm11 = vmmov %vm16698_vm13  ;;  %v16703_v1 = vunpack.i.l.bf16 %v16702_v62  ;;  %v14178_v45 = vpop.permute.xlu0 %9225  ;;  %v16707_v6 = vunpack.i.h.bf16 %v13511_v39  ;;  %v16789_v22 = vld [vmem:[#allocation65_spill] sm:$0xff] }
 0x650   : > { %v3963_v13 = vsel %vm2895_vm8, %v13825_v30, %v16699_v27  ;;  %v3938_v57 = vsel %vm16701_vm11, %v9202_v14, %v9203_v21  ;;  %4188 = vmatprep.subr.bf16.mxu1 %v4013_v29  ;;  %vm16705_vm4 = vmmov %vm16701_vm11  ;;  %v9228_v51 = vunpack.i.h.bf16 %v14178_v45  ;;  %v9223_v18 = vunpack.i.h.bf16 %v9221_v42  ;;  %v14212_v14 = vld [vmem:[%s16375_s18 + $0x124] ss:$16 sps:$4 sm:$0xff]  }
 0x651   : > { %v3964_v46 = vsel %vm2895_vm8, %v13832_v26, %v16700_v33  ;;  %v3962_v12 = vsel %vm2895_vm8, %v16704_v50, %v16703_v1  ;;  %v3940_v30 = vsel %vm16705_vm4, %v9217_v41, %v9218_v49  ;;  %v16706_v26 = vunpack.i.l.bf16 %v13511_v39  ;;  %vm16708_vm2 = vmmov %vm16705_vm4  ;;  %v16719_v27 = vld [vmem:[#allocation55_spill] sm:$0xff]  ;;  %v16790_v10 = vld [vmem:[#allocation13_spill] sm:$0xff] }
 0x652   : > { %v3958_v7 = vsel %vm2888_vm10, %v16707_v6, %v3898_v17  ;;  %v3937_v63 = vsel %vm16708_vm2, %v9182_v23, %v9183_v9  ;;  %4189 = vmatpush2.bf16.msra.mxu1 %v4012_v32  ;;  %v3969_v11 = vsel %vm16709_vm9, %v3963_v13, %v3939_v58  ;;  %v3970_v54 = vsel %vm16710_vm6, %v3964_v46, %v3940_v30  ;;  %v16714_v23 = vld [vmem:[#allocation47_spill] sm:$0xff]  ;;  %v14219_v58 = vpop.permute.xlu1 %9230  ;;  %vm16722_vm14 = vmmov %vm16708_vm2  ;;  %v16723_v30 = vld [vmem:[#allocation12_spill] sm:$0xff] }
 0x653   : > { %v3957_v35 = vsel %vm2888_vm10, %v16706_v26, %v3897_v8  ;;  %v3968_v34 = vsel %vm16650_vm0, %v3962_v12, %v3938_v57  ;;  %v9227_v8 = vunpack.i.l.bf16 %v14178_v45  ;;  %v9222_v39 = vunpack.i.l.bf16 %v9221_v42  ;;  %v9236_v36 = vpop.permute.xlu0 %9235  ;;  %vm16731_vm3 = vmmov %vm16708_vm2  ;;  %v4462_v45 = vld [vmem:[#allocation2 + $0xe0] sm:$0xff] }
 0x654   : > { %v4067_v61 = vpack.c.bf16 %v3970_v54, %v3969_v11  ;;  %v16711_v17 = vmov 0   ;;  %v16713_v20 = vunpack.i.h.bf16 %v16712_v52  ;;  %v16715_v38 = vunpack.i.h.bf16 %v16714_v23  ;;  %v16728_v11 = vld [vmem:[#allocation40_spill] sm:$0xff]  ;;  %v16734_v23 = vld [vmem:[#allocation29_spill] sm:$0xff] }
 0x655   : > { %4369 = vmatprep.subr.bf16.mxu1 %v16711_v17  ;;  %v4066_v28 = vpack.c.bf16 %v3958_v7, %v3957_v35  ;;  %v3967_v43 = vsel %vm16717_vm12, %v16716_v0, %v3937_v63  ;;  %v3895_v47 = vsel %vm799_vm7, %v9222_v39, %v16718_v56  ;;  %v3896_v19 = vsel %vm799_vm7, %v9223_v18, %v16704_v50  ;;  %v16725_v35 = vld [vmem:[#allocation67_spill] sm:$0xff] }
 0x656   : > { %v4059_v44 = vpack.c.bf16 %v16715_v38, %v16713_v20  ;;  %4257 = vmatprep.subr.bf16.mxu0 %v4067_v61  ;;  %4191 = vmatmul.mubr.bf16.vlgmr.msra.gmra.mxu1 %v14183_v59  ;;  %v4064_v32 = vpack.c.bf16 %v3968_v34, %v3967_v43  ;;  %v9238_v41 = vunpack.i.h.bf16 %v9236_v36  ;;  %v9237_v29 = vunpack.i.l.bf16 %v9236_v36  ;;  %v16727_v63 = vld [vmem:[#allocation35_spill] sm:$0xff]  ;;  %v16729_v34 = vld [vmem:[#allocation18_spill] sm:$0xff]  ;;  %v16732_v61 = vld [vmem:[#allocation16_spill] sm:$0xff] }
 0x657   : > { %4258 = vmatpush2.bf16.msra.mxu0 %v4066_v28  ;;  %v16720_v13 = vunpack.i.l.bf16 %v16719_v27  ;;  %v16721_v46 = vunpack.i.h.bf16 %v16719_v27  ;;  %v9233_v62 = vunpack.i.h.bf16 %v14219_v58  ;;  %v9232_v1 = vunpack.i.l.bf16 %v14219_v58  ;;  %4200 = vmatprep.mubr.bf16.mxu1 %v14212_v14  ;;  %v14262_v43 = vld [vmem:[%s16375_s18 + $0x120] ss:$16 sps:$4 sm:$0xff]  }
 0x658   : > { %4370 = vmatpush1.bf16.msra.mxu1 %v4059_v44  ;;  %4259 = vmatprep.subr.bf16.mxu0 %v4064_v32  ;;  %v3935_v12 = vsel %vm16722_vm14, %v9227_v8, %v9228_v51  ;;  %v16724_v26 = vunpack.i.h.bf16 %v16723_v30  ;;  %v16726_v6 = vunpack.i.h.bf16 %v16725_v35  ;;  %v3893_v42 = vsel %vm799_vm7, %v9237_v29, %v16727_v63  ;;  %v16739_v32 = vld [vmem:[#allocation41_spill] sm:$0xff]  ;;  %v16741_v29 = vld [vmem:[#allocation8_spill] sm:$0xff] }
 0x659   : > { %v3955_v33 = vsel %vm2888_vm10, %v16720_v13, %v3895_v47  ;;  %v3956_v57 = vsel %vm2888_vm10, %v16721_v46, %v3896_v19  ;;  %4371 = vmatprep.subr.bf16.mxu1 %v16711_v17  ;;  %v3894_v54 = vsel %vm799_vm7, %v9238_v41, %v16728_v11  ;;  %v16730_v18 = vunpack.i.l.bf16 %v16729_v34  ;;  %vm16737_vm7 = vmmov %vm16650_vm0  ;;  %v16743_v46 = vld [vmem:[#allocation33_spill] sm:$0xff]  ;;  %v14283_v30 = vld [vmem:[%s16375_s18 + $0x108] ss:$16 sps:$4 sm:$0xff]  }
 0x65a   : > { %v4063_v50 = vpack.c.bf16 %v3956_v57, %v3955_v33  ;;  %v4056_v7 = vpack.c.bf16 %v16726_v6, %v16724_v26  ;;  %v3936_v8 = vsel %vm16731_vm3, %v9232_v1, %v9233_v62  ;;  %v16733_v52 = vunpack.i.l.bf16 %v16732_v61  ;;  %v14274_v33 = vld [vmem:[%s16375_s18 + $0x144] ss:$16 sps:$4 sm:$0xff]   ;;  %v16745_v1 = vld [vmem:[#allocation34_spill] sm:$0xff]  ;;  %v16747_v26 = vld [vmem:[#allocation20_spill] sm:$0xff] }
 0x65b   : > { %v3959_v39 = vsel %vm2895_vm8, %v16727_v63, %v16730_v18  ;;  %v16735_v38 = vunpack.i.l.bf16 %v16734_v23  ;;  %v16736_v28 = vunpack.i.h.bf16 %v16734_v23  ;;  %v16740_v41 = vunpack.i.h.bf16 %v16739_v32  ;;  %v14294_v63 = vld [vmem:[%s16375_s18 + $0x12c] ss:$16 sps:$4 sm:$0xff]   ;;  %v14305_v18 = vld [vmem:[%s16375_s18 + $0x140] ss:$16 sps:$4 sm:$0xff]  }
 0x65c   : > { %v3960_v20 = vsel %vm2895_vm8, %v16728_v11, %v16733_v52  ;;  %4260 = vmatpush2.bf16.msra.mxu0 %v4063_v50  ;;  %4372 = vmatpush1.bf16.msra.mxu1 %v4056_v7  ;;  %v3965_v56 = vsel %vm16737_vm7, %v3959_v39, %v3935_v12  ;;  %v16742_v27 = vunpack.i.h.bf16 %v16741_v29  ;;  %v16744_v57 = vunpack.i.h.bf16 %v16743_v46  ;;  %v16754_v39 = vld [vmem:[#allocation14_spill] sm:$0xff]  ;;  %v16756_v61 = vld [vmem:[#allocation71_spill] sm:$0xff]  ;;  %v16758_v23 = vld [vmem:[#allocation21_spill] sm:$0xff] }
 0x65d   : > { %v3953_v44 = vsel %vm2888_vm10, %v16735_v38, %v3893_v42  ;;  %v3954_v0 = vsel %vm2888_vm10, %v16736_v28, %v3894_v54  ;;  %v3966_v47 = vsel %vm16738_vm5, %v3960_v20, %v3936_v8  ;;  %4373 = vmatprep.subr.bf16.mxu1 %v16711_v17  ;;  %v16746_v50 = vunpack.i.h.bf16 %v16745_v1  ;;  %v16750_v42 = vld [vmem:[#allocation45_spill] sm:$0xff]  ;;  %v16765_v32 = vld [vmem:[#allocation36_spill] sm:$0xff] }
 0x65e   : > { %v4060_v19 = vpack.c.bf16 %v3954_v0, %v3953_v44  ;;  %v4061_v36 = vpack.c.bf16 %v3966_v47, %v3965_v56  ;;  %v4053_v13 = vpack.c.bf16 %v16742_v27, %v16740_v41  ;;  %4201 = vmatmul.mubr.bf16.gmra.mxu1 %v14262_v43  ;;  %v16748_v35 = vunpack.i.h.bf16 %v16747_v26  ;;  %v16760_v44 = vld [vmem:[#allocation69_spill] sm:$0xff]  ;;  %v14327_v56 = vld [vmem:[%s16375_s18 + $0x128] ss:$16 sps:$4 sm:$0xff]   ;;  %v14339_v27 = vld [vmem:[%s16375_s18 + $0x14c] ss:$16 sps:$4 sm:$0xff]  }
 0x65f   : > { %v4035_v12 = vpack.c.bf16 %v16746_v50, %v16744_v57  ;;  %v16749_v6 = vunpack.i.h.bf16 %v13940_v55  ;;  %4210 = vmatprep.mubr.bf16.mxu1 %v14274_v33  ;;  %v16751_v11 = vunpack.i.h.bf16 %v16750_v42  ;;  %v16752_v54 = vunpack.i.h.bf16 %v13844_v60  ;;  %v16753_v55 = vld [vmem:[#allocation68_spill] sm:$0xff]  ;;  %v14318_v60 = vld [vmem:[%s16375_s18 + $0x164] ss:$16 sps:$4 sm:$0xff]   ;;  %v16771_v26 = vld [vmem:[#allocation62_spill] sm:$0xff] }
 0x660   : > { %4261 = vmatprep.subr.bf16.mxu0 %v4061_v36  ;;  %4374 = vmatpush1.bf16.msra.mxu1 %v4053_v13  ;;  %v16755_v8 = vunpack.i.h.bf16 %v16754_v39  ;;  %v16757_v52 = vunpack.i.h.bf16 %v16756_v61  ;;  %v16759_v38 = vunpack.i.h.bf16 %v16758_v23  ;;  %v16761_v28 = vunpack.i.h.bf16 %v16760_v44  ;;  %v16762_v47 = vld [vmem:[#allocation9_spill] sm:$0xff]  ;;  %v16767_v13 = vld [vmem:[#allocation42_spill] sm:$0xff]  ;;  %v16769_v57 = vld [vmem:[#allocation44_spill] sm:$0xff] }
 0x661   : > { %4262 = vmatpush2.bf16.msra.mxu0 %v4060_v19  ;;  %4375 = vmatprep.subr.bf16.mxu1 %v16711_v17  ;;  %v4050_v7 = vpack.c.bf16 %v16749_v6, %v16748_v35  ;;  %v4032_v34 = vpack.c.bf16 %v16752_v54, %v16751_v11  ;;  %v16763_v19 = vld [vmem:[#allocation38_spill] sm:$0xff]  ;;  %v16766_v41 = vunpack.i.h.bf16 %v16765_v32  ;;  %v16768_v46 = vunpack.i.h.bf16 %v16767_v13  ;;  %v4460_v58 = vld [vmem:[#allocation2 + $0xd0] sm:$0xff]  ;;  %v4438_v13 = vld [vmem:[#allocation2 + $0x20] sm:$0xff] }
 0x662   : > { %7162 = vmatprep.subr.bf16.mxu0 %v4035_v12  ;;  %v4047_v20 = vpack.c.bf16 %v16757_v52, %v16755_v8  ;;  %v4029_v0 = vpack.c.bf16 %v16761_v28, %v16759_v38  ;;  %v16764_v36 = vunpack.i.h.bf16 %v16763_v19  ;;  %v16770_v1 = vunpack.i.h.bf16 %v16769_v57  ;;  %v14350_v12 = vld [vmem:[%s16375_s18 + $0x160] ss:$16 sps:$4 sm:$0xff]   ;;  %v14367_v11 = vld [vmem:[%s16375_s18 + $0x148] ss:$16 sps:$4 sm:$0xff]  }
 0x663   : > { %v16772_v35 = vunpack.i.h.bf16 %v16620_v4  ;;  %v16774_v54 = vld [vmem:[#allocation70_spill] sm:$0xff]  ;;  %v16781_v8 = vld [vmem:[#allocation19_spill] sm:$0xff]  ;;  %v4068_v23 = vpack.c.bf16 %v9218_v49, %v9113_v48  ;;  %v16784_v38 = vld [vmem:[#allocation28_spill] sm:$0xff]  ;;  %v4065_v2 = vpack.c.bf16 %v9203_v21, %v9183_v9  ;;  %v4014_v48 = vpack.c.bf16 %v9213_v40, %v9078_v15 }
 0x664   : > { %4264 = vmatmul.mubr.bf16.vlgmr.msra.gmra.mxu0 %v14283_v30  ;;  %4376 = vmatpush1.bf16.msra.mxu1 %v4050_v7  ;;  %v4044_v29 = vpack.c.bf16 %v16766_v41, %v16764_v36  ;;  %v4026_v50 = vpack.c.bf16 %v16770_v1, %v16768_v46  ;;  %v16773_v7 = vunpack.i.h.bf16 %v16616_v16  ;;  %v16775_v4 = vld [vmem:[#allocation50_spill] sm:$0xff]  ;;  %v16782_v61 = vunpack.i.h.bf16 %v16781_v8  ;;  %v16786_v28 = vld [vmem:[#allocation37_spill] sm:$0xff]  ;;  %v4463_v21 = vld [vmem:[#allocation2 + $0xe8] sm:$0xff] }
 0x665   : > { %7163 = vmatpush3.bf16.msra.mxu0 %v16753_v55  ;;  %4377 = vmatprep.subr.bf16.mxu1 %v16711_v17  ;;  %v4041_v6 = vpack.c.bf16 %v9193_v5, %v16772_v35  ;;  %v16776_v3 = vunpack.i.h.bf16 %v16775_v4  ;;  %v16777_v5 = vld [vmem:[#allocation24_spill] sm:$0xff]  ;;  %v16785_v44 = vunpack.i.h.bf16 %v16784_v38  ;;  %v16788_v36 = vld [vmem:[#allocation66_spill] sm:$0xff]  ;;  %v4062_v31 = vpack.c.bf16 %v9233_v62, %v9228_v51  ;;  %v10247_v9 = vld [vmem:[%s16375_s18 + $0x104] ss:$16 sps:$4 sm:$0xff]  }
 0x666   : > { %7164 = vmatprep.subr.bf16.mxu0 %v4032_v34  ;;  %6999 = vmatprep.mubr.msk.bf16.mxu0 %vm4145_vm15, %v14294_v63  ;;  %v4023_v42 = vpack.c.bf16 %v9168_v53, %v16773_v7  ;;  %v16778_v16 = vunpack.i.h.bf16 %v16777_v5  ;;  %v10246_v53 = vld [vmem:[%s16375_s18 + $0x10c] ss:$16 sps:$4 sm:$0xff]   ;;  %v14405_v19 = vld [vmem:[%s16375_s18 + $0x168] ss:$16 sps:$4 sm:$0xff]   ;;  %v4448_v40 = vld [vmem:[#allocation2 + $0x70] sm:$0xff]  ;;  %vm5384_vm10 = vcmask 523264  }
 0x667   : > { %4211 = vmatmul.mubr.bf16.gmra.mxu1 %v14305_v18  ;;  %v16779_v55 = vld [vmem:[#allocation48_spill] sm:$0xff]  ;;  %v4449_v15 = vld [vmem:[#allocation2 + $0x78] sm:$0xff]  ;;  %v4446_v51 = vld [vmem:[#allocation2 + $0x60] sm:$0xff]  ;;  %vm4874_vm13 = vcmask 162816   ;;  %vm4883_vm11 = vcmask 326656   ;;  %vm4892_vm4 = vcmask 490496  }
 0x668   : > { %4378 = vmatpush1.bf16.msra.mxu1 %v4047_v20  ;;  %4220 = vmatprep.mubr.bf16.mxu1 %v14318_v60  ;;  %v4038_v34 = vpack.c.bf16 %v16778_v16, %v16776_v3  ;;  %v16780_v39 = vunpack.i.h.bf16 %v16779_v55  ;;  %v16783_v20 = vld [vmem:[#allocation25_spill] sm:$0xff]  ;;  %v4447_v49 = vld [vmem:[#allocation2 + $0x68] sm:$0xff]  ;;  %v4441_v32 = vld [vmem:[#allocation2 + $0x38] sm:$0xff]  ;;  %v10347_v3 = vmov 2  }
 0x669   : > { %7165 = vmatpush3.bf16.msra.mxu0 %v16762_v47  ;;  %4379 = vmatprep.subr.bf16.mxu1 %v16711_v17  ;;  %v4444_v62 = vld [vmem:[#allocation2 + $0x50] sm:$0xff]  ;;  %v4453_v46 = vld [vmem:[#allocation2 + $0x98] sm:$0xff]  ;;  %v4450_v35 = vld [vmem:[#allocation2 + $0x80] sm:$0xff] }
 0x66a   : > { %7166 = vmatprep.subr.bf16.mxu0 %v4029_v0  ;;  %v4020_v52 = vpack.c.bf16 %v16782_v61, %v16780_v39  ;;  %v16787_v0 = vunpack.i.h.bf16 %v16786_v28  ;;  %v4456_v41 = vld [vmem:[#allocation2 + $0xb0] sm:$0xff]  ;;  %v4437_v57 = vld [vmem:[#allocation2 + $0x18] sm:$0xff]  ;;  %9239 = vset.pattern.permute.xlu1 %v10347_v3  ;;  %v10248_v16 = vld [vmem:[%s16791_s4 + $0x20] sm:$0xff] }
 0x66b   : > { %v4452_v1 = vld [vmem:[#allocation2 + $0x90] sm:$0xff]  ;;  %v4469_v7 = vld [vmem:[#allocation2 + $0x118] sm:$0xff]  ;;  %9240 = vset.pattern.permute.xlu0 %v10347_v3  ;;  %v14478_v39 = vld [vmem:[%s16791_s4 + $0x8] sm:$0xff] }
 0x66c   : > { %4274 = vmatmul.mubr.bf16.gmra.mxu0 %v14327_v56  ;;  %4380 = vmatpush1.bf16.msra.mxu1 %v4044_v29  ;;  %v4017_v47 = vpack.c.bf16 %v16787_v0, %v16785_v44  ;;  %v4440_v29 = vld [vmem:[#allocation2 + $0x30] sm:$0xff]  ;;  %v273_v5 = vld [vmem:[%s16791_s4 + $0x38] sm:$0xff] }
 0x66d   : > { %7167 = vmatpush3.bf16.msra.mxu0 %v16771_v26  ;;  %4381 = vmatprep.subr.bf16.mxu1 %v16711_v17  ;;  %v4451_v26 = vld [vmem:[#allocation2 + $0x88] sm:$0xff]  ;;  %v272_v4 = vld [vmem:[%s16791_s4 + $0x30] sm:$0xff]  ;;  %v14472_v55 = vld [vmem:[%s16791_s4 + $0x18] sm:$0xff] }
 0x66e   : > { %7168 = vmatprep.subr.bf16.mxu0 %v4026_v50  ;;  %7000 = vmatprep.mubr.msk.bf16.mxu0 %vm4145_vm15, %v14339_v27  ;;  %v4436_v50 = vld [vmem:[#allocation2 + $0x10] sm:$0xff] }
 0x66f   : > { %4221 = vmatmul.mubr.bf16.gmra.mxu1 %v14350_v12  ;;  %4496 = vperm.xlu1 %9239, %v272_v4  }
 0x670   : > { %4382 = vmatpush1.bf16.msra.mxu1 %v4041_v6  ;;  %7002 = vmatprep.mubr.msk.bf16.mxu1 %vm4145_vm15, %v10246_v53  ;;  %v4434_v6 = vld [vmem:[#allocation2] sm:$0xff] }
 0x671   : > { %7169 = vmatpush3.bf16.msra.mxu0 %v16774_v54  ;;  %4383 = vmatprep.subr.bf16.mxu1 %v16711_v17  ;;  %v4466_v54 = vld [vmem:[#allocation2 + $0x100] sm:$0xff] }
 0x672   : > { %7170 = vmatprep.subr.bf16.mxu0 %v4023_v42  ;;  %v4468_v42 = vld [vmem:[#allocation2 + $0x110] sm:$0xff]  ;;  %4501 = vperm.xlu0 %9240, %v273_v5   ;;  %v14466_v53 = vld [vmem:[%s16791_s4] sm:$0xff] }
 0x673   : > { %4487 = vperm.xlu1 %9239, %v10248_v16  }
 0x674   : > { %4284 = vmatmul.mubr.bf16.gmra.mxu0 %v14367_v11  ;;  %4384 = vmatpush1.bf16.msra.mxu1 %v4038_v34  ;;  %v14457_v34 = vld [vmem:[%s16791_s4 + $0x10] sm:$0xff] }
 0x675   : > { %7171 = vmatpush3.bf16.msra.mxu0 %v16783_v20  ;;  %4395 = vmatprep.subr.bf16.mxu1 %v16711_v17 }
 0x676   : > { %7172 = vmatprep.subr.bf16.mxu0 %v4020_v52  ;;  %7001 = vmatprep.mubr.msk.bf16.mxu0 %vm4145_vm15, %v14379_v37 }
 0x677   : > { %4479 = vperm.xlu0 %9240, %v14457_v34  }
 0x678   : > { %4396 = vmatpush2.bf16.msra.mxu1 %v4068_v23 }
 0x679   : > { %7173 = vmatpush3.bf16.msra.mxu0 %v16788_v36  ;;  %4397 = vmatprep.subr.bf16.mxu1 %v16711_v17 }
 0x67a   : > { %7174 = vmatprep.subr.bf16.mxu0 %v4017_v47 }
 0x67b   : > { %4471 = vperm.xlu0 %9240, %v14466_v53  }
 0x67c   : > { %4294 = vmatmul.mubr.bf16.gmra.mxu0 %v14405_v19  ;;  %4398 = vmatpush2.bf16.msra.mxu1 %v4065_v2 }
 0x67d   : > { %7175 = vmatpush3.bf16.msra.mxu0 %v16789_v22  ;;  %4399 = vmatprep.subr.bf16.mxu1 %v16711_v17 }
 0x67e   : > { %7176 = vmatprep.subr.bf16.mxu0 %v4014_v48  ;;  %4336 = vmatprep.mubr.bf16.mxu0 %v10247_v9 }
 0x680   : > { %4400 = vmatpush2.bf16.msra.mxu1 %v4062_v31 }
 0x681   : > { %7177 = vmatpush3.bf16.msra.mxu0 %v16790_v10  ;;  %7365 = vmatprep.subr.mxu1 %v4469_v7 }
 0x682   : > { %7202 = vmatprep.subr.mxu0 %v4465_v25 }
 0x683   : > { %4402 = vmatmul.mubr.bf16.vlgmr.msra.gmra.mxu1 %v14283_v30  ;;  %v4459_v30 = vld [vmem:[#allocation2 + $0xc8] sm:$0xff] }
 0x684   : > { %4337 = vmatmul.mubr.bf16.vlgmr.msra.gmra.mxu0 %v14183_v59  ;;  %7003 = vmatprep.mubr.msk.bf16.mxu1 %vm4145_vm15, %v14294_v63  ;;  %v4461_v59 = vld [vmem:[#allocation2 + $0xd8] sm:$0xff]  ;;  %v4443_v63 = vld [vmem:[#allocation2 + $0x48] sm:$0xff] }
 0x685   : > { %4344 = vmatprep.mubr.bf16.mxu0 %v14212_v14  ;;  %7203 = vmatpush3.msra.mxu0 %v4449_v15  ;;  %v4445_v14 = vld [vmem:[#allocation2 + $0x58] sm:$0xff] }
 0x686   : > { %7204 = vmatprep.subr.mxu0 %v4464_v24  ;;  %7366 = vmatpush3.msra.mxu1 %v4469_v7 }
 0x687   : > { %7205 = vmatpush3.msra.mxu0 %v4448_v40  ;;  %7367 = vmatprep.subr.mxu1 %v4468_v42 }
 0x688   : > { %7206 = vmatprep.subr.mxu0 %v4463_v21  ;;  %7368 = vmatpush3.msra.mxu1 %v4468_v42 }
 0x689   : > { %7207 = vmatpush3.msra.mxu0 %v4447_v49 }
 0x68a   : > { %7208 = vmatprep.subr.mxu0 %v4462_v45 }
 0x68b   : > { %4410 = vmatmul.mubr.bf16.gmra.mxu1 %v14327_v56  ;;  %7209 = vmatpush3.msra.mxu0 %v4446_v51  ;;  %v4457_v56 = vld [vmem:[#allocation2 + $0xb8] sm:$0xff] }
 0x68c   : > { %4345 = vmatmul.mubr.bf16.gmra.mxu0 %v14262_v43  ;;  %7004 = vmatprep.mubr.msk.bf16.mxu1 %vm4145_vm15, %v14339_v27  ;;  %v4458_v43 = vld [vmem:[#allocation2 + $0xc0] sm:$0xff] }
 0x68d   : > { %4352 = vmatprep.mubr.bf16.mxu0 %v14274_v33  ;;  %7210 = vmatprep.subr.mxu0 %v4461_v59  ;;  %v4442_v33 = vld [vmem:[#allocation2 + $0x40] sm:$0xff] }
 0x68e   : > { %7211 = vmatpush3.msra.mxu0 %v4445_v14  ;;  %v4454_v27 = vld [vmem:[#allocation2 + $0xa0] sm:$0xff] }
 0x68f   : > { %7212 = vmatprep.subr.mxu0 %v4460_v58 }
 0x690   : > { %7213 = vmatpush3.msra.mxu0 %v4444_v62 }
 0x691   : > { %7214 = vmatprep.subr.mxu0 %v4459_v30 }
 0x692   : > { %7215 = vmatpush3.msra.mxu0 %v4443_v63 }
 0x693   : > { %4418 = vmatmul.mubr.bf16.gmra.mxu1 %v14367_v11  ;;  %7216 = vmatprep.subr.mxu0 %v4458_v43  ;;  %v4467_v11 = vld [vmem:[#allocation2 + $0x108] sm:$0xff] }
 0x694   : > { %4353 = vmatmul.mubr.bf16.gmra.mxu0 %v14305_v18  ;;  %7005 = vmatprep.mubr.msk.bf16.mxu1 %vm4145_vm15, %v14379_v37  ;;  %v4455_v18 = vld [vmem:[#allocation2 + $0xa8] sm:$0xff] }
 0x695   : > { %4360 = vmatprep.mubr.bf16.mxu0 %v14318_v60  ;;  %7217 = vmatpush3.msra.mxu0 %v4442_v33  ;;  %v4439_v60 = vld [vmem:[#allocation2 + $0x28] sm:$0xff] }
 0x696   : > { %7218 = vmatprep.subr.mxu0 %v4457_v56  ;;  %7369 = vmatprep.subr.mxu1 %v4467_v11  ;;  %v10250_v37 = vld [vmem:[%s16791_s4 + $0x28] sm:$0xff] }
 0x697   : > { %7219 = vmatpush3.msra.mxu0 %v4441_v32  ;;  %7370 = vmatpush3.msra.mxu1 %v4467_v11 }
 0x698   : > { %7220 = vmatprep.subr.mxu0 %v4456_v41  ;;  %7371 = vmatprep.subr.mxu1 %v4466_v54 }
 0x699   : > { %7221 = vmatpush3.msra.mxu0 %v4440_v29  ;;  %7372 = vmatpush3.msra.mxu1 %v4466_v54 }
 0x69a   : > { %7222 = vmatprep.subr.mxu0 %v4455_v18  ;;  %4491 = vperm.xlu1 %9239, %v10250_v37  }
 0x69b   : > { %4426 = vmatmul.mubr.bf16.gmra.mxu1 %v14405_v19  ;;  %7223 = vmatpush3.msra.mxu0 %v4439_v60 }
 0x69c   : > { %4361 = vmatmul.mubr.bf16.gmra.mxu0 %v14350_v12  ;;  %7224 = vmatprep.subr.mxu0 %v4454_v27  ;;  %v4435_v12 = vld [vmem:[#allocation2 + $0x8] sm:$0xff] }
 0x69d   : > { %7225 = vmatpush3.msra.mxu0 %v4438_v13 }
 0x69e   : > { %7226 = vmatprep.subr.mxu0 %v4453_v46  ;;  %4483 = vperm.xlu1 %9239, %v14472_v55  }
 0x69f   : > { %7227 = vmatpush3.msra.mxu0 %v4437_v57 }
 0x6a0   : > { %7228 = vmatprep.subr.mxu0 %v4452_v1 }
 0x6a1   : > { %7229 = vmatpush3.msra.mxu0 %v4436_v50 }
 0x6a2   : > { %7230 = vmatprep.subr.mxu0 %v4451_v26  ;;  %4475 = vperm.xlu1 %9239, %v14478_v39  }
 0x6a3   : > { %7231 = vmatpush3.msra.mxu0 %v4435_v12 }
 0x6a4   : > { %7232 = vmatprep.subr.mxu0 %v4450_v35 }
 0x6a5   : > { %7233 = vmatpush3.msra.mxu0 %v4434_v6 }
 0x716   : > { %v4192_v8 = vpop.f32.mrf.mxu1 }
 0x718   : > { %v4194_v61 = vpop.f32.mrf.mxu1 }
 0x71a   : > { %v4196_v52 = vpop.f32.mrf.mxu1 }
 0x71c   : > { %v4198_v20 = vpop.f32.mrf.mxu1 }
 0x71e   : > { %v4202_v23 = vpop.f32.mrf.mxu1 }
 0x720   : > { %v4204_v38 = vpop.f32.mrf.mxu1 }
 0x722   : > { %v4206_v28 = vpop.f32.mrf.mxu1 }
 0x724   : > { %v4265_v44 = vpop.f32.mrf.mxu0  ;;  %v4208_v47 = vpop.f32.mrf.mxu1 }
 0x725   : > { %v4266_v36 = vadd.f32 %v4265_v44, %v4192_v8 }
 0x726   : > { %v4267_v0 = vpop.f32.mrf.mxu0 }
 0x727   : > { %v4268_v19 = vadd.f32 %v4267_v0, %v4194_v61  ;;  %v4212_v48 = vpop.f32.mrf.mxu1 }
 0x728   : > { %v4269_v2 = vpop.f32.mrf.mxu0 }
 0x729   : > { %4592 = vmatprep.mubr.f32.mxu0 %v4268_v19  ;;  %v4214_v31 = vpop.f32.mrf.mxu1  ;;  %v4270_v25 = vadd.f32 %v4269_v2, %v4196_v52 }
 0x72a   : > { %v4271_v22 = vpop.f32.mrf.mxu0  ;;  %4593 = vmatmul.mubr.f32.vlgmr.msra.gmra.mxu0 %v4266_v36 }
 0x72b   : > { %v4272_v9 = vadd.f32 %v4271_v22, %v4198_v20  ;;  %v4216_v24 = vpop.f32.mrf.mxu1 }
 0x72c   : > { %v4275_v10 = vpop.f32.mrf.mxu0 }
 0x72d   : > { %4597 = vmatprep.mubr.f32.mxu0 %v4272_v9  ;;  %v4276_v21 = vadd.f32 %v4275_v10, %v4202_v23  ;;  %v4218_v51 = vpop.f32.mrf.mxu1 }
 0x72e   : > { %v4277_v15 = vpop.f32.mrf.mxu0  ;;  %4598 = vmatmul.mubr.f32.gmra.mxu0 %v4270_v25 }
 0x72f   : > { %v4278_v40 = vadd.f32 %v4277_v15, %v4204_v38  ;;  %v4222_v30 = vpop.f32.mrf.mxu1 }
 0x730   : > { %v4279_v49 = vpop.f32.mrf.mxu0 }
 0x731   : > { %4602 = vmatprep.mubr.f32.mxu0 %v4278_v40  ;;  %v4280_v14 = vadd.f32 %v4279_v49, %v4206_v28  ;;  %v4224_v32 = vpop.f32.mrf.mxu1 }
 0x732   : > { %v4281_v45 = vpop.f32.mrf.mxu0  ;;  %4603 = vmatmul.mubr.f32.gmra.mxu0 %v4276_v21 }
 0x733   : > { %v4282_v59 = vadd.f32 %v4281_v45, %v4208_v47  ;;  %v4226_v27 = vpop.f32.mrf.mxu1 }
 0x734   : > { %v4285_v58 = vpop.f32.mrf.mxu0 }
 0x735   : > { %4607 = vmatprep.mubr.f32.mxu0 %v4282_v59  ;;  %v4286_v43 = vadd.f32 %v4285_v58, %v4212_v48  ;;  %v4228_v50 = vpop.f32.mrf.mxu1 }
 0x736   : > { %v4287_v62 = vpop.f32.mrf.mxu0  ;;  %4608 = vmatmul.mubr.f32.gmra.mxu0 %v4280_v14 }
 0x737   : > { %v4288_v63 = vadd.f32 %v4287_v62, %v4214_v31 }
 0x738   : > { %v4289_v33 = vpop.f32.mrf.mxu0 }
 0x739   : > { %4612 = vmatprep.mubr.f32.mxu0 %v4288_v63  ;;  %v4290_v29 = vadd.f32 %v4289_v33, %v4216_v24 }
 0x73a   : > { %v4291_v56 = vpop.f32.mrf.mxu0  ;;  %4613 = vmatmul.mubr.f32.gmra.mxu0 %v4286_v43 }
 0x73b   : > { %v4292_v41 = vadd.f32 %v4291_v56, %v4218_v51 }
 0x73c   : > { %v4295_v18 = vpop.f32.mrf.mxu0 }
 0x73d   : > { %4617 = vmatprep.mubr.f32.mxu0 %v4292_v41  ;;  %v4296_v46 = vadd.f32 %v4295_v18, %v4222_v30 }
 0x73e   : > { %v4297_v60 = vpop.f32.mrf.mxu0  ;;  %4618 = vmatmul.mubr.f32.gmra.mxu0 %v4290_v29  ;;  %v14489_v29 = vpop.permute.xlu1 %4496 }
 0x73f   : > { %v4298_v13 = vadd.f32 %v4297_v60, %v4224_v32 }
 0x740   : > { %v4299_v57 = vpop.f32.mrf.mxu0 }
 0x741   : > { %4622 = vmatprep.mubr.f32.mxu0 %v4298_v13  ;;  %v4300_v12 = vadd.f32 %v4299_v57, %v4226_v27 }
 0x742   : > { %v4301_v1 = vpop.f32.mrf.mxu0  ;;  %4623 = vmatmul.mubr.f32.gmra.mxu0 %v4296_v46  ;;  %v4488_v27 = vpop.permute.xlu1 %4487 }
 0x743   : > { %v4302_v26 = vadd.f32 %v4301_v1, %v4228_v50  ;;  %v4403_v6 = vpop.f32.mrf.mxu1  ;;  %v14491_v1 = vpop.permute.xlu0 %4501 }
 0x744   : > { %v7178_v35 = vpop.f32.mrf.mxu0 }
 0x745   : > { %4627 = vmatprep.mubr.f32.mxu0 %v4302_v26  ;;  %v4405_v42 = vpop.f32.mrf.mxu1 }
 0x746   : > { %v7179_v7 = vpop.f32.mrf.mxu0  ;;  %4628 = vmatmul.mubr.f32.gmra.mxu0 %v4300_v12  ;;  %v4492_v46 = vpop.permute.xlu1 %4491 }
 0x747   : > { %v7180_v11 = vadd.f32 %v7179_v7, %v7178_v35  ;;  %v4406_v4 = vpop.f32.mrf.mxu1  ;;  %v4480_v12 = vpop.permute.xlu0 %4479 }
 0x748   : > { %v7181_v54 = vpop.f32.mrf.mxu0 }
 0x749   : > { %v4404_v3 = vadd.f32 %v7180_v11, %v4403_v6  ;;  %v4408_v16 = vpop.f32.mrf.mxu1 }
 0x74a   : > { %v7182_v5 = vpop.f32.mrf.mxu0  ;;  %v4484_v26 = vpop.permute.xlu1 %4483 }
 0x74b   : > { %v7183_v37 = vadd.f32 %v7182_v5, %v7181_v54  ;;  %7373 = vmatprep.mubr.msk.f32.mxu1 %vm1598_vm1, %v4404_v3  ;;  %v4411_v61 = vpop.f32.mrf.mxu1  ;;  %v4472_v54 = vpop.permute.xlu0 %4471 }
 0x74c   : > { %v7184_v8 = vpop.f32.mrf.mxu0 }
 0x74d   : > { %v4407_v52 = vadd.f32 %v7183_v37, %v4406_v4  ;;  %v4413_v23 = vpop.f32.mrf.mxu1 }
 0x74e   : > { %v7185_v20 = vpop.f32.mrf.mxu0  ;;  %v4476_v7 = vpop.permute.xlu1 %4475 }
 0x74f   : > { %v7186_v38 = vadd.f32 %v7185_v20, %v7184_v8  ;;  %7374 = vmatmul.mubr.msk.f32.vlgmr.msra.gmra.mxu1 %vm1598_vm1, %v4407_v52  ;;  %v4414_v28 = vpop.f32.mrf.mxu1 }
 0x750   : > { %v7187_v44 = vpop.f32.mrf.mxu0 }
 0x751   : > { %v4412_v0 = vadd.f32 %v7186_v38, %v4411_v61  ;;  %v4416_v19 = vpop.f32.mrf.mxu1 }
 0x752   : > { %v7188_v47 = vpop.f32.mrf.mxu0 }
 0x753   : > { %v7189_v36 = vadd.f32 %v7188_v47, %v7187_v44  ;;  %7376 = vmatprep.mubr.msk.f32.mxu1 %vm1598_vm1, %v4412_v0  ;;  %v4419_v48 = vpop.f32.mrf.mxu1 }
 0x754   : > { %v7190_v2 = vpop.f32.mrf.mxu0 }
 0x755   : > { %v4415_v22 = vadd.f32 %v7189_v36, %v4414_v28  ;;  %v4421_v9 = vpop.f32.mrf.mxu1 }
 0x756   : > { %v7191_v31 = vpop.f32.mrf.mxu0 }
 0x757   : > { %v7192_v25 = vadd.f32 %v7191_v31, %v7190_v2  ;;  %7377 = vmatmul.mubr.msk.f32.gmra.mxu1 %vm1598_vm1, %v4415_v22  ;;  %v4422_v15 = vpop.f32.mrf.mxu1 }
 0x758   : > { %v7193_v10 = vpop.f32.mrf.mxu0 }
 0x759   : > { %v4420_v24 = vadd.f32 %v7192_v25, %v4419_v48  ;;  %v4424_v21 = vpop.f32.mrf.mxu1 }
 0x75a   : > { %v7194_v40 = vpop.f32.mrf.mxu0 }
 0x75b   : > { %v7195_v49 = vadd.f32 %v7194_v40, %v7193_v10  ;;  %7379 = vmatprep.mubr.msk.f32.mxu1 %vm1598_vm1, %v4420_v24  ;;  %v4427_v51 = vpop.f32.mrf.mxu1 }
 0x75c   : > { %v7196_v45 = vpop.f32.mrf.mxu0 }
 0x75d   : > { %v4423_v59 = vadd.f32 %v7195_v49, %v4422_v15  ;;  %v4429_v58 = vpop.f32.mrf.mxu1 }
 0x75e   : > { %v7197_v14 = vpop.f32.mrf.mxu0 }
 0x75f   : > { %v7198_v62 = vadd.f32 %v7197_v14, %v7196_v45  ;;  %7380 = vmatmul.mubr.msk.f32.gmra.mxu1 %vm1598_vm1, %v4423_v59  ;;  %v4430_v63 = vpop.f32.mrf.mxu1 }
 0x760   : > { %v7199_v30 = vpop.f32.mrf.mxu0 }
 0x761   : > { %v4428_v43 = vadd.f32 %v7198_v62, %v4427_v51  ;;  %v4432_v56 = vpop.f32.mrf.mxu1 }
 0x762   : > { %v7200_v33 = vpop.f32.mrf.mxu0 }
 0x763   : > { %v7201_v32 = vadd.f32 %v7200_v33, %v7199_v30  ;;  %7382 = vmatprep.mubr.msk.f32.mxu1 %vm1598_vm1, %v4428_v43 }
 0x765   : > { %v4431_v41 = vadd.f32 %v7201_v32, %v4430_v63 }
 0x767   : > { %7383 = vmatmul.mubr.msk.f32.gmra.mxu1 %vm1598_vm1, %v4431_v41 }
 0x7ea   : > { %v7234_v18 = vpop.f32.mrf.mxu0 }
 0x7ec   : > { %v7235_v60 = vpop.f32.mrf.mxu0 }
 0x7ed   : > { %v7236_v11 = vadd.f32 %v7235_v60, %v7234_v18 }
 0x7ee   : > { %v7237_v13 = vpop.f32.mrf.mxu0 }
 0x7ef   : > { %v4595_v16 = vadd.f32 %v7236_v11, %v4472_v54 }
 0x7f0   : > { %v7238_v57 = vpop.f32.mrf.mxu0 }
 0x7f1   : > { %v7239_v6 = vadd.f32 %v7238_v57, %v7237_v13 }
 0x7f2   : > { %v7240_v50 = vpop.f32.mrf.mxu0 }
 0x7f3   : > { %v4600_v4 = vadd.f32 %v7239_v6, %v4476_v7 }
 0x7f4   : > { %v7241_v35 = vpop.f32.mrf.mxu0 }
 0x7f5   : > { %v7242_v23 = vadd.f32 %v7241_v35, %v7240_v50 }
 0x7f6   : > { %v7243_v42 = vpop.f32.mrf.mxu0 }
 0x7f7   : > { %v4605_v47 = vadd.f32 %v7242_v23, %v4480_v12 }
 0x7f8   : > { %v7244_v3 = vpop.f32.mrf.mxu0 }
 0x7f9   : > { %v7245_v61 = vadd.f32 %v7244_v3, %v7243_v42 }
 0x7fa   : > { %v7246_v22 = vpop.f32.mrf.mxu0 }
 0x7fb   : > { %v4610_v44 = vadd.f32 %v7245_v61, %v4484_v26 }
 0x7fc   : > { %v7247_v10 = vpop.f32.mrf.mxu0 }
 0x7fd   : > { %v7248_v45 = vadd.f32 %v7247_v10, %v7246_v22 }
 0x7fe   : > { %v7249_v24 = vpop.f32.mrf.mxu0 }
 0x7ff   : > { %v4615_v30 = vadd.f32 %v7248_v45, %v4488_v27 }
 0x800   : > { %v7250_v21 = vpop.f32.mrf.mxu0 }
 0x801   : > { %v7251_v59 = vadd.f32 %v7250_v21, %v7249_v24 }
 0x803   : > { %v4620_v43 = vadd.f32 %v7251_v59, %v4492_v46  ;;  %v7252_v46 = vpop.f32.mrf.mxu0  ;;  %v10019_v59 = vld [vmem:[%s16375_s18 + $0x188] ss:$16 sps:$4 sm:$0xff]  }
 0x804   : > { %7393 = vmatprep.mubr.msk.bf16.mxu1 %vm5384_vm10, %v10019_v59 }
 0x805   : > { %v7253_v12 = vpop.f32.mrf.mxu0 }
 0x807   : > { %v7255_v42 = vpop.f32.mrf.mxu0 }
 0x80f   : > { %v7375_v5 = vpop.f32.mrf.mxu1 }
 0x810   : > { %v4705_v37 = vadd.f32 %v7375_v5, %v4600_v4  ;;  %v7256_v4 = vpop.f32.mrf.mxu0  ;;  %v7254_v5 = vadd.f32 %v7253_v12, %v7252_v46 }
 0x811   : > { %v4699_v8 = vpop.f32.mrf.mxu1 }
 0x812   : > { %v7015_v52 = vmul.f32 -1.442695, %v4705_v37  ;;  %v4700_v20 = vadd.f32 %v4699_v8, %v4595_v16  ;;  %v4625_v61 = vadd.f32 %v7254_v5, %v14489_v29 }
 0x814   : > { %10139 = vpow2.f32 %v7015_v52  ;;  %v7014_v38 = vmul.f32 -1.442695, %v4700_v20 }
 0x816   : > { %10141 = vpow2.f32 %v7014_v38 }
 0x817   : > { %v7378_v28 = vpop.f32.mrf.mxu1 }
 0x818   : > { %v4715_v0 = vadd.f32 %v7378_v28, %v4610_v44 }
 0x819   : > { %v4709_v19 = vpop.f32.mrf.mxu1 }
 0x81a   : > { %v4710_v36 = vadd.f32 %v4709_v19, %v4605_v47  ;;  %v7017_v2 = vmul.f32 -1.442695, %v4715_v0 }
 0x81c   : > { %v7016_v48 = vmul.f32 -1.442695, %v4710_v36 }
 0x81e   : > { %10143 = vpow2.f32 %v7016_v48 }
 0x81f   : > { %10145 = vpow2.f32 %v7017_v2  ;;  %v7381_v49 = vpop.f32.mrf.mxu1 }
 0x820   : > { %v4725_v18 = vadd.f32 %v7381_v49, %v4620_v43 }
 0x821   : > { %v10140_v31 = vpop.eup %10139  ;;  %v4719_v58 = vpop.f32.mrf.mxu1 }
 0x822   : > { %v4763_v9 = vadd.f32 1.0, %v10140_v31  ;;  %v4720_v33 = vadd.f32 %v4719_v58, %v4615_v30  ;;  %v7019_v57 = vmul.f32 -1.442695, %v4725_v18 }
 0x823   : > { %v10142_v25 = vpop.eup %10141 }
 0x824   : > { %10147 = vrcp.f32 %v4763_v9  ;;  %v4762_v15 = vadd.f32 1.0, %v10142_v25  ;;  %v7018_v60 = vmul.f32 -1.442695, %v4720_v33 }
 0x826   : > { %10149 = vrcp.f32 %v4762_v15  ;;  %v10015_v15 = vld [vmem:[%s16375_s18 + $0x184] ss:$16 sps:$4 sm:$0xff]  }
 0x827   : > { %v7384_v3 = vpop.f32.mrf.mxu1  ;;  %5423 = vmatprep.mubr.bf16.mxu0 %v10015_v15 }
 0x829   : > { %v4729_v8 = vpop.f32.mrf.mxu1 }
 0x82b   : > { %v10144_v40 = vpop.eup %10143 }
 0x82c   : > { %v10146_v51 = vpop.eup %10145  ;;  %v4764_v14 = vadd.f32 1.0, %v10144_v40 }
 0x82d   : > { %v4765_v62 = vadd.f32 1.0, %v10146_v51 }
 0x82e   : > { %10151 = vrcp.f32 %v4764_v14 }
 0x82f   : > { %10153 = vrcp.f32 %v4765_v62  ;;  %v10348_v62 = vmov 3  }
 0x830   : > { %10155 = vpow2.f32 %v7018_v60  ;;  %9562 = vset.pattern.permute.xlu1 %v10348_v62  ;;  %9561 = vset.pattern.permute.xlu0 %v10348_v62 }
 0x831   : > { %v10148_v63 = vpop.eup %10147  ;;  %10157 = vpow2.f32 %v7019_v57 }
 0x832   : > { %v14493_v32 = vmul.f32 %v10148_v63, %v4705_v37  ;;  %v7257_v37 = vadd.f32 %v7256_v4, %v7255_v42 }
 0x833   : > { %v10150_v56 = vpop.eup %10149 }
 0x834   : > { %v14495_v41 = vmul.f32 %v10150_v56, %v4700_v20  ;;  %v4630_v52 = vadd.f32 %v7257_v37, %v14491_v1  ;;  %v4730_v20 = vadd.f32 %v4729_v8, %v4625_v61 }
 0x836   : > { %16792 = vst [vmem:[#allocation30_spill] sm:$0xff] %v14495_v41  ;;  %v14499_v13 = vpack.i.bf16 %v14493_v32, %v14495_v41  ;;  %v4735_v23 = vadd.f32 %v7384_v3, %v4630_v52  ;;  %v7020_v38 = vmul.f32 -1.442695, %v4730_v20 }
 0x838   : > { %9247 = vrot.lane.b32.xlu1 %v14499_v13, %s16121_s0  ;;  %9242 = vrot.lane.b32.xlu0 %v14499_v13, %s16282_s12  ;;  %v7021_v44 = vmul.f32 -1.442695, %v4735_v23 }
 0x83b   : > { %v10152_v27 = vpop.eup %10151 }
 0x83c   : > { %9257 = vrot.lane.b32.xlu1 %v14499_v13, %s16131_s5  ;;  %9252 = vrot.lane.b32.xlu0 %v14499_v13, %s16085_s15  ;;  %v10154_v50 = vpop.eup %10153  ;;  %v14513_v26 = vmul.f32 %v10152_v27, %v4710_v36 }
 0x83d   : > { %v14515_v35 = vmul.f32 %v10154_v50, %v4715_v0  ;;  %v10156_v7 = vpop.eup %10155 }
 0x83e   : > { %v10158_v11 = vpop.eup %10157  ;;  %v4766_v54 = vadd.f32 1.0, %v10156_v7 }
 0x83f   : > { %v14523_v6 = vpack.i.bf16 %v14515_v35, %v14513_v26  ;;  %v4767_v16 = vadd.f32 1.0, %v10158_v11 }
 0x840   : > { %9267 = vrot.lane.b32.xlu1 %v14499_v13, %s16087_s25  ;;  %9262 = vrot.lane.b32.xlu0 %v14499_v13, %s16091_s7  ;;  %10159 = vrcp.f32 %v4766_v54 }
 0x841   : > { %10161 = vrcp.f32 %v4767_v16 }
 0x842   : > { %10163 = vpow2.f32 %v7020_v38 }
 0x843   : > { %10165 = vpow2.f32 %v7021_v44 }
 0x844   : > { %9277 = vrot.lane.b32.xlu1 %v14499_v13, %s16092_s8  ;;  %9272 = vrot.lane.b32.xlu0 %v14499_v13, %s16130_s22 }
 0x848   : > { %9287 = vrot.lane.b32.xlu1 %v14523_v6, %s16121_s0  ;;  %9282 = vrot.lane.b32.xlu0 %v14523_v6, %s16282_s12 }
 0x84c   : > { %9297 = vrot.lane.b32.xlu1 %v14523_v6, %s16131_s5  ;;  %9292 = vrot.lane.b32.xlu0 %v14523_v6, %s16085_s15 }
 0x84d   : > { %v10160_v29 = vpop.eup %10159 }
 0x84e   : > { %v10162_v1 = vpop.eup %10161  ;;  %v14551_v28 = vmul.f32 %v10160_v29, %v4720_v33 }
 0x84f   : > { %v14553_v0 = vmul.f32 %v10162_v1, %v4725_v18  ;;  %v10164_v19 = vpop.eup %10163 }
 0x850   : > { %9307 = vrot.lane.b32.xlu1 %v14523_v6, %s16087_s25  ;;  %9302 = vrot.lane.b32.xlu0 %v14523_v6, %s16091_s7  ;;  %v10166_v36 = vpop.eup %10165  ;;  %v4768_v2 = vadd.f32 1.0, %v10164_v19 }
 0x851   : > { %v9361_v47 = vpack.i.bf16 %v14553_v0, %v14551_v28  ;;  %v4769_v48 = vadd.f32 1.0, %v10166_v36 }
 0x852   : > { %10167 = vrcp.f32 %v4768_v2 }
 0x853   : > { %10169 = vrcp.f32 %v4769_v48 }
 0x854   : > { %9317 = vrot.lane.b32.xlu1 %v14523_v6, %s16092_s8  ;;  %9312 = vrot.lane.b32.xlu0 %v14523_v6, %s16130_s22 }
 0x858   : > { %9327 = vrot.lane.b32.xlu1 %v14523_v6, %s16120_s11  ;;  %9322 = vrot.lane.b32.xlu0 %v14523_v6, %s16095_s27 }
 0x85c   : > { %9337 = vrot.lane.b32.xlu1 %v14523_v6, %s16102_s14  ;;  %9332 = vrot.lane.b32.xlu0 %v14523_v6, %s16103_s13 }
 0x85f   : > { %v10168_v22 = vpop.eup %10167 }
 0x860   : > { %9347 = vrot.lane.b32.xlu1 %v14523_v6, %s16099_s10  ;;  %9342 = vrot.lane.b32.xlu0 %v14523_v6, %s16112_s28  ;;  %v10170_v31 = vpop.eup %10169  ;;  %v14576_v9 = vmul.f32 %v10168_v22, %v4730_v20 }
 0x861   : > { %v14578_v25 = vmul.f32 %v10170_v31, %v4735_v23 }
 0x863   : > { %v9436_v10 = vpack.i.bf16 %v14578_v25, %v14576_v9 }
 0x864   : > { %9362 = vrot.lane.b32.xlu1 %v9361_v47, %s16121_s0  ;;  %9352 = vrot.lane.b32.xlu0 %v14523_v6, %s16093_s9 }
 0x868   : > { %9372 = vrot.lane.b32.xlu1 %v9361_v47, %s16131_s5  ;;  %9357 = vrot.lane.b32.xlu0 %v9361_v47, %s16282_s12 }
 0x86c   : > { %9382 = vrot.lane.b32.xlu1 %v9361_v47, %s16087_s25  ;;  %9367 = vrot.lane.b32.xlu0 %v9361_v47, %s16085_s15 }
 0x870   : > { %9392 = vrot.lane.b32.xlu1 %v9361_v47, %s16092_s8  ;;  %9377 = vrot.lane.b32.xlu0 %v9361_v47, %s16091_s7 }
 0x874   : > { %9397 = vrot.lane.b32.xlu1 %v9361_v47, %s16095_s27  ;;  %9387 = vrot.lane.b32.xlu0 %v9361_v47, %s16130_s22 }
 0x878   : > { %9407 = vrot.lane.b32.xlu1 %v9361_v47, %s16103_s13  ;;  %9402 = vrot.lane.b32.xlu0 %v9361_v47, %s16120_s11 }
 0x87c   : > { %9417 = vrot.lane.b32.xlu1 %v9361_v47, %s16112_s28  ;;  %9412 = vrot.lane.b32.xlu0 %v9361_v47, %s16102_s14 }
 0x880   : > { %9427 = vrot.lane.b32.xlu1 %v9361_v47, %s16093_s9  ;;  %9422 = vrot.lane.b32.xlu0 %v9361_v47, %s16099_s10 }
 0x884   : > { %9437 = vrot.lane.b32.xlu1 %v9436_v10, %s16121_s0  ;;  %9432 = vrot.lane.b32.xlu0 %v9436_v10, %s16282_s12 }
 0x888   : > { %9447 = vrot.lane.b32.xlu1 %v9436_v10, %s16131_s5  ;;  %9442 = vrot.lane.b32.xlu0 %v9436_v10, %s16085_s15 }
 0x88c   : > { %9457 = vrot.lane.b32.xlu1 %v9436_v10, %s16087_s25  ;;  %9452 = vrot.lane.b32.xlu0 %v9436_v10, %s16091_s7 }
 0x890   : > { %9467 = vrot.lane.b32.xlu1 %v9436_v10, %s16092_s8  ;;  %9462 = vrot.lane.b32.xlu0 %v9436_v10, %s16130_s22 }
 0x894   : > { %9477 = vrot.lane.b32.xlu1 %v9436_v10, %s16120_s11  ;;  %9472 = vrot.lane.b32.xlu0 %v9436_v10, %s16095_s27 }
 0x898   : > { %9487 = vrot.lane.b32.xlu1 %v9436_v10, %s16102_s14  ;;  %9482 = vrot.lane.b32.xlu0 %v9436_v10, %s16103_s13 }
 0x89c   : > { %9497 = vrot.lane.b32.xlu1 %v9436_v10, %s16099_s10  ;;  %9492 = vrot.lane.b32.xlu0 %v9436_v10, %s16112_s28 }
 0x8a0   : > { %9502 = vrot.lane.b32.xlu1 %v14499_v13, %s16095_s27  ;;  %9507 = vrot.lane.b32.xlu0 %v9436_v10, %s16093_s9 }
 0x8a4   : > { %9517 = vrot.lane.b32.xlu1 %v14499_v13, %s16103_s13  ;;  %9512 = vrot.lane.b32.xlu0 %v14499_v13, %s16120_s11 }
 0x8a8   : > { %9527 = vrot.lane.b32.xlu1 %v14499_v13, %s16112_s28  ;;  %9522 = vrot.lane.b32.xlu0 %v14499_v13, %s16102_s14 }
 0x8aa   : > { %v14612_v24 = vpop.permute.xlu1 %9247  ;;  %v14614_v40 = vpop.permute.xlu0 %9242 }
 0x8ab   : > { %v9250_v4 = vunpack.i.h.bf16 %v14612_v24  ;;  %v9249_v3 = vunpack.i.l.bf16 %v14612_v24  ;;  %v9245_v5 = vunpack.i.h.bf16 %v14614_v40  ;;  %v9244_v16 = vunpack.i.l.bf16 %v14614_v40 }
 0x8ac   : > { %9537 = vrot.lane.b32.xlu1 %v14499_v13, %s16093_s9  ;;  %9532 = vrot.lane.b32.xlu0 %v14499_v13, %s16099_s10 }
 0x8ad   : > { %v5237_v19 = vsel %vm4874_vm13, %v9244_v16, %v9249_v3 }
 0x8ae   : > { %v14620_v21 = vpop.permute.xlu1 %9257  ;;  %v14622_v49 = vpop.permute.xlu0 %9252 }
 0x8af   : > { %v9260_v37 = vunpack.i.h.bf16 %v14620_v21  ;;  %v9259_v8 = vunpack.i.l.bf16 %v14620_v21  ;;  %v9255_v61 = vunpack.i.h.bf16 %v14622_v49  ;;  %v9254_v52 = vunpack.i.l.bf16 %v14622_v49 }
 0x8b0   : > { %9547 = vrot.lane.b32.xlu1 %v9361_v47, %s16124_s21  ;;  %9542 = vrot.lane.b32.xlu0 %v9436_v10, %s16124_s21  ;;  %v5238_v47 = vsel %vm4874_vm13, %v9245_v5, %v9250_v4 }
 0x8b1   : > { %v4998_v36 = vsel %vm4874_vm13, %v9255_v61, %v9260_v37  ;;  %v4997_v2 = vsel %vm4874_vm13, %v9254_v52, %v9259_v8 }
 0x8b2   : > { %v9268_v45 = vpop.permute.xlu1 %9267  ;;  %v14626_v51 = vpop.permute.xlu0 %9262 }
 0x8b3   : > { %v9270_v20 = vunpack.i.h.bf16 %v9268_v45  ;;  %v9269_v23 = vunpack.i.l.bf16 %v9268_v45  ;;  %v9265_v38 = vunpack.i.h.bf16 %v14626_v51  ;;  %v9264_v44 = vunpack.i.l.bf16 %v14626_v51 }
 0x8b4   : > { %9557 = vrot.lane.b32.xlu1 %v14499_v13, %s16124_s21  ;;  %9552 = vrot.lane.b32.xlu0 %v14523_v6, %s16124_s21 }
 0x8b5   : > { %v5005_v48 = vsel %vm4883_vm11, %v4997_v2, %v9269_v23  ;;  %v5006_v22 = vsel %vm4883_vm11, %v4998_v36, %v9270_v20  ;;  %v5245_v15 = vsel %vm4883_vm11, %v5237_v19, %v9264_v44  ;;  %v5246_v24 = vsel %vm4883_vm11, %v5238_v47, %v9265_v38 }
 0x8b6   : > { %v14635_v14 = vpop.permute.xlu1 %9277  ;;  %v14637_v58 = vpop.permute.xlu0 %9272 }
 0x8b7   : > { %v9280_v40 = vunpack.i.h.bf16 %v14635_v14  ;;  %v9279_v21 = vunpack.i.l.bf16 %v14635_v14  ;;  %v9275_v49 = vunpack.i.h.bf16 %v14637_v58  ;;  %v9274_v45 = vunpack.i.l.bf16 %v14637_v58 }
 0x8b8   : > { %5351 = vperm.xlu1 %9562, %v14472_v55   ;;  %5347 = vperm.xlu0 %9561, %v14457_v34  }
 0x8b9   : > { %v14739_v23 = vsel %vm4892_vm4, %v5005_v48, %v9279_v21  ;;  %v14748_v38 = vsel %vm4892_vm4, %v5246_v24, %v9275_v49 }
 0x8ba   : > { %v14640_v30 = vpop.permute.xlu1 %9287  ;;  %v14642_v63 = vpop.permute.xlu0 %9282 }
 0x8bb   : > { %v9290_v51 = vunpack.i.h.bf16 %v14640_v30  ;;  %v9289_v59 = vunpack.i.l.bf16 %v14640_v30  ;;  %v9285_v62 = vunpack.i.h.bf16 %v14642_v63  ;;  %v9284_v4 = vunpack.i.l.bf16 %v14642_v63 }
 0x8bc   : > { %5339 = vperm.xlu1 %9562, %v14466_v53   ;;  %5343 = vperm.xlu0 %9561, %v14478_v39  }
 0x8bd   : > { %v5240_v44 = vsel %vm4874_vm13, %v9285_v62, %v9290_v51 }
 0x8be   : > { %v14646_v43 = vpop.permute.xlu1 %9297  ;;  %v14648_v33 = vpop.permute.xlu0 %9292 }
 0x8bf   : > { %v9300_v3 = vunpack.i.h.bf16 %v14646_v43  ;;  %v9299_v5 = vunpack.i.l.bf16 %v14646_v43  ;;  %v9295_v16 = vunpack.i.h.bf16 %v14648_v33  ;;  %v9294_v14 = vunpack.i.l.bf16 %v14648_v33 }
 0x8c1   : > { %v5000_v47 = vsel %vm4874_vm13, %v9295_v16, %v9300_v3 }
 0x8c2   : > { %v14652_v56 = vpop.permute.xlu1 %9307  ;;  %v14654_v18 = vpop.permute.xlu0 %9302 }
 0x8c3   : > { %v9310_v37 = vunpack.i.h.bf16 %v14652_v56  ;;  %v9309_v58 = vunpack.i.l.bf16 %v14652_v56  ;;  %v9305_v8 = vunpack.i.h.bf16 %v14654_v18  ;;  %v9304_v30 = vunpack.i.l.bf16 %v14654_v18 }
 0x8c4   : > { %v14742_v56 = vsel %vm4892_vm4, %v5006_v22, %v9280_v40  ;;  %v14745_v18 = vsel %vm4892_vm4, %v5245_v15, %v9274_v45 }
 0x8c5   : > { %v5008_v36 = vsel %vm4883_vm11, %v5000_v47, %v9310_v37  ;;  %v5248_v15 = vsel %vm4883_vm11, %v5240_v44, %v9305_v8 }
 0x8c6   : > { %v14656_v60 = vpop.permute.xlu1 %9317  ;;  %v14658_v13 = vpop.permute.xlu0 %9312 }
 0x8c7   : > { %v9320_v63 = vunpack.i.h.bf16 %v14656_v60  ;;  %v9319_v43 = vunpack.i.l.bf16 %v14656_v60  ;;  %v9315_v20 = vunpack.i.h.bf16 %v14658_v13  ;;  %v9314_v33 = vunpack.i.l.bf16 %v14658_v13 }
 0x8c8   : > { %v5239_v60 = vsel %vm4874_vm13, %v9284_v4, %v9289_v59  ;;  %v4999_v13 = vsel %vm4874_vm13, %v9294_v14, %v9299_v5 }
 0x8c9   : > { %v5007_v19 = vsel %vm4883_vm11, %v4999_v13, %v9309_v58  ;;  %v5247_v22 = vsel %vm4883_vm11, %v5239_v60, %v9304_v30  ;;  %v14766_v40 = vsel %vm4892_vm4, %v5008_v36, %v9320_v63  ;;  %v14772_v49 = vsel %vm4892_vm4, %v5248_v15, %v9315_v20 }
 0x8ca   : > { %v14660_v55 = vpop.permute.xlu1 %9327  ;;  %v14662_v57 = vpop.permute.xlu0 %9322  ;;  %v14763_v24 = vsel %vm4892_vm4, %v5007_v19, %v9319_v43  ;;  %v14769_v21 = vsel %vm4892_vm4, %v5247_v22, %v9314_v33 }
 0x8cb   : > { %v9330_v45 = vunpack.i.h.bf16 %v14660_v55  ;;  %v9329_v51 = vunpack.i.l.bf16 %v14660_v55  ;;  %v9325_v59 = vunpack.i.h.bf16 %v14662_v57  ;;  %v9324_v62 = vunpack.i.l.bf16 %v14662_v57 }
 0x8cd   : > { %v14790_v8 = vsel %vm4874_vm13, %v9325_v59, %v9330_v45  ;;  %v14793_v30 = vsel %vm4874_vm13, %v9324_v62, %v9329_v51 }
 0x8ce   : > { %v14664_v34 = vpop.permute.xlu1 %9337  ;;  %v14666_v27 = vpop.permute.xlu0 %9332 }
 0x8cf   : > { %v16064_v4 = vunpack.i.h.bf16 %v14666_v27 }
 0x8d1   : > { %v14803_v33 = vsel %vm4874_vm13, %v14515_v35, %v16064_v4 }
 0x8d2   : > { %v14668_v46 = vpop.permute.xlu1 %9347  ;;  %v14670_v53 = vpop.permute.xlu0 %9342 }
 0x8d6   : > { %v14672_v39 = vpop.permute.xlu1 %9362  ;;  %v14674_v50 = vpop.permute.xlu0 %9352 }
 0x8d7   : > { %v9364_v63 = vunpack.i.l.bf16 %v14672_v39 }
 0x8da   : > { %v14676_v12 = vpop.permute.xlu1 %9372  ;;  %v14678_v6 = vpop.permute.xlu0 %9357 }
 0x8db   : > { %v9360_v3 = vunpack.i.h.bf16 %v14678_v6  ;;  %v9359_v5 = vunpack.i.l.bf16 %v14678_v6  ;;  %v9365_v6 = vunpack.i.h.bf16 %v14672_v39  ;;  %v9375_v60 = vunpack.i.h.bf16 %v14676_v12 }
 0x8dc   : > { %v9374_v47 = vunpack.i.l.bf16 %v14676_v12 }
 0x8dd   : > { %v5242_v13 = vsel %vm4874_vm13, %v9360_v3, %v9365_v6  ;;  %v5241_v39 = vsel %vm4874_vm13, %v9359_v5, %v9364_v63 }
 0x8de   : > { %v14680_v7 = vpop.permute.xlu1 %9382  ;;  %v14682_v42 = vpop.permute.xlu0 %9367 }
 0x8df   : > { %v9370_v22 = vunpack.i.h.bf16 %v14682_v42  ;;  %v9369_v15 = vunpack.i.l.bf16 %v14682_v42  ;;  %v9385_v51 = vunpack.i.h.bf16 %v14680_v7  ;;  %v9384_v59 = vunpack.i.l.bf16 %v14680_v7 }
 0x8e1   : > { %v5001_v43 = vsel %vm4874_vm13, %v9369_v15, %v9374_v47 }
 0x8e2   : > { %v14684_v11 = vpop.permute.xlu1 %9392  ;;  %v14686_v54 = vpop.permute.xlu0 %9377 }
 0x8e3   : > { %v9380_v45 = vunpack.i.h.bf16 %v14686_v54  ;;  %v9379_v35 = vunpack.i.l.bf16 %v14686_v54  ;;  %v5002_v54 = vsel %vm4874_vm13, %v9370_v22, %v9375_v60 }
 0x8e5   : > { %v5249_v7 = vsel %vm4883_vm11, %v5241_v39, %v9379_v35  ;;  %v5250_v20 = vsel %vm4883_vm11, %v5242_v13, %v9380_v45 }
 0x8e6   : > { %v14698_v29 = vpop.permute.xlu1 %9397  ;;  %v14700_v1 = vpop.permute.xlu0 %9387 }
 0x8e7   : > { %v9390_v12 = vunpack.i.h.bf16 %v14700_v1  ;;  %v9389_v62 = vunpack.i.l.bf16 %v14700_v1 }
 0x8e9   : > { %v5258_v41 = vsel %vm4892_vm4, %v5250_v20, %v9390_v12 }
 0x8ea   : > { %v14708_v31 = vpop.permute.xlu1 %9407  ;;  %v14710_v10 = vpop.permute.xlu0 %9402 }
 0x8ee   : > { %v14730_v61 = vpop.permute.xlu1 %9417  ;;  %v14732_v52 = vpop.permute.xlu0 %9412 }
 0x8f2   : > { %v14756_v2 = vpop.permute.xlu1 %9427  ;;  %v14758_v48 = vpop.permute.xlu0 %9422 }
 0x8f6   : > { %v9438_v16 = vpop.permute.xlu1 %9437  ;;  %v9433_v14 = vpop.permute.xlu0 %9432 }
 0x8f7   : > { %v9440_v3 = vunpack.i.h.bf16 %v9438_v16  ;;  %v9439_v5 = vunpack.i.l.bf16 %v9438_v16  ;;  %v9435_v6 = vunpack.i.h.bf16 %v9433_v14  ;;  %v9434_v63 = vunpack.i.l.bf16 %v9433_v14 }
 0x8f8   : > { %v9395_v14 = vunpack.i.h.bf16 %v14684_v11 }
 0x8f9   : > { %v5244_v60 = vsel %vm4874_vm13, %v9435_v6, %v9440_v3  ;;  %v5243_v47 = vsel %vm4874_vm13, %v9434_v63, %v9439_v5  ;;  %v5009_v5 = vsel %vm4883_vm11, %v5001_v43, %v9384_v59  ;;  %v5010_v6 = vsel %vm4883_vm11, %v5002_v54, %v9385_v51 }
 0x8fa   : > { %v9448_v19 = vpop.permute.xlu1 %9447  ;;  %v9443_v36 = vpop.permute.xlu0 %9442  ;;  %v9350_v51 = vunpack.i.h.bf16 %v14668_v46  ;;  %v9349_v59 = vunpack.i.l.bf16 %v14668_v46 }
 0x8fb   : > { %v9450_v4 = vunpack.i.h.bf16 %v9448_v19  ;;  %v9449_v57 = vunpack.i.l.bf16 %v9448_v19  ;;  %v9445_v55 = vunpack.i.h.bf16 %v9443_v36  ;;  %v9444_v42 = vunpack.i.l.bf16 %v9443_v36 }
 0x8fc   : > { %v9394_v19 = vunpack.i.l.bf16 %v14684_v11  ;;  %v5257_v36 = vsel %vm4892_vm4, %v5249_v7, %v9389_v62 }
 0x8fd   : > { %v5004_v39 = vsel %vm4874_vm13, %v9445_v55, %v9450_v4  ;;  %v5003_v13 = vsel %vm4874_vm13, %v9444_v42, %v9449_v57  ;;  %v5332_v54 = vpack.c.bf16 %v5258_v41, %v5257_v36  ;;  %v9414_v41 = vunpack.i.l.bf16 %v14732_v52 }
 0x8fe   : > { %v9458_v58 = vpop.permute.xlu1 %9457  ;;  %v9453_v37 = vpop.permute.xlu0 %9452 }
 0x8ff   : > { %v9460_v44 = vunpack.i.h.bf16 %v9458_v58  ;;  %v9459_v1 = vunpack.i.l.bf16 %v9458_v58  ;;  %v9455_v17 = vunpack.i.h.bf16 %v9453_v37  ;;  %v9454_v16 = vunpack.i.l.bf16 %v9453_v37 }
 0x901   : > { %v5011_v11 = vsel %vm4883_vm11, %v5003_v13, %v9459_v1  ;;  %v5012_v62 = vsel %vm4883_vm11, %v5004_v39, %v9460_v44  ;;  %v5251_v20 = vsel %vm4883_vm11, %v5243_v47, %v9454_v16  ;;  %v5252_v12 = vsel %vm4883_vm11, %v5244_v60, %v9455_v17 }
 0x902   : > { %v9468_v22 = vpop.permute.xlu1 %9467  ;;  %v9463_v58 = vpop.permute.xlu0 %9462  ;;  %v16793_v1 = vunpack.i.l.bf16 %v14666_v27  ;;  %v5017_v16 = vsel %vm4892_vm4, %v5009_v5, %v9394_v19  ;;  %v5018_v60 = vsel %vm4892_vm4, %v5010_v6, %v9395_v14  ;;  %v16794_v47 = vunpack.i.l.bf16 %v14664_v34 }
 0x903   : > { %v9470_v15 = vunpack.i.h.bf16 %v9468_v22  ;;  %v9469_v37 = vunpack.i.l.bf16 %v9468_v22  ;;  %v9465_v45 = vunpack.i.h.bf16 %v9463_v58  ;;  %v9464_v35 = vunpack.i.l.bf16 %v9463_v58 }
 0x904   : > { %v14844_v17 = vsel %vm4874_vm13, %v14513_v26, %v16793_v1  ;;  %v14852_v43 = vsel %vm4883_vm11, %v14793_v30, %v16794_v47  ;;  %v16795_v39 = vunpack.i.h.bf16 %v14664_v34  ;;  %v9345_v14 = vunpack.i.h.bf16 %v14670_v53 }
 0x905   : > { %v5019_v3 = vsel %vm4892_vm4, %v5011_v11, %v9469_v37  ;;  %v5020_v4 = vsel %vm4892_vm4, %v5012_v62, %v9470_v15  ;;  %v5259_v55 = vsel %vm4892_vm4, %v5251_v20, %v9464_v35  ;;  %v5260_v57 = vsel %vm4892_vm4, %v5252_v12, %v9465_v45 }
 0x906   : > { %v9478_v63 = vpop.permute.xlu1 %9477  ;;  %v9473_v42 = vpop.permute.xlu0 %9472  ;;  %v5333_v7 = vpack.c.bf16 %v5260_v57, %v5259_v55  ;;  %v5325_v44 = vpack.c.bf16 %v5020_v4, %v5019_v3  ;;  %v14860_v26 = vsel %vm4883_vm11, %v14790_v8, %v16795_v39  ;;  %v9344_v19 = vunpack.i.l.bf16 %v14670_v53 }
 0x907   : > { %v9405_v13 = vunpack.i.h.bf16 %v14710_v10  ;;  %v9404_v30 = vunpack.i.l.bf16 %v14710_v10  ;;  %v9355_v22 = vunpack.i.h.bf16 %v14674_v50  ;;  %v9354_v58 = vunpack.i.l.bf16 %v14674_v50 }
 0x908   : > { %7270 = vmatprep.subr.bf16.mxu0 %v5333_v7  ;;  %v5324_v8 = vpack.c.bf16 %v5018_v60, %v5017_v16  ;;  %v9400_v15 = vunpack.i.h.bf16 %v14698_v29  ;;  %v9399_v37 = vunpack.i.l.bf16 %v14698_v29  ;;  %v9410_v45 = vunpack.i.h.bf16 %v14708_v31 }
 0x909   : > { %7271 = vmatpush3.bf16.msra.mxu0 %v5325_v44  ;;  %v9409_v10 = vunpack.i.l.bf16 %v14708_v31  ;;  %v9480_v35 = vunpack.i.h.bf16 %v9478_v63  ;;  %v9479_v11 = vunpack.i.l.bf16 %v9478_v63  ;;  %v9475_v62 = vunpack.i.h.bf16 %v9473_v42 }
 0x90a   : > { %v9488_v34 = vpop.permute.xlu1 %9487  ;;  %v14869_v36 = vpop.permute.xlu0 %9482  ;;  %7272 = vmatprep.subr.bf16.mxu0 %v5332_v54  ;;  %v9474_v20 = vunpack.i.l.bf16 %v9473_v42  ;;  %v5122_v12 = vsel %vm4874_vm13, %v9400_v15, %v9405_v13  ;;  %v5121_v3 = vsel %vm4874_vm13, %v9399_v37, %v9404_v30  ;;  %v9420_v57 = vunpack.i.h.bf16 %v14730_v61 }
 0x90b   : > { %v9490_v4 = vunpack.i.h.bf16 %v9488_v34  ;;  %v9489_v55 = vunpack.i.l.bf16 %v9488_v34  ;;  %v9419_v5 = vunpack.i.l.bf16 %v14730_v61  ;;  %v9415_v29 = vunpack.i.h.bf16 %v14732_v52 }
 0x90c   : > { %v16796_v63 = vpack.c.bf16 %v14772_v49, %v14769_v21  ;;  %v5129_v42 = vsel %vm4883_vm11, %v5121_v3, %v9414_v41  ;;  %v9485_v44 = vunpack.i.h.bf16 %v14869_v36  ;;  %v9484_v1 = vunpack.i.l.bf16 %v14869_v36  ;;  %v10013_v36 = vld [vmem:[%s16375_s18 + $0x180] ss:$16 sps:$4 sm:$0xff]  }
 0x90d   : > { %7273 = vmatpush3.bf16.msra.mxu0 %v5324_v8  ;;  %v5124_v47 = vsel %vm4874_vm13, %v9475_v62, %v9480_v35  ;;  %v5123_v54 = vsel %vm4874_vm13, %v9474_v20, %v9479_v11  ;;  %v9425_v13 = vunpack.i.h.bf16 %v14758_v48  ;;  %v9424_v21 = vunpack.i.l.bf16 %v14758_v48 }
 0x90e   : > { %v9498_v6 = vpop.permute.xlu1 %9497  ;;  %v14880_v7 = vpop.permute.xlu0 %9492  ;;  %7274 = vmatprep.subr.bf16.mxu0 %v16796_v63  ;;  %v16797_v49 = vpack.c.bf16 %v14766_v40, %v14763_v24  ;;  %v5131_v30 = vsel %vm4883_vm11, %v5123_v54, %v9489_v55  ;;  %v5132_v41 = vsel %vm4883_vm11, %v5124_v47, %v9490_v4  ;;  %v9430_v34 = vunpack.i.h.bf16 %v14756_v2 }
 0x90f   : > { %v9500_v16 = vunpack.i.h.bf16 %v9498_v6  ;;  %v9499_v60 = vunpack.i.l.bf16 %v9498_v6  ;;  %v9495_v52 = vunpack.i.h.bf16 %v14880_v7  ;;  %v9494_v39 = vunpack.i.l.bf16 %v14880_v7 }
 0x910   : > { %v16798_v37 = vpack.c.bf16 %v14748_v38, %v14745_v18  ;;  %v5130_v24 = vsel %vm4883_vm11, %v5122_v12, %v9415_v29  ;;  %v4882_v40 = vsel %vm4874_vm13, %v14578_v25, %v9485_v44  ;;  %v4881_v11 = vsel %vm4874_vm13, %v14576_v9, %v9484_v1 }
 0x911   : > { %7275 = vmatpush3.bf16.msra.mxu0 %v16797_v49  ;;  %v5139_v35 = vsel %vm4892_vm4, %v5131_v30, %v9499_v60  ;;  %v5140_v48 = vsel %vm4892_vm4, %v5132_v41, %v9500_v16  ;;  %v9429_v38 = vunpack.i.l.bf16 %v14756_v2  ;;  %v4890_v20 = vsel %vm4883_vm11, %v4881_v11, %v9494_v39 }
 0x912   : > { %v9503_v8 = vpop.permute.xlu1 %9502  ;;  %v14900_v15 = vpop.permute.xlu0 %9507  ;;  %7276 = vmatprep.subr.bf16.mxu0 %v16798_v37  ;;  %v4891_v12 = vsel %vm4883_vm11, %v4882_v40, %v9495_v52  ;;  %v5329_v25 = vpack.c.bf16 %v5140_v48, %v5139_v35  ;;  %v16799_v4 = vpack.c.bf16 %v14742_v56, %v14739_v23  ;;  %v5137_v55 = vsel %vm4892_vm4, %v5129_v42, %v9424_v21 }
 0x913   : > { %v9510_v62 = vunpack.i.h.bf16 %v14900_v15  ;;  %v9509_v18 = vunpack.i.l.bf16 %v14900_v15  ;;  %v5138_v29 = vsel %vm4892_vm4, %v5130_v24, %v9425_v13  ;;  %v4886_v6 = vsel %vm4883_vm11, %v14844_v17, %v9344_v19 }
 0x914   : > { %v4880_v63 = vsel %vm4874_vm13, %v14553_v0, %v9410_v45  ;;  %v4879_v23 = vsel %vm4874_vm13, %v14551_v28, %v9409_v10  ;;  %v4887_v17 = vsel %vm4883_vm11, %v14803_v33, %v9345_v14  ;;  %v5135_v28 = vsel %vm4892_vm4, %v14852_v43, %v9349_v59 }
 0x915   : > { %v4899_v3 = vsel %vm4892_vm4, %v4890_v20, %v9509_v18  ;;  %v4900_v9 = vsel %vm4892_vm4, %v4891_v12, %v9510_v62  ;;  %7277 = vmatpush3.bf16.msra.mxu0 %v16799_v4  ;;  %v4888_v60 = vsel %vm4883_vm11, %v4879_v23, %v9419_v5  ;;  %v4889_v0 = vsel %vm4883_vm11, %v4880_v63, %v9420_v57 }
 0x916   : > { %v14948_v56 = vpop.permute.xlu1 %9517  ;;  %v9513_v42 = vpop.permute.xlu0 %9512  ;;  %7278 = vmatprep.subr.bf16.mxu0 %v5329_v25  ;;  %v5321_v16 = vpack.c.bf16 %v4900_v9, %v4899_v3  ;;  %v4897_v47 = vsel %vm4892_vm4, %v4888_v60, %v9429_v38  ;;  %v4898_v33 = vsel %vm4892_vm4, %v4889_v0, %v9430_v34  ;;  %v5328_v54 = vpack.c.bf16 %v5138_v29, %v5137_v55  ;;  %v16800_v9 = vld [vmem:[#allocation30_spill] sm:$0xff] }
 0x917   : > { %v5136_v13 = vsel %vm4892_vm4, %v14860_v26, %v9350_v51  ;;  %v4895_v21 = vsel %vm4892_vm4, %v4886_v6, %v9354_v58  ;;  %v4896_v43 = vsel %vm4892_vm4, %v4887_v17, %v9355_v22  ;;  %v9520_v59 = vunpack.i.h.bf16 %v14948_v56 }
 0x918   : > { %v9519_v49 = vunpack.i.l.bf16 %v14948_v56  ;;  %v9515_v30 = vunpack.i.h.bf16 %v9513_v42  ;;  %v9514_v41 = vunpack.i.l.bf16 %v9513_v42  ;;  %v9505_v51 = vunpack.i.h.bf16 %v9503_v8  ;;  %v10020_v56 = vld [vmem:[%s16375_s18 + $0x1a8] ss:$16 sps:$4 sm:$0xff]  }
 0x919   : > { %7279 = vmatpush3.bf16.msra.mxu0 %v5321_v16  ;;  %v9504_v26 = vunpack.i.l.bf16 %v9503_v8  ;;  %v5320_v35 = vpack.c.bf16 %v4898_v33, %v4897_v47  ;;  %v5327_v48 = vpack.c.bf16 %v5136_v13, %v5135_v28  ;;  %v5289_v12 = vsel %vm4874_vm13, %v9409_v10, %v9419_v5 }
 0x91a   : > { %v14982_v37 = vpop.permute.xlu1 %9527  ;;  %v9523_v46 = vpop.permute.xlu0 %9522  ;;  %7280 = vmatprep.subr.bf16.mxu0 %v5328_v54  ;;  %v5290_v8 = vsel %vm4874_vm13, %v9410_v45, %v9420_v57  ;;  %v5319_v25 = vpack.c.bf16 %v4896_v43, %v4895_v21  ;;  %v4876_v3 = vsel %vm4874_vm13, %v14493_v32, %v9520_v59  ;;  %v4875_v4 = vsel %vm4874_vm13, %v16800_v9, %v9519_v49 }
 0x91b   : > { %v9530_v24 = vunpack.i.h.bf16 %v14982_v37  ;;  %v9529_v40 = vunpack.i.l.bf16 %v14982_v37  ;;  %v9525_v11 = vunpack.i.h.bf16 %v9523_v46  ;;  %v9524_v20 = vunpack.i.l.bf16 %v9523_v46 }
 0x91c   : > { %v5118_v10 = vsel %vm4874_vm13, %v9505_v51, %v9515_v30  ;;  %v5117_v61 = vsel %vm4874_vm13, %v9504_v26, %v9514_v41  ;;  %v5291_v0 = vsel %vm4874_vm13, %v9484_v1, %v9494_v39  ;;  %v5292_v28 = vsel %vm4874_vm13, %v9485_v44, %v9495_v52 }
 0x91d   : > { %7281 = vmatpush3.bf16.msra.mxu0 %v5320_v35  ;;  %v4884_v32 = vsel %vm4883_vm11, %v4875_v4, %v9529_v40  ;;  %v4885_v6 = vsel %vm4883_vm11, %v4876_v3, %v9530_v24  ;;  %v5125_v63 = vsel %vm4883_vm11, %v5117_v61, %v9524_v20  ;;  %v5126_v23 = vsel %vm4883_vm11, %v5118_v10, %v9525_v11 }
 0x91e   : > { %v15006_v5 = vpop.permute.xlu1 %9537  ;;  %v9533_v31 = vpop.permute.xlu0 %9532  ;;  %7282 = vmatprep.subr.bf16.mxu0 %v5327_v48  ;;  %v5299_v46 = vsel %vm4883_vm11, %v5291_v0, %v9509_v18  ;;  %v5300_v7 = vsel %vm4883_vm11, %v5292_v28, %v9510_v62  ;;  %v5297_v44 = vsel %vm4883_vm11, %v5289_v12, %v9429_v38  ;;  %v5298_v1 = vsel %vm4883_vm11, %v5290_v8, %v9430_v34  ;;  %v10016_v18 = vld [vmem:[%s16375_s18 + $0x1a4] ss:$16 sps:$4 sm:$0xff]  }
 0x91f   : > { %v9540_v45 = vunpack.i.h.bf16 %v15006_v5  ;;  %v9539_v57 = vunpack.i.l.bf16 %v15006_v5  ;;  %v9535_v55 = vunpack.i.h.bf16 %v9533_v31  ;;  %v9534_v29 = vunpack.i.l.bf16 %v9533_v31 }
 0x920   : > { %v16801_v2 = vunpack.i.l.bf16 %v14666_v27  ;;  %v16802_v35 = vunpack.i.h.bf16 %v14666_v27  ;;  %v5286_v50 = vsel %vm4874_vm13, %v9520_v59, %v9530_v24  ;;  %v16803_v59 = vmov 0  }
 0x921   : > { %v4893_v42 = vsel %vm4892_vm4, %v4884_v32, %v9539_v57  ;;  %v4894_v16 = vsel %vm4892_vm4, %v4885_v6, %v9540_v45  ;;  %7283 = vmatpush3.bf16.msra.mxu0 %v5319_v25  ;;  %v5133_v17 = vsel %vm4892_vm4, %v5125_v63, %v9534_v29  ;;  %v5134_v60 = vsel %vm4892_vm4, %v5126_v23, %v9535_v55 }
 0x922   : > { %v9548_v47 = vpop.permute.xlu1 %9547  ;;  %v9543_v33 = vpop.permute.xlu0 %9542  ;;  %v5326_v54 = vpack.c.bf16 %v5134_v60, %v5133_v17  ;;  %v5318_v13 = vpack.c.bf16 %v4894_v16, %v4893_v42  ;;  %v5287_v34 = vsel %vm4874_vm13, %v16801_v2, %v9344_v19  ;;  %v5288_v48 = vsel %vm4874_vm13, %v16802_v35, %v9345_v14 }
 0x923   : > { %v9550_v21 = vunpack.i.h.bf16 %v9548_v47  ;;  %v9549_v43 = vunpack.i.l.bf16 %v9548_v47  ;;  %v9545_v30 = vunpack.i.h.bf16 %v9543_v33  ;;  %v9544_v41 = vunpack.i.l.bf16 %v9543_v33 }
 0x924   : > { %7284 = vmatprep.subr.bf16.mxu0 %v5326_v54  ;;  %v5295_v8 = vsel %vm4883_vm11, %v5287_v34, %v9354_v58  ;;  %v5296_v25 = vsel %vm4883_vm11, %v5288_v48, %v9355_v22  ;;  %v5285_v14 = vsel %vm4874_vm13, %v9519_v49, %v9529_v40  ;;  %v10018_v58 = vld [vmem:[%s16375_s18 + $0x1a0] ss:$16 sps:$4 sm:$0xff]   ;;  %v5294_v4 = vsel %vm4883_vm11, %v5286_v50, %v9540_v45 }
 0x925   : > { %7285 = vmatpush3.bf16.msra.mxu0 %v5318_v13  ;;  %v5307_v52 = vsel %vm4892_vm4, %v5299_v46, %v9544_v41  ;;  %v5308_v39 = vsel %vm4892_vm4, %v5300_v7, %v9545_v30  ;;  %v5305_v15 = vsel %vm4892_vm4, %v5297_v44, %v9549_v43  ;;  %v5306_v62 = vsel %vm4892_vm4, %v5298_v1, %v9550_v21  ;;  %v15157_v50 = vld [vmem:[%s16791_s4] sm:$0xff] }
 0x926   : > { %v9558_v51 = vpop.permute.xlu1 %9557  ;;  %v9553_v26 = vpop.permute.xlu0 %9552  ;;  %v5337_v38 = vpack.c.bf16 %v5308_v39, %v5307_v52  ;;  %v5336_v12 = vpack.c.bf16 %v5306_v62, %v5305_v15  ;;  %v5293_v9 = vsel %vm4883_vm11, %v5285_v14, %v9539_v57  ;;  %v15151_v14 = vld [vmem:[%s16791_s4 + $0x18] sm:$0xff] }
 0x927   : > { %v9555_v11 = vunpack.i.h.bf16 %v9553_v26  ;;  %v9554_v20 = vunpack.i.l.bf16 %v9553_v26  ;;  %v9560_v19 = vunpack.i.h.bf16 %v9558_v51  ;;  %v9559_v3 = vunpack.i.l.bf16 %v9558_v51 }
 0x928   : > { %7385 = vmatprep.subr.bf16.mxu1 %v5337_v38  ;;  %5424 = vmatmul.mubr.bf16.vlgmr.msra.gmra.mxu0 %v10013_v36 }
 0x929   : > { %7386 = vmatpush3.bf16.msra.mxu1 %v5337_v38  ;;  %v5303_v27 = vsel %vm4892_vm4, %v5295_v8, %v9554_v20  ;;  %v5304_v53 = vsel %vm4892_vm4, %v5296_v25, %v9555_v11  ;;  %5431 = vmatprep.mubr.bf16.mxu0 %v10016_v18  ;;  %v5301_v10 = vsel %vm4892_vm4, %v5293_v9, %v9559_v3  ;;  %v10021_v3 = vld [vmem:[%s16375_s18 + $0x204] ss:$16 sps:$4 sm:$0xff]  }
 0x92a   : > { %7387 = vmatprep.subr.bf16.mxu1 %v5336_v12  ;;  %v5335_v22 = vpack.c.bf16 %v5304_v53, %v5303_v27  ;;  %v5302_v49 = vsel %vm4892_vm4, %v5294_v4, %v9560_v19  ;;  %v10349_v27 = vmov 4   ;;  %v15145_v53 = vld [vmem:[%s16791_s4 + $0x10] sm:$0xff] }
 0x92b   : > { %v5334_v37 = vpack.c.bf16 %v5302_v49, %v5301_v10  ;;  %9723 = vset.pattern.permute.xlu1 %v10349_v27  ;;  %9724 = vset.pattern.permute.xlu0 %v10349_v27 }
 0x92d   : > { %7388 = vmatpush3.bf16.msra.mxu1 %v5336_v12 }
 0x92e   : > { %7389 = vmatprep.subr.bf16.mxu1 %v5335_v22 }
 0x930   : > { %5432 = vmatmul.mubr.bf16.gmra.mxu0 %v10018_v58 }
 0x931   : > { %7390 = vmatpush3.bf16.msra.mxu1 %v5335_v22  ;;  %v15163_v22 = vld [vmem:[%s16791_s4 + $0x8] sm:$0xff] }
 0x932   : > { %7391 = vmatprep.subr.bf16.mxu1 %v5334_v37 }
 0x933   : > { %v5352_v5 = vpop.permute.xlu1 %5351  ;;  %v5348_v45 = vpop.permute.xlu0 %5347 }
 0x935   : > { %7392 = vmatpush3.bf16.msra.mxu1 %v5334_v37 }
 0x936   : > { %5828 = vmatprep.subr.bf16.mxu1 %v16803_v59 }
 0x937   : > { %v5340_v29 = vpop.permute.xlu1 %5339  ;;  %v5344_v16 = vpop.permute.xlu0 %5343 }
 0x938   : > { %7394 = vmatmul.mubr.msk.bf16.vlgmr.msra.gmra.mxu1 %vm5384_vm10, %v10020_v56 }
 0x939   : > { %7050 = vmatprep.mubr.msk.bf16.mxu1 %vm1598_vm1, %v10021_v3 }
 0x9e8   : > { %v7286_v24 = vpop.f32.mrf.mxu0 }
 0x9ea   : > { %v7287_v40 = vpop.f32.mrf.mxu0 }
 0x9eb   : > { %v7288_v57 = vadd.f32 %v7287_v40, %v7286_v24 }
 0x9ec   : > { %v7289_v61 = vpop.f32.mrf.mxu0 }
 0x9ed   : > { %v5426_v23 = vadd.f32 %v7288_v57, %v5340_v29 }
 0x9ee   : > { %v7290_v31 = vpop.f32.mrf.mxu0 }
 0x9ef   : > { %v7291_v6 = vadd.f32 %v7290_v31, %v7289_v61 }
 0x9f0   : > { %v7292_v55 = vpop.f32.mrf.mxu0 }
 0x9f1   : > { %v5429_v47 = vadd.f32 %v7291_v6, %v5344_v16 }
 0x9f2   : > { %v7293_v63 = vpop.f32.mrf.mxu0 }
 0x9f3   : > { %v7294_v30 = vadd.f32 %v7293_v63, %v7292_v55 }
 0x9f4   : > { %v7295_v0 = vpop.f32.mrf.mxu0 }
 0x9f5   : > { %v5434_v46 = vadd.f32 %v7294_v30, %v5348_v45 }
 0x9f6   : > { %v7296_v13 = vpop.f32.mrf.mxu0 }
 0x9f7   : > { %v7297_v43 = vadd.f32 %v7296_v13, %v7295_v0 }
 0x9f8   : > { %v7395_v32 = vpop.f32.mrf.mxu1 }
 0x9f9   : > { %v5437_v41 = vadd.f32 %v7297_v43, %v5352_v5  ;;  %v5483_v44 = vadd.f32 %v7395_v32, %v5434_v46 }
 0x9fa   : > { %v5474_v42 = vpop.f32.mrf.mxu1 }
 0x9fb   : > { %v5475_v17 = vadd.f32 %v5474_v42, %v5426_v23  ;;  %v7040_v15 = vmul.f32 -1.442695, %v5483_v44 }
 0x9fc   : > { %v7396_v60 = vpop.f32.mrf.mxu1 }
 0x9fd   : > { %v7038_v28 = vmul.f32 -1.442695, %v5475_v17  ;;  %v5486_v7 = vadd.f32 %v7396_v60, %v5437_v41 }
 0x9fe   : > { %v5477_v33 = vpop.f32.mrf.mxu1 }
 0x9ff   : > { %10171 = vpow2.f32 %v7038_v28  ;;  %v5478_v54 = vadd.f32 %v5477_v33, %v5429_v47  ;;  %v7041_v52 = vmul.f32 -1.442695, %v5486_v7 }
 0xa01   : > { %v7039_v21 = vmul.f32 -1.442695, %v5478_v54 }
 0xa03   : > { %10173 = vpow2.f32 %v7039_v21 }
 0xa0c   : > { %v10172_v36 = vpop.eup %10171 }
 0xa0d   : > { %v5501_v1 = vadd.f32 1.0, %v10172_v36 }
 0xa0f   : > { %10175 = vrcp.f32 %v5501_v1 }
 0xa10   : > { %v10174_v39 = vpop.eup %10173  ;;  %10177 = vpow2.f32 %v7041_v52 }
 0xa11   : > { %v5502_v62 = vadd.f32 1.0, %v10174_v39 }
 0xa13   : > { %10179 = vrcp.f32 %v5502_v62 }
 0xa14   : > { %10181 = vpow2.f32 %v7040_v15 }
 0xa1c   : > { %v10176_v18 = vpop.eup %10175 }
 0xa1d   : > { %v10178_v51 = vpop.eup %10177  ;;  %v15094_v38 = vmul.f32 %v10176_v18, %v5475_v17 }
 0xa1e   : > { %v5504_v35 = vadd.f32 1.0, %v10178_v51 }
 0xa20   : > { %v10180_v26 = vpop.eup %10179  ;;  %10183 = vrcp.f32 %v5504_v35 }
 0xa21   : > { %v15096_v2 = vmul.f32 %v10180_v26, %v5478_v54  ;;  %v10182_v34 = vpop.eup %10181 }
 0xa22   : > { %v5503_v11 = vadd.f32 1.0, %v10182_v34 }
 0xa23   : > { %v9568_v48 = vpack.i.bf16 %v15096_v2, %v15094_v38 }
 0xa24   : > { %10185 = vrcp.f32 %v5503_v11 }
 0xa25   : > { %9569 = vrot.lane.b32.xlu0 %v9568_v48, %s16121_s0  ;;  %9564 = vrot.lane.b32.xlu1 %v9568_v48, %s16282_s12 }
 0xa29   : > { %9579 = vrot.lane.b32.xlu0 %v9568_v48, %s16130_s22  ;;  %9574 = vrot.lane.b32.xlu1 %v9568_v48, %s16091_s7 }
 0xa2d   : > { %9589 = vrot.lane.b32.xlu0 %v9568_v48, %s16120_s11  ;;  %9584 = vrot.lane.b32.xlu1 %v9568_v48, %s16095_s27  ;;  %v10184_v20 = vpop.eup %10183 }
 0xa2e   : > { %v15110_v8 = vmul.f32 %v10184_v20, %v5486_v7 }
 0xa31   : > { %9599 = vrot.lane.b32.xlu0 %v9568_v48, %s16099_s10  ;;  %9594 = vrot.lane.b32.xlu1 %v9568_v48, %s16102_s14  ;;  %v10186_v12 = vpop.eup %10185 }
 0xa32   : > { %v15112_v25 = vmul.f32 %v10186_v12, %v5483_v44 }
 0xa34   : > { %v9628_v19 = vpack.i.bf16 %v15110_v8, %v15112_v25 }
 0xa35   : > { %9609 = vrot.lane.b32.xlu0 %v9568_v48, %s16131_s5  ;;  %9604 = vrot.lane.b32.xlu1 %v9568_v48, %s16085_s15 }
 0xa39   : > { %9619 = vrot.lane.b32.xlu0 %v9568_v48, %s16092_s8  ;;  %9614 = vrot.lane.b32.xlu1 %v9568_v48, %s16087_s25 }
 0xa3d   : > { %9629 = vrot.lane.b32.xlu0 %v9628_v19, %s16121_s0  ;;  %9624 = vrot.lane.b32.xlu1 %v9628_v19, %s16282_s12 }
 0xa41   : > { %9639 = vrot.lane.b32.xlu0 %v9628_v19, %s16130_s22  ;;  %9634 = vrot.lane.b32.xlu1 %v9628_v19, %s16091_s7 }
 0xa45   : > { %9649 = vrot.lane.b32.xlu0 %v9628_v19, %s16120_s11  ;;  %9644 = vrot.lane.b32.xlu1 %v9628_v19, %s16095_s27 }
 0xa49   : > { %9659 = vrot.lane.b32.xlu0 %v9628_v19, %s16099_s10  ;;  %9654 = vrot.lane.b32.xlu1 %v9628_v19, %s16102_s14  ;;  %s16822_s14 = sld [smem:[#allocation96_spill]] }
 0xa4d   : > { %9669 = vrot.lane.b32.xlu0 %v9628_v19, %s16131_s5  ;;  %9664 = vrot.lane.b32.xlu1 %v9628_v19, %s16085_s15 }
 0xa51   : > { %9679 = vrot.lane.b32.xlu0 %v9628_v19, %s16092_s8  ;;  %9674 = vrot.lane.b32.xlu1 %v9628_v19, %s16087_s25 }
 0xa55   : > { %9689 = vrot.lane.b32.xlu0 %v9628_v19, %s16112_s28  ;;  %9684 = vrot.lane.b32.xlu1 %v9628_v19, %s16103_s13 }
 0xa59   : > { %9694 = vrot.lane.b32.xlu0 %v9568_v48, %s16103_s13  ;;  %9699 = vrot.lane.b32.xlu1 %v9628_v19, %s16093_s9 }
 0xa5d   : > { %9709 = vrot.lane.b32.xlu0 %v9568_v48, %s16093_s9  ;;  %9704 = vrot.lane.b32.xlu1 %v9568_v48, %s16112_s28 }
 0xa61   : > { %9719 = vrot.lane.b32.xlu0 %v9568_v48, %s16124_s21  ;;  %9714 = vrot.lane.b32.xlu1 %v9628_v19, %s16124_s21 }
 0xa65   : > { %5797 = vperm.xlu1 %9723, %v15145_v53   ;;  %5801 = vperm.xlu0 %9724, %v15151_v14  }
 0xa69   : > { %5789 = vperm.xlu1 %9723, %v15157_v50  }
 0xa6d   : > { %5793 = vperm.xlu1 %9723, %v15163_v22  }
 0xa97   : > { %v9570_v58 = vpop.permute.xlu0 %9569  ;;  %v9565_v9 = vpop.permute.xlu1 %9564 }
 0xa98   : > { %v9572_v45 = vunpack.i.h.bf16 %v9570_v58  ;;  %v9571_v57 = vunpack.i.l.bf16 %v9570_v58  ;;  %v9567_v55 = vunpack.i.h.bf16 %v9565_v9  ;;  %v9566_v29 = vunpack.i.l.bf16 %v9565_v9 }
 0xa9a   : > { %v5738_v42 = vsel %vm2895_vm8, %v9567_v55, %v9572_v45  ;;  %v5737_v16 = vsel %vm2895_vm8, %v9566_v29, %v9571_v57 }
 0xa9b   : > { %v9580_v4 = vpop.permute.xlu0 %9579  ;;  %v9575_v10 = vpop.permute.xlu1 %9574 }
 0xa9c   : > { %v9577_v32 = vunpack.i.h.bf16 %v9575_v10  ;;  %v9576_v6 = vunpack.i.l.bf16 %v9575_v10  ;;  %v9582_v17 = vunpack.i.h.bf16 %v9580_v4  ;;  %v9581_v60 = vunpack.i.l.bf16 %v9580_v4 }
 0xa9e   : > { %v5741_v54 = vsel %vm1598_vm1, %v5737_v16, %v9576_v6  ;;  %v5742_v13 = vsel %vm1598_vm1, %v5738_v42, %v9577_v32 }
 0xa9f   : > { %v9590_v49 = vpop.permute.xlu0 %9589  ;;  %v9585_v37 = vpop.permute.xlu1 %9584  ;;  %v5745_v1 = vsel %vm4145_vm15, %v5741_v54, %v9581_v60  ;;  %v5746_v52 = vsel %vm4145_vm15, %v5742_v13, %v9582_v17 }
 0xaa0   : > { %v9592_v39 = vunpack.i.h.bf16 %v9590_v49  ;;  %v9591_v15 = vunpack.i.l.bf16 %v9590_v49  ;;  %v9587_v51 = vunpack.i.h.bf16 %v9585_v37  ;;  %v9586_v26 = vunpack.i.l.bf16 %v9585_v37 }
 0xaa1   : > { %v5784_v4 = vpack.c.bf16 %v5746_v52, %v5745_v1 }
 0xaa2   : > { %v5678_v10 = vsel %vm2895_vm8, %v9587_v51, %v9592_v39  ;;  %v5677_v49 = vsel %vm2895_vm8, %v9586_v26, %v9591_v15 }
 0xaa3   : > { %v15166_v56 = vpop.permute.xlu0 %9599  ;;  %v15168_v24 = vpop.permute.xlu1 %9594 }
 0xaa4   : > { %v9597_v20 = vunpack.i.h.bf16 %v15168_v24  ;;  %v9596_v12 = vunpack.i.l.bf16 %v15168_v24  ;;  %v9602_v37 = vunpack.i.h.bf16 %v15166_v56  ;;  %v9601_v45 = vunpack.i.l.bf16 %v15166_v56 }
 0xaa7   : > { %v15170_v40 = vpop.permute.xlu0 %9609  ;;  %v15172_v61 = vpop.permute.xlu1 %9604 }
 0xaa8   : > { %v9612_v17 = vunpack.i.h.bf16 %v15170_v40  ;;  %v9611_v56 = vunpack.i.l.bf16 %v15170_v40 }
 0xaab   : > { %v15174_v5 = vpop.permute.xlu0 %9619  ;;  %v15176_v31 = vpop.permute.xlu1 %9614 }
 0xaac   : > { %v9621_v39 = vunpack.i.l.bf16 %v15174_v5 }
 0xaaf   : > { %v9630_v63 = vpop.permute.xlu0 %9629  ;;  %v9625_v23 = vpop.permute.xlu1 %9624 }
 0xab0   : > { %v9632_v0 = vunpack.i.h.bf16 %v9630_v63  ;;  %v9631_v28 = vunpack.i.l.bf16 %v9630_v63  ;;  %v9627_v47 = vunpack.i.h.bf16 %v9625_v23  ;;  %v9626_v33 = vunpack.i.l.bf16 %v9625_v23 }
 0xab1   : > { %v5681_v63 = vsel %vm1598_vm1, %v5677_v49, %v9596_v12  ;;  %v5682_v23 = vsel %vm1598_vm1, %v5678_v10, %v9597_v20 }
 0xab2   : > { %v5740_v36 = vsel %vm2895_vm8, %v9627_v47, %v9632_v0  ;;  %v5739_v44 = vsel %vm2895_vm8, %v9626_v33, %v9631_v28  ;;  %v9607_v28 = vunpack.i.h.bf16 %v15172_v61  ;;  %v9606_v47 = vunpack.i.l.bf16 %v15172_v61 }
 0xab3   : > { %v9640_v21 = vpop.permute.xlu0 %9639  ;;  %v9635_v43 = vpop.permute.xlu1 %9634  ;;  %v5685_v40 = vsel %vm4145_vm15, %v5681_v63, %v9601_v45 }
 0xab4   : > { %v9642_v30 = vunpack.i.h.bf16 %v9640_v21  ;;  %v9641_v41 = vunpack.i.l.bf16 %v9640_v21  ;;  %v9637_v46 = vunpack.i.h.bf16 %v9635_v43  ;;  %v9636_v7 = vunpack.i.l.bf16 %v9635_v43 }
 0xab5   : > { %v9616_v43 = vunpack.i.l.bf16 %v15176_v31  ;;  %v5618_v1 = vsel %vm2895_vm8, %v9607_v28, %v9612_v17  ;;  %v5617_v52 = vsel %vm2895_vm8, %v9606_v47, %v9611_v56 }
 0xab6   : > { %v5743_v62 = vsel %vm1598_vm1, %v5739_v44, %v9636_v7  ;;  %v5744_v18 = vsel %vm1598_vm1, %v5740_v36, %v9637_v46  ;;  %v9617_v44 = vunpack.i.h.bf16 %v15176_v31 }
 0xab7   : > { %v9650_v34 = vpop.permute.xlu0 %9649  ;;  %v9645_v35 = vpop.permute.xlu1 %9644  ;;  %v5747_v48 = vsel %vm4145_vm15, %v5743_v62, %v9641_v41  ;;  %v5748_v11 = vsel %vm4145_vm15, %v5744_v18, %v9642_v30  ;;  %v5686_v41 = vsel %vm4145_vm15, %v5682_v23, %v9602_v37  ;;  %v5621_v31 = vsel %vm1598_vm1, %v5617_v52, %v9616_v43 }
 0xab8   : > { %v9652_v19 = vunpack.i.h.bf16 %v9650_v34  ;;  %v9651_v3 = vunpack.i.l.bf16 %v9650_v34  ;;  %v9647_v27 = vunpack.i.h.bf16 %v9645_v35  ;;  %v9646_v58 = vunpack.i.l.bf16 %v9645_v35 }
 0xab9   : > { %v5785_v9 = vpack.c.bf16 %v5748_v11, %v5747_v48  ;;  %v5782_v18 = vpack.c.bf16 %v5686_v41, %v5685_v40  ;;  %v9622_v48 = vunpack.i.h.bf16 %v15174_v5  ;;  %v5622_v12 = vsel %vm1598_vm1, %v5618_v1, %v9617_v44 }
 0xaba   : > { %v5680_v42 = vsel %vm2895_vm8, %v9647_v27, %v9652_v19  ;;  %v5679_v16 = vsel %vm2895_vm8, %v9646_v58, %v9651_v3  ;;  %v5625_v49 = vsel %vm4145_vm15, %v5621_v31, %v9621_v39 }
 0xabb   : > { %5829 = vmatpush1.bf16.msra.mxu1 %v5785_v9  ;;  %v9660_v57 = vpop.permute.xlu0 %9659  ;;  %v9655_v55 = vpop.permute.xlu1 %9654 }
 0xabc   : > { %v9662_v29 = vunpack.i.h.bf16 %v9660_v57  ;;  %v9661_v32 = vunpack.i.l.bf16 %v9660_v57  ;;  %v9657_v24 = vunpack.i.h.bf16 %v9655_v55  ;;  %v9656_v6 = vunpack.i.l.bf16 %v9655_v55  ;;  %5830 = vmatprep.subr.bf16.mxu1 %v16803_v59 }
 0xabd   : > { %v5626_v55 = vsel %vm4145_vm15, %v5622_v12, %v9622_v48 }
 0xabe   : > { %v5683_v60 = vsel %vm1598_vm1, %v5679_v16, %v9656_v6  ;;  %v5684_v0 = vsel %vm1598_vm1, %v5680_v42, %v9657_v24  ;;  %v5780_v42 = vpack.c.bf16 %v5626_v55, %v5625_v49 }
 0xabf   : > { %5831 = vmatpush1.bf16.msra.mxu1 %v5784_v4  ;;  %v9670_v33 = vpop.permute.xlu0 %9669  ;;  %v9665_v54 = vpop.permute.xlu1 %9664  ;;  %v5687_v13 = vsel %vm4145_vm15, %v5683_v60, %v9661_v32  ;;  %v5688_v21 = vsel %vm4145_vm15, %v5684_v0, %v9662_v29 }
 0xac0   : > { %v9672_v30 = vunpack.i.h.bf16 %v9670_v33  ;;  %5832 = vmatprep.subr.bf16.mxu1 %v16803_v59  ;;  %v9671_v46 = vunpack.i.l.bf16 %v9670_v33  ;;  %v9667_v7 = vunpack.i.h.bf16 %v9665_v54  ;;  %v9666_v36 = vunpack.i.l.bf16 %v9665_v54 }
 0xac1   : > { %v5783_v61 = vpack.c.bf16 %v5688_v21, %v5687_v13 }
 0xac2   : > { %v5620_v11 = vsel %vm2895_vm8, %v9667_v7, %v9672_v30  ;;  %v5619_v20 = vsel %vm2895_vm8, %v9666_v36, %v9671_v46 }
 0xac3   : > { %5833 = vmatpush1.bf16.msra.mxu1 %v5783_v61  ;;  %v9680_v15 = vpop.permute.xlu0 %9679  ;;  %v9675_v62 = vpop.permute.xlu1 %9674 }
 0xac4   : > { %v9682_v51 = vunpack.i.h.bf16 %v9680_v15  ;;  %v9681_v26 = vunpack.i.l.bf16 %v9680_v15  ;;  %v9677_v34 = vunpack.i.h.bf16 %v9675_v62  ;;  %v9676_v35 = vunpack.i.l.bf16 %v9675_v62  ;;  %5834 = vmatprep.subr.bf16.mxu1 %v16803_v59 }
 0xac6   : > { %v5623_v19 = vsel %vm1598_vm1, %v5619_v20, %v9676_v35  ;;  %v5624_v3 = vsel %vm1598_vm1, %v5620_v11, %v9677_v34 }
 0xac7   : > { %5835 = vmatpush1.bf16.msra.mxu1 %v5782_v18  ;;  %v9690_v27 = vpop.permute.xlu0 %9689  ;;  %v9685_v58 = vpop.permute.xlu1 %9684  ;;  %v5627_v9 = vsel %vm4145_vm15, %v5623_v19, %v9681_v26  ;;  %v5628_v4 = vsel %vm4145_vm15, %v5624_v3, %v9682_v51  ;;  %v10023_v3 = vld [vmem:[%s16375_s18 + $0x200] ss:$16 sps:$4 sm:$0xff]  }
 0xac8   : > { %v9687_v5 = vunpack.i.h.bf16 %v9685_v58  ;;  %v9686_v10 = vunpack.i.l.bf16 %v9685_v58  ;;  %5836 = vmatprep.subr.bf16.mxu1 %v16803_v59  ;;  %v9692_v37 = vunpack.i.h.bf16 %v9690_v27  ;;  %v9691_v45 = vunpack.i.l.bf16 %v9690_v27  ;;  %v10024_v27 = vld [vmem:[%s16375_s18 + $0x224] ss:$16 sps:$4 sm:$0xff]   ;;  %v10026_v58 = vld [vmem:[%s16375_s18 + $0x220] ss:$16 sps:$4 sm:$0xff]  }
 0xac9   : > { %v5781_v57 = vpack.c.bf16 %v5628_v4, %v5627_v9 }
 0xaca   : > { %v5560_v29 = vsel %vm2895_vm8, %v15110_v8, %v9687_v5  ;;  %v5559_v32 = vsel %vm2895_vm8, %v15112_v25, %v9686_v10  ;;  %v5763_v46 = vsel %vm2895_vm8, %v9686_v10, %v9691_v45  ;;  %v5764_v1 = vsel %vm2895_vm8, %v9687_v5, %v9692_v37 }
 0xacb   : > { %5837 = vmatpush1.bf16.msra.mxu1 %v5781_v57  ;;  %v9695_v24 = vpop.permute.xlu0 %9694  ;;  %v9700_v6 = vpop.permute.xlu1 %9699  ;;  %v5563_v56 = vsel %vm1598_vm1, %v5559_v32, %v9691_v45  ;;  %v5564_v60 = vsel %vm1598_vm1, %v5560_v29, %v9692_v37 }
 0xacc   : > { %v9702_v63 = vunpack.i.h.bf16 %v9700_v6  ;;  %v9701_v23 = vunpack.i.l.bf16 %v9700_v6  ;;  %5838 = vmatprep.subr.bf16.mxu1 %v16803_v59  ;;  %v9697_v16 = vunpack.i.h.bf16 %v9695_v24  ;;  %v9696_v17 = vunpack.i.l.bf16 %v9695_v24 }
 0xace   : > { %v5567_v0 = vsel %vm4145_vm15, %v5563_v56, %v9701_v23  ;;  %v5568_v8 = vsel %vm4145_vm15, %v5564_v60, %v9702_v63  ;;  %v5558_v43 = vsel %vm2895_vm8, %v15096_v2, %v9697_v16  ;;  %v5557_v30 = vsel %vm2895_vm8, %v15094_v38, %v9696_v17 }
 0xacf   : > { %v5779_v28 = vpack.c.bf16 %v5568_v8, %v5567_v0  ;;  %5839 = vmatpush1.bf16.msra.mxu1 %v5780_v42  ;;  %v9710_v25 = vpop.permute.xlu0 %9709  ;;  %v9705_v47 = vpop.permute.xlu1 %9704  ;;  %v5767_v2 = vsel %vm1598_vm1, %v5763_v46, %v9701_v23  ;;  %v5768_v38 = vsel %vm1598_vm1, %v5764_v1, %v9702_v63 }
 0xad0   : > { %v9712_v33 = vunpack.i.h.bf16 %v9710_v25  ;;  %v9711_v54 = vunpack.i.l.bf16 %v9710_v25  ;;  %v9707_v13 = vunpack.i.h.bf16 %v9705_v47  ;;  %v9706_v21 = vunpack.i.l.bf16 %v9705_v47  ;;  %5840 = vmatprep.subr.bf16.mxu1 %v16803_v59 }
 0xad2   : > { %v5562_v40 = vsel %vm1598_vm1, %v5558_v43, %v9707_v13  ;;  %v5561_v41 = vsel %vm1598_vm1, %v5557_v30, %v9706_v21  ;;  %v5762_v15 = vsel %vm2895_vm8, %v9697_v16, %v9707_v13  ;;  %v5761_v62 = vsel %vm2895_vm8, %v9696_v17, %v9706_v21 }
 0xad3   : > { %5841 = vmatpush1.bf16.msra.mxu1 %v5779_v28  ;;  %v9720_v7 = vpop.permute.xlu0 %9719  ;;  %v9715_v36 = vpop.permute.xlu1 %9714  ;;  %v5565_v61 = vsel %vm4145_vm15, %v5561_v41, %v9711_v54  ;;  %v5566_v44 = vsel %vm4145_vm15, %v5562_v40, %v9712_v33  ;;  %v5765_v31 = vsel %vm1598_vm1, %v5761_v62, %v9711_v54  ;;  %v5766_v11 = vsel %vm1598_vm1, %v5762_v15, %v9712_v33 }
 0xad4   : > { %v9717_v52 = vunpack.i.h.bf16 %v9715_v36  ;;  %v9716_v39 = vunpack.i.l.bf16 %v9715_v36  ;;  %5842 = vmatprep.subr.bf16.mxu1 %v16803_v59  ;;  %v5778_v18 = vpack.c.bf16 %v5566_v44, %v5565_v61  ;;  %v9722_v51 = vunpack.i.h.bf16 %v9720_v7  ;;  %v10027_v44 = vld [vmem:[%s16375_s18 + $0x280] ss:$16 sps:$4 sm:$0xff]  }
 0xad5   : > { %v9721_v26 = vunpack.i.l.bf16 %v9720_v7  ;;  %vm5949_vm8 = vcmask 228352  }
 0xad6   : > { %v5771_v34 = vsel %vm4145_vm15, %v5767_v2, %v9716_v39  ;;  %v5772_v35 = vsel %vm4145_vm15, %v5768_v38, %v9717_v52  ;;  %v5770_v12 = vsel %vm4145_vm15, %v5766_v11, %v9722_v51 }
 0xad7   : > { %v5787_v48 = vpack.c.bf16 %v5772_v35, %v5771_v34  ;;  %5843 = vmatpush1.bf16.msra.mxu1 %v5778_v18  ;;  %v5769_v20 = vsel %vm4145_vm15, %v5765_v31, %v9721_v26  ;;  %vm5954_vm15 = vcmask 343040  }
 0xad8   : > { %5856 = vmatprep.subr.bf16.mxu1 %v16803_v59  ;;  %v5786_v19 = vpack.c.bf16 %v5770_v12, %v5769_v20 }
 0xadb   : > { %5857 = vmatpush2.bf16.msra.mxu1 %v5787_v48 }
 0xadc   : > { %5858 = vmatprep.subr.bf16.mxu1 %v16803_v59 }
 0xadf   : > { %5859 = vmatpush2.bf16.msra.mxu1 %v5786_v19 }
 0xae0   : > { %v5798_v9 = vpop.permute.xlu1 %5797  ;;  %v5802_v63 = vpop.permute.xlu0 %5801 }
 0xae2   : > { %5861 = vmatmul.mubr.bf16.vlgmr.msra.gmra.mxu1 %v10023_v3 }
 0xae3   : > { %7051 = vmatprep.mubr.msk.bf16.mxu1 %vm1598_vm1, %v10024_v27  ;;  %vm16804_vm1 = vmmov %vm16708_vm2  ;;  %vm16805_vm2 = vcmask 113664  }
 0xae4   : > { %v5790_v59 = vpop.permute.xlu1 %5789  ;;  %7409 = vmatprep.mubr.msk.bf16.mxu0 %vm16804_vm1, %v10027_v44  ;;  %vm16806_vm9 = vmmov %vm16805_vm2 }
 0xae5   : > { %vm16807_vm6 = vmmov %vm16805_vm2 }
 0xae6   : > { %vm16808_vm0 = vmmov %vm16805_vm2 }
 0xae7   : > { %vm16809_vm12 = vmmov %vm16808_vm0 }
 0xae8   : > { %v5794_v37 = vpop.permute.xlu1 %5793  ;;  %vm16810_vm14 = vmmov %vm16808_vm0 }
 0xae9   : > { %vm16811_vm3 = vmmov %vm16808_vm0 }
 0xaea   : > { %5869 = vmatmul.mubr.bf16.gmra.mxu1 %v10026_v58  ;;  %vm16812_vm7 = vmmov %vm16808_vm0 }
 0xaeb   : > { %vm16813_vm5 = vmmov %vm16808_vm0 }
 0xaec   : > { %vm16814_vm10 = vmmov %vm16808_vm0 }
 0xaed   : > { %vm16815_vm11 = vmmov %vm16808_vm0 }
 0xaee   : > { %vm16816_vm4 = vmmov %vm16808_vm0 }
 0xba2   : > { %v5862_v4 = vpop.f32.mrf.mxu1 }
 0xba3   : > { %v5863_v5 = vadd.f32 %v5862_v4, %v5790_v59 }
 0xba4   : > { %v5864_v10 = vpop.f32.mrf.mxu1 }
 0xba5   : > { %v7052_v49 = vmul.f32 -1.442695, %v5863_v5 }
 0xba6   : > { %v5865_v45 = vpop.f32.mrf.mxu1 }
 0xba7   : > { %10187 = vpow2.f32 %v7052_v49  ;;  %v5866_v57 = vadd.f32 %v5865_v45, %v5794_v37 }
 0xba8   : > { %v5867_v55 = vpop.f32.mrf.mxu1 }
 0xba9   : > { %v7053_v29 = vmul.f32 -1.442695, %v5866_v57 }
 0xbaa   : > { %v5870_v32 = vpop.f32.mrf.mxu1 }
 0xbab   : > { %10189 = vpow2.f32 %v7053_v29  ;;  %v5871_v24 = vadd.f32 %v5870_v32, %v5798_v9 }
 0xbac   : > { %v5872_v6 = vpop.f32.mrf.mxu1 }
 0xbad   : > { %v7054_v23 = vmul.f32 -1.442695, %v5871_v24 }
 0xbae   : > { %v5873_v42 = vpop.f32.mrf.mxu1 }
 0xbaf   : > { %v5874_v16 = vadd.f32 %v5873_v42, %v5802_v63  ;;  %10191 = vpow2.f32 %v7054_v23 }
 0xbb0   : > { %v5875_v17 = vpop.f32.mrf.mxu1 }
 0xbb1   : > { %v7055_v56 = vmul.f32 -1.442695, %v5874_v16 }
 0xbb3   : > { %10193 = vpow2.f32 %v7055_v56 }
 0xbb4   : > { %v10188_v60 = vpop.eup %10187 }
 0xbb5   : > { %v5889_v0 = vadd.f32 1.0, %v10188_v60 }
 0xbb7   : > { %10195 = vrcp.f32 %v5889_v0 }
 0xbb8   : > { %v10190_v8 = vpop.eup %10189 }
 0xbb9   : > { %v5890_v28 = vadd.f32 1.0, %v10190_v8 }
 0xbbb   : > { %10197 = vrcp.f32 %v5890_v28 }
 0xbbc   : > { %v10192_v25 = vpop.eup %10191 }
 0xbbd   : > { %v5891_v33 = vadd.f32 1.0, %v10192_v25 }
 0xbc0   : > { %v10194_v47 = vpop.eup %10193 }
 0xbc1   : > { %v5892_v54 = vadd.f32 1.0, %v10194_v47 }
 0xbc3   : > { %10199 = vrcp.f32 %v5892_v54 }
 0xbc4   : > { %10201 = vrcp.f32 %v5891_v33  ;;  %v10196_v13 = vpop.eup %10195 }
 0xbc5   : > { %v15273_v43 = vmul.f32 %v10196_v13, %v5863_v5 }
 0xbc8   : > { %v10198_v21 = vpop.eup %10197 }
 0xbc9   : > { %v15275_v30 = vmul.f32 %v10198_v21, %v5866_v57 }
 0xbcb   : > { %v9730_v40 = vpack.i.bf16 %v15275_v30, %v15273_v43 }
 0xbcd   : > { %9731 = vrot.lane.b32.xlu1 %v9730_v40, %s16103_s13  ;;  %9726 = vrot.lane.b32.xlu0 %v9730_v40, %s16095_s27 }
 0xbd0   : > { %v10200_v41 = vpop.eup %10199 }
 0xbd1   : > { %9741 = vrot.lane.b32.xlu1 %v9730_v40, %s16112_s28  ;;  %9736 = vrot.lane.b32.xlu0 %v9730_v40, %s16120_s11  ;;  %v10202_v46 = vpop.eup %10201  ;;  %v15283_v7 = vmul.f32 %v10200_v41, %v5874_v16 }
 0xbd2   : > { %v15285_v36 = vmul.f32 %v10202_v46, %v5871_v24 }
 0xbd4   : > { %v9760_v61 = vpack.i.bf16 %v15283_v7, %v15285_v36 }
 0xbd5   : > { %9751 = vrot.lane.b32.xlu1 %v9730_v40, %s16282_s12  ;;  %9746 = vrot.lane.b32.xlu0 %v9730_v40, %s16085_s15 }
 0xbd9   : > { %9761 = vrot.lane.b32.xlu1 %v9760_v61, %s16103_s13  ;;  %9756 = vrot.lane.b32.xlu0 %v9760_v61, %s16095_s27 }
 0xbdd   : > { %9771 = vrot.lane.b32.xlu1 %v9760_v61, %s16112_s28  ;;  %9766 = vrot.lane.b32.xlu0 %v9760_v61, %s16120_s11 }
 0xbe1   : > { %9781 = vrot.lane.b32.xlu1 %v9760_v61, %s16282_s12  ;;  %9776 = vrot.lane.b32.xlu0 %v9760_v61, %s16085_s15 }
 0xbe5   : > { %9796 = vrot.lane.b32.xlu1 %v9760_v61, %s16121_s0  ;;  %9786 = vrot.lane.b32.xlu0 %v9760_v61, %s16131_s5 }
 0xbe9   : > { %9801 = vrot.lane.b32.xlu1 %v9730_v40, %s16121_s0  ;;  %9791 = vrot.lane.b32.xlu0 %v9730_v40, %s16131_s5 }
 0xc3f   : > { %v15305_v1 = vpop.permute.xlu1 %9731  ;;  %v15307_v2 = vpop.permute.xlu0 %9726 }
 0xc40   : > { %v9734_v62 = vunpack.i.h.bf16 %v15305_v1  ;;  %v9733_v18 = vunpack.i.l.bf16 %v15305_v1  ;;  %v9729_v51 = vunpack.i.h.bf16 %v15307_v2  ;;  %v9728_v26 = vunpack.i.l.bf16 %v15307_v2  ;;  %v10028_v1 = vld [vmem:[%s16375_s18 + $0x2a0] ss:$16 sps:$4 sm:$0xff]  }
 0xc42   : > { %v6032_v3 = vsel %vm16805_vm2, %v9729_v51, %v9734_v62  ;;  %v6031_v27 = vsel %vm16806_vm9, %v9728_v26, %v9733_v18  ;;  %vm16820_vm2 = vmmov %vm16804_vm1  ;;  %vm6308_vm9 = vcmask 39936  }
 0xc43   : > { %v9742_v52 = vpop.permute.xlu1 %9741  ;;  %v15309_v39 = vpop.permute.xlu0 %9736 }
 0xc44   : > { %v9739_v48 = vunpack.i.h.bf16 %v15309_v39  ;;  %v9738_v31 = vunpack.i.l.bf16 %v15309_v39  ;;  %v9744_v58 = vunpack.i.h.bf16 %v9742_v52  ;;  %v9743_v9 = vunpack.i.l.bf16 %v9742_v52  ;;  %v6124_v39 = vld [vmem:[%s16817_s6 + $0x28] sm:$0xff] }
 0xc46   : > { %v6035_v45 = vsel %vm5949_vm8, %v6031_v27, %v9738_v31  ;;  %v6036_v57 = vsel %vm5949_vm8, %v6032_v3, %v9739_v48 }
 0xc47   : > { %v15311_v38 = vpop.permute.xlu1 %9751  ;;  %v15313_v15 = vpop.permute.xlu0 %9746  ;;  %v6039_v17 = vsel %vm5954_vm15, %v6035_v45, %v9743_v9  ;;  %v6040_v56 = vsel %vm5954_vm15, %v6036_v57, %v9744_v58 }
 0xc48   : > { %v9754_v25 = vunpack.i.h.bf16 %v15311_v38  ;;  %v9753_v47 = vunpack.i.l.bf16 %v15311_v38  ;;  %v6052_v13 = vpack.c.bf16 %v6040_v56, %v6039_v17  ;;  %v9749_v61 = vunpack.i.h.bf16 %v15313_v15 }
 0xc49   : > { %v9748_v44 = vunpack.i.l.bf16 %v15313_v15 }
 0xc4b   : > { %v15319_v34 = vpop.permute.xlu1 %9761  ;;  %v9757_v35 = vpop.permute.xlu0 %9756 }
 0xc4c   : > { %v9764_v11 = vunpack.i.h.bf16 %v15319_v34  ;;  %v9763_v20 = vunpack.i.l.bf16 %v15319_v34  ;;  %v9759_v12 = vunpack.i.h.bf16 %v9757_v35  ;;  %v9758_v19 = vunpack.i.l.bf16 %v9757_v35 }
 0xc4e   : > { %v6034_v55 = vsel %vm16807_vm6, %v9759_v12, %v9764_v11  ;;  %v6033_v29 = vsel %vm16808_vm0, %v9758_v19, %v9763_v20  ;;  %v5948_v27 = vsel %vm16811_vm3, %v15283_v7, %v9759_v12  ;;  %v5947_v58 = vsel %vm16812_vm7, %v15285_v36, %v9758_v19 }
 0xc4f   : > { %v9772_v59 = vpop.permute.xlu1 %9771  ;;  %v15335_v4 = vpop.permute.xlu0 %9766  ;;  %v5946_v7 = vsel %vm16815_vm11, %v15275_v30, %v9729_v51  ;;  %v5945_v30 = vsel %vm16816_vm4, %v15273_v43, %v9728_v26  ;;  %vm6313_vm6 = vcmask 80896   ;;  %vm6318_vm0 = vcmask 121856  }
 0xc50   : > { %v9774_v5 = vunpack.i.h.bf16 %v9772_v59  ;;  %v9773_v10 = vunpack.i.l.bf16 %v9772_v59  ;;  %v9769_v49 = vunpack.i.h.bf16 %v15335_v4  ;;  %v9768_v37 = vunpack.i.l.bf16 %v15335_v4  ;;  %v6119_v4 = vld [vmem:[%s16817_s6] sm:$0xff] }
 0xc51   : > { %v5950_v34 = vsel %vm5949_vm8, %v5945_v30, %v9733_v18  ;;  %v5951_v2 = vsel %vm5949_vm8, %v5946_v7, %v9734_v62  ;;  %v6125_v18 = vld [vmem:[%s16817_s6 + $0x30] sm:$0xff]  ;;  %v6123_v62 = vld [vmem:[%s16817_s6 + $0x20] sm:$0xff]  ;;  %vm6675_vm7 = vcmask 15360   ;;  %vm6824_vm11 = vcmask 31744  }
 0xc52   : > { %v6037_v32 = vsel %vm5949_vm8, %v6033_v29, %v9768_v37  ;;  %v6038_v24 = vsel %vm5949_vm8, %v6034_v55, %v9769_v49  ;;  %v6008_v29 = vsel %vm16813_vm5, %v9749_v61, %v9754_v25  ;;  %v5955_v43 = vsel %vm5954_vm15, %v5950_v34, %v9738_v31  ;;  %v6121_v31 = vld [vmem:[%s16817_s6 + $0x10] sm:$0xff] }
 0xc53   : > { %v9782_v6 = vpop.permute.xlu1 %9781  ;;  %v9777_v63 = vpop.permute.xlu0 %9776  ;;  %v6041_v23 = vsel %vm5954_vm15, %v6037_v32, %v9773_v10  ;;  %v6042_v42 = vsel %vm5954_vm15, %v6038_v24, %v9774_v5  ;;  %v6007_v32 = vsel %vm16814_vm10, %v9748_v44, %v9753_v47  ;;  %v5956_v26 = vsel %vm5954_vm15, %v5951_v2, %v9739_v48  ;;  %v6122_v48 = vld [vmem:[%s16817_s6 + $0x18] sm:$0xff]  ;;  %vm16826_vm10 = vmmov %vm16804_vm1 }
 0xc54   : > { %v9784_v16 = vunpack.i.h.bf16 %v9782_v6  ;;  %v9783_v60 = vunpack.i.l.bf16 %v9782_v6  ;;  %v9779_v0 = vunpack.i.h.bf16 %v9777_v63  ;;  %v9778_v8 = vunpack.i.l.bf16 %v9777_v63 }
 0xc55   : > { %v6053_v28 = vpack.c.bf16 %v6042_v42, %v6041_v23  ;;  %v5952_v63 = vsel %vm5949_vm8, %v5947_v58, %v9763_v20  ;;  %v5953_v23 = vsel %vm5949_vm8, %v5948_v27, %v9764_v11  ;;  %v6048_v11 = vpack.c.bf16 %v5956_v26, %v5955_v43  ;;  %v6120_v20 = vld [vmem:[%s16817_s6 + $0x8] sm:$0xff] }
 0xc56   : > { %v6010_v52 = vsel %vm16809_vm12, %v9779_v0, %v9784_v16  ;;  %v6009_v35 = vsel %vm16810_vm14, %v9778_v8, %v9783_v60  ;;  %v5957_v42 = vsel %vm5954_vm15, %v5952_v63, %v9768_v37  ;;  %v5958_v16 = vsel %vm5954_vm15, %v5953_v23, %v9769_v49  ;;  %vm16821_vm12 = vmmov %vm16804_vm1 }
 0xc57   : > { %7397 = vmatprep.subr.bf16.mxu0 %v6053_v28  ;;  %v9797_v33 = vpop.permute.xlu1 %9796  ;;  %v9787_v54 = vpop.permute.xlu0 %9786  ;;  %v6049_v17 = vpack.c.bf16 %v5958_v16, %v5957_v42  ;;  %v16818_v49 = vmov 0.0   ;;  %v10350_v37 = vmov 5   ;;  %vm16823_vm14 = vcmask 1043456  }
 0xc58   : > { %v9799_v21 = vunpack.i.h.bf16 %v9797_v33  ;;  %v9798_v40 = vunpack.i.l.bf16 %v9797_v33  ;;  %v9789_v41 = vunpack.i.h.bf16 %v9787_v54  ;;  %v9788_v46 = vunpack.i.l.bf16 %v9787_v54  ;;  %7398 = vmatpush3.bf16.msra.mxu0 %v6053_v28  ;;  %9805 = vset.pattern.permute.xlu0 %v10350_v37  ;;  %vm16824_vm3 = vmmov %vm16823_vm14 }
 0xc59   : > { %7399 = vmatprep.subr.bf16.mxu0 %v6052_v13  ;;  %9806 = vset.pattern.permute.xlu1 %v10350_v37  ;;  %vm6680_vm5 = vcmask 23552  }
 0xc5a   : > { %v6013_v38 = vsel %vm5949_vm8, %v6009_v35, %v9788_v46  ;;  %v6014_v3 = vsel %vm5949_vm8, %v6010_v52, %v9789_v41  ;;  %6135 = vperm.xlu0 %9805, %v15145_v53   ;;  %6139 = vperm.xlu1 %9806, %v15151_v14  }
 0xc5b   : > { %v9802_v9 = vpop.permute.xlu1 %9801  ;;  %v9792_v59 = vpop.permute.xlu0 %9791  ;;  %v6017_v5 = vsel %vm5954_vm15, %v6013_v38, %v9798_v40  ;;  %v6018_v15 = vsel %vm5954_vm15, %v6014_v3, %v9799_v21 }
 0xc5c   : > { %v9804_v10 = vunpack.i.h.bf16 %v9802_v9  ;;  %v9803_v45 = vunpack.i.l.bf16 %v9802_v9  ;;  %v9794_v57 = vunpack.i.h.bf16 %v9792_v59  ;;  %v9793_v55 = vunpack.i.l.bf16 %v9792_v59  ;;  %7400 = vmatpush3.bf16.msra.mxu0 %v6052_v13 }
 0xc5d   : > { %v6051_v24 = vpack.c.bf16 %v6018_v15, %v6017_v5 }
 0xc5e   : > { %v6011_v36 = vsel %vm5949_vm8, %v6007_v32, %v9793_v55  ;;  %v6012_v12 = vsel %vm5949_vm8, %v6008_v29, %v9794_v57  ;;  %6131 = vperm.xlu0 %9805, %v15163_v22   ;;  %6127 = vperm.xlu1 %9806, %v15157_v50   ;;  %vm6142_vm8 = vcmask 457728  }
 0xc5f   : > { %7401 = vmatprep.subr.bf16.mxu0 %v6051_v24  ;;  %v6015_v19 = vsel %vm5954_vm15, %v6011_v36, %v9803_v45  ;;  %v6016_v6 = vsel %vm5954_vm15, %v6012_v12, %v9804_v10  ;;  %vm16819_vm15 = vmmov 0   ;;  %v10029_v36 = vld [vmem:[%s16375_s18 + $0x300] ss:$16 sps:$4 sm:$0xff]  }
 0xc60   : > { %7402 = vmatpush3.bf16.msra.mxu0 %v6051_v24  ;;  %v6050_v51 = vpack.c.bf16 %v6016_v6, %v6015_v19  ;;  %7445 = vmatprep.mubr.msk.bf16.mxu1 %vm16820_vm2, %v10029_v36 }
 0xc62   : > { %7403 = vmatprep.subr.bf16.mxu0 %v6050_v51 }
 0xc64   : > { %7404 = vmatpush3.bf16.msra.mxu0 %v6050_v51 }
 0xc65   : > { %7405 = vmatprep.subr.bf16.mxu0 %v6049_v17 }
 0xc68   : > { %7406 = vmatpush3.bf16.msra.mxu0 %v6049_v17 }
 0xc69   : > { %7407 = vmatprep.subr.bf16.mxu0 %v6048_v11 }
 0xc6c   : > { %7408 = vmatpush3.bf16.msra.mxu0 %v6048_v11 }
 0xc6d   : > { %7413 = vmatprep.subr.mxu0 %v6125_v18 }
 0xc6f   : > { %7410 = vmatmul.mubr.msk.bf16.vlgmr.msra.gmra.mxu0 %vm16804_vm1, %v10028_v1 }
 0xc70   : > { %7414 = vmatpush3.msra.mxu0 %v6125_v18 }
 0xc71   : > { %7415 = vmatprep.subr.mxu0 %v6124_v39 }
 0xc72   : > { %7416 = vmatpush3.msra.mxu0 %v6124_v39 }
 0xc73   : > { %7417 = vmatprep.subr.mxu0 %v6123_v62 }
 0xc74   : > { %7418 = vmatpush3.msra.mxu0 %v6123_v62 }
 0xc75   : > { %7419 = vmatprep.subr.mxu0 %v6122_v48 }
 0xc76   : > { %7420 = vmatpush3.msra.mxu0 %v6122_v48 }
 0xc77   : > { %7421 = vmatprep.subr.mxu0 %v6121_v31 }
 0xc78   : > { %7422 = vmatpush3.msra.mxu0 %v6121_v31 }
 0xc79   : > { %7423 = vmatprep.subr.mxu0 %v6120_v20 }
 0xc7a   : > { %7424 = vmatpush3.msra.mxu0 %v6120_v20 }
 0xc7b   : > { %7425 = vmatprep.subr.mxu0 %v6119_v4 }
 0xc7c   : > { %7426 = vmatpush3.msra.mxu0 %v6119_v4 }
 0xc7d   : > { %7461 = vmatprep.subr.bf16.mxu0 %v16818_v49 }
 0xcd5   : > { %v6136_v28 = vpop.permute.xlu0 %6135  ;;  %v6140_v53 = vpop.permute.xlu1 %6139 }
 0xcd9   : > { %v6132_v25 = vpop.permute.xlu0 %6131  ;;  %v6128_v22 = vpop.permute.xlu1 %6127 }
 0xd2f   : > { %v7411_v56 = vpop.f32.mrf.mxu0 }
 0xd31   : > { %v6104_v60 = vpop.f32.mrf.mxu0 }
 0xd32   : > { %7427 = vmatprep.mubr.msk.f32.mxu0 %vm6142_vm8, %v6104_v60 }
 0xd33   : > { %v7412_v0 = vpop.f32.mrf.mxu0 }
 0xd35   : > { %v6107_v8 = vpop.f32.mrf.mxu0 }
 0xd36   : > { %7428 = vmatmul.mubr.msk.f32.vlgmr.msra.gmra.mxu0 %vm6142_vm8, %v6107_v8 }
 0xd37   : > { %7430 = vmatprep.mubr.msk.f32.mxu0 %vm6142_vm8, %v7411_v56 }
 0xd3a   : > { %7431 = vmatmul.mubr.msk.f32.gmra.mxu0 %vm6142_vm8, %v7412_v0 }
 0xd3b   : > { %7473 = vmatprep.mubr.msk.bf16.mxu0 %vm16819_vm15, %v16818_v49 }
 0xdf6   : > { %v7429_v14 = vpop.f32.mrf.mxu0 }
 0xdf7   : > { %v6227_v47 = vadd.f32 %v7429_v14, %v6132_v25 }
 0xdf8   : > { %v6221_v33 = vpop.f32.mrf.mxu0 }
 0xdf9   : > { %v7069_v50 = vmul.f32 -1.442695, %v6227_v47  ;;  %v6222_v54 = vadd.f32 %v6221_v33, %v6128_v22 }
 0xdfa   : > { %v7432_v13 = vpop.f32.mrf.mxu0 }
 0xdfb   : > { %10203 = vpow2.f32 %v7069_v50  ;;  %v7068_v21 = vmul.f32 -1.442695, %v6222_v54  ;;  %v6237_v40 = vadd.f32 %v7432_v13, %v6140_v53 }
 0xdfc   : > { %v6231_v41 = vpop.f32.mrf.mxu0 }
 0xdfd   : > { %10205 = vpow2.f32 %v7068_v21  ;;  %v6232_v46 = vadd.f32 %v6231_v41, %v6136_v28  ;;  %v7071_v61 = vmul.f32 -1.442695, %v6237_v40 }
 0xdff   : > { %v7070_v44 = vmul.f32 -1.442695, %v6232_v46 }
 0xe01   : > { %10207 = vpow2.f32 %v7070_v44 }
 0xe02   : > { %10209 = vpow2.f32 %v7071_v61 }
 0xe08   : > { %v10204_v52 = vpop.eup %10203 }
 0xe09   : > { %v6253_v35 = vadd.f32 1.0, %v10204_v52 }
 0xe0a   : > { %v10206_v38 = vpop.eup %10205 }
 0xe0b   : > { %10211 = vrcp.f32 %v6253_v35  ;;  %v6252_v3 = vadd.f32 1.0, %v10206_v38 }
 0xe0d   : > { %10213 = vrcp.f32 %v6252_v3 }
 0xe0e   : > { %v10208_v27 = vpop.eup %10207 }
 0xe0f   : > { %v10210_v58 = vpop.eup %10209  ;;  %v6254_v9 = vadd.f32 1.0, %v10208_v27 }
 0xe10   : > { %v6255_v59 = vadd.f32 1.0, %v10210_v58 }
 0xe11   : > { %10215 = vrcp.f32 %v6254_v9 }
 0xe12   : > { %10217 = vrcp.f32 %v6255_v59 }
 0xe18   : > { %v10212_v5 = vpop.eup %10211 }
 0xe19   : > { %v15441_v10 = vmul.f32 %v10212_v5, %v6227_v47 }
 0xe1a   : > { %v10214_v15 = vpop.eup %10213 }
 0xe1b   : > { %v15443_v45 = vmul.f32 %v10214_v15, %v6222_v54 }
 0xe1d   : > { %v9812_v57 = vpack.i.bf16 %v15441_v10, %v15443_v45 }
 0xe1e   : > { %v10216_v55 = vpop.eup %10215 }
 0xe1f   : > { %9813 = vrot.lane.b32.xlu0 %v9812_v57, %s16103_s13  ;;  %9808 = vrot.lane.b32.xlu1 %v9812_v57, %s16095_s27  ;;  %v10218_v29 = vpop.eup %10217  ;;  %v15451_v32 = vmul.f32 %v10216_v55, %v6232_v46 }
 0xe20   : > { %v15453_v24 = vmul.f32 %v10218_v29, %v6237_v40 }
 0xe22   : > { %v9842_v7 = vpack.i.bf16 %v15453_v24, %v15451_v32 }
 0xe23   : > { %9823 = vrot.lane.b32.xlu0 %v9812_v57, %s16112_s28  ;;  %9818 = vrot.lane.b32.xlu1 %v9812_v57, %s16120_s11 }
 0xe27   : > { %9833 = vrot.lane.b32.xlu0 %v9812_v57, %s16282_s12  ;;  %9828 = vrot.lane.b32.xlu1 %v9812_v57, %s16085_s15 }
 0xe2b   : > { %9843 = vrot.lane.b32.xlu0 %v9842_v7, %s16103_s13  ;;  %9838 = vrot.lane.b32.xlu1 %v9842_v7, %s16095_s27 }
 0xe2f   : > { %9853 = vrot.lane.b32.xlu0 %v9842_v7, %s16112_s28  ;;  %9848 = vrot.lane.b32.xlu1 %v9842_v7, %s16120_s11 }
 0xe33   : > { %9863 = vrot.lane.b32.xlu0 %v9842_v7, %s16282_s12  ;;  %9858 = vrot.lane.b32.xlu1 %v9842_v7, %s16085_s15 }
 0xe37   : > { %9878 = vrot.lane.b32.xlu0 %v9842_v7, %s16121_s0  ;;  %9868 = vrot.lane.b32.xlu1 %v9842_v7, %s16131_s5 }
 0xe3b   : > { %9883 = vrot.lane.b32.xlu0 %v9812_v57, %s16121_s0  ;;  %9873 = vrot.lane.b32.xlu1 %v9812_v57, %s16131_s5 }
 0xe91   : > { %v15473_v12 = vpop.permute.xlu0 %9813  ;;  %v15475_v19 = vpop.permute.xlu1 %9808 }
 0xe92   : > { %v9816_v51 = vunpack.i.h.bf16 %v15473_v12  ;;  %v9815_v42 = vunpack.i.l.bf16 %v15473_v12  ;;  %v9811_v16 = vunpack.i.h.bf16 %v15475_v19  ;;  %v9810_v17 = vunpack.i.l.bf16 %v15475_v19  ;;  %v6485_v12 = vld [vmem:[%s16822_s14 + $0x10] sm:$0xf] }
 0xe94   : > { %v6396_v62 = vsel %vm6308_vm9, %v9811_v16, %v9816_v51  ;;  %v6395_v48 = vsel %vm6308_vm9, %v9810_v17, %v9815_v42 }
 0xe95   : > { %v9824_v6 = vpop.permute.xlu0 %9823  ;;  %v15477_v63 = vpop.permute.xlu1 %9818 }
 0xe96   : > { %v9821_v43 = vunpack.i.h.bf16 %v15477_v63  ;;  %v9820_v26 = vunpack.i.l.bf16 %v15477_v63  ;;  %v9826_v31 = vunpack.i.h.bf16 %v9824_v6  ;;  %v9825_v20 = vunpack.i.l.bf16 %v9824_v6  ;;  %v6484_v63 = vld [vmem:[%s16822_s14 + $0x8] sm:$0xff] }
 0xe98   : > { %v6399_v28 = vsel %vm6313_vm6, %v6395_v48, %v9820_v26  ;;  %v6400_v53 = vsel %vm6313_vm6, %v6396_v62, %v9821_v43 }
 0xe99   : > { %v15479_v23 = vpop.permute.xlu0 %9833  ;;  %v15481_v30 = vpop.permute.xlu1 %9828  ;;  %v6403_v40 = vsel %vm6318_vm0, %v6399_v28, %v9825_v20  ;;  %v6404_v41 = vsel %vm6318_vm0, %v6400_v53, %v9826_v31 }
 0xe9a   : > { %v9836_v35 = vunpack.i.h.bf16 %v15479_v23  ;;  %v9835_v38 = vunpack.i.l.bf16 %v15479_v23  ;;  %v6416_v58 = vpack.c.bf16 %v6404_v41, %v6403_v40  ;;  %v9831_v57 = vunpack.i.h.bf16 %v15481_v30 }
 0xe9b   : > { %v9830_v55 = vunpack.i.l.bf16 %v15481_v30 }
 0xe9c   : > { %v6372_v28 = vsel %vm6308_vm9, %v9831_v57, %v9836_v35 }
 0xe9d   : > { %v15487_v34 = vpop.permute.xlu0 %9843  ;;  %v9839_v2 = vpop.permute.xlu1 %9838  ;;  %v6371_v53 = vsel %vm6308_vm9, %v9830_v55, %v9835_v38 }
 0xe9e   : > { %v9846_v11 = vunpack.i.h.bf16 %v15487_v34  ;;  %v9845_v18 = vunpack.i.l.bf16 %v15487_v34  ;;  %v9841_v1 = vunpack.i.h.bf16 %v9839_v2  ;;  %v9840_v39 = vunpack.i.l.bf16 %v9839_v2 }
 0xea0   : > { %v6398_v25 = vsel %vm6308_vm9, %v9841_v1, %v9846_v11  ;;  %v6397_v14 = vsel %vm6308_vm9, %v9840_v39, %v9845_v18  ;;  %v6312_v23 = vsel %vm6308_vm9, %v15453_v24, %v9841_v1  ;;  %v6311_v2 = vsel %vm6308_vm9, %v15451_v32, %v9840_v39 }
 0xea1   : > { %v9854_v4 = vpop.permute.xlu0 %9853  ;;  %v15503_v37 = vpop.permute.xlu1 %9848  ;;  %v6310_v32 = vsel %vm6308_vm9, %v15441_v10, %v9811_v16  ;;  %v6309_v10 = vsel %vm6308_vm9, %v15443_v45, %v9810_v17 }
 0xea2   : > { %v9856_v56 = vunpack.i.h.bf16 %v9854_v4  ;;  %v9855_v60 = vunpack.i.l.bf16 %v9854_v4  ;;  %v9851_v0 = vunpack.i.h.bf16 %v15503_v37  ;;  %v9850_v8 = vunpack.i.l.bf16 %v15503_v37  ;;  %v15601_v37 = vld [vmem:[%s16791_s4] sm:$0xff] }
 0xea3   : > { %v6314_v34 = vsel %vm6313_vm6, %v6309_v10, %v9815_v42  ;;  %v6315_v19 = vsel %vm6313_vm6, %v6310_v32, %v9816_v51  ;;  %v10030_v42 = vld [vmem:[%s16375_s18 + $0x320] ss:$16 sps:$4 sm:$0xff]  }
 0xea4   : > { %v6401_v47 = vsel %vm6313_vm6, %v6397_v14, %v9850_v8  ;;  %v6402_v22 = vsel %vm6313_vm6, %v6398_v25, %v9851_v0  ;;  %v6319_v45 = vsel %vm6318_vm0, %v6314_v34, %v9820_v26  ;;  %v6320_v17 = vsel %vm6318_vm0, %v6315_v19, %v9821_v43  ;;  %v6483_v51 = vld [vmem:[%s16822_s14] sm:$0xff]  ;;  %v10258_v26 = vld [vmem:[%s16791_s4 + $0x10] sm:$0xff] }
 0xea5   : > { %v9864_v33 = vpop.permute.xlu0 %9863  ;;  %v9859_v50 = vpop.permute.xlu1 %9858  ;;  %v6405_v54 = vsel %vm6318_vm0, %v6401_v47, %v9855_v60  ;;  %v6406_v13 = vsel %vm6318_vm0, %v6402_v22, %v9856_v56  ;;  %v6316_v47 = vsel %vm6313_vm6, %v6311_v2, %v9845_v18  ;;  %v6317_v22 = vsel %vm6313_vm6, %v6312_v23, %v9846_v11  ;;  %v10259_v18 = vld [vmem:[%s16791_s4 + $0x18] sm:$0xff] }
 0xea6   : > { %v9866_v21 = vunpack.i.h.bf16 %v9864_v33  ;;  %v9865_v46 = vunpack.i.l.bf16 %v9864_v33  ;;  %v9861_v61 = vunpack.i.h.bf16 %v9859_v50  ;;  %v9860_v44 = vunpack.i.l.bf16 %v9859_v50 }
 0xea7   : > { %v6417_v52 = vpack.c.bf16 %v6406_v13, %v6405_v54  ;;  %v6321_v33 = vsel %vm6318_vm0, %v6316_v47, %v9850_v8  ;;  %v6322_v50 = vsel %vm6318_vm0, %v6317_v22, %v9851_v0  ;;  %v6412_v11 = vpack.c.bf16 %v6320_v17, %v6319_v45  ;;  %v10261_v0 = vld [vmem:[%s16791_s4 + $0x8] sm:$0xff] }
 0xea8   : > { %v6374_v29 = vsel %vm6308_vm9, %v9861_v61, %v9866_v21  ;;  %v6373_v7 = vsel %vm6308_vm9, %v9860_v44, %v9865_v46  ;;  %v6413_v54 = vpack.c.bf16 %v6322_v50, %v6321_v33  ;;  %v10351_v43 = vmov 6  }
 0xea9   : > { %7433 = vmatprep.subr.bf16.mxu1 %v6417_v52  ;;  %v9879_v3 = vpop.permute.xlu0 %9878  ;;  %v9869_v27 = vpop.permute.xlu1 %9868  ;;  %9887 = vset.pattern.permute.xlu1 %v10351_v43 }
 0xeaa   : > { %v9881_v9 = vunpack.i.h.bf16 %v9879_v3  ;;  %v9880_v59 = vunpack.i.l.bf16 %v9879_v3  ;;  %v9871_v5 = vunpack.i.h.bf16 %v9869_v27  ;;  %v9870_v15 = vunpack.i.l.bf16 %v9869_v27  ;;  %7434 = vmatpush3.bf16.msra.mxu1 %v6417_v52  ;;  %9888 = vset.pattern.permute.xlu0 %v10351_v43 }
 0xeab   : > { %7435 = vmatprep.subr.bf16.mxu1 %v6416_v58  ;;  %6495 = vperm.xlu1 %9887, %v10258_v26  }
 0xeac   : > { %v6377_v36 = vsel %vm6313_vm6, %v6373_v7, %v9870_v15  ;;  %v6378_v6 = vsel %vm6313_vm6, %v6374_v29, %v9871_v5  ;;  %6499 = vperm.xlu0 %9888, %v10259_v18  }
 0xead   : > { %v9884_v62 = vpop.permute.xlu0 %9883  ;;  %v9874_v48 = vpop.permute.xlu1 %9873  ;;  %v6381_v31 = vsel %vm6318_vm0, %v6377_v36, %v9880_v59  ;;  %v6382_v30 = vsel %vm6318_vm0, %v6378_v6, %v9881_v9 }
 0xeae   : > { %v9886_v20 = vunpack.i.h.bf16 %v9884_v62  ;;  %v9885_v4 = vunpack.i.l.bf16 %v9884_v62  ;;  %v9876_v56 = vunpack.i.h.bf16 %v9874_v48  ;;  %v9875_v60 = vunpack.i.l.bf16 %v9874_v48  ;;  %7436 = vmatpush3.bf16.msra.mxu1 %v6416_v58 }
 0xeaf   : > { %v6415_v25 = vpack.c.bf16 %v6382_v30, %v6381_v31  ;;  %6487 = vperm.xlu1 %9887, %v15601_v37  }
 0xeb0   : > { %v6375_v24 = vsel %vm6313_vm6, %v6371_v53, %v9875_v60  ;;  %v6376_v1 = vsel %vm6313_vm6, %v6372_v28, %v9876_v56 }
 0xeb1   : > { %7437 = vmatprep.subr.bf16.mxu1 %v6415_v25  ;;  %v6379_v39 = vsel %vm6318_vm0, %v6375_v24, %v9885_v4  ;;  %v6380_v14 = vsel %vm6318_vm0, %v6376_v1, %v9886_v20  ;;  %v10352_v24 = vmov 7  }
 0xeb2   : > { %7438 = vmatpush3.bf16.msra.mxu1 %v6415_v25  ;;  %v6414_v16 = vpack.c.bf16 %v6380_v14, %v6379_v39  ;;  %9969 = vset.pattern.permute.xlu0 %v10352_v24 }
 0xeb3   : > { %6491 = vperm.xlu1 %9887, %v10261_v0  }
 0xeb4   : > { %7439 = vmatprep.subr.bf16.mxu1 %v6414_v16 }
 0xeb6   : > { %7440 = vmatpush3.bf16.msra.mxu1 %v6414_v16 }
 0xeb7   : > { %7441 = vmatprep.subr.bf16.mxu1 %v6413_v54 }
 0xeba   : > { %7442 = vmatpush3.bf16.msra.mxu1 %v6413_v54 }
 0xebb   : > { %7443 = vmatprep.subr.bf16.mxu1 %v6412_v11 }
 0xebe   : > { %7444 = vmatpush3.bf16.msra.mxu1 %v6412_v11 }
 0xebf   : > { %7449 = vmatprep.subr.msk.mxu1 %vm16823_vm14, %v6485_v12 }
 0xec1   : > { %7446 = vmatmul.mubr.msk.bf16.vlgmr.msra.gmra.mxu1 %vm16821_vm12, %v10030_v42 }
 0xec2   : > { %7450 = vmatpush3.msk.msra.mxu1 %vm16824_vm3, %v6485_v12 }
 0xec3   : > { %7451 = vmatprep.subr.mxu1 %v6484_v63 }
 0xec4   : > { %7452 = vmatpush3.msra.mxu1 %v6484_v63 }
 0xec5   : > { %7453 = vmatprep.subr.mxu1 %v6483_v51 }
 0xec6   : > { %7454 = vmatpush3.msra.mxu1 %v6483_v51 }
 0xf26   : > { %v6496_v41 = vpop.permute.xlu1 %6495 }
 0xf27   : > { %v6500_v38 = vpop.permute.xlu0 %6499 }
 0xf2a   : > { %v6488_v46 = vpop.permute.xlu1 %6487 }
 0xf2e   : > { %v6492_v61 = vpop.permute.xlu1 %6491 }
 0xf81   : > { %v7447_v8 = vpop.f32.mrf.mxu1 }
 0xf83   : > { %v6468_v13 = vpop.f32.mrf.mxu1 }
 0xf84   : > { %7455 = vmatprep.mubr.msk.f32.mxu1 %vm4874_vm13, %v6468_v13 }
 0xf85   : > { %v7448_v21 = vpop.f32.mrf.mxu1 }
 0xf87   : > { %v6471_v40 = vpop.f32.mrf.mxu1 }
 0xf88   : > { %7456 = vmatmul.mubr.msk.f32.vlgmr.msra.gmra.mxu1 %vm4874_vm13, %v6471_v40 }
 0xf89   : > { %7458 = vmatprep.mubr.msk.f32.mxu1 %vm4874_vm13, %v7447_v8 }
 0xf8c   : > { %7459 = vmatmul.mubr.msk.f32.gmra.mxu1 %vm4874_vm13, %v7448_v21  ;;  %vm6670_vm13 = vcmask 7168  }
0x1048   : > { %v7457_v44 = vpop.f32.mrf.mxu1 }
0x1049   : > { %v6589_v52 = vadd.f32 %v7457_v44, %v6492_v61 }
0x104a   : > { %v6583_v35 = vpop.f32.mrf.mxu1 }
0x104b   : > { %v7086_v3 = vmul.f32 -1.442695, %v6589_v52  ;;  %v6584_v27 = vadd.f32 %v6583_v35, %v6488_v46 }
0x104c   : > { %v7460_v58 = vpop.f32.mrf.mxu1 }
0x104d   : > { %10219 = vpow2.f32 %v7086_v3  ;;  %v7085_v9 = vmul.f32 -1.442695, %v6584_v27  ;;  %v6599_v59 = vadd.f32 %v7460_v58, %v6500_v38 }
0x104e   : > { %v6593_v5 = vpop.f32.mrf.mxu1 }
0x104f   : > { %10221 = vpow2.f32 %v7085_v9  ;;  %v6594_v15 = vadd.f32 %v6593_v5, %v6496_v41  ;;  %v7088_v57 = vmul.f32 -1.442695, %v6599_v59 }
0x1051   : > { %v7087_v55 = vmul.f32 -1.442695, %v6594_v15 }
0x1053   : > { %10223 = vpow2.f32 %v7087_v55 }
0x1054   : > { %10225 = vpow2.f32 %v7088_v57 }
0x105a   : > { %v10220_v29 = vpop.eup %10219 }
0x105b   : > { %v6615_v7 = vadd.f32 1.0, %v10220_v29 }
0x105c   : > { %v10222_v36 = vpop.eup %10221 }
0x105d   : > { %10227 = vrcp.f32 %v6615_v7  ;;  %v6614_v6 = vadd.f32 1.0, %v10222_v36 }
0x105f   : > { %10229 = vrcp.f32 %v6614_v6 }
0x1060   : > { %v10224_v23 = vpop.eup %10223 }
0x1061   : > { %v10226_v2 = vpop.eup %10225  ;;  %v6616_v62 = vadd.f32 1.0, %v10224_v23 }
0x1062   : > { %v6617_v48 = vadd.f32 1.0, %v10226_v2 }
0x1063   : > { %10231 = vrcp.f32 %v6616_v62 }
0x1064   : > { %10233 = vrcp.f32 %v6617_v48 }
0x106a   : > { %v10228_v31 = vpop.eup %10227 }
0x106b   : > { %v15611_v20 = vmul.f32 %v10228_v31, %v6589_v52 }
0x106c   : > { %v10230_v30 = vpop.eup %10229 }
0x106d   : > { %v15613_v4 = vmul.f32 %v10230_v30, %v6584_v27 }
0x106f   : > { %v9894_v56 = vpack.i.bf16 %v15611_v20, %v15613_v4 }
0x1070   : > { %v10232_v60 = vpop.eup %10231 }
0x1071   : > { %9895 = vrot.lane.b32.xlu1 %v9894_v56, %s16103_s13  ;;  %9890 = vrot.lane.b32.xlu0 %v9894_v56, %s16095_s27  ;;  %v10234_v28 = vpop.eup %10233  ;;  %v15621_v53 = vmul.f32 %v10232_v60, %v6594_v15 }
0x1072   : > { %v15623_v25 = vmul.f32 %v10234_v28, %v6599_v59 }
0x1074   : > { %v9924_v32 = vpack.i.bf16 %v15623_v25, %v15621_v53 }
0x1075   : > { %9905 = vrot.lane.b32.xlu1 %v9894_v56, %s16112_s28  ;;  %9900 = vrot.lane.b32.xlu0 %v9894_v56, %s16120_s11 }
0x1079   : > { %9915 = vrot.lane.b32.xlu1 %v9894_v56, %s16282_s12  ;;  %9910 = vrot.lane.b32.xlu0 %v9894_v56, %s16085_s15 }
0x107d   : > { %9925 = vrot.lane.b32.xlu1 %v9924_v32, %s16103_s13  ;;  %9920 = vrot.lane.b32.xlu0 %v9924_v32, %s16095_s27  ;;  %s16827_s27 = sld [smem:[#allocation97_spill]] }
0x1081   : > { %9935 = vrot.lane.b32.xlu1 %v9924_v32, %s16112_s28  ;;  %9930 = vrot.lane.b32.xlu0 %v9924_v32, %s16120_s11 }
0x1085   : > { %9945 = vrot.lane.b32.xlu1 %v9924_v32, %s16282_s12  ;;  %9940 = vrot.lane.b32.xlu0 %v9924_v32, %s16085_s15 }
0x1089   : > { %9960 = vrot.lane.b32.xlu1 %v9924_v32, %s16121_s0  ;;  %9950 = vrot.lane.b32.xlu0 %v9924_v32, %s16131_s5 }
0x108d   : > { %9965 = vrot.lane.b32.xlu1 %v9894_v56, %s16121_s0  ;;  %9955 = vrot.lane.b32.xlu0 %v9894_v56, %s16131_s5  ;;  %s16825_s0 = sld [smem:[#allocation6_spill]] }
0x1091   : > { %6778 = vperm.xlu0 %9969, %v15601_v37  }
0x1093   : > { %s6899_s13 = sshll.u32 %s16825_s0, 3 }
0x1094   : > { %s264_s12 = scalar_lea.vmem %s16827_s27, %s6899_s13 }
0x10e3   : > { %v15640_v1 = vpop.permute.xlu1 %9895  ;;  %v15642_v39 = vpop.permute.xlu0 %9890 }
0x10e4   : > { %v9898_v50 = vunpack.i.h.bf16 %v15640_v1  ;;  %v9897_v54 = vunpack.i.l.bf16 %v15640_v1  ;;  %v9893_v34 = vunpack.i.h.bf16 %v15642_v39  ;;  %v9892_v19 = vunpack.i.l.bf16 %v15642_v39  ;;  %v7089_v1 = vld [vmem:[%s16375_s18 + $0x380] sm:$0xff] }
0x10e6   : > { %v6758_v8 = vsel %vm6670_vm13, %v9893_v34, %v9898_v50  ;;  %v6757_v13 = vsel %vm6670_vm13, %v9892_v19, %v9897_v54 }
0x10e7   : > { %v9906_v14 = vpop.permute.xlu1 %9905  ;;  %v15644_v47 = vpop.permute.xlu0 %9900 }
0x10e8   : > { %v9903_v12 = vunpack.i.h.bf16 %v15644_v47  ;;  %v9902_v63 = vunpack.i.l.bf16 %v15644_v47  ;;  %v9908_v41 = vunpack.i.h.bf16 %v9906_v14  ;;  %v9907_v46 = vunpack.i.l.bf16 %v9906_v14 }
0x10ea   : > { %v6761_v52 = vsel %vm6675_vm7, %v6757_v13, %v9902_v63  ;;  %v6762_v35 = vsel %vm6675_vm7, %v6758_v8, %v9903_v12 }
0x10eb   : > { %v15646_v22 = vpop.permute.xlu1 %9915  ;;  %v15648_v10 = vpop.permute.xlu0 %9910  ;;  %v6765_v55 = vsel %vm6680_vm5, %v6761_v52, %v9907_v46  ;;  %v6766_v29 = vsel %vm6680_vm5, %v6762_v35, %v9908_v41 }
0x10ec   : > { %v9918_v7 = vunpack.i.h.bf16 %v15646_v22  ;;  %v9917_v36 = vunpack.i.l.bf16 %v15646_v22  ;;  %v9913_v6 = vunpack.i.h.bf16 %v15648_v10  ;;  %v9912_v56 = vunpack.i.l.bf16 %v15648_v10 }
0x10ed   : > { %v6775_v32 = vpack.c.bf16 %v6766_v29, %v6765_v55 }
0x10ee   : > { %v6733_v41 = vsel %vm6670_vm13, %v9912_v56, %v9917_v36 }
0x10ef   : > { %v15650_v16 = vpop.permute.xlu1 %9925  ;;  %v15652_v33 = vpop.permute.xlu0 %9920 }
0x10f0   : > { %v9928_v45 = vunpack.i.h.bf16 %v15650_v16  ;;  %v9927_v17 = vunpack.i.l.bf16 %v15650_v16  ;;  %v9923_v11 = vunpack.i.h.bf16 %v15652_v33  ;;  %v9922_v42 = vunpack.i.l.bf16 %v15652_v33 }
0x10f1   : > { %v6672_v33 = vsel %vm6670_vm13, %v15611_v20, %v9893_v34 }
0x10f2   : > { %v6760_v21 = vsel %vm6670_vm13, %v9923_v11, %v9928_v45  ;;  %v6759_v40 = vsel %vm6670_vm13, %v9922_v42, %v9927_v17 }
0x10f3   : > { %v9936_v51 = vpop.permute.xlu1 %9935  ;;  %v15664_v43 = vpop.permute.xlu0 %9930 }
0x10f4   : > { %v9938_v26 = vunpack.i.h.bf16 %v9936_v51  ;;  %v9937_v18 = vunpack.i.l.bf16 %v9936_v51  ;;  %v9933_v37 = vunpack.i.h.bf16 %v15664_v43  ;;  %v9932_v0 = vunpack.i.l.bf16 %v15664_v43 }
0x10f6   : > { %v6763_v61 = vsel %vm6675_vm7, %v6759_v40, %v9932_v0  ;;  %v6764_v44 = vsel %vm6675_vm7, %v6760_v21, %v9933_v37  ;;  %v6734_v40 = vsel %vm6670_vm13, %v9913_v6, %v9918_v7 }
0x10f7   : > { %v9946_v38 = vpop.permute.xlu1 %9945  ;;  %v9941_v3 = vpop.permute.xlu0 %9940  ;;  %v6767_v27 = vsel %vm6680_vm5, %v6763_v61, %v9937_v18  ;;  %v6768_v58 = vsel %vm6680_vm5, %v6764_v44, %v9938_v26  ;;  %v6674_v61 = vsel %vm6670_vm13, %v15623_v25, %v9923_v11  ;;  %v6673_v44 = vsel %vm6670_vm13, %v15621_v53, %v9922_v42 }
0x10f8   : > { %v9948_v9 = vunpack.i.h.bf16 %v9946_v38  ;;  %v9947_v59 = vunpack.i.l.bf16 %v9946_v38  ;;  %v9943_v5 = vunpack.i.h.bf16 %v9941_v3  ;;  %v9942_v15 = vunpack.i.l.bf16 %v9941_v3 }
0x10f9   : > { %v6776_v57 = vpack.c.bf16 %v6768_v58, %v6767_v27  ;;  %v6678_v25 = vsel %vm6675_vm7, %v6673_v44, %v9927_v17  ;;  %v6679_v53 = vsel %vm6675_vm7, %v6674_v61, %v9928_v45  ;;  %v6671_v11 = vsel %vm6670_vm13, %v15613_v4, %v9892_v19 }
0x10fa   : > { %v6736_v60 = vsel %vm6670_vm13, %v9943_v5, %v9948_v9  ;;  %v6735_v28 = vsel %vm6670_vm13, %v9942_v15, %v9947_v59  ;;  %v6683_v42 = vsel %vm6680_vm5, %v6678_v25, %v9932_v0  ;;  %v6684_v16 = vsel %vm6680_vm5, %v6679_v53, %v9933_v37 }
0x10fb   : > { %7462 = vmatpush3.bf16.msra.mxu0 %v6776_v57  ;;  %v9961_v23 = vpop.permute.xlu1 %9960  ;;  %v9951_v2 = vpop.permute.xlu0 %9950  ;;  %v6676_v20 = vsel %vm6675_vm7, %v6671_v11, %v9897_v54  ;;  %v6677_v4 = vsel %vm6675_vm7, %v6672_v33, %v9898_v50  ;;  %v6772_v39 = vpack.c.bf16 %v6684_v16, %v6683_v42 }
0x10fc   : > { %v9963_v62 = vunpack.i.h.bf16 %v9961_v23  ;;  %v9962_v48 = vunpack.i.l.bf16 %v9961_v23  ;;  %v9953_v31 = vunpack.i.h.bf16 %v9951_v2  ;;  %v9952_v30 = vunpack.i.l.bf16 %v9951_v2  ;;  %7463 = vmatprep.subr.bf16.mxu0 %v16818_v49 }
0x10fd   : > { %v6681_v34 = vsel %vm6680_vm5, %v6676_v20, %v9902_v63  ;;  %v6682_v19 = vsel %vm6680_vm5, %v6677_v4, %v9903_v12 }
0x10fe   : > { %v6739_v24 = vsel %vm6675_vm7, %v6735_v28, %v9952_v30  ;;  %v6740_v14 = vsel %vm6675_vm7, %v6736_v60, %v9953_v31  ;;  %v6771_v45 = vpack.c.bf16 %v6682_v19, %v6681_v34 }
0x10ff   : > { %7464 = vmatpush3.bf16.msra.mxu0 %v6775_v32  ;;  %v9966_v22 = vpop.permute.xlu1 %9965  ;;  %v9956_v51 = vpop.permute.xlu0 %9955  ;;  %v6743_v26 = vsel %vm6680_vm5, %v6739_v24, %v9962_v48  ;;  %v6744_v18 = vsel %vm6680_vm5, %v6740_v14, %v9963_v62 }
0x1100   : > { %v9968_v8 = vunpack.i.h.bf16 %v9966_v22  ;;  %v9967_v13 = vunpack.i.l.bf16 %v9966_v22  ;;  %v9958_v21 = vunpack.i.h.bf16 %v9956_v51  ;;  %v9957_v10 = vunpack.i.l.bf16 %v9956_v51  ;;  %7465 = vmatprep.subr.bf16.mxu0 %v16818_v49 }
0x1101   : > { %v6774_v46 = vpack.c.bf16 %v6744_v18, %v6743_v26 }
0x1102   : > { %v6737_v52 = vsel %vm6675_vm7, %v6733_v41, %v9957_v10  ;;  %v6738_v35 = vsel %vm6675_vm7, %v6734_v40, %v9958_v21 }
0x1103   : > { %7466 = vmatpush3.bf16.msra.mxu0 %v6774_v46  ;;  %v6741_v38 = vsel %vm6680_vm5, %v6737_v52, %v9967_v13  ;;  %v6742_v3 = vsel %vm6680_vm5, %v6738_v35, %v9968_v8 }
0x1104   : > { %7467 = vmatprep.subr.bf16.mxu0 %v16818_v49  ;;  %v6773_v27 = vpack.c.bf16 %v6742_v3, %v6741_v38 }
0x1107   : > { %7468 = vmatpush3.bf16.msra.mxu0 %v6773_v27 }
0x1108   : > { %7469 = vmatprep.subr.bf16.mxu0 %v16818_v49 }
0x110b   : > { %7470 = vmatpush3.bf16.msra.mxu0 %v6772_v39 }
0x110c   : > { %7471 = vmatprep.subr.bf16.mxu0 %v16818_v49  ;;  %v6779_v50 = vpop.permute.xlu0 %6778 }
0x110f   : > { %7472 = vmatpush3.bf16.msra.mxu0 %v6771_v45 }
0x1112   : > { %7474 = vmatmul.mubr.msk.bf16.vlgmr.msra.gmra.mxu0 %vm16826_vm10, %v7089_v1 }
0x11d2   : > { %v6818_v54 = vpop.f32.mrf.mxu0 }
0x11d3   : > { %v6819_v47 = vadd.f32 %v6818_v54, %v6779_v50 }
0x11d4   : > { %v7475_v17 = vpop.f32.mrf.mxu0 }
0x11d5   : > { %6825 = vst.msk [vmem:[%s264_s12] sm:$0xff] %vm6824_vm11, %v6819_v47 }
0x11d6   : > { %v6821_v49 = vpop.f32.mrf.mxu0 }
0x11d8   : > { %v7476_v12 = vpop.f32.mrf.mxu0 }
0x11d9 PF: > { %s16828_s4 = sld [smem:[#allocation5_spill]] }
0x11df   : > { %s17_s21 = sadd.s32 1, %s16828_s4  }
0x11e0   : > { %p14_p1 = scmp.ge.s32.totalorder %s17_s21, 4  }
0x11e2   :  { %16 = sbr.rel (!%p14_p1) target bundleno = 9 (0x9), region = 86 }
0x11e7   :  { %6845 = vsyncpa [#allocation3], 1 }
0x11e8   :  { %6847 = vsyncpa [#allocation3 + $0x1], 1 }

</bundles_post_ra>
